<compile_context>
chip_gen: v6e
topology: v6e:2x2x1
jax: 0.10.0
libtpu: 0.0.40
codegen_flags: <defaults>
</compile_context>

<pallas_src>
import functools

import jax
import jax.numpy as jnp
from jax import lax
from jax.experimental import pallas as pl
from jax.experimental.pallas import tpu as pltpu


# ----------------------------------------------------------------------------
# K1: qkv pointwise conv (one lane-dense bf16 MXU matmul) + depthwise 3x3 conv
#     (9 VPU taps over all 3C channels), per batch element, padded in-kernel.
# ----------------------------------------------------------------------------
def _qkv_dw_kernel(x_ref, wqkv_ref, wd_ref, qkv_ref, pad_ref, *, H, W):
    hw, C3 = qkv_ref.shape[1], qkv_ref.shape[2]
    x = x_ref[0].astype(jnp.bfloat16)                             # (hw, Ci)
    pw = jnp.dot(x, wqkv_ref[...], preferred_element_type=jnp.float32)
    # Zero-ring scratch = in-kernel "same" padding (no wrapper jnp.pad).
    pad_ref[...] = jnp.zeros(pad_ref.shape, pad_ref.dtype)
    pad_ref[1:H + 1, 1:W + 1, :] = pw.reshape(H, W, C3)
    acc = jnp.zeros((H, W, C3), jnp.float32)
    for dy in range(3):                          # 9 shifted FMAs, all 3C at once
        for dx in range(3):
            acc = acc + pad_ref[dy:dy + H, dx:dx + W, :] * wd_ref[dy, dx]
    qkv_ref[0] = acc.reshape(hw, C3).astype(jnp.bfloat16)


def qkv_dw(x, wqkv, wd, h, w):
    b, hw, ci = x.shape
    c3 = wqkv.shape[1]
    return pl.pallas_call(
        functools.partial(_qkv_dw_kernel, H=h, W=w),
        out_shape=jax.ShapeDtypeStruct((b, hw, c3), jnp.bfloat16),
        grid=(b,),
        in_specs=[
            pl.BlockSpec((1, hw, ci), lambda i: (i, 0, 0)),
            pl.BlockSpec((ci, c3), lambda i: (0, 0)),
            pl.BlockSpec((3, 3, 1, c3), lambda i: (0, 0, 0, 0)),
        ],
        out_specs=pl.BlockSpec((1, hw, c3), lambda i: (i, 0, 0)),
        scratch_shapes=[pltpu.VMEM((h + 2, w + 2, c3), jnp.float32)],
        compiler_params=pltpu.CompilerParams(dimension_semantics=("parallel",)),
    )(x, wqkv, wd)


# ----------------------------------------------------------------------------
# K2: attention, all heads of one batch element in a single kernel invocation
#     (bf16 MXU operands, f32 accumulation).
# ----------------------------------------------------------------------------
def _attn_kernel(qkv_ref, sm_ref, bm_ref, o_ref):
    C = o_ref.shape[2]
    q = qkv_ref[0, :, 0:C].astype(jnp.float32)
    k = qkv_ref[0, :, C:2 * C].astype(jnp.float32)
    v = qkv_ref[0, :, 2 * C:3 * C]                                 # bf16
    # F.normalize(p=2, dim=-1, eps=1e-12) of each per-head (cd, hw) row is a
    # per-column L2 normalisation in this (hw, c) layout; sums stay in f32.
    qn = q * lax.rsqrt(jnp.maximum(jnp.sum(q * q, axis=0, keepdims=True), 1e-24))
    kn = k * lax.rsqrt(jnp.maximum(jnp.sum(k * k, axis=0, keepdims=True), 1e-24))
    # (c, c) logits for all heads at once: scale_mask carries the per-head
    # temperature on the block diagonal, bias_mask sends cross-head entries to
    # -inf so the softmax stays exactly per-head.
    s = jnp.dot(qn.T.astype(jnp.bfloat16), kn.astype(jnp.bfloat16),
                preferred_element_type=jnp.float32)
    s = s * sm_ref[...] + bm_ref[...]
    s = s - jnp.max(s, axis=-1, keepdims=True)
    e = jnp.exp(s)
    p = e * pl.reciprocal(jnp.sum(e, axis=-1, keepdims=True), approx=True)
    out = jnp.dot(v, p.T.astype(jnp.bfloat16), preferred_element_type=jnp.float32)
    o_ref[0] = out.astype(jnp.bfloat16)


def attention(qkv, scale_mask, bias_mask, c):
    b, hw, c3 = qkv.shape
    io = pl.BlockSpec((1, hw, c), lambda i: (i, 0, 0))
    return pl.pallas_call(
        _attn_kernel,
        out_shape=jax.ShapeDtypeStruct((b, hw, c), jnp.bfloat16),
        grid=(b,),
        in_specs=[
            pl.BlockSpec((1, hw, c3), lambda i: (i, 0, 0)),
            pl.BlockSpec((c, c), lambda i: (0, 0)),
            pl.BlockSpec((c, c), lambda i: (0, 0)),
        ],
        out_specs=io,
        compiler_params=pltpu.CompilerParams(dimension_semantics=("parallel",)),
    )(qkv, scale_mask, bias_mask)


# ----------------------------------------------------------------------------
# K3: lane-dense matmul + bias (fc branch, weights pre-expanded over cd)
# ----------------------------------------------------------------------------
def _matmul_bias_kernel(x_ref, w_ref, b_ref, o_ref):
    acc = jnp.dot(x_ref[...], w_ref[...], preferred_element_type=jnp.float32)
    o_ref[...] = (acc + b_ref[...]).astype(o_ref.dtype)


def _row_tile(n, k, m, budget_bytes=32 << 20):
    """Largest row tile (multiple of 8, dividing n, <=2048) whose
    double-buffered bf16 input+output rows fit the VMEM budget."""
    per_row = 2 * 2 * (k + m)
    t = min(n, max(8, (budget_bytes // per_row) // 8 * 8), 2048)
    if n % t:
        divisors = [d for d in range(t - (t % 8), 7, -8) if n % d == 0]
        t = divisors[0] if divisors else n
    return t


def matmul_bias(x, w_bf16, b):
    N, K = x.shape
    M = w_bf16.shape[1]
    tile_n = _row_tile(N, K, M)
    return pl.pallas_call(
        _matmul_bias_kernel,
        out_shape=jax.ShapeDtypeStruct((N, M), jnp.bfloat16),
        grid=(N // tile_n,),
        in_specs=[
            pl.BlockSpec((tile_n, K), lambda i: (i, 0)),
            pl.BlockSpec((K, M), lambda i: (0, 0)),
            pl.BlockSpec((1, M), lambda i: (0, 0)),
        ],
        out_specs=pl.BlockSpec((tile_n, M), lambda i: (i, 0)),
        compiler_params=pltpu.CompilerParams(dimension_semantics=("parallel",)),
    )(x, w_bf16, b.reshape(1, M))


# ----------------------------------------------------------------------------
# K4+K5 fused: dep_conv (grouped 3x3, densified) + project_out + sum +
#              fuse conv (BN folded) + residual(+y) + final ReLU, per batch.
# ----------------------------------------------------------------------------
def _final_kernel(f_ref, att_ref, y_ref, depw_ref, depb_ref, projw_ref,
                  fusew_ref, shift_ref, o_ref, fpad_ref, spad_ref, *, H, W):
    hw = H * W
    C = o_ref.shape[2]
    Cf = f_ref.shape[2]

    # dep_conv: grouped 3x3 conv (dense weights with structural zeros) + bias.
    fpad_ref[...] = jnp.zeros(fpad_ref.shape, fpad_ref.dtype)
    fpad_ref[1:H + 1, 1:W + 1, :] = f_ref[0].astype(jnp.float32).reshape(H, W, Cf)
    acc = jnp.zeros((hw, C), jnp.float32)
    for dy in range(3):
        for dx in range(3):
            patch = fpad_ref[dy:dy + H, dx:dx + W, :].reshape(hw, Cf)
            acc = acc + jnp.dot(patch.astype(jnp.bfloat16), depw_ref[dy, dx],
                                preferred_element_type=jnp.float32)
    out_conv = acc + depb_ref[...]

    # project_out (1x1, no bias) on the attention output; sum stays in f32.
    proj = jnp.dot(att_ref[0], projw_ref[...], preferred_element_type=jnp.float32)
    xsum = proj + out_conv

    # fuse: 3x3 conv with BatchNorm (eval) folded into weights / shift.
    spad_ref[...] = jnp.zeros(spad_ref.shape, spad_ref.dtype)
    spad_ref[1:H + 1, 1:W + 1, :] = xsum.reshape(H, W, C)
    accf = jnp.zeros((hw, C), jnp.float32)
    for dy in range(3):
        for dx in range(3):
            patch = spad_ref[dy:dy + H, dx:dx + W, :].reshape(hw, C)
            accf = accf + jnp.dot(patch.astype(jnp.bfloat16), fusew_ref[dy, dx],
                                  preferred_element_type=jnp.float32)
    out = accf + shift_ref[...] + y_ref[0]
    o_ref[0] = jnp.maximum(out, 0.0)


def final_fused(f_conv, att, y_in, dep_w, dep_b, proj_w, fuse_w, shift, h, w):
    b, hw, cf = f_conv.shape
    c = att.shape[2]
    io = pl.BlockSpec((1, hw, c), lambda i: (i, 0, 0))
    return pl.pallas_call(
        functools.partial(_final_kernel, H=h, W=w),
        out_shape=jax.ShapeDtypeStruct((b, hw, c), jnp.float32),
        grid=(b,),
        in_specs=[
            pl.BlockSpec((1, hw, cf), lambda i: (i, 0, 0)),
            io,
            io,
            pl.BlockSpec((3, 3, cf, c), lambda i: (0, 0, 0, 0)),
            pl.BlockSpec((1, c), lambda i: (0, 0)),
            pl.BlockSpec((c, c), lambda i: (0, 0)),
            pl.BlockSpec((3, 3, c, c), lambda i: (0, 0, 0, 0)),
            pl.BlockSpec((1, c), lambda i: (0, 0)),
        ],
        out_specs=io,
        scratch_shapes=[pltpu.VMEM((h + 2, w + 2, cf), jnp.float32),
                        pltpu.VMEM((h + 2, w + 2, c), jnp.float32)],
        compiler_params=pltpu.CompilerParams(dimension_semantics=("parallel",)),
    )(f_conv, att, y_in, dep_w, dep_b.reshape(1, c), proj_w, fuse_w,
      shift.reshape(1, c))


# ------------------------------- FG forward --------------------------------
def fg_forward(y, params, num_heads):
    b, c, h, w = y.shape
    cd = c // num_heads
    hw = h * w

    x_nhwc = jnp.transpose(y, (0, 2, 3, 1)).reshape(b, hw, c)      # (b,hw,c) f32

    # K1: qkv 1x1x1 conv (single lane-dense matmul) + depthwise 3x3 (centre
    # depth slice), padding handled in-kernel.
    qkv = qkv_dw(x_nhwc, params["qkv_w"], params["dw_w"], h, w)    # (b,hw,3c) bf16

    # K2: attention; per-head temperature + head restriction live in a (c,c)
    # scale / additive-mask pair so all heads share one kernel.
    hid = jnp.arange(c) // cd
    head_eq = (hid[:, None] == hid[None, :]).astype(jnp.float32)
    scale_mask = jnp.repeat(params["temperature"], cd)[:, None] * head_eq
    bias_mask = (1.0 - head_eq) * (-1e30)
    att = attention(qkv, scale_mask, bias_mask, c)                 # (b,hw,c) bf16

    # fc branch: PyTorch raw-reinterprets the contiguous NCHW qkv buffer as
    # (b, h*w, 3*num_heads, cd).  One bf16 swapaxes materialises that view;
    # the tiny 12->9 fc conv is pre-expanded over the cd axis into a
    # lane-dense (3c -> 9*cd) matmul whose output IS the dep_conv NHWC input.
    m = jnp.swapaxes(qkv, 1, 2).reshape(b * hw, 3 * c)
    f_conv = matmul_bias(m, params["fc_w_exp"], params["fc_b_exp"])
    f_conv = f_conv.reshape(b, hw, 9 * cd)                         # bf16

    # K4+K5: dep_conv + project_out + sum + fuse(BN folded) + residual + ReLU.
    out = final_fused(f_conv, att, x_nhwc, params["dep_dense"], params["dep_b"],
                      params["proj_w"], params["fuse_w_scaled"],
                      params["bn_shift"], h, w)                    # (b,hw,c) f32
    return jnp.transpose(out.reshape(b, h, w, c), (0, 3, 1, 2))    # NCHW


# ------------------------------ parameters ---------------------------------
def init_params(key, dim, num_heads):
    """FG parameters, pre-laid-out / folded for the Pallas kernels.

    BatchNorm is folded in eval mode with its default running statistics
    (mean=0, var=1, gamma=1, beta=0).
    """
    cd = dim // num_heads
    nh3 = 3 * num_heads
    ks = jax.random.split(key, 8)
    r = lambda k, s: 0.05 * jax.random.normal(k, s, jnp.float32)
    bf16 = lambda a: a.astype(jnp.bfloat16)

    # qkv 1x1x1 conv (dim -> 3*dim, no bias), stored (in, out): q|k|v columns.
    qkv_w = r(ks[0], (dim, 3 * dim))

    # qkv_dwconv depthwise 3x3x3 (groups=3*dim, no bias): with depth==1 and
    # depth padding 1 only the centre depth slice contributes.
    dw_w = r(ks[1], (3, 3, 3 * dim)).reshape(3, 3, 1, 3 * dim)

    # fc: 1x1x1 conv (3*num_heads -> 9, bias) expanded over the cd axis into a
    # (3*dim -> 9*cd) lane-dense matmul (structural zeros outside each cd row).
    fc_w = r(ks[2], (nh3, 9))
    fc_b = r(ks[3], (9,))
    fc_w_exp = (fc_w[:, None, None, :] *
                jnp.eye(cd, dtype=jnp.float32)[None, :, :, None]
                ).reshape(nh3 * cd, cd * 9)
    fc_b_exp = jnp.tile(fc_b, (cd,))

    # dep_conv: grouped 3x3(x3) conv (9*cd -> dim, groups=cd, bias) densified
    # with structural zeros so each tap is a single MXU matmul.
    dep_w = r(ks[4], (dim, 9, 3, 3))
    dep_b = r(ks[5], (dim,))
    cin = jnp.arange(9 * cd)
    cout = jnp.arange(dim)
    gmask = ((cin[:, None] // 9) == (cout[None, :] // num_heads)).astype(jnp.float32)
    dep_dense = jnp.transpose(dep_w, (2, 3, 1, 0))[:, :, cin % 9, :] * gmask[None, None]

    # project_out 1x1x1 conv (no bias), stored (in, out).
    proj_w = r(ks[6], (dim, dim))

    # fuse: 3x3 conv (no bias) + BatchNorm(eval) folded into weights / shift.
    fuse_w = r(ks[7], (3, 3, dim, dim))
    bn_gamma = jnp.ones((dim,), jnp.float32)
    bn_beta = jnp.zeros((dim,), jnp.float32)
    bn_mean = jnp.zeros((dim,), jnp.float32)
    bn_var = jnp.ones((dim,), jnp.float32)
    bn_scale = bn_gamma / jnp.sqrt(bn_var + 1e-5)
    bn_shift = bn_beta - bn_mean * bn_scale
    fuse_w_scaled = fuse_w * bn_scale

    return dict(
        qkv_w=bf16(qkv_w), dw_w=dw_w,
        fc_w_exp=bf16(fc_w_exp), fc_b_exp=fc_b_exp,
        dep_dense=bf16(dep_dense), dep_b=dep_b,
        proj_w=bf16(proj_w),
        fuse_w_scaled=bf16(fuse_w_scaled), bn_shift=bn_shift,
        temperature=jnp.ones((num_heads,), jnp.float32),           # nn.Parameter(ones)
    )


if __name__ == "__main__":
    # FG's fuse layer is hardcoded to 64 channels, so dim must be 64.
    dim, num_heads = 64, 4
    b, h, w = 2, 8, 8

    key = jax.random.PRNGKey(0)
    kp, kx = jax.random.split(key)
    params = init_params(kp, dim, num_heads)
    y = jax.random.normal(kx, (b, dim, h, w), jnp.float32)

    fwd = jax.jit(functools.partial(fg_forward, num_heads=num_heads))
    out = fwd(y, params)
    jax.block_until_ready(out)

    assert out.shape == (b, dim, h, w) and out.dtype == jnp.float32
    assert bool(jnp.all(out >= 0.0))  # final ReLU
    print("KERNEL_OK")
</pallas_src>

<mosaic_0001>
module attributes {stable_mosaic.version = 11 : i64} {
  func.func @_qkv_dw_kernel(%arg0: i32, %arg1: memref<1x64x64xf32, #tpu.memory_space<vmem>>, %arg2: memref<64x192xbf16, #tpu.memory_space<vmem>>, %arg3: memref<3x3x1x192xf32, #tpu.memory_space<vmem>>, %arg4: memref<1x64x192xbf16, #tpu.memory_space<vmem>>, %arg5: memref<10x10x192xf32, #tpu.memory_space<vmem>>) attributes {dimension_semantics = [#tpu.dimension_semantics<parallel>], iteration_bounds = array<i64: 2>, scalar_prefetch = 0 : i64, scratch_operands = 1 : i64, tpu.core_type = #tpu.core_type<tc>, window_params = [{transform_indices = @transform_0, window_bounds = array<i64: 1, 64, 64>}, {pipeline_mode = #tpu.pipeline_mode<synchronous>, transform_indices = @transform_1, window_bounds = array<i64: 64, 192>}, {pipeline_mode = #tpu.pipeline_mode<synchronous>, transform_indices = @transform_2, window_bounds = array<i64: 3, 3, 1, 192>}, {transform_indices = @transform_3, window_bounds = array<i64: 1, 64, 192>}]} {
    %c0 = arith.constant 0 : index
    %c0_0 = arith.constant 0 : index
    %c0_1 = arith.constant 0 : index
    %0 = vector.load %arg1[%c0, %c0_0, %c0_1] : memref<1x64x64xf32, #tpu.memory_space<vmem>>, vector<1x64x64xf32>
    %1 = vector.shape_cast %0 : vector<1x64x64xf32> to vector<64x64xf32>
    %2 = arith.truncf %1 : vector<64x64xf32> to vector<64x64xbf16>
    %c0_2 = arith.constant 0 : index
    %c0_3 = arith.constant 0 : index
    %3 = vector.load %arg2[%c0_2, %c0_3] : memref<64x192xbf16, #tpu.memory_space<vmem>>, vector<64x192xbf16>
    %cst = arith.constant dense<0.000000e+00> : vector<64x192xf32>
    %4 = tpu.matmul %2, %3, %cst {dimension_numbers = #tpu.dot_dimension_numbers<[1], [0], [0], [1], [0, 0, 1, 1], [], []>} : vector<64x64xbf16>, vector<64x192xbf16>, vector<64x192xf32> -> vector<64x192xf32>
    %cst_4 = arith.constant 0.000000e+00 : f32
    %5 = vector.broadcast %cst_4 : f32 to vector<10x10x192xf32>
    %c0_5 = arith.constant 0 : index
    %c0_6 = arith.constant 0 : index
    %c0_7 = arith.constant 0 : index
    %6 = vector.load %arg5[%c0_5, %c0_6, %c0_7] : memref<10x10x192xf32, #tpu.memory_space<vmem>>, vector<10x10x192xf32>
    tpu.vector_store %arg5[%c0_5, %c0_6, %c0_7], %5 {strides = array<i32>} : memref<10x10x192xf32, #tpu.memory_space<vmem>>, vector<10x10x192xf32>,
    %7 = vector.shape_cast %4 : vector<64x192xf32> to vector<8x8x192xf32>
    %c1 = arith.constant 1 : index
    %c1_8 = arith.constant 1 : index
    %c0_9 = arith.constant 0 : index
    %8 = vector.load %arg5[%c1, %c1_8, %c0_9] : memref<10x10x192xf32, #tpu.memory_space<vmem>>, vector<8x8x192xf32>
    tpu.vector_store %arg5[%c1, %c1_8, %c0_9], %7 {strides = array<i32>} : memref<10x10x192xf32, #tpu.memory_space<vmem>>, vector<8x8x192xf32>,
    %cst_10 = arith.constant 0.000000e+00 : f32
    %9 = vector.broadcast %cst_10 : f32 to vector<8x8x192xf32>
    %c0_11 = arith.constant 0 : index
    %c0_12 = arith.constant 0 : index
    %c0_13 = arith.constant 0 : index
    %10 = vector.load %arg5[%c0_11, %c0_12, %c0_13] : memref<10x10x192xf32, #tpu.memory_space<vmem>>, vector<8x8x192xf32>
    %c0_14 = arith.constant 0 : index
    %c0_15 = arith.constant 0 : index
    %c0_16 = arith.constant 0 : index
    %c0_17 = arith.constant 0 : index
    %11 = vector.load %arg3[%c0_14, %c0_15, %c0_16, %c0_17] : memref<3x3x1x192xf32, #tpu.memory_space<vmem>>, vector<1x1x1x192xf32>
    %12 = vector.shape_cast %11 : vector<1x1x1x192xf32> to vector<1x192xf32>
    %13 = vector.shape_cast %12 : vector<1x192xf32> to vector<1x1x192xf32>
    %14 = vector.broadcast %13 : vector<1x1x192xf32> to vector<8x8x192xf32>
    %15 = arith.mulf %10, %14 : vector<8x8x192xf32>
    %16 = arith.addf %9, %15 : vector<8x8x192xf32>
    %c0_18 = arith.constant 0 : index
    %c1_19 = arith.constant 1 : index
    %c0_20 = arith.constant 0 : index
    %17 = vector.load %arg5[%c0_18, %c1_19, %c0_20] : memref<10x10x192xf32, #tpu.memory_space<vmem>>, vector<8x8x192xf32>
    %c0_21 = arith.constant 0 : index
    %c1_22 = arith.constant 1 : index
    %c0_23 = arith.constant 0 : index
    %c0_24 = arith.constant 0 : index
    %18 = vector.load %arg3[%c0_21, %c1_22, %c0_23, %c0_24] : memref<3x3x1x192xf32, #tpu.memory_space<vmem>>, vector<1x1x1x192xf32>
    %19 = vector.shape_cast %18 : vector<1x1x1x192xf32> to vector<1x192xf32>
    %20 = vector.shape_cast %19 : vector<1x192xf32> to vector<1x1x192xf32>
    %21 = vector.broadcast %20 : vector<1x1x192xf32> to vector<8x8x192xf32>
    %22 = arith.mulf %17, %21 : vector<8x8x192xf32>
    %23 = arith.addf %16, %22 : vector<8x8x192xf32>
    %c0_25 = arith.constant 0 : index
    %c2 = arith.constant 2 : index
    %c0_26 = arith.constant 0 : index
    %24 = vector.load %arg5[%c0_25, %c2, %c0_26] : memref<10x10x192xf32, #tpu.memory_space<vmem>>, vector<8x8x192xf32>
    %c0_27 = arith.constant 0 : index
    %c2_28 = arith.constant 2 : index
    %c0_29 = arith.constant 0 : index
    %c0_30 = arith.constant 0 : index
    %25 = vector.load %arg3[%c0_27, %c2_28, %c0_29, %c0_30] : memref<3x3x1x192xf32, #tpu.memory_space<vmem>>, vector<1x1x1x192xf32>
    %26 = vector.shape_cast %25 : vector<1x1x1x192xf32> to vector<1x192xf32>
    %27 = vector.shape_cast %26 : vector<1x192xf32> to vector<1x1x192xf32>
    %28 = vector.broadcast %27 : vector<1x1x192xf32> to vector<8x8x192xf32>
    %29 = arith.mulf %24, %28 : vector<8x8x192xf32>
    %30 = arith.addf %23, %29 : vector<8x8x192xf32>
    %c1_31 = arith.constant 1 : index
    %c0_32 = arith.constant 0 : index
    %c0_33 = arith.constant 0 : index
    %31 = vector.load %arg5[%c1_31, %c0_32, %c0_33] : memref<10x10x192xf32, #tpu.memory_space<vmem>>, vector<8x8x192xf32>
    %c1_34 = arith.constant 1 : index
    %c0_35 = arith.constant 0 : index
    %c0_36 = arith.constant 0 : index
    %c0_37 = arith.constant 0 : index
    %32 = vector.load %arg3[%c1_34, %c0_35, %c0_36, %c0_37] : memref<3x3x1x192xf32, #tpu.memory_space<vmem>>, vector<1x1x1x192xf32>
    %33 = vector.shape_cast %32 : vector<1x1x1x192xf32> to vector<1x192xf32>
    %34 = vector.shape_cast %33 : vector<1x192xf32> to vector<1x1x192xf32>
    %35 = vector.broadcast %34 : vector<1x1x192xf32> to vector<8x8x192xf32>
    %36 = arith.mulf %31, %35 : vector<8x8x192xf32>
    %37 = arith.addf %30, %36 : vector<8x8x192xf32>
    %c1_38 = arith.constant 1 : index
    %c1_39 = arith.constant 1 : index
    %c0_40 = arith.constant 0 : index
    %38 = vector.load %arg5[%c1_38, %c1_39, %c0_40] : memref<10x10x192xf32, #tpu.memory_space<vmem>>, vector<8x8x192xf32>
    %c1_41 = arith.constant 1 : index
    %c1_42 = arith.constant 1 : index
    %c0_43 = arith.constant 0 : index
    %c0_44 = arith.constant 0 : index
    %39 = vector.load %arg3[%c1_41, %c1_42, %c0_43, %c0_44] : memref<3x3x1x192xf32, #tpu.memory_space<vmem>>, vector<1x1x1x192xf32>
    %40 = vector.shape_cast %39 : vector<1x1x1x192xf32> to vector<1x192xf32>
    %41 = vector.shape_cast %40 : vector<1x192xf32> to vector<1x1x192xf32>
    %42 = vector.broadcast %41 : vector<1x1x192xf32> to vector<8x8x192xf32>
    %43 = arith.mulf %38, %42 : vector<8x8x192xf32>
    %44 = arith.addf %37, %43 : vector<8x8x192xf32>
    %c1_45 = arith.constant 1 : index
    %c2_46 = arith.constant 2 : index
    %c0_47 = arith.constant 0 : index
    %45 = vector.load %arg5[%c1_45, %c2_46, %c0_47] : memref<10x10x192xf32, #tpu.memory_space<vmem>>, vector<8x8x192xf32>
    %c1_48 = arith.constant 1 : index
    %c2_49 = arith.constant 2 : index
    %c0_50 = arith.constant 0 : index
    %c0_51 = arith.constant 0 : index
    %46 = vector.load %arg3[%c1_48, %c2_49, %c0_50, %c0_51] : memref<3x3x1x192xf32, #tpu.memory_space<vmem>>, vector<1x1x1x192xf32>
    %47 = vector.shape_cast %46 : vector<1x1x1x192xf32> to vector<1x192xf32>
    %48 = vector.shape_cast %47 : vector<1x192xf32> to vector<1x1x192xf32>
    %49 = vector.broadcast %48 : vector<1x1x192xf32> to vector<8x8x192xf32>
    %50 = arith.mulf %45, %49 : vector<8x8x192xf32>
    %51 = arith.addf %44, %50 : vector<8x8x192xf32>
    %c2_52 = arith.constant 2 : index
    %c0_53 = arith.constant 0 : index
    %c0_54 = arith.constant 0 : index
    %52 = vector.load %arg5[%c2_52, %c0_53, %c0_54] : memref<10x10x192xf32, #tpu.memory_space<vmem>>, vector<8x8x192xf32>
    %c2_55 = arith.constant 2 : index
    %c0_56 = arith.constant 0 : index
    %c0_57 = arith.constant 0 : index
    %c0_58 = arith.constant 0 : index
    %53 = vector.load %arg3[%c2_55, %c0_56, %c0_57, %c0_58] : memref<3x3x1x192xf32, #tpu.memory_space<vmem>>, vector<1x1x1x192xf32>
    %54 = vector.shape_cast %53 : vector<1x1x1x192xf32> to vector<1x192xf32>
    %55 = vector.shape_cast %54 : vector<1x192xf32> to vector<1x1x192xf32>
    %56 = vector.broadcast %55 : vector<1x1x192xf32> to vector<8x8x192xf32>
    %57 = arith.mulf %52, %56 : vector<8x8x192xf32>
    %58 = arith.addf %51, %57 : vector<8x8x192xf32>
    %c2_59 = arith.constant 2 : index
    %c1_60 = arith.constant 1 : index
    %c0_61 = arith.constant 0 : index
    %59 = vector.load %arg5[%c2_59, %c1_60, %c0_61] : memref<10x10x192xf32, #tpu.memory_space<vmem>>, vector<8x8x192xf32>
    %c2_62 = arith.constant 2 : index
    %c1_63 = arith.constant 1 : index
    %c0_64 = arith.constant 0 : index
    %c0_65 = arith.constant 0 : index
    %60 = vector.load %arg3[%c2_62, %c1_63, %c0_64, %c0_65] : memref<3x3x1x192xf32, #tpu.memory_space<vmem>>, vector<1x1x1x192xf32>
    %61 = vector.shape_cast %60 : vector<1x1x1x192xf32> to vector<1x192xf32>
    %62 = vector.shape_cast %61 : vector<1x192xf32> to vector<1x1x192xf32>
    %63 = vector.broadcast %62 : vector<1x1x192xf32> to vector<8x8x192xf32>
    %64 = arith.mulf %59, %63 : vector<8x8x192xf32>
    %65 = arith.addf %58, %64 : vector<8x8x192xf32>
    %c2_66 = arith.constant 2 : index
    %c2_67 = arith.constant 2 : index
    %c0_68 = arith.constant 0 : index
    %66 = vector.load %arg5[%c2_66, %c2_67, %c0_68] : memref<10x10x192xf32, #tpu.memory_space<vmem>>, vector<8x8x192xf32>
    %c2_69 = arith.constant 2 : index
    %c2_70 = arith.constant 2 : index
    %c0_71 = arith.constant 0 : index
    %c0_72 = arith.constant 0 : index
    %67 = vector.load %arg3[%c2_69, %c2_70, %c0_71, %c0_72] : memref<3x3x1x192xf32, #tpu.memory_space<vmem>>, vector<1x1x1x192xf32>
    %68 = vector.shape_cast %67 : vector<1x1x1x192xf32> to vector<1x192xf32>
    %69 = vector.shape_cast %68 : vector<1x192xf32> to vector<1x1x192xf32>
    %70 = vector.broadcast %69 : vector<1x1x192xf32> to vector<8x8x192xf32>
    %71 = arith.mulf %66, %70 : vector<8x8x192xf32>
    %72 = arith.addf %65, %71 : vector<8x8x192xf32>
    %73 = vector.shape_cast %72 : vector<8x8x192xf32> to vector<64x192xf32>
    %74 = arith.truncf %73 : vector<64x192xf32> to vector<64x192xbf16>
    %c0_73 = arith.constant 0 : index
    %c0_74 = arith.constant 0 : index
    %c0_75 = arith.constant 0 : index
    %75 = vector.load %arg4[%c0_73, %c0_74, %c0_75] : memref<1x64x192xbf16, #tpu.memory_space<vmem>>, vector<1x64x192xbf16>
    %76 = vector.shape_cast %75 : vector<1x64x192xbf16> to vector<64x192xbf16>
    %77 = vector.shape_cast %74 : vector<64x192xbf16> to vector<1x64x192xbf16>
    tpu.vector_store %arg4[%c0_73, %c0_74, %c0_75], %77 {strides = array<i32>} : memref<1x64x192xbf16, #tpu.memory_space<vmem>>, vector<1x64x192xbf16>,
    return
  }
  func.func @transform_0(%arg0: i32) -> (i32, i32, i32) {
    %c0_i32 = arith.constant 0 : i32
    %c0_i32_0 = arith.constant 0 : i32
    %c0_i32_1 = arith.constant 0 : i32
    return %arg0, %c0_i32, %c0_i32_0 : i32, i32, i32
  }
  func.func @transform_1(%arg0: i32) -> (i32, i32) {
    %c0_i32 = arith.constant 0 : i32
    %c0_i32_0 = arith.constant 0 : i32
    %c0_i32_1 = arith.constant 0 : i32
    return %c0_i32, %c0_i32_0 : i32, i32
  }
  func.func @transform_2(%arg0: i32) -> (i32, i32, i32, i32) {
    %c0_i32 = arith.constant 0 : i32
    %c0_i32_0 = arith.constant 0 : i32
    %c0_i32_1 = arith.constant 0 : i32
    %c0_i32_2 = arith.constant 0 : i32
    %c0_i32_3 = arith.constant 0 : i32
    return %c0_i32, %c0_i32_0, %c0_i32_1, %c0_i32_2 : i32, i32, i32, i32
  }
  func.func @transform_3(%arg0: i32) -> (i32, i32, i32) {
    %c0_i32 = arith.constant 0 : i32
    %c0_i32_0 = arith.constant 0 : i32
    %c0_i32_1 = arith.constant 0 : i32
    return %arg0, %c0_i32, %c0_i32_0 : i32, i32, i32
  }
}

module attributes {stable_mosaic.version = 11 : i64} {
  func.func @_attn_kernel(%arg0: i32, %arg1: memref<1x64x192xbf16, #tpu.memory_space<vmem>>, %arg2: memref<64x64xf32, #tpu.memory_space<vmem>>, %arg3: memref<64x64xf32, #tpu.memory_space<vmem>>, %arg4: memref<1x64x64xbf16, #tpu.memory_space<vmem>>) attributes {dimension_semantics = [#tpu.dimension_semantics<parallel>], iteration_bounds = array<i64: 2>, scalar_prefetch = 0 : i64, scratch_operands = 0 : i64, tpu.core_type = #tpu.core_type<tc>, window_params = [{transform_indices = @transform_0, window_bounds = array<i64: 1, 64, 192>}, {pipeline_mode = #tpu.pipeline_mode<synchronous>, transform_indices = @transform_1, window_bounds = array<i64: 64, 64>}, {pipeline_mode = #tpu.pipeline_mode<synchronous>, transform_indices = @transform_2, window_bounds = array<i64: 64, 64>}, {transform_indices = @transform_3, window_bounds = array<i64: 1, 64, 64>}]} {
    %c0 = arith.constant 0 : index
    %c0_0 = arith.constant 0 : index
    %c0_1 = arith.constant 0 : index
    %0 = vector.load %arg1[%c0, %c0_0, %c0_1] : memref<1x64x192xbf16, #tpu.memory_space<vmem>>, vector<1x64x64xbf16>
    %1 = vector.shape_cast %0 : vector<1x64x64xbf16> to vector<64x64xbf16>
    %2 = arith.extf %1 : vector<64x64xbf16> to vector<64x64xf32>
    %c0_2 = arith.constant 0 : index
    %c0_3 = arith.constant 0 : index
    %c64 = arith.constant 64 : index
    %3 = vector.load %arg1[%c0_2, %c0_3, %c64] : memref<1x64x192xbf16, #tpu.memory_space<vmem>>, vector<1x64x64xbf16>
    %4 = vector.shape_cast %3 : vector<1x64x64xbf16> to vector<64x64xbf16>
    %5 = arith.extf %4 : vector<64x64xbf16> to vector<64x64xf32>
    %c0_4 = arith.constant 0 : index
    %c0_5 = arith.constant 0 : index
    %c128 = arith.constant 128 : index
    %6 = vector.load %arg1[%c0_4, %c0_5, %c128] : memref<1x64x192xbf16, #tpu.memory_space<vmem>>, vector<1x64x64xbf16>
    %7 = vector.shape_cast %6 : vector<1x64x64xbf16> to vector<64x64xbf16>
    %8 = arith.mulf %2, %2 : vector<64x64xf32>
    %cst = arith.constant dense<0.000000e+00> : vector<64xf32>
    %9 = vector.multi_reduction <add>, %8, %cst [0] : vector<64x64xf32> to vector<64xf32>
    %10 = vector.shape_cast %9 : vector<64xf32> to vector<1x64xf32>
    %cst_6 = arith.constant 1.000000e-24 : f32
    %11 = vector.broadcast %cst_6 : f32 to vector<1x64xf32>
    %12 = arith.maximumf %10, %11 : vector<1x64xf32>
    %13 = math.rsqrt %12 : vector<1x64xf32>
    %14 = vector.broadcast %13 : vector<1x64xf32> to vector<64x64xf32>
    %15 = arith.mulf %2, %14 : vector<64x64xf32>
    %16 = arith.mulf %5, %5 : vector<64x64xf32>
    %cst_7 = arith.constant dense<0.000000e+00> : vector<64xf32>
    %17 = vector.multi_reduction <add>, %16, %cst_7 [0] : vector<64x64xf32> to vector<64xf32>
    %18 = vector.shape_cast %17 : vector<64xf32> to vector<1x64xf32>
    %cst_8 = arith.constant 1.000000e-24 : f32
    %19 = vector.broadcast %cst_8 : f32 to vector<1x64xf32>
    %20 = arith.maximumf %18, %19 : vector<1x64xf32>
    %21 = math.rsqrt %20 : vector<1x64xf32>
    %22 = vector.broadcast %21 : vector<1x64xf32> to vector<64x64xf32>
    %23 = arith.mulf %5, %22 : vector<64x64xf32>
    %24 = tpu.transpose %15, [1, 0] : vector<64x64xf32> -> vector<64x64xf32>
    %25 = arith.truncf %24 : vector<64x64xf32> to vector<64x64xbf16>
    %26 = arith.truncf %23 : vector<64x64xf32> to vector<64x64xbf16>
    %cst_9 = arith.constant dense<0.000000e+00> : vector<64x64xf32>
    %27 = tpu.matmul %25, %26, %cst_9 {dimension_numbers = #tpu.dot_dimension_numbers<[1], [0], [0], [1], [0, 0, 1, 1], [], []>} : vector<64x64xbf16>, vector<64x64xbf16>, vector<64x64xf32> -> vector<64x64xf32>
    %c0_10 = arith.constant 0 : index
    %c0_11 = arith.constant 0 : index
    %28 = vector.load %arg2[%c0_10, %c0_11] : memref<64x64xf32, #tpu.memory_space<vmem>>, vector<64x64xf32>
    %29 = arith.mulf %27, %28 : vector<64x64xf32>
    %c0_12 = arith.constant 0 : index
    %c0_13 = arith.constant 0 : index
    %30 = vector.load %arg3[%c0_12, %c0_13] : memref<64x64xf32, #tpu.memory_space<vmem>>, vector<64x64xf32>
    %31 = arith.addf %29, %30 : vector<64x64xf32>
    %cst_14 = arith.constant dense<0xFF800000> : vector<64xf32>
    %32 = vector.multi_reduction <maximumf>, %31, %cst_14 [1] : vector<64x64xf32> to vector<64xf32>
    %33 = vector.shape_cast %32 : vector<64xf32> to vector<64x1xf32>
    %34 = vector.broadcast %33 : vector<64x1xf32> to vector<64x64xf32>
    %35 = arith.subf %31, %34 : vector<64x64xf32>
    %36 = math.exp %35 : vector<64x64xf32>
    %cst_15 = arith.constant dense<0.000000e+00> : vector<64xf32>
    %37 = vector.multi_reduction <add>, %36, %cst_15 [1] : vector<64x64xf32> to vector<64xf32>
    %38 = vector.shape_cast %37 : vector<64xf32> to vector<64x1xf32>
    %39 = tpu.reciprocal %38 {approx = true} : vector<64x1xf32> -> vector<64x1xf32>
    %40 = vector.broadcast %39 : vector<64x1xf32> to vector<64x64xf32>
    %41 = arith.mulf %36, %40 : vector<64x64xf32>
    %42 = tpu.transpose %41, [1, 0] : vector<64x64xf32> -> vector<64x64xf32>
    %43 = arith.truncf %42 : vector<64x64xf32> to vector<64x64xbf16>
    %cst_16 = arith.constant dense<0.000000e+00> : vector<64x64xf32>
    %44 = tpu.matmul %7, %43, %cst_16 {dimension_numbers = #tpu.dot_dimension_numbers<[1], [0], [0], [1], [0, 0, 1, 1], [], []>} : vector<64x64xbf16>, vector<64x64xbf16>, vector<64x64xf32> -> vector<64x64xf32>
    %45 = arith.truncf %44 : vector<64x64xf32> to vector<64x64xbf16>
    %c0_17 = arith.constant 0 : index
    %c0_18 = arith.constant 0 : index
    %c0_19 = arith.constant 0 : index
    %46 = vector.load %arg4[%c0_17, %c0_18, %c0_19] : memref<1x64x64xbf16, #tpu.memory_space<vmem>>, vector<1x64x64xbf16>
    %47 = vector.shape_cast %46 : vector<1x64x64xbf16> to vector<64x64xbf16>
    %48 = vector.shape_cast %45 : vector<64x64xbf16> to vector<1x64x64xbf16>
    tpu.vector_store %arg4[%c0_17, %c0_18, %c0_19], %48 {strides = array<i32>} : memref<1x64x64xbf16, #tpu.memory_space<vmem>>, vector<1x64x64xbf16>,
    return
  }
  func.func @transform_0(%arg0: i32) -> (i32, i32, i32) {
    %c0_i32 = arith.constant 0 : i32
    %c0_i32_0 = arith.constant 0 : i32
    %c0_i32_1 = arith.constant 0 : i32
    return %arg0, %c0_i32, %c0_i32_0 : i32, i32, i32
  }
  func.func @transform_1(%arg0: i32) -> (i32, i32) {
    %c0_i32 = arith.constant 0 : i32
    %c0_i32_0 = arith.constant 0 : i32
    %c0_i32_1 = arith.constant 0 : i32
    return %c0_i32, %c0_i32_0 : i32, i32
  }
  func.func @transform_2(%arg0: i32) -> (i32, i32) {
    %c0_i32 = arith.constant 0 : i32
    %c0_i32_0 = arith.constant 0 : i32
    %c0_i32_1 = arith.constant 0 : i32
    return %c0_i32, %c0_i32_0 : i32, i32
  }
  func.func @transform_3(%arg0: i32) -> (i32, i32, i32) {
    %c0_i32 = arith.constant 0 : i32
    %c0_i32_0 = arith.constant 0 : i32
    %c0_i32_1 = arith.constant 0 : i32
    return %arg0, %c0_i32, %c0_i32_0 : i32, i32, i32
  }
}

module attributes {stable_mosaic.version = 11 : i64} {
  func.func @_matmul_bias_kernel(%arg0: i32, %arg1: memref<128x192xbf16, #tpu.memory_space<vmem>>, %arg2: memref<192x144xbf16, #tpu.memory_space<vmem>>, %arg3: memref<1x144xf32, #tpu.memory_space<vmem>>, %arg4: memref<128x144xbf16, #tpu.memory_space<vmem>>) attributes {dimension_semantics = [#tpu.dimension_semantics<parallel>], iteration_bounds = array<i64: 1>, scalar_prefetch = 0 : i64, scratch_operands = 0 : i64, tpu.core_type = #tpu.core_type<tc>, window_params = [{transform_indices = @transform_0, window_bounds = array<i64: 128, 192>}, {pipeline_mode = #tpu.pipeline_mode<synchronous>, transform_indices = @transform_1, window_bounds = array<i64: 192, 144>}, {pipeline_mode = #tpu.pipeline_mode<synchronous>, transform_indices = @transform_2, window_bounds = array<i64: 1, 144>}, {transform_indices = @transform_3, window_bounds = array<i64: 128, 144>}]} {
    %c0 = arith.constant 0 : index
    %c0_0 = arith.constant 0 : index
    %0 = vector.load %arg1[%c0, %c0_0] : memref<128x192xbf16, #tpu.memory_space<vmem>>, vector<128x192xbf16>
    %c0_1 = arith.constant 0 : index
    %c0_2 = arith.constant 0 : index
    %1 = vector.load %arg2[%c0_1, %c0_2] : memref<192x144xbf16, #tpu.memory_space<vmem>>, vector<192x144xbf16>
    %cst = arith.constant dense<0.000000e+00> : vector<128x144xf32>
    %2 = tpu.matmul %0, %1, %cst {dimension_numbers = #tpu.dot_dimension_numbers<[1], [0], [0], [1], [0, 0, 1, 1], [], []>} : vector<128x192xbf16>, vector<192x144xbf16>, vector<128x144xf32> -> vector<128x144xf32>
    %c0_3 = arith.constant 0 : index
    %c0_4 = arith.constant 0 : index
    %3 = vector.load %arg3[%c0_3, %c0_4] : memref<1x144xf32, #tpu.memory_space<vmem>>, vector<1x144xf32>
    %4 = vector.broadcast %3 : vector<1x144xf32> to vector<128x144xf32>
    %5 = arith.addf %2, %4 : vector<128x144xf32>
    %6 = arith.truncf %5 : vector<128x144xf32> to vector<128x144xbf16>
    %c0_5 = arith.constant 0 : index
    %c0_6 = arith.constant 0 : index
    %7 = vector.load %arg4[%c0_5, %c0_6] : memref<128x144xbf16, #tpu.memory_space<vmem>>, vector<128x144xbf16>
    tpu.vector_store %arg4[%c0_5, %c0_6], %6 {strides = array<i32>} : memref<128x144xbf16, #tpu.memory_space<vmem>>, vector<128x144xbf16>,
    return
  }
  func.func @transform_0(%arg0: i32) -> (i32, i32) {
    %c0_i32 = arith.constant 0 : i32
    %c0_i32_0 = arith.constant 0 : i32
    return %arg0, %c0_i32 : i32, i32
  }
  func.func @transform_1(%arg0: i32) -> (i32, i32) {
    %c0_i32 = arith.constant 0 : i32
    %c0_i32_0 = arith.constant 0 : i32
    %c0_i32_1 = arith.constant 0 : i32
    return %c0_i32, %c0_i32_0 : i32, i32
  }
  func.func @transform_2(%arg0: i32) -> (i32, i32) {
    %c0_i32 = arith.constant 0 : i32
    %c0_i32_0 = arith.constant 0 : i32
    %c0_i32_1 = arith.constant 0 : i32
    return %c0_i32, %c0_i32_0 : i32, i32
  }
  func.func @transform_3(%arg0: i32) -> (i32, i32) {
    %c0_i32 = arith.constant 0 : i32
    %c0_i32_0 = arith.constant 0 : i32
    return %arg0, %c0_i32 : i32, i32
  }
}

module attributes {stable_mosaic.version = 11 : i64} {
  func.func @_final_kernel(%arg0: i32, %arg1: memref<1x64x144xbf16, #tpu.memory_space<vmem>>, %arg2: memref<1x64x64xbf16, #tpu.memory_space<vmem>>, %arg3: memref<1x64x64xf32, #tpu.memory_space<vmem>>, %arg4: memref<3x3x144x64xbf16, #tpu.memory_space<vmem>>, %arg5: memref<1x64xf32, #tpu.memory_space<vmem>>, %arg6: memref<64x64xbf16, #tpu.memory_space<vmem>>, %arg7: memref<3x3x64x64xbf16, #tpu.memory_space<vmem>>, %arg8: memref<1x64xf32, #tpu.memory_space<vmem>>, %arg9: memref<1x64x64xf32, #tpu.memory_space<vmem>>, %arg10: memref<10x10x144xf32, #tpu.memory_space<vmem>>, %arg11: memref<10x10x64xf32, #tpu.memory_space<vmem>>) attributes {dimension_semantics = [#tpu.dimension_semantics<parallel>], iteration_bounds = array<i64: 2>, scalar_prefetch = 0 : i64, scratch_operands = 2 : i64, tpu.core_type = #tpu.core_type<tc>, window_params = [{transform_indices = @transform_0, window_bounds = array<i64: 1, 64, 144>}, {transform_indices = @transform_1, window_bounds = array<i64: 1, 64, 64>}, {transform_indices = @transform_2, window_bounds = array<i64: 1, 64, 64>}, {pipeline_mode = #tpu.pipeline_mode<synchronous>, transform_indices = @transform_3, window_bounds = array<i64: 3, 3, 144, 64>}, {pipeline_mode = #tpu.pipeline_mode<synchronous>, transform_indices = @transform_4, window_bounds = array<i64: 1, 64>}, {pipeline_mode = #tpu.pipeline_mode<synchronous>, transform_indices = @transform_5, window_bounds = array<i64: 64, 64>}, {pipeline_mode = #tpu.pipeline_mode<synchronous>, transform_indices = @transform_6, window_bounds = array<i64: 3, 3, 64, 64>}, {pipeline_mode = #tpu.pipeline_mode<synchronous>, transform_indices = @transform_7, window_bounds = array<i64: 1, 64>}, {transform_indices = @transform_8, window_bounds = array<i64: 1, 64, 64>}]} {
    %cst = arith.constant 0.000000e+00 : f32
    %0 = vector.broadcast %cst : f32 to vector<10x10x144xf32>
    %c0 = arith.constant 0 : index
    %c0_0 = arith.constant 0 : index
    %c0_1 = arith.constant 0 : index
    %1 = vector.load %arg10[%c0, %c0_0, %c0_1] : memref<10x10x144xf32, #tpu.memory_space<vmem>>, vector<10x10x144xf32>
    tpu.vector_store %arg10[%c0, %c0_0, %c0_1], %0 {strides = array<i32>} : memref<10x10x144xf32, #tpu.memory_space<vmem>>, vector<10x10x144xf32>,
    %c0_2 = arith.constant 0 : index
    %c0_3 = arith.constant 0 : index
    %c0_4 = arith.constant 0 : index
    %2 = vector.load %arg1[%c0_2, %c0_3, %c0_4] : memref<1x64x144xbf16, #tpu.memory_space<vmem>>, vector<1x64x144xbf16>
    %3 = vector.shape_cast %2 : vector<1x64x144xbf16> to vector<64x144xbf16>
    %4 = arith.extf %3 : vector<64x144xbf16> to vector<64x144xf32>
    %5 = vector.shape_cast %4 : vector<64x144xf32> to vector<8x8x144xf32>
    %c1 = arith.constant 1 : index
    %c1_5 = arith.constant 1 : index
    %c0_6 = arith.constant 0 : index
    %6 = vector.load %arg10[%c1, %c1_5, %c0_6] : memref<10x10x144xf32, #tpu.memory_space<vmem>>, vector<8x8x144xf32>
    tpu.vector_store %arg10[%c1, %c1_5, %c0_6], %5 {strides = array<i32>} : memref<10x10x144xf32, #tpu.memory_space<vmem>>, vector<8x8x144xf32>,
    %cst_7 = arith.constant 0.000000e+00 : f32
    %7 = vector.broadcast %cst_7 : f32 to vector<64x64xf32>
    %c0_8 = arith.constant 0 : index
    %c0_9 = arith.constant 0 : index
    %c0_10 = arith.constant 0 : index
    %8 = vector.load %arg10[%c0_8, %c0_9, %c0_10] : memref<10x10x144xf32, #tpu.memory_space<vmem>>, vector<8x8x144xf32>
    %9 = vector.shape_cast %8 : vector<8x8x144xf32> to vector<64x144xf32>
    %10 = arith.truncf %9 : vector<64x144xf32> to vector<64x144xbf16>
    %c0_11 = arith.constant 0 : index
    %c0_12 = arith.constant 0 : index
    %c0_13 = arith.constant 0 : index
    %c0_14 = arith.constant 0 : index
    %11 = vector.load %arg4[%c0_11, %c0_12, %c0_13, %c0_14] : memref<3x3x144x64xbf16, #tpu.memory_space<vmem>>, vector<1x1x144x64xbf16>
    %12 = vector.shape_cast %11 : vector<1x1x144x64xbf16> to vector<144x64xbf16>
    %cst_15 = arith.constant dense<0.000000e+00> : vector<64x64xf32>
    %13 = tpu.matmul %10, %12, %cst_15 {dimension_numbers = #tpu.dot_dimension_numbers<[1], [0], [0], [1], [0, 0, 1, 1], [], []>} : vector<64x144xbf16>, vector<144x64xbf16>, vector<64x64xf32> -> vector<64x64xf32>
    %14 = arith.addf %7, %13 : vector<64x64xf32>
    %c0_16 = arith.constant 0 : index
    %c1_17 = arith.constant 1 : index
    %c0_18 = arith.constant 0 : index
    %15 = vector.load %arg10[%c0_16, %c1_17, %c0_18] : memref<10x10x144xf32, #tpu.memory_space<vmem>>, vector<8x8x144xf32>
    %16 = vector.shape_cast %15 : vector<8x8x144xf32> to vector<64x144xf32>
    %17 = arith.truncf %16 : vector<64x144xf32> to vector<64x144xbf16>
    %c0_19 = arith.constant 0 : index
    %c1_20 = arith.constant 1 : index
    %c0_21 = arith.constant 0 : index
    %c0_22 = arith.constant 0 : index
    %18 = vector.load %arg4[%c0_19, %c1_20, %c0_21, %c0_22] : memref<3x3x144x64xbf16, #tpu.memory_space<vmem>>, vector<1x1x144x64xbf16>
    %19 = vector.shape_cast %18 : vector<1x1x144x64xbf16> to vector<144x64xbf16>
    %cst_23 = arith.constant dense<0.000000e+00> : vector<64x64xf32>
    %20 = tpu.matmul %17, %19, %cst_23 {dimension_numbers = #tpu.dot_dimension_numbers<[1], [0], [0], [1], [0, 0, 1, 1], [], []>} : vector<64x144xbf16>, vector<144x64xbf16>, vector<64x64xf32> -> vector<64x64xf32>
    %21 = arith.addf %14, %20 : vector<64x64xf32>
    %c0_24 = arith.constant 0 : index
    %c2 = arith.constant 2 : index
    %c0_25 = arith.constant 0 : index
    %22 = vector.load %arg10[%c0_24, %c2, %c0_25] : memref<10x10x144xf32, #tpu.memory_space<vmem>>, vector<8x8x144xf32>
    %23 = vector.shape_cast %22 : vector<8x8x144xf32> to vector<64x144xf32>
    %24 = arith.truncf %23 : vector<64x144xf32> to vector<64x144xbf16>
    %c0_26 = arith.constant 0 : index
    %c2_27 = arith.constant 2 : index
    %c0_28 = arith.constant 0 : index
    %c0_29 = arith.constant 0 : index
    %25 = vector.load %arg4[%c0_26, %c2_27, %c0_28, %c0_29] : memref<3x3x144x64xbf16, #tpu.memory_space<vmem>>, vector<1x1x144x64xbf16>
    %26 = vector.shape_cast %25 : vector<1x1x144x64xbf16> to vector<144x64xbf16>
    %cst_30 = arith.constant dense<0.000000e+00> : vector<64x64xf32>
    %27 = tpu.matmul %24, %26, %cst_30 {dimension_numbers = #tpu.dot_dimension_numbers<[1], [0], [0], [1], [0, 0, 1, 1], [], []>} : vector<64x144xbf16>, vector<144x64xbf16>, vector<64x64xf32> -> vector<64x64xf32>
    %28 = arith.addf %21, %27 : vector<64x64xf32>
    %c1_31 = arith.constant 1 : index
    %c0_32 = arith.constant 0 : index
    %c0_33 = arith.constant 0 : index
    %29 = vector.load %arg10[%c1_31, %c0_32, %c0_33] : memref<10x10x144xf32, #tpu.memory_space<vmem>>, vector<8x8x144xf32>
    %30 = vector.shape_cast %29 : vector<8x8x144xf32> to vector<64x144xf32>
    %31 = arith.truncf %30 : vector<64x144xf32> to vector<64x144xbf16>
    %c1_34 = arith.constant 1 : index
    %c0_35 = arith.constant 0 : index
    %c0_36 = arith.constant 0 : index
    %c0_37 = arith.constant 0 : index
    %32 = vector.load %arg4[%c1_34, %c0_35, %c0_36, %c0_37] : memref<3x3x144x64xbf16, #tpu.memory_space<vmem>>, vector<1x1x144x64xbf16>
    %33 = vector.shape_cast %32 : vector<1x1x144x64xbf16> to vector<144x64xbf16>
    %cst_38 = arith.constant dense<0.000000e+00> : vector<64x64xf32>
    %34 = tpu.matmul %31, %33, %cst_38 {dimension_numbers = #tpu.dot_dimension_numbers<[1], [0], [0], [1], [0, 0, 1, 1], [], []>} : vector<64x144xbf16>, vector<144x64xbf16>, vector<64x64xf32> -> vector<64x64xf32>
    %35 = arith.addf %28, %34 : vector<64x64xf32>
    %c1_39 = arith.constant 1 : index
    %c1_40 = arith.constant 1 : index
    %c0_41 = arith.constant 0 : index
    %36 = vector.load %arg10[%c1_39, %c1_40, %c0_41] : memref<10x10x144xf32, #tpu.memory_space<vmem>>, vector<8x8x144xf32>
    %37 = vector.shape_cast %36 : vector<8x8x144xf32> to vector<64x144xf32>
    %38 = arith.truncf %37 : vector<64x144xf32> to vector<64x144xbf16>
    %c1_42 = arith.constant 1 : index
    %c1_43 = arith.constant 1 : index
    %c0_44 = arith.constant 0 : index
    %c0_45 = arith.constant 0 : index
    %39 = vector.load %arg4[%c1_42, %c1_43, %c0_44, %c0_45] : memref<3x3x144x64xbf16, #tpu.memory_space<vmem>>, vector<1x1x144x64xbf16>
    %40 = vector.shape_cast %39 : vector<1x1x144x64xbf16> to vector<144x64xbf16>
    %cst_46 = arith.constant dense<0.000000e+00> : vector<64x64xf32>
    %41 = tpu.matmul %38, %40, %cst_46 {dimension_numbers = #tpu.dot_dimension_numbers<[1], [0], [0], [1], [0, 0, 1, 1], [], []>} : vector<64x144xbf16>, vector<144x64xbf16>, vector<64x64xf32> -> vector<64x64xf32>
    %42 = arith.addf %35, %41 : vector<64x64xf32>
    %c1_47 = arith.constant 1 : index
    %c2_48 = arith.constant 2 : index
    %c0_49 = arith.constant 0 : index
    %43 = vector.load %arg10[%c1_47, %c2_48, %c0_49] : memref<10x10x144xf32, #tpu.memory_space<vmem>>, vector<8x8x144xf32>
    %44 = vector.shape_cast %43 : vector<8x8x144xf32> to vector<64x144xf32>
    %45 = arith.truncf %44 : vector<64x144xf32> to vector<64x144xbf16>
    %c1_50 = arith.constant 1 : index
    %c2_51 = arith.constant 2 : index
    %c0_52 = arith.constant 0 : index
    %c0_53 = arith.constant 0 : index
    %46 = vector.load %arg4[%c1_50, %c2_51, %c0_52, %c0_53] : memref<3x3x144x64xbf16, #tpu.memory_space<vmem>>, vector<1x1x144x64xbf16>
    %47 = vector.shape_cast %46 : vector<1x1x144x64xbf16> to vector<144x64xbf16>
    %cst_54 = arith.constant dense<0.000000e+00> : vector<64x64xf32>
    %48 = tpu.matmul %45, %47, %cst_54 {dimension_numbers = #tpu.dot_dimension_numbers<[1], [0], [0], [1], [0, 0, 1, 1], [], []>} : vector<64x144xbf16>, vector<144x64xbf16>, vector<64x64xf32> -> vector<64x64xf32>
    %49 = arith.addf %42, %48 : vector<64x64xf32>
    %c2_55 = arith.constant 2 : index
    %c0_56 = arith.constant 0 : index
    %c0_57 = arith.constant 0 : index
    %50 = vector.load %arg10[%c2_55, %c0_56, %c0_57] : memref<10x10x144xf32, #tpu.memory_space<vmem>>, vector<8x8x144xf32>
    %51 = vector.shape_cast %50 : vector<8x8x144xf32> to vector<64x144xf32>
    %52 = arith.truncf %51 : vector<64x144xf32> to vector<64x144xbf16>
    %c2_58 = arith.constant 2 : index
    %c0_59 = arith.constant 0 : index
    %c0_60 = arith.constant 0 : index
    %c0_61 = arith.constant 0 : index
    %53 = vector.load %arg4[%c2_58, %c0_59, %c0_60, %c0_61] : memref<3x3x144x64xbf16, #tpu.memory_space<vmem>>, vector<1x1x144x64xbf16>
    %54 = vector.shape_cast %53 : vector<1x1x144x64xbf16> to vector<144x64xbf16>
    %cst_62 = arith.constant dense<0.000000e+00> : vector<64x64xf32>
    %55 = tpu.matmul %52, %54, %cst_62 {dimension_numbers = #tpu.dot_dimension_numbers<[1], [0], [0], [1], [0, 0, 1, 1], [], []>} : vector<64x144xbf16>, vector<144x64xbf16>, vector<64x64xf32> -> vector<64x64xf32>
    %56 = arith.addf %49, %55 : vector<64x64xf32>
    %c2_63 = arith.constant 2 : index
    %c1_64 = arith.constant 1 : index
    %c0_65 = arith.constant 0 : index
    %57 = vector.load %arg10[%c2_63, %c1_64, %c0_65] : memref<10x10x144xf32, #tpu.memory_space<vmem>>, vector<8x8x144xf32>
    %58 = vector.shape_cast %57 : vector<8x8x144xf32> to vector<64x144xf32>
    %59 = arith.truncf %58 : vector<64x144xf32> to vector<64x144xbf16>
    %c2_66 = arith.constant 2 : index
    %c1_67 = arith.constant 1 : index
    %c0_68 = arith.constant 0 : index
    %c0_69 = arith.constant 0 : index
    %60 = vector.load %arg4[%c2_66, %c1_67, %c0_68, %c0_69] : memref<3x3x144x64xbf16, #tpu.memory_space<vmem>>, vector<1x1x144x64xbf16>
    %61 = vector.shape_cast %60 : vector<1x1x144x64xbf16> to vector<144x64xbf16>
    %cst_70 = arith.constant dense<0.000000e+00> : vector<64x64xf32>
    %62 = tpu.matmul %59, %61, %cst_70 {dimension_numbers = #tpu.dot_dimension_numbers<[1], [0], [0], [1], [0, 0, 1, 1], [], []>} : vector<64x144xbf16>, vector<144x64xbf16>, vector<64x64xf32> -> vector<64x64xf32>
    %63 = arith.addf %56, %62 : vector<64x64xf32>
    %c2_71 = arith.constant 2 : index
    %c2_72 = arith.constant 2 : index
    %c0_73 = arith.constant 0 : index
    %64 = vector.load %arg10[%c2_71, %c2_72, %c0_73] : memref<10x10x144xf32, #tpu.memory_space<vmem>>, vector<8x8x144xf32>
    %65 = vector.shape_cast %64 : vector<8x8x144xf32> to vector<64x144xf32>
    %66 = arith.truncf %65 : vector<64x144xf32> to vector<64x144xbf16>
    %c2_74 = arith.constant 2 : index
    %c2_75 = arith.constant 2 : index
    %c0_76 = arith.constant 0 : index
    %c0_77 = arith.constant 0 : index
    %67 = vector.load %arg4[%c2_74, %c2_75, %c0_76, %c0_77] : memref<3x3x144x64xbf16, #tpu.memory_space<vmem>>, vector<1x1x144x64xbf16>
    %68 = vector.shape_cast %67 : vector<1x1x144x64xbf16> to vector<144x64xbf16>
    %cst_78 = arith.constant dense<0.000000e+00> : vector<64x64xf32>
    %69 = tpu.matmul %66, %68, %cst_78 {dimension_numbers = #tpu.dot_dimension_numbers<[1], [0], [0], [1], [0, 0, 1, 1], [], []>} : vector<64x144xbf16>, vector<144x64xbf16>, vector<64x64xf32> -> vector<64x64xf32>
    %70 = arith.addf %63, %69 : vector<64x64xf32>
    %c0_79 = arith.constant 0 : index
    %c0_80 = arith.constant 0 : index
    %71 = vector.load %arg5[%c0_79, %c0_80] : memref<1x64xf32, #tpu.memory_space<vmem>>, vector<1x64xf32>
    %72 = vector.broadcast %71 : vector<1x64xf32> to vector<64x64xf32>
    %73 = arith.addf %70, %72 : vector<64x64xf32>
    %c0_81 = arith.constant 0 : index
    %c0_82 = arith.constant 0 : index
    %c0_83 = arith.constant 0 : index
    %74 = vector.load %arg2[%c0_81, %c0_82, %c0_83] : memref<1x64x64xbf16, #tpu.memory_space<vmem>>, vector<1x64x64xbf16>
    %75 = vector.shape_cast %74 : vector<1x64x64xbf16> to vector<64x64xbf16>
    %c0_84 = arith.constant 0 : index
    %c0_85 = arith.constant 0 : index
    %76 = vector.load %arg6[%c0_84, %c0_85] : memref<64x64xbf16, #tpu.memory_space<vmem>>, vector<64x64xbf16>
    %cst_86 = arith.constant dense<0.000000e+00> : vector<64x64xf32>
    %77 = tpu.matmul %75, %76, %cst_86 {dimension_numbers = #tpu.dot_dimension_numbers<[1], [0], [0], [1], [0, 0, 1, 1], [], []>} : vector<64x64xbf16>, vector<64x64xbf16>, vector<64x64xf32> -> vector<64x64xf32>
    %78 = arith.addf %77, %73 : vector<64x64xf32>
    %cst_87 = arith.constant 0.000000e+00 : f32
    %79 = vector.broadcast %cst_87 : f32 to vector<10x10x64xf32>
    %c0_88 = arith.constant 0 : index
    %c0_89 = arith.constant 0 : index
    %c0_90 = arith.constant 0 : index
    %80 = vector.load %arg11[%c0_88, %c0_89, %c0_90] : memref<10x10x64xf32, #tpu.memory_space<vmem>>, vector<10x10x64xf32>
    tpu.vector_store %arg11[%c0_88, %c0_89, %c0_90], %79 {strides = array<i32>} : memref<10x10x64xf32, #tpu.memory_space<vmem>>, vector<10x10x64xf32>,
    %81 = vector.shape_cast %78 : vector<64x64xf32> to vector<8x8x64xf32>
    %c1_91 = arith.constant 1 : index
    %c1_92 = arith.constant 1 : index
    %c0_93 = arith.constant 0 : index
    %82 = vector.load %arg11[%c1_91, %c1_92, %c0_93] : memref<10x10x64xf32, #tpu.memory_space<vmem>>, vector<8x8x64xf32>
    tpu.vector_store %arg11[%c1_91, %c1_92, %c0_93], %81 {strides = array<i32>} : memref<10x10x64xf32, #tpu.memory_space<vmem>>, vector<8x8x64xf32>,
    %cst_94 = arith.constant 0.000000e+00 : f32
    %83 = vector.broadcast %cst_94 : f32 to vector<64x64xf32>
    %c0_95 = arith.constant 0 : index
    %c0_96 = arith.constant 0 : index
    %c0_97 = arith.constant 0 : index
    %84 = vector.load %arg11[%c0_95, %c0_96, %c0_97] : memref<10x10x64xf32, #tpu.memory_space<vmem>>, vector<8x8x64xf32>
    %85 = vector.shape_cast %84 : vector<8x8x64xf32> to vector<64x64xf32>
    %86 = arith.truncf %85 : vector<64x64xf32> to vector<64x64xbf16>
    %c0_98 = arith.constant 0 : index
    %c0_99 = arith.constant 0 : index
    %c0_100 = arith.constant 0 : index
    %c0_101 = arith.constant 0 : index
    %87 = vector.load %arg7[%c0_98, %c0_99, %c0_100, %c0_101] : memref<3x3x64x64xbf16, #tpu.memory_space<vmem>>, vector<1x1x64x64xbf16>
    %88 = vector.shape_cast %87 : vector<1x1x64x64xbf16> to vector<64x64xbf16>
    %cst_102 = arith.constant dense<0.000000e+00> : vector<64x64xf32>
    %89 = tpu.matmul %86, %88, %cst_102 {dimension_numbers = #tpu.dot_dimension_numbers<[1], [0], [0], [1], [0, 0, 1, 1], [], []>} : vector<64x64xbf16>, vector<64x64xbf16>, vector<64x64xf32> -> vector<64x64xf32>
    %90 = arith.addf %83, %89 : vector<64x64xf32>
    %c0_103 = arith.constant 0 : index
    %c1_104 = arith.constant 1 : index
    %c0_105 = arith.constant 0 : index
    %91 = vector.load %arg11[%c0_103, %c1_104, %c0_105] : memref<10x10x64xf32, #tpu.memory_space<vmem>>, vector<8x8x64xf32>
    %92 = vector.shape_cast %91 : vector<8x8x64xf32> to vector<64x64xf32>
    %93 = arith.truncf %92 : vector<64x64xf32> to vector<64x64xbf16>
    %c0_106 = arith.constant 0 : index
    %c1_107 = arith.constant 1 : index
    %c0_108 = arith.constant 0 : index
    %c0_109 = arith.constant 0 : index
    %94 = vector.load %arg7[%c0_106, %c1_107, %c0_108, %c0_109] : memref<3x3x64x64xbf16, #tpu.memory_space<vmem>>, vector<1x1x64x64xbf16>
    %95 = vector.shape_cast %94 : vector<1x1x64x64xbf16> to vector<64x64xbf16>
    %cst_110 = arith.constant dense<0.000000e+00> : vector<64x64xf32>
    %96 = tpu.matmul %93, %95, %cst_110 {dimension_numbers = #tpu.dot_dimension_numbers<[1], [0], [0], [1], [0, 0, 1, 1], [], []>} : vector<64x64xbf16>, vector<64x64xbf16>, vector<64x64xf32> -> vector<64x64xf32>
    %97 = arith.addf %90, %96 : vector<64x64xf32>
    %c0_111 = arith.constant 0 : index
    %c2_112 = arith.constant 2 : index
    %c0_113 = arith.constant 0 : index
    %98 = vector.load %arg11[%c0_111, %c2_112, %c0_113] : memref<10x10x64xf32, #tpu.memory_space<vmem>>, vector<8x8x64xf32>
    %99 = vector.shape_cast %98 : vector<8x8x64xf32> to vector<64x64xf32>
    %100 = arith.truncf %99 : vector<64x64xf32> to vector<64x64xbf16>
    %c0_114 = arith.constant 0 : index
    %c2_115 = arith.constant 2 : index
    %c0_116 = arith.constant 0 : index
    %c0_117 = arith.constant 0 : index
    %101 = vector.load %arg7[%c0_114, %c2_115, %c0_116, %c0_117] : memref<3x3x64x64xbf16, #tpu.memory_space<vmem>>, vector<1x1x64x64xbf16>
    %102 = vector.shape_cast %101 : vector<1x1x64x64xbf16> to vector<64x64xbf16>
    %cst_118 = arith.constant dense<0.000000e+00> : vector<64x64xf32>
    %103 = tpu.matmul %100, %102, %cst_118 {dimension_numbers = #tpu.dot_dimension_numbers<[1], [0], [0], [1], [0, 0, 1, 1], [], []>} : vector<64x64xbf16>, vector<64x64xbf16>, vector<64x64xf32> -> vector<64x64xf32>
    %104 = arith.addf %97, %103 : vector<64x64xf32>
    %c1_119 = arith.constant 1 : index
    %c0_120 = arith.constant 0 : index
    %c0_121 = arith.constant 0 : index
    %105 = vector.load %arg11[%c1_119, %c0_120, %c0_121] : memref<10x10x64xf32, #tpu.memory_space<vmem>>, vector<8x8x64xf32>
    %106 = vector.shape_cast %105 : vector<8x8x64xf32> to vector<64x64xf32>
    %107 = arith.truncf %106 : vector<64x64xf32> to vector<64x64xbf16>
    %c1_122 = arith.constant 1 : index
    %c0_123 = arith.constant 0 : index
    %c0_124 = arith.constant 0 : index
    %c0_125 = arith.constant 0 : index
    %108 = vector.load %arg7[%c1_122, %c0_123, %c0_124, %c0_125] : memref<3x3x64x64xbf16, #tpu.memory_space<vmem>>, vector<1x1x64x64xbf16>
    %109 = vector.shape_cast %108 : vector<1x1x64x64xbf16> to vector<64x64xbf16>
    %cst_126 = arith.constant dense<0.000000e+00> : vector<64x64xf32>
    %110 = tpu.matmul %107, %109, %cst_126 {dimension_numbers = #tpu.dot_dimension_numbers<[1], [0], [0], [1], [0, 0, 1, 1], [], []>} : vector<64x64xbf16>, vector<64x64xbf16>, vector<64x64xf32> -> vector<64x64xf32>
    %111 = arith.addf %104, %110 : vector<64x64xf32>
    %c1_127 = arith.constant 1 : index
    %c1_128 = arith.constant 1 : index
    %c0_129 = arith.constant 0 : index
    %112 = vector.load %arg11[%c1_127, %c1_128, %c0_129] : memref<10x10x64xf32, #tpu.memory_space<vmem>>, vector<8x8x64xf32>
    %113 = vector.shape_cast %112 : vector<8x8x64xf32> to vector<64x64xf32>
    %114 = arith.truncf %113 : vector<64x64xf32> to vector<64x64xbf16>
    %c1_130 = arith.constant 1 : index
    %c1_131 = arith.constant 1 : index
    %c0_132 = arith.constant 0 : index
    %c0_133 = arith.constant 0 : index
    %115 = vector.load %arg7[%c1_130, %c1_131, %c0_132, %c0_133] : memref<3x3x64x64xbf16, #tpu.memory_space<vmem>>, vector<1x1x64x64xbf16>
    %116 = vector.shape_cast %115 : vector<1x1x64x64xbf16> to vector<64x64xbf16>
    %cst_134 = arith.constant dense<0.000000e+00> : vector<64x64xf32>
    %117 = tpu.matmul %114, %116, %cst_134 {dimension_numbers = #tpu.dot_dimension_numbers<[1], [0], [0], [1], [0, 0, 1, 1], [], []>} : vector<64x64xbf16>, vector<64x64xbf16>, vector<64x64xf32> -> vector<64x64xf32>
    %118 = arith.addf %111, %117 : vector<64x64xf32>
    %c1_135 = arith.constant 1 : index
    %c2_136 = arith.constant 2 : index
    %c0_137 = arith.constant 0 : index
    %119 = vector.load %arg11[%c1_135, %c2_136, %c0_137] : memref<10x10x64xf32, #tpu.memory_space<vmem>>, vector<8x8x64xf32>
    %120 = vector.shape_cast %119 : vector<8x8x64xf32> to vector<64x64xf32>
    %121 = arith.truncf %120 : vector<64x64xf32> to vector<64x64xbf16>
    %c1_138 = arith.constant 1 : index
    %c2_139 = arith.constant 2 : index
    %c0_140 = arith.constant 0 : index
    %c0_141 = arith.constant 0 : index
    %122 = vector.load %arg7[%c1_138, %c2_139, %c0_140, %c0_141] : memref<3x3x64x64xbf16, #tpu.memory_space<vmem>>, vector<1x1x64x64xbf16>
    %123 = vector.shape_cast %122 : vector<1x1x64x64xbf16> to vector<64x64xbf16>
    %cst_142 = arith.constant dense<0.000000e+00> : vector<64x64xf32>
    %124 = tpu.matmul %121, %123, %cst_142 {dimension_numbers = #tpu.dot_dimension_numbers<[1], [0], [0], [1], [0, 0, 1, 1], [], []>} : vector<64x64xbf16>, vector<64x64xbf16>, vector<64x64xf32> -> vector<64x64xf32>
    %125 = arith.addf %118, %124 : vector<64x64xf32>
    %c2_143 = arith.constant 2 : index
    %c0_144 = arith.constant 0 : index
    %c0_145 = arith.constant 0 : index
    %126 = vector.load %arg11[%c2_143, %c0_144, %c0_145] : memref<10x10x64xf32, #tpu.memory_space<vmem>>, vector<8x8x64xf32>
    %127 = vector.shape_cast %126 : vector<8x8x64xf32> to vector<64x64xf32>
    %128 = arith.truncf %127 : vector<64x64xf32> to vector<64x64xbf16>
    %c2_146 = arith.constant 2 : index
    %c0_147 = arith.constant 0 : index
    %c0_148 = arith.constant 0 : index
    %c0_149 = arith.constant 0 : index
    %129 = vector.load %arg7[%c2_146, %c0_147, %c0_148, %c0_149] : memref<3x3x64x64xbf16, #tpu.memory_space<vmem>>, vector<1x1x64x64xbf16>
    %130 = vector.shape_cast %129 : vector<1x1x64x64xbf16> to vector<64x64xbf16>
    %cst_150 = arith.constant dense<0.000000e+00> : vector<64x64xf32>
    %131 = tpu.matmul %128, %130, %cst_150 {dimension_numbers = #tpu.dot_dimension_numbers<[1], [0], [0], [1], [0, 0, 1, 1], [], []>} : vector<64x64xbf16>, vector<64x64xbf16>, vector<64x64xf32> -> vector<64x64xf32>
    %132 = arith.addf %125, %131 : vector<64x64xf32>
    %c2_151 = arith.constant 2 : index
    %c1_152 = arith.constant 1 : index
    %c0_153 = arith.constant 0 : index
    %133 = vector.load %arg11[%c2_151, %c1_152, %c0_153] : memref<10x10x64xf32, #tpu.memory_space<vmem>>, vector<8x8x64xf32>
    %134 = vector.shape_cast %133 : vector<8x8x64xf32> to vector<64x64xf32>
    %135 = arith.truncf %134 : vector<64x64xf32> to vector<64x64xbf16>
    %c2_154 = arith.constant 2 : index
    %c1_155 = arith.constant 1 : index
    %c0_156 = arith.constant 0 : index
    %c0_157 = arith.constant 0 : index
    %136 = vector.load %arg7[%c2_154, %c1_155, %c0_156, %c0_157] : memref<3x3x64x64xbf16, #tpu.memory_space<vmem>>, vector<1x1x64x64xbf16>
    %137 = vector.shape_cast %136 : vector<1x1x64x64xbf16> to vector<64x64xbf16>
    %cst_158 = arith.constant dense<0.000000e+00> : vector<64x64xf32>
    %138 = tpu.matmul %135, %137, %cst_158 {dimension_numbers = #tpu.dot_dimension_numbers<[1], [0], [0], [1], [0, 0, 1, 1], [], []>} : vector<64x64xbf16>, vector<64x64xbf16>, vector<64x64xf32> -> vector<64x64xf32>
    %139 = arith.addf %132, %138 : vector<64x64xf32>
    %c2_159 = arith.constant 2 : index
    %c2_160 = arith.constant 2 : index
    %c0_161 = arith.constant 0 : index
    %140 = vector.load %arg11[%c2_159, %c2_160, %c0_161] : memref<10x10x64xf32, #tpu.memory_space<vmem>>, vector<8x8x64xf32>
    %141 = vector.shape_cast %140 : vector<8x8x64xf32> to vector<64x64xf32>
    %142 = arith.truncf %141 : vector<64x64xf32> to vector<64x64xbf16>
    %c2_162 = arith.constant 2 : index
    %c2_163 = arith.constant 2 : index
    %c0_164 = arith.constant 0 : index
    %c0_165 = arith.constant 0 : index
    %143 = vector.load %arg7[%c2_162, %c2_163, %c0_164, %c0_165] : memref<3x3x64x64xbf16, #tpu.memory_space<vmem>>, vector<1x1x64x64xbf16>
    %144 = vector.shape_cast %143 : vector<1x1x64x64xbf16> to vector<64x64xbf16>
    %cst_166 = arith.constant dense<0.000000e+00> : vector<64x64xf32>
    %145 = tpu.matmul %142, %144, %cst_166 {dimension_numbers = #tpu.dot_dimension_numbers<[1], [0], [0], [1], [0, 0, 1, 1], [], []>} : vector<64x64xbf16>, vector<64x64xbf16>, vector<64x64xf32> -> vector<64x64xf32>
    %146 = arith.addf %139, %145 : vector<64x64xf32>
    %c0_167 = arith.constant 0 : index
    %c0_168 = arith.constant 0 : index
    %147 = vector.load %arg8[%c0_167, %c0_168] : memref<1x64xf32, #tpu.memory_space<vmem>>, vector<1x64xf32>
    %148 = vector.broadcast %147 : vector<1x64xf32> to vector<64x64xf32>
    %149 = arith.addf %146, %148 : vector<64x64xf32>
    %c0_169 = arith.constant 0 : index
    %c0_170 = arith.constant 0 : index
    %c0_171 = arith.constant 0 : index
    %150 = vector.load %arg3[%c0_169, %c0_170, %c0_171] : memref<1x64x64xf32, #tpu.memory_space<vmem>>, vector<1x64x64xf32>
    %151 = vector.shape_cast %150 : vector<1x64x64xf32> to vector<64x64xf32>
    %152 = arith.addf %149, %151 : vector<64x64xf32>
    %cst_172 = arith.constant 0.000000e+00 : f32
    %153 = vector.broadcast %cst_172 : f32 to vector<64x64xf32>
    %154 = arith.maximumf %152, %153 : vector<64x64xf32>
    %c0_173 = arith.constant 0 : index
    %c0_174 = arith.constant 0 : index
    %c0_175 = arith.constant 0 : index
    %155 = vector.load %arg9[%c0_173, %c0_174, %c0_175] : memref<1x64x64xf32, #tpu.memory_space<vmem>>, vector<1x64x64xf32>
    %156 = vector.shape_cast %155 : vector<1x64x64xf32> to vector<64x64xf32>
    %157 = vector.shape_cast %154 : vector<64x64xf32> to vector<1x64x64xf32>
    tpu.vector_store %arg9[%c0_173, %c0_174, %c0_175], %157 {strides = array<i32>} : memref<1x64x64xf32, #tpu.memory_space<vmem>>, vector<1x64x64xf32>,
    return
  }
  func.func @transform_0(%arg0: i32) -> (i32, i32, i32) {
    %c0_i32 = arith.constant 0 : i32
    %c0_i32_0 = arith.constant 0 : i32
    %c0_i32_1 = arith.constant 0 : i32
    return %arg0, %c0_i32, %c0_i32_0 : i32, i32, i32
  }
  func.func @transform_1(%arg0: i32) -> (i32, i32, i32) {
    %c0_i32 = arith.constant 0 : i32
    %c0_i32_0 = arith.constant 0 : i32
    %c0_i32_1 = arith.constant 0 : i32
    return %arg0, %c0_i32, %c0_i32_0 : i32, i32, i32
  }
  func.func @transform_2(%arg0: i32) -> (i32, i32, i32) {
    %c0_i32 = arith.constant 0 : i32
    %c0_i32_0 = arith.constant 0 : i32
    %c0_i32_1 = arith.constant 0 : i32
    return %arg0, %c0_i32, %c0_i32_0 : i32, i32, i32
  }
  func.func @transform_3(%arg0: i32) -> (i32, i32, i32, i32) {
    %c0_i32 = arith.constant 0 : i32
    %c0_i32_0 = arith.constant 0 : i32
    %c0_i32_1 = arith.constant 0 : i32
    %c0_i32_2 = arith.constant 0 : i32
    %c0_i32_3 = arith.constant 0 : i32
    return %c0_i32, %c0_i32_0, %c0_i32_1, %c0_i32_2 : i32, i32, i32, i32
  }
  func.func @transform_4(%arg0: i32) -> (i32, i32) {
    %c0_i32 = arith.constant 0 : i32
    %c0_i32_0 = arith.constant 0 : i32
    %c0_i32_1 = arith.constant 0 : i32
    return %c0_i32, %c0_i32_0 : i32, i32
  }
  func.func @transform_5(%arg0: i32) -> (i32, i32) {
    %c0_i32 = arith.constant 0 : i32
    %c0_i32_0 = arith.constant 0 : i32
    %c0_i32_1 = arith.constant 0 : i32
    return %c0_i32, %c0_i32_0 : i32, i32
  }
  func.func @transform_6(%arg0: i32) -> (i32, i32, i32, i32) {
    %c0_i32 = arith.constant 0 : i32
    %c0_i32_0 = arith.constant 0 : i32
    %c0_i32_1 = arith.constant 0 : i32
    %c0_i32_2 = arith.constant 0 : i32
    %c0_i32_3 = arith.constant 0 : i32
    return %c0_i32, %c0_i32_0, %c0_i32_1, %c0_i32_2 : i32, i32, i32, i32
  }
  func.func @transform_7(%arg0: i32) -> (i32, i32) {
    %c0_i32 = arith.constant 0 : i32
    %c0_i32_0 = arith.constant 0 : i32
    %c0_i32_1 = arith.constant 0 : i32
    return %c0_i32, %c0_i32_0 : i32, i32
  }
  func.func @transform_8(%arg0: i32) -> (i32, i32, i32) {
    %c0_i32 = arith.constant 0 : i32
    %c0_i32_0 = arith.constant 0 : i32
    %c0_i32_1 = arith.constant 0 : i32
    return %arg0, %c0_i32, %c0_i32_0 : i32, i32, i32
  }
}

</mosaic_0001>

<bundles_post_ra>
// kernel: mul.8
= control target key start
LH: loop header
LB: loop body
LE: loop exit
PB: predicated region body
PF: predicated region fallthrough
CT: control target
= control target key end

     0   :  { %vm8_vm0 = vcmask 130048   ;;  %s40_s8 = smov 16   ;;  %s41_s9 = smov 32   ;;  %vm14_vm1 = vcmask 523648   ;;  %vm20_vm2 = vcmask 392448   ;;  %vm26_vm3 = vcmask 261248   ;;  %s58_s0 = inlined_call_operand.vmem [shape: f32[4,16], index: 0, kind: input, shape index: {}]   ;;  %s59_s1 = inlined_call_operand.vmem [shape: f32[64], index: 1, kind: output, shape index: {}]  }
   0x1   :  { %v5_v0 = vld [vmem:[%s58_s0] sm:$0xf]  ;;  %s39_s0 = smov 48  }
   0x2   :  { %6 = vst [vmem:[#allocation1] sm:$0xf] %v5_v0 }
   0x9   :  { %v11_v1 = vld [vmem:[#allocation1 + $0x3] sm:$0x1]   ;;  %v23_v2 = vld [vmem:[#allocation1 + $0x1] sm:$0x1]   ;;  %v7_v3 = vld [vmem:[#allocation1] sm:$0x1]  }
   0xa   :  { %12 = vrot.lane.b32.xlu0 %v11_v1, %s39_s0  ;;  %24 = vrot.lane.b32.xlu1 %v23_v2, %s40_s8  ;;  %v17_v4 = vld [vmem:[#allocation1 + $0x2] sm:$0x1]   ;;  %9 = vst.msk [vmem:[#allocation0] sm:$0x1] %vm8_vm0, %v7_v3  }
   0xe   :  { %18 = vrot.lane.b32.xlu0 %v17_v4, %s41_s9 }
  0x7c   :  { %v13_v5 = vpop.permute.xlu0 %12   ;;  %v25_v6 = vpop.permute.xlu1 %24  }
  0x7d   :  { %15 = vst.msk [vmem:[#allocation0] sm:$0x1] %vm14_vm1, %v13_v5  }
  0x80   :  { %v19_v7 = vpop.permute.xlu0 %18  }
  0x81   :  { %21 = vst.msk [vmem:[#allocation0] sm:$0x1] %vm20_vm2, %v19_v7  }
  0x82   :  { %27 = vst.msk [vmem:[#allocation0] sm:$0x1] %vm26_vm3, %v25_v6  }
  0x89   :  { %v32_v8 = vld [vmem:[#allocation0] sm:$0x1] }
  0x8a   :  { %35 = vst [vmem:[%s59_s1] sm:$0x1] %v32_v8 }

// kernel: fg_forward.5
= control target key start
LH: loop header
LB: loop body
LE: loop exit
PB: predicated region body
PF: predicated region fallthrough
CT: control target
= control target key end

     0   :  { %s918_s12 = smov 0   ;;  %s1093_s0 = inlined_call_operand.vmem [shape: bf16[2,64,192], index: 0, kind: input, shape index: {}]   ;;  %s1094_s1 = inlined_call_operand.vmem [shape: f32[64,64], index: 1, kind: input, shape index: {}]   ;;  %s1095_s2 = inlined_call_operand.vmem [shape: f32[64,64], index: 2, kind: input, shape index: {}]   ;;  %s1096_s3 = inlined_call_operand.vmem [shape: bf16[2,64,64], index: 3, kind: output, shape index: {}]  }
   0x1 LB: > { %s750_s13 = sadd.s32 4294967295, %s895_s12   ;;  %p754_p0 = scmp.ge.s32.totalorder %s895_s12, 1  ;;  %s895_s12 = sphi %s918_s12, %s13_s12  }
   0x2   : > { %p137_p1 = scmp.lt.s32.totalorder %s895_s12, 3 }
   0x4   : > { %p138_p2 = pnand %p754_p0, %p137_p1 }
   0x5   : > { %p161_p3 = scmp.lt.s32.totalorder (!%p138_p2), %s750_s13, 1  ;;  %s897_s18 = smov (!%p138_p2), 64  }
   0x6   : > { %141 = sbr.rel (%p138_p2) target bundleno = 1143 (0x477), region = 32 }
   0xb   : > { %s1098_s13 = smov (!%p161_p3, %s750_s13), 1  ;;  %vm236_vm0 = vcmask 1048064   ;;  %vm204_vm1 = vcmask 523264   ;;  %vm686_vm2 = vcmask 519168  }
   0xc   : > { %s781_s14 = sshll.u32 %s1098_s13, 6  ;;  %s782_s27 = sshll.u32 %s1098_s13, 5 }
   0xd   : > { %s932_s17 = scalar_lea.vmem %s1093_s0, %s781_s14  ;;  %s170_s30 = scalar_lea.vmem %s1096_s3, %s782_s27 }
   0xe   : > { %v172_v0 = vld [vmem:[%s932_s17] ss:$8 sps:$4 sm:$0xff]   ;;  %v174_v1 = vld [vmem:[%s932_s17 + $0x10] ss:$8 sps:$4 sm:$0xff]  }
   0xf   : > { %v176_v2 = vld [vmem:[%s932_s17 + $0x20] ss:$8 sps:$4 sm:$0xff]   ;;  %v937_v3 = vunpack.c.l.bf16 %v172_v0  ;;  %v939_v4 = vunpack.c.h.bf16 %v172_v0  ;;  %v941_v5 = vunpack.c.l.bf16 %v174_v1  ;;  %v943_v6 = vunpack.c.h.bf16 %v174_v1  ;;  %v178_v11 = vld [vmem:[%s932_s17 + $0x30] ss:$8 sps:$4 sm:$0xff]  }
  0x10   : > { %v945_v7 = vunpack.c.l.bf16 %v176_v2  ;;  %v954_v12 = vunpack.c.h.bf16 %v176_v2  ;;  %v959_v15 = vunpack.c.l.bf16 %v178_v11  ;;  %v965_v19 = vunpack.c.h.bf16 %v178_v11 }
  0x11   : > { %v196_v8 = vmul.f32 %v937_v3, %v937_v3  ;;  %v197_v9 = vmul.f32 %v939_v4, %v939_v4  ;;  %v198_v10 = vmul.f32 %v941_v5, %v941_v5  ;;  %v199_v13 = vmul.f32 %v943_v6, %v943_v6 }
  0x12   : > { %v200_v16 = vmul.f32 %v945_v7, %v945_v7  ;;  %v201_v21 = vmul.f32 %v954_v12, %v954_v12  ;;  %v202_v26 = vmul.f32 %v959_v15, %v959_v15  ;;  %v203_v30 = vmul.f32 %v965_v19, %v965_v19 }
  0x13   : > { %v237_v14 = vsel %vm236_vm0, %v196_v8, 0.0  ;;  %v238_v17 = vsel %vm236_vm0, %v197_v9, 0.0  ;;  %v240_v18 = vsel %vm236_vm0, %v198_v10, 0.0  ;;  %v206_v22 = vsel %vm204_vm1, %v197_v9, 0.0 }
  0x14   : > { %v239_v20 = vadd.f32 %v238_v17, %v237_v14  ;;  %v242_v23 = vsel %vm236_vm0, %v199_v13, 0.0  ;;  %v205_v24 = vsel %vm204_vm1, %v196_v8, 0.0  ;;  %v244_v27 = vsel %vm236_vm0, %v200_v16, 0.0 }
  0x15   : > { %v207_v29 = vadd.f32 %v206_v22, %v205_v24  ;;  %v208_v31 = vsel %vm204_vm1, %v198_v10, 0.0  ;;  %v246_v32 = vsel %vm236_vm0, %v201_v21, 0.0  ;;  %v248_v34 = vsel %vm236_vm0, %v202_v26, 0.0 }
  0x16   : > { %v241_v25 = vadd.f32 %v240_v18, %v239_v20  ;;  %v210_v37 = vsel %vm204_vm1, %v199_v13, 0.0  ;;  %v250_v38 = vsel %vm236_vm0, %v203_v30, 0.0  ;;  %v212_v42 = vsel %vm204_vm1, %v200_v16, 0.0 }
  0x17   : > { %v209_v36 = vadd.f32 %v208_v31, %v207_v29  ;;  %v214_v46 = vsel %vm204_vm1, %v201_v21, 0.0  ;;  %v216_v50 = vsel %vm204_vm1, %v202_v26, 0.0  ;;  %v218_v54 = vsel %vm204_vm1, %v203_v30, 0.0 }
  0x18   : > { %v243_v28 = vadd.f32 %v242_v23, %v241_v25 }
  0x19   : > { %v211_v41 = vadd.f32 %v210_v37, %v209_v36 }
  0x1a   : > { %v245_v33 = vadd.f32 %v244_v27, %v243_v28 }
  0x1b   : > { %v213_v45 = vadd.f32 %v212_v42, %v211_v41  ;;  %v419_v41 = vld [vmem:[%s1095_s2 + $0x10] sm:$0xff] }
  0x1c   : > { %v247_v35 = vadd.f32 %v246_v32, %v245_v33 }
  0x1d   : > { %v215_v49 = vadd.f32 %v214_v46, %v213_v45  ;;  %v417_v45 = vld [vmem:[%s1095_s2] sm:$0xff] }
  0x1e   : > { %v249_v39 = vadd.f32 %v248_v34, %v247_v35 }
  0x1f   : > { %v217_v53 = vadd.f32 %v216_v50, %v215_v49 }
  0x20   : > { %v251_v40 = vadd.f32 %v250_v38, %v249_v39  ;;  %v403_v38 = vld [vmem:[%s1094_s1 + $0x10] sm:$0xff] }
  0x21   : > { %v219_v56 = vadd.f32 %v218_v54, %v217_v53  ;;  %v402_v53 = vld [vmem:[%s1094_s1 + $0x8] sm:$0xff]  ;;  %v420_v54 = vld [vmem:[%s1095_s2 + $0x18] sm:$0xff] }
  0x22   : > { %v252_v43 = vrot.slane %v251_v40, 4 }
  0x23   : > { %v220_v57 = vrot.slane %v219_v56, 4 }
  0x24   : > { %v253_v44 = vadd.f32 %v252_v43, %v251_v40  ;;  %v401_v40 = vld [vmem:[%s1094_s1] sm:$0xff] }
  0x25   : > { %v221_v58 = vadd.f32 %v220_v57, %v219_v56 }
  0x26   : > { %v254_v47 = vrot.slane %v253_v44, 2 }
  0x27   : > { %v222_v59 = vrot.slane %v221_v58, 2 }
  0x28   : > { %v255_v48 = vadd.f32 %v254_v47, %v253_v44  ;;  %v404_v44 = vld [vmem:[%s1094_s1 + $0x18] sm:$0xff] }
  0x29   : > { %v223_v11 = vadd.f32 %v222_v59, %v221_v58  ;;  %v418_v58 = vld [vmem:[%s1095_s2 + $0x8] sm:$0xff] }
  0x2a   : > { %v256_v51 = vrot.slane %v255_v48, 1 }
  0x2b   : > { %v224_v17 = vrot.slane %v223_v11, 1 }
  0x2c   : > { %v257_v52 = vadd.f32 %v256_v51, %v255_v48 }
  0x2d   : > { %v225_v18 = vadd.f32 %v224_v17, %v223_v11  ;;  %v406_v11 = vld [vmem:[%s1094_s1 + $0x28] sm:$0xff] }
  0x2e   : > { %v258_v55 = vmax.f32 %v257_v52, 1e-24 }
  0x2f   : > { %v226_v20 = vmax.f32 %v225_v18, 1e-24  ;;  %v422_v18 = vld [vmem:[%s1095_s2 + $0x28] sm:$0xff] }
  0x30   : > { %853 = vrsqrt.f32 %v258_v55 }
  0x31   : > { %855 = vrsqrt.f32 %v226_v20 }
  0x3d   : > { %v854_v60 = vpop.eup %853 }
  0x3e   : > { %v266_v61 = vmul.f32 %v854_v60, %v959_v15  ;;  %v267_v62 = vmul.f32 %v854_v60, %v965_v19  ;;  %v264_v63 = vmul.f32 %v854_v60, %v945_v7  ;;  %v265_v0 = vmul.f32 %v854_v60, %v954_v12  ;;  %v856_v21 = vpop.eup %855 }
  0x3f   : > { %v262_v1 = vmul.f32 %v854_v60, %v941_v5  ;;  %v263_v2 = vmul.f32 %v854_v60, %v943_v6  ;;  %v260_v8 = vmul.f32 %v854_v60, %v937_v3  ;;  %v261_v9 = vmul.f32 %v854_v60, %v939_v4 }
  0x40   : > { %v307_v10 = vpack.c.bf16 %v267_v62, %v266_v61  ;;  %v306_v14 = vpack.c.bf16 %v265_v0, %v264_v63  ;;  %v228_v22 = vmul.f32 %v856_v21, %v937_v3  ;;  %v229_v23 = vmul.f32 %v856_v21, %v939_v4  ;;  %v405_v62 = vld [vmem:[%s1094_s1 + $0x20] sm:$0xff] }
  0x41   : > { %v305_v13 = vpack.c.bf16 %v263_v2, %v262_v1  ;;  %v304_v16 = vpack.c.bf16 %v261_v9, %v260_v8  ;;  %v230_v24 = vmul.f32 %v856_v21, %v941_v5  ;;  %v231_v25 = vmul.f32 %v856_v21, %v943_v6  ;;  %v408_v1 = vld [vmem:[%s1094_s1 + $0x38] sm:$0xff]  ;;  %v421_v2 = vld [vmem:[%s1095_s2 + $0x20] sm:$0xff]  ;;  %v407_v9 = vld [vmem:[%s1094_s1 + $0x30] sm:$0xff] }
  0x42   : > { %318 = vrot.lane.b32.xlu0 %v307_v10, %s897_s18  ;;  %v232_v26 = vmul.f32 %v856_v21, %v945_v7  ;;  %v233_v27 = vmul.f32 %v856_v21, %v954_v12  ;;  %v234_v28 = vmul.f32 %v856_v21, %v959_v15  ;;  %v235_v3 = vmul.f32 %v856_v21, %v965_v19 }
  0x43   : > { %314 = vrot.lane.b32.xlu1 %v305_v13, %s897_s18  ;;  %v424_v13 = vld [vmem:[%s1095_s2 + $0x38] sm:$0xff] }
  0x46   : > { %316 = vrot.lane.b32.xlu0 %v306_v14, %s897_s18 }
  0x47   : > { %312 = vrot.lane.b32.xlu1 %v304_v16, %s897_s18 }
  0x64   : > { %268 = vxpose.xlu0.b32.start [1/8] (short) (narrow) %v228_v22, 64 }
  0x68   : > { %269 = vxpose.xlu0.b32.cont [2/8] (short) (narrow) %v229_v23, 64 }
  0x6c   : > { %270 = vxpose.xlu0.b32.cont [3/8] (short) (narrow) %v230_v24, 64  ;;  %v423_v24 = vld [vmem:[%s1095_s2 + $0x30] sm:$0xff] }
  0x70   : > { %271 = vxpose.xlu0.b32.cont [4/8] (short) (narrow) %v231_v25, 64 }
  0x74   : > { %272 = vxpose.xlu0.b32.cont [5/8] (short) (narrow) %v232_v26, 64 }
  0x78   : > { %273 = vxpose.xlu0.b32.cont [6/8] (short) (narrow) %v233_v27, 64 }
  0x7c   : > { %274 = vxpose.xlu0.b32.cont [7/8] (short) (narrow) %v234_v28, 64 }
  0x80   : > { %275 = vxpose.xlu0.b32.end [8/8] (short) (narrow) %v235_v3, 64 }
  0xb4   : > { %v319_v4 = vpop.permute.xlu0 %318 }
  0xb5   : > { %807 = vmatprep.subr.bf16.mxu0 %v319_v4  ;;  %v315_v5 = vpop.permute.xlu1 %314 }
  0xb6   : > { %808 = vmatpush3.bf16.msra.mxu0 %v319_v4 }
  0xb8   : > { %v317_v29 = vpop.permute.xlu0 %316 }
  0xb9   : > { %809 = vmatprep.subr.bf16.mxu0 %v317_v29  ;;  %v313_v6 = vpop.permute.xlu1 %312 }
  0xba   : > { %810 = vmatpush3.bf16.msra.mxu0 %v317_v29 }
  0xbb   : > { %811 = vmatprep.subr.bf16.mxu0 %v315_v5 }
  0xbe   : > { %812 = vmatpush3.bf16.msra.mxu0 %v315_v5 }
  0xbf   : > { %813 = vmatprep.subr.bf16.mxu0 %v313_v6 }
  0xc2   : > { %814 = vmatpush3.bf16.msra.mxu0 %v313_v6 }
  0xe0   : > { %v284_v7 = vpop.trf.xlu0 }
  0xe4   : > { %v285_v12 = vpop.trf.xlu0 }
  0xe5   : > { %v300_v30 = vpack.c.bf16 %v285_v12, %v284_v7 }
  0xe7   : > { %815 = vmatprep.mubr.msk.bf16.mxu0 %vm204_vm1, %v300_v30 }
  0xe8   : > { %v286_v15 = vpop.trf.xlu0 }
  0xec   : > { %v287_v19 = vpop.trf.xlu0 }
  0xed   : > { %v301_v31 = vpack.c.bf16 %v287_v19, %v286_v15 }
  0xef   : > { %816 = vmatmul.mubr.msk.bf16.vlgmr.msra.gmra.mxu0 %vm204_vm1, %v301_v31 }
  0xf0   : > { %v288_v32 = vpop.trf.xlu0 }
  0xf4   : > { %v289_v33 = vpop.trf.xlu0 }
  0xf5   : > { %v302_v34 = vpack.c.bf16 %v289_v33, %v288_v32 }
  0xf7   : > { %819 = vmatprep.mubr.msk.bf16.mxu0 %vm204_vm1, %v302_v34 }
  0xf8   : > { %v290_v35 = vpop.trf.xlu0 }
  0xfc   : > { %v291_v36 = vpop.trf.xlu0 }
  0xfd   : > { %v303_v37 = vpack.c.bf16 %v291_v36, %v290_v35 }
  0xff   : > { %820 = vmatmul.mubr.msk.bf16.gmra.mxu0 %vm204_vm1, %v303_v37 }
 0x1af   : > { %v817_v39 = vpop.f32.mrf.mxu0 }
 0x1b0   : > { %v411_v42 = vmul.f32 %v817_v39, %v403_v38 }
 0x1b1   : > { %v370_v43 = vpop.f32.mrf.mxu0 }
 0x1b2   : > { %v409_v46 = vmul.f32 %v401_v40, %v370_v43  ;;  %v427_v47 = vadd.f32 %v419_v41, %v411_v42 }
 0x1b3   : > { %v818_v48 = vpop.f32.mrf.mxu0 }
 0x1b4   : > { %v412_v49 = vmul.f32 %v818_v48, %v404_v44  ;;  %v439_v50 = vsel %vm204_vm1, %v427_v47, -inf  ;;  %v425_v51 = vadd.f32 %v417_v45, %v409_v46 }
 0x1b5   : > { %440 = vmax.xlane.f32.xlu1 %v439_v50  ;;  %v373_v52 = vpop.f32.mrf.mxu0 }
 0x1b6   : > { %v410_v55 = vmul.f32 %v402_v53, %v373_v52  ;;  %v433_v56 = vsel %vm204_vm1, %v425_v51, -inf  ;;  %v428_v57 = vadd.f32 %v420_v54, %v412_v49 }
 0x1b8   : > { %v442_v59 = vsel %vm204_vm1, %v428_v57, -inf  ;;  %v426_v60 = vadd.f32 %v418_v58, %v410_v55 }
 0x1b9   : > { %434 = vmax.xlane.f32.xlu1 %v433_v56 }
 0x1ba   : > { %v436_v63 = vsel %vm204_vm1, %v426_v60, -inf }
 0x1bd   : > { %443 = vmax.xlane.f32.xlu1 %v442_v59 }
 0x1bf   : > { %v821_v61 = vpop.f32.mrf.mxu0 }
 0x1c0   : > { %v415_v20 = vmul.f32 %v821_v61, %v407_v9 }
 0x1c1   : > { %437 = vmax.xlane.f32.xlu1 %v436_v63  ;;  %v386_v0 = vpop.f32.mrf.mxu0 }
 0x1c2   : > { %v413_v8 = vmul.f32 %v405_v62, %v386_v0  ;;  %v431_v28 = vadd.f32 %v423_v24, %v415_v20 }
 0x1c3   : > { %v822_v10 = vpop.f32.mrf.mxu0 }
 0x1c4   : > { %v416_v14 = vmul.f32 %v822_v10, %v408_v1  ;;  %v429_v16 = vadd.f32 %v421_v2, %v413_v8  ;;  %v451_v3 = vsel %vm204_vm1, %v431_v28, -inf }
 0x1c5   : > { %v389_v17 = vpop.f32.mrf.mxu0 }
 0x1c6   : > { %v414_v21 = vmul.f32 %v406_v11, %v389_v17  ;;  %v445_v22 = vsel %vm204_vm1, %v429_v16, -inf  ;;  %v432_v23 = vadd.f32 %v424_v13, %v416_v14 }
 0x1c7   : > { %446 = vmax.xlane.f32.xlu1 %v445_v22 }
 0x1c8   : > { %v454_v25 = vsel %vm204_vm1, %v432_v23, -inf  ;;  %v430_v26 = vadd.f32 %v422_v18, %v414_v21 }
 0x1c9   : > { %455 = vmax.xlane.f32.xlu0 %v454_v25 }
 0x1ca   : > { %v448_v27 = vsel %vm204_vm1, %v430_v26, -inf }
 0x1cb   : > { %449 = vmax.xlane.f32.xlu1 %v448_v27 }
 0x1cf   : > { %452 = vmax.xlane.f32.xlu1 %v451_v3 }
 0x23e   : > { %v441_v4 = vpop.xlane.xlu1 %440 }
 0x23f   : > { %v459_v5 = vsub.f32 %v427_v47, %v441_v4  ;;  %v849_v4 = vld [vmem:[%s932_s17 + $0x4] ss:$8 sps:$4 sm:$0xff]  }
 0x240   : > { %831 = vmatprep.mubr.msk.bf16.mxu1 %vm204_vm1, %v849_v4 }
 0x241   : > { %v469_v29 = vmul.f32 1.442695, %v459_v5 }
 0x242   : > { %v435_v6 = vpop.xlane.xlu1 %434 }
 0x243   : > { %857 = vpow2.f32 %v469_v29  ;;  %v457_v7 = vsub.f32 %v425_v51, %v435_v6 }
 0x245   : > { %v465_v12 = vmul.f32 1.442695, %v457_v7 }
 0x246   : > { %v444_v30 = vpop.xlane.xlu1 %443 }
 0x247   : > { %859 = vpow2.f32 %v465_v12  ;;  %v460_v15 = vsub.f32 %v428_v57, %v444_v30 }
 0x249   : > { %v471_v19 = vmul.f32 1.442695, %v460_v15 }
 0x24a   : > { %v438_v31 = vpop.xlane.xlu1 %437 }
 0x24b   : > { %861 = vpow2.f32 %v471_v19  ;;  %v458_v32 = vsub.f32 %v426_v60, %v438_v31 }
 0x24d   : > { %v467_v33 = vmul.f32 1.442695, %v458_v32 }
 0x24f   : > { %863 = vpow2.f32 %v467_v33 }
 0x250   : > { %v858_v34 = vpop.eup %857  ;;  %v447_v35 = vpop.xlane.xlu1 %446 }
 0x251   : > { %v487_v36 = vsel %vm204_vm1, %v858_v34, 0.0  ;;  %v461_v40 = vsub.f32 %v429_v16, %v447_v35  ;;  %v850_v35 = vld [vmem:[%s932_s17 + $0x14] ss:$8 sps:$4 sm:$0xff]  }
 0x252   : > { %488 = vadd.xlane.f32.xlu1 %v487_v36  ;;  %v456_v49 = vpop.xlane.xlu0 %455  ;;  %v851_v36 = vld [vmem:[%s932_s17 + $0x24] ss:$8 sps:$4 sm:$0xff]  }
 0x253   : > { %v473_v45 = vmul.f32 1.442695, %v461_v40  ;;  %v464_v51 = vsub.f32 %v432_v23, %v456_v49 }
 0x254   : > { %v860_v37 = vpop.eup %859  ;;  %v450_v38 = vpop.xlane.xlu1 %449 }
 0x255   : > { %v481_v39 = vsel %vm204_vm1, %v860_v37, 0.0  ;;  %v462_v46 = vsub.f32 %v430_v26, %v450_v38  ;;  %v479_v53 = vmul.f32 1.442695, %v464_v51 }
 0x256   : > { %482 = vadd.xlane.f32.xlu1 %v481_v39 }
 0x257   : > { %v475_v52 = vmul.f32 1.442695, %v462_v46 }
 0x258   : > { %v862_v41 = vpop.eup %861  ;;  %v453_v42 = vpop.xlane.xlu1 %452 }
 0x259   : > { %v463_v43 = vsub.f32 %v431_v28, %v453_v42  ;;  %v490_v44 = vsel %vm204_vm1, %v862_v41, 0.0 }
 0x25a   : > { %491 = vadd.xlane.f32.xlu1 %v490_v44 }
 0x25b   : > { %v477_v47 = vmul.f32 1.442695, %v463_v43 }
 0x25c   : > { %v864_v48 = vpop.eup %863 }
 0x25d   : > { %865 = vpow2.f32 %v477_v47  ;;  %v484_v50 = vsel %vm204_vm1, %v864_v48, 0.0 }
 0x25e   : > { %485 = vadd.xlane.f32.xlu1 %v484_v50  ;;  %867 = vpow2.f32 %v473_v45 }
 0x25f   : > { %869 = vpow2.f32 %v475_v52 }
 0x260   : > { %871 = vpow2.f32 %v479_v53 }
 0x26a   : > { %v866_v54 = vpop.eup %865 }
 0x26b   : > { %v499_v55 = vsel %vm204_vm1, %v866_v54, 0.0  ;;  %v868_v56 = vpop.eup %867 }
 0x26c   : > { %500 = vadd.xlane.f32.xlu1 %v499_v55  ;;  %v493_v57 = vsel %vm204_vm1, %v868_v56, 0.0  ;;  %v870_v58 = vpop.eup %869 }
 0x26d   : > { %v496_v59 = vsel %vm204_vm1, %v870_v58, 0.0  ;;  %v872_v60 = vpop.eup %871 }
 0x26e   : > { %v502_v61 = vsel %vm204_vm1, %v872_v60, 0.0 }
 0x270   : > { %494 = vadd.xlane.f32.xlu1 %v493_v57 }
 0x274   : > { %497 = vadd.xlane.f32.xlu1 %v496_v59 }
 0x278   : > { %503 = vadd.xlane.f32.xlu1 %v502_v61 }
 0x2db   : > { %v489_v62 = vpop.xlane.xlu1 %488 }
 0x2df   : > { %v483_v63 = vpop.xlane.xlu1 %482 }
 0x2e0   : > { %873 = vrcp.f32 %v483_v63 }
 0x2e3   : > { %v492_v0 = vpop.xlane.xlu1 %491 }
 0x2e7   : > { %v486_v1 = vpop.xlane.xlu1 %485 }
 0x2e8   : > { %875 = vrcp.f32 %v486_v1 }
 0x2e9   : > { %877 = vrcp.f32 %v489_v62 }
 0x2ea   : > { %879 = vrcp.f32 %v492_v0 }
 0x2ed   : > { %v874_v2 = vpop.eup %873 }
 0x2ee   : > { %v513_v8 = vmul.f32 %v874_v2, %v860_v37  ;;  %v852_v37 = vld [vmem:[%s932_s17 + $0x34] ss:$8 sps:$4 sm:$0xff]  }
 0x2f0   : > { %521 = vxpose.xlu1.b32.start [1/8] (short) (narrow) %v513_v8, 64 }
 0x2f5   : > { %v876_v9 = vpop.eup %875  ;;  %v501_v10 = vpop.xlane.xlu1 %500 }
 0x2f6   : > { %v514_v11 = vmul.f32 %v876_v9, %v864_v48  ;;  %v878_v13 = vpop.eup %877 }
 0x2f7   : > { %v515_v16 = vmul.f32 %v878_v13, %v858_v34  ;;  %v880_v17 = vpop.eup %879 }
 0x2f8   : > { %522 = vxpose.xlu1.b32.cont [2/8] (short) (narrow) %v514_v11, 64  ;;  %v516_v20 = vmul.f32 %v880_v17, %v862_v41 }
 0x2f9   : > { %v495_v14 = vpop.xlane.xlu1 %494 }
 0x2fa   : > { %881 = vrcp.f32 %v495_v14 }
 0x2fc   : > { %523 = vxpose.xlu1.b32.cont [3/8] (short) (narrow) %v515_v16, 64 }
 0x2fd   : > { %v498_v18 = vpop.xlane.xlu1 %497 }
 0x2fe   : > { %883 = vrcp.f32 %v498_v18 }
 0x2ff   : > { %885 = vrcp.f32 %v501_v10 }
 0x300   : > { %524 = vxpose.xlu1.b32.cont [4/8] (short) (narrow) %v516_v20, 64 }
 0x301   : > { %v504_v21 = vpop.xlane.xlu1 %503 }
 0x302   : > { %887 = vrcp.f32 %v504_v21 }
 0x307   : > { %v882_v22 = vpop.eup %881 }
 0x308   : > { %v517_v23 = vmul.f32 %v882_v22, %v868_v56 }
 0x30a   : > { %525 = vxpose.xlu1.b32.cont [5/8] (short) (narrow) %v517_v23, 64 }
 0x30b   : > { %v884_v24 = vpop.eup %883 }
 0x30c   : > { %v518_v25 = vmul.f32 %v884_v24, %v870_v58  ;;  %v886_v26 = vpop.eup %885 }
 0x30d   : > { %v519_v27 = vmul.f32 %v886_v26, %v866_v54 }
 0x30e   : > { %526 = vxpose.xlu1.b32.cont [6/8] (short) (narrow) %v518_v25, 64 }
 0x30f   : > { %v888_v28 = vpop.eup %887 }
 0x310   : > { %v520_v3 = vmul.f32 %v888_v28, %v872_v60 }
 0x312   : > { %527 = vxpose.xlu1.b32.cont [7/8] (short) (narrow) %v519_v27, 64 }
 0x316   : > { %528 = vxpose.xlu1.b32.end [8/8] (short) (narrow) %v520_v3, 64 }
 0x376   : > { %v537_v5 = vpop.trf.xlu1 }
 0x37a   : > { %v538_v29 = vpop.trf.xlu1 }
 0x37b   : > { %v553_v34 = vpack.c.bf16 %v538_v29, %v537_v5 }
 0x37e   : > { %v539_v6 = vpop.trf.xlu1 }
 0x382   : > { %v540_v7 = vpop.trf.xlu1 }
 0x383   : > { %v554_v33 = vpack.c.bf16 %v540_v7, %v539_v6 }
 0x386   : > { %v541_v12 = vpop.trf.xlu1 }
 0x38a   : > { %v542_v30 = vpop.trf.xlu1 }
 0x38b   : > { %v555_v32 = vpack.c.bf16 %v542_v30, %v541_v12 }
 0x38e   : > { %v543_v15 = vpop.trf.xlu1 }
 0x392   : > { %v544_v19 = vpop.trf.xlu1 }
 0x393   : > { %v556_v31 = vpack.c.bf16 %v544_v19, %v543_v15 }
 0x395   : > { %823 = vmatprep.subr.bf16.mxu1 %v556_v31 }
 0x396   : > { %824 = vmatpush3.bf16.msra.mxu1 %v556_v31 }
 0x397   : > { %825 = vmatprep.subr.bf16.mxu1 %v555_v32 }
 0x39a   : > { %826 = vmatpush3.bf16.msra.mxu1 %v555_v32 }
 0x39b   : > { %827 = vmatprep.subr.bf16.mxu1 %v554_v33 }
 0x39e   : > { %828 = vmatpush3.bf16.msra.mxu1 %v554_v33 }
 0x39f   : > { %829 = vmatprep.subr.bf16.mxu1 %v553_v34 }
 0x3a2   : > { %830 = vmatpush3.bf16.msra.mxu1 %v553_v34 }
 0x3a5   : > { %832 = vmatmul.mubr.msk.bf16.vlgmr.msra.gmra.mxu1 %vm204_vm1, %v850_v35 }
 0x3a6   : > { %835 = vmatprep.mubr.msk.bf16.mxu1 %vm204_vm1, %v851_v36 }
 0x3ad   : > { %836 = vmatmul.mubr.msk.bf16.gmra.mxu1 %vm204_vm1, %v852_v37 }
 0x465   : > { %v833_v38 = vpop.f32.mrf.mxu1 }
 0x466   : > { %v785_v39 = vpack.c.bf16 %v833_v38, %v833_v38 }
 0x467   : > { %v623_v40 = vpop.f32.mrf.mxu1 }
 0x468   : > { %689 = vst.msk [vmem:[%s170_s30 + $0x8] sm:$0xf] %vm686_vm2, %v785_v39  ;;  %v783_v41 = vpack.c.bf16 %v623_v40, %v623_v40 }
 0x469   : > { %v834_v42 = vpop.f32.mrf.mxu1 }
 0x46a   : > { %687 = vst.msk [vmem:[%s170_s30] sm:$0xf] %vm686_vm2, %v783_v41  ;;  %v786_v43 = vpack.c.bf16 %v834_v42, %v834_v42 }
 0x46b   : > { %v626_v44 = vpop.f32.mrf.mxu1 }
 0x46c   : > { %690 = vst.msk [vmem:[%s170_s30 + $0xc] sm:$0xf] %vm686_vm2, %v786_v43  ;;  %v784_v45 = vpack.c.bf16 %v626_v44, %v626_v44 }
 0x46d   : > { %v837_v46 = vpop.f32.mrf.mxu1 }
 0x46e   : > { %688 = vst.msk [vmem:[%s170_s30 + $0x4] sm:$0xf] %vm686_vm2, %v784_v45  ;;  %v789_v47 = vpack.c.bf16 %v837_v46, %v837_v46 }
 0x46f   : > { %v639_v48 = vpop.f32.mrf.mxu1 }
 0x470   : > { %693 = vst.msk [vmem:[%s170_s30 + $0x18] sm:$0xf] %vm686_vm2, %v789_v47  ;;  %v787_v49 = vpack.c.bf16 %v639_v48, %v639_v48 }
 0x471   : > { %v838_v50 = vpop.f32.mrf.mxu1 }
 0x472   : > { %691 = vst.msk [vmem:[%s170_s30 + $0x10] sm:$0xf] %vm686_vm2, %v787_v49  ;;  %v790_v51 = vpack.c.bf16 %v838_v50, %v838_v50 }
 0x473   : > { %v642_v52 = vpop.f32.mrf.mxu1 }
 0x474   : > { %694 = vst.msk [vmem:[%s170_s30 + $0x1c] sm:$0xf] %vm686_vm2, %v790_v51  ;;  %v788_v53 = vpack.c.bf16 %v642_v52, %v642_v52 }
 0x476   : > { %692 = vst.msk [vmem:[%s170_s30 + $0x14] sm:$0xf] %vm686_vm2, %v788_v53 }
 0x477 PF: > { %s13_s12 = sadd.s32 1, %s895_s12  }
 0x478   : > { %p10_p4 = scmp.ge.s32.totalorder %s13_s12, 4  }
 0x47a   :  { %12 = sbr.rel (!%p10_p4) target bundleno = 1 (0x1), region = 62 }

// kernel: fg_forward.6
= control target key start
LH: loop header
LB: loop body
LE: loop exit
PB: predicated region body
PF: predicated region fallthrough
CT: control target
= control target key end

     0   :  { %vm259_vm0 = vcmask 523264   ;;  %v57_v40 = vlaneseq  ;;  %vm493_vm1 = vcmask 1043456   ;;  %vm494_vm2 = vcmask 130052   ;;  %s951_s1 = inlined_call_operand.vmem [shape: bf16[192,144], index: 1, kind: input, shape index: {}]   ;;  %s952_s0 = inlined_call_operand.vmem [shape: bf16[128,192], index: 0, kind: input, shape index: {}]   ;;  %s953_s2 = inlined_call_operand.vmem [shape: f32[1,144], index: 2, kind: input, shape index: {}]   ;;  %s954_s3 = inlined_call_operand.vmem [shape: bf16[128,144], index: 3, kind: output, shape index: {}]  }
   0x1   :  { %v620_v0 = vld [vmem:[%s951_s1 + $0x74] ss:$8 sps:$4 sm:$0xff]   ;;  %v622_v1 = vld [vmem:[%s951_s1 + $0x70] ss:$8 sps:$4 sm:$0xff]   ;;  %v623_v2 = vld [vmem:[%s951_s1 + $0x64] ss:$8 sps:$4 sm:$0xff]  }
   0x2   :  { %284 = vmatprep.subr.bf16.mxu0 %v620_v0  ;;  %596 = vmatprep.subr.bf16.mxu1 %v620_v0  ;;  %v625_v3 = vld [vmem:[%s951_s1 + $0x60] ss:$8 sps:$4 sm:$0xff]   ;;  %v626_v4 = vld [vmem:[%s951_s1 + $0x54] ss:$8 sps:$4 sm:$0xff]   ;;  %v628_v5 = vld [vmem:[%s951_s1 + $0x50] ss:$8 sps:$4 sm:$0xff]  }
   0x3   :  { %285 = vmatpush1.bf16.msra.mxu0 %v622_v1  ;;  %608 = vmatpush1.bf16.msra.mxu1 %v622_v1  ;;  %v629_v6 = vld [vmem:[%s951_s1 + $0x44] ss:$8 sps:$4 sm:$0xff]   ;;  %v631_v7 = vld [vmem:[%s951_s1 + $0x40] ss:$8 sps:$4 sm:$0xff]   ;;  %v632_v8 = vld [vmem:[%s951_s1 + $0x34] ss:$8 sps:$4 sm:$0xff]  }
   0x4   :  { %286 = vmatprep.subr.bf16.mxu0 %v623_v2  ;;  %597 = vmatprep.subr.bf16.mxu1 %v623_v2  ;;  %v634_v9 = vld [vmem:[%s951_s1 + $0x30] ss:$8 sps:$4 sm:$0xff]   ;;  %v635_v10 = vld [vmem:[%s951_s1 + $0x24] ss:$8 sps:$4 sm:$0xff]   ;;  %v637_v13 = vld [vmem:[%s951_s1 + $0x20] ss:$8 sps:$4 sm:$0xff]  }
   0x5   :  { %v658_v11 = vld [vmem:[%s952_s0 + $0x4] ss:$8 sps:$4 sm:$0xff]   ;;  %v638_v14 = vld [vmem:[%s951_s1 + $0x14] ss:$8 sps:$4 sm:$0xff]   ;;  %v640_v15 = vld [vmem:[%s951_s1 + $0x10] ss:$8 sps:$4 sm:$0xff]  }
   0x6   :  { %v661_v12 = vld [vmem:[%s952_s0 + $0x44] ss:$8 sps:$4 sm:$0xff]   ;;  %556 = vmatprep.mubr.msk.bf16.mxu0 %vm259_vm0, %v658_v11  ;;  %v643_v17 = vld [vmem:[%s951_s1] ss:$8 sps:$4 sm:$0xff]   ;;  %v644_v18 = vld [vmem:[%s951_s1 + $0xb4] ss:$8 sps:$4 sm:$0xff]  }
   0x7   :  { %287 = vmatpush1.bf16.msra.mxu0 %v625_v3  ;;  %609 = vmatpush1.bf16.msra.mxu1 %v625_v3  ;;  %v641_v16 = vld [vmem:[%s951_s1 + $0x4] ss:$8 sps:$4 sm:$0xff]   ;;  %v646_v19 = vld [vmem:[%s951_s1 + $0xb0] ss:$8 sps:$4 sm:$0xff]   ;;  %v649_v21 = vld [vmem:[%s951_s1 + $0xa0] ss:$8 sps:$4 sm:$0xff]  }
   0x8   :  { %288 = vmatprep.subr.bf16.mxu0 %v626_v4  ;;  %598 = vmatprep.subr.bf16.mxu1 %v626_v4  ;;  %v647_v20 = vld [vmem:[%s951_s1 + $0xa4] ss:$8 sps:$4 sm:$0xff]   ;;  %v650_v22 = vld [vmem:[%s951_s1 + $0x94] ss:$8 sps:$4 sm:$0xff]   ;;  %v652_v23 = vld [vmem:[%s951_s1 + $0x90] ss:$8 sps:$4 sm:$0xff]  }
   0x9   :  { %560 = vmatprep.mubr.msk.bf16.mxu1 %vm259_vm0, %v661_v12  ;;  %v653_v24 = vld [vmem:[%s951_s1 + $0x84] ss:$8 sps:$4 sm:$0xff]   ;;  %v655_v25 = vld [vmem:[%s951_s1 + $0x80] ss:$8 sps:$4 sm:$0xff]   ;;  %v662_v28 = vld [vmem:[%s952_s0 + $0x14] ss:$8 sps:$4 sm:$0xff]  }
   0xa   :  { %v656_v26 = vld [vmem:[%s952_s0] ss:$8 sps:$4 sm:$0xff]   ;;  %v664_v29 = vld [vmem:[%s952_s0 + $0x54] ss:$8 sps:$4 sm:$0xff]   ;;  %v666_v30 = vld [vmem:[%s952_s0 + $0x10] ss:$8 sps:$4 sm:$0xff]  }
   0xb   :  { %289 = vmatpush1.bf16.msra.mxu0 %v628_v5  ;;  %610 = vmatpush1.bf16.msra.mxu1 %v628_v5  ;;  %v659_v27 = vld [vmem:[%s952_s0 + $0x40] ss:$8 sps:$4 sm:$0xff]   ;;  %v667_v31 = vld [vmem:[%s952_s0 + $0x50] ss:$8 sps:$4 sm:$0xff]   ;;  %v668_v32 = vld [vmem:[%s952_s0 + $0x24] ss:$8 sps:$4 sm:$0xff]  }
   0xc   :  { %290 = vmatprep.subr.bf16.mxu0 %v629_v6  ;;  %599 = vmatprep.subr.bf16.mxu1 %v629_v6  ;;  %v670_v33 = vld [vmem:[%s952_s0 + $0x64] ss:$8 sps:$4 sm:$0xff]   ;;  %v672_v34 = vld [vmem:[%s952_s0 + $0x20] ss:$8 sps:$4 sm:$0xff]   ;;  %v674_v36 = vld [vmem:[%s952_s0 + $0x34] ss:$8 sps:$4 sm:$0xff]  }
   0xd   :  { %v673_v35 = vld [vmem:[%s952_s0 + $0x60] ss:$8 sps:$4 sm:$0xff]   ;;  %v676_v37 = vld [vmem:[%s952_s0 + $0x74] ss:$8 sps:$4 sm:$0xff]   ;;  %v678_v38 = vld [vmem:[%s952_s0 + $0x30] ss:$8 sps:$4 sm:$0xff]  }
   0xe   :  { %v679_v39 = vld [vmem:[%s952_s0 + $0x70] ss:$8 sps:$4 sm:$0xff]   ;;  %v58_v41 = vshrl.u32 %v57_v40, 7  ;;  %v55_v44 = vld [vmem:[%s953_s2] sm:$0x3]  ;;  %vm839_vm3 = vmor %vm494_vm2, %vm493_vm1 }
   0xf   :  { %291 = vmatpush1.bf16.msra.mxu0 %v631_v7  ;;  %611 = vmatpush1.bf16.msra.mxu1 %v631_v7 }
  0x10   :  { %292 = vmatprep.subr.bf16.mxu0 %v632_v8  ;;  %600 = vmatprep.subr.bf16.mxu1 %v632_v8  ;;  %v59_v42 = vsub.s32 0, %v58_v41  ;;  %v63_v43 = vsub.s32 1, %v58_v41 }
  0x12   :  { %v831_v45 = vrot.slane %v55_v44, %v59_v42  ;;  %v833_v46 = vrot.slane %v55_v44, %v63_v43 }
  0x13   :  { %293 = vmatpush1.bf16.msra.mxu0 %v634_v9  ;;  %612 = vmatpush1.bf16.msra.mxu1 %v634_v9 }
  0x14   :  { %294 = vmatprep.subr.bf16.mxu0 %v635_v10  ;;  %601 = vmatprep.subr.bf16.mxu1 %v635_v10 }
  0x17   :  { %295 = vmatpush1.bf16.msra.mxu0 %v637_v13  ;;  %613 = vmatpush1.bf16.msra.mxu1 %v637_v13 }
  0x18   :  { %296 = vmatprep.subr.bf16.mxu0 %v638_v14  ;;  %602 = vmatprep.subr.bf16.mxu1 %v638_v14 }
  0x1b   :  { %297 = vmatpush1.bf16.msra.mxu0 %v640_v15  ;;  %614 = vmatpush1.bf16.msra.mxu1 %v640_v15 }
  0x1c   :  { %298 = vmatprep.subr.bf16.mxu0 %v641_v16  ;;  %603 = vmatprep.subr.bf16.mxu1 %v641_v16 }
  0x1f   :  { %299 = vmatpush1.bf16.msra.mxu0 %v643_v17  ;;  %615 = vmatpush1.bf16.msra.mxu1 %v643_v17 }
  0x20   :  { %308 = vmatprep.subr.bf16.mxu0 %v644_v18  ;;  %604 = vmatprep.subr.bf16.mxu1 %v644_v18 }
  0x23   :  { %309 = vmatpush2.bf16.msra.mxu0 %v646_v19  ;;  %616 = vmatpush2.bf16.msra.mxu1 %v646_v19 }
  0x24   :  { %310 = vmatprep.subr.bf16.mxu0 %v647_v20  ;;  %605 = vmatprep.subr.bf16.mxu1 %v647_v20 }
  0x27   :  { %311 = vmatpush2.bf16.msra.mxu0 %v649_v21  ;;  %617 = vmatpush2.bf16.msra.mxu1 %v649_v21 }
  0x28   :  { %312 = vmatprep.subr.bf16.mxu0 %v650_v22  ;;  %606 = vmatprep.subr.bf16.mxu1 %v650_v22 }
  0x2b   :  { %313 = vmatpush2.bf16.msra.mxu0 %v652_v23  ;;  %618 = vmatpush2.bf16.msra.mxu1 %v652_v23 }
  0x2c   :  { %314 = vmatprep.subr.bf16.mxu0 %v653_v24  ;;  %607 = vmatprep.subr.bf16.mxu1 %v653_v24 }
  0x2f   :  { %315 = vmatpush2.bf16.msra.mxu0 %v655_v25  ;;  %619 = vmatpush2.bf16.msra.mxu1 %v655_v25 }
  0x32   :  { %317 = vmatmul.mubr.bf16.vlgmr.msra.gmra.mxu0 %v656_v26  ;;  %357 = vmatmul.mubr.bf16.vlgmr.msra.gmra.mxu1 %v659_v27 }
  0x33   :  { %557 = vmatprep.mubr.msk.bf16.mxu0 %vm259_vm0, %v662_v28  ;;  %561 = vmatprep.mubr.msk.bf16.mxu1 %vm259_vm0, %v664_v29 }
  0x3a   :  { %327 = vmatmul.mubr.bf16.gmra.mxu0 %v666_v30  ;;  %367 = vmatmul.mubr.bf16.gmra.mxu1 %v667_v31 }
  0x3b   :  { %558 = vmatprep.mubr.msk.bf16.mxu0 %vm259_vm0, %v668_v32  ;;  %562 = vmatprep.mubr.msk.bf16.mxu1 %vm259_vm0, %v670_v33 }
  0x42   :  { %337 = vmatmul.mubr.bf16.gmra.mxu0 %v672_v34  ;;  %377 = vmatmul.mubr.bf16.gmra.mxu1 %v673_v35 }
  0x43   :  { %559 = vmatprep.mubr.msk.bf16.mxu0 %vm259_vm0, %v674_v36  ;;  %563 = vmatprep.mubr.msk.bf16.mxu1 %vm259_vm0, %v676_v37 }
  0x4a   :  { %347 = vmatmul.mubr.bf16.gmra.mxu0 %v678_v38  ;;  %387 = vmatmul.mubr.bf16.gmra.mxu1 %v679_v39 }
  0xf2   :  { %v318_v47 = vpop.f32.mrf.mxu0  ;;  %v358_v48 = vpop.f32.mrf.mxu1 }
  0xf3   :  { %v319_v51 = vadd.f32 %v318_v47, %v831_v45  ;;  %v359_v52 = vadd.f32 %v358_v48, %v831_v45 }
  0xf4   :  { %v320_v49 = vpop.f32.mrf.mxu0  ;;  %v360_v50 = vpop.f32.mrf.mxu1 }
  0xf5   :  { %v321_v53 = vadd.f32 %v320_v49, %v833_v46  ;;  %v361_v54 = vadd.f32 %v360_v50, %v833_v46 }
  0xf6   :  { %v322_v56 = vpop.f32.mrf.mxu0  ;;  %v362_v57 = vpop.f32.mrf.mxu1 }
  0xf7   :  { %v580_v58 = vpack.c.bf16 %v321_v53, %v319_v51  ;;  %v588_v59 = vpack.c.bf16 %v361_v54, %v359_v52  ;;  %v323_v62 = vadd.f32 %v322_v56, %v831_v45  ;;  %v363_v63 = vadd.f32 %v362_v57, %v831_v45 }
  0xf8   :  { %v324_v60 = vpop.f32.mrf.mxu0  ;;  %v364_v61 = vpop.f32.mrf.mxu1 }
  0xf9   :  { %496 = vst.msk [vmem:[%s954_s3] sm:$0xff] %vm839_vm3, %v580_v58  ;;  %504 = vst.msk [vmem:[%s954_s3 + $0x40] sm:$0xff] %vm839_vm3, %v588_v59  ;;  %v325_v0 = vadd.f32 %v324_v60, %v833_v46  ;;  %v365_v1 = vadd.f32 %v364_v61, %v833_v46 }
  0xfa   :  { %v328_v2 = vpop.f32.mrf.mxu0  ;;  %v368_v3 = vpop.f32.mrf.mxu1 }
  0xfb   :  { %v581_v4 = vpack.c.bf16 %v325_v0, %v323_v62  ;;  %v589_v5 = vpack.c.bf16 %v365_v1, %v363_v63  ;;  %v329_v8 = vadd.f32 %v328_v2, %v831_v45  ;;  %v369_v9 = vadd.f32 %v368_v3, %v831_v45 }
  0xfc   :  { %v330_v6 = vpop.f32.mrf.mxu0  ;;  %v370_v7 = vpop.f32.mrf.mxu1 }
  0xfd   :  { %497 = vst.msk [vmem:[%s954_s3 + $0x8] sm:$0xff] %vm839_vm3, %v581_v4  ;;  %505 = vst.msk [vmem:[%s954_s3 + $0x48] sm:$0xff] %vm839_vm3, %v589_v5  ;;  %v331_v10 = vadd.f32 %v330_v6, %v833_v46  ;;  %v371_v11 = vadd.f32 %v370_v7, %v833_v46 }
  0xfe   :  { %v332_v12 = vpop.f32.mrf.mxu0  ;;  %v372_v13 = vpop.f32.mrf.mxu1 }
  0xff   :  { %v582_v14 = vpack.c.bf16 %v331_v10, %v329_v8  ;;  %v590_v15 = vpack.c.bf16 %v371_v11, %v369_v9  ;;  %v333_v18 = vadd.f32 %v332_v12, %v831_v45  ;;  %v373_v19 = vadd.f32 %v372_v13, %v831_v45 }
 0x100   :  { %v334_v16 = vpop.f32.mrf.mxu0  ;;  %v374_v17 = vpop.f32.mrf.mxu1 }
 0x101   :  { %498 = vst.msk [vmem:[%s954_s3 + $0x10] sm:$0xff] %vm839_vm3, %v582_v14  ;;  %506 = vst.msk [vmem:[%s954_s3 + $0x50] sm:$0xff] %vm839_vm3, %v590_v15  ;;  %v335_v20 = vadd.f32 %v334_v16, %v833_v46  ;;  %v375_v21 = vadd.f32 %v374_v17, %v833_v46 }
 0x102   :  { %v338_v22 = vpop.f32.mrf.mxu0  ;;  %v378_v23 = vpop.f32.mrf.mxu1 }
 0x103   :  { %v583_v24 = vpack.c.bf16 %v335_v20, %v333_v18  ;;  %v591_v25 = vpack.c.bf16 %v375_v21, %v373_v19  ;;  %v339_v28 = vadd.f32 %v338_v22, %v831_v45  ;;  %v379_v29 = vadd.f32 %v378_v23, %v831_v45 }
 0x104   :  { %v340_v26 = vpop.f32.mrf.mxu0  ;;  %v380_v27 = vpop.f32.mrf.mxu1 }
 0x105   :  { %499 = vst.msk [vmem:[%s954_s3 + $0x18] sm:$0xff] %vm839_vm3, %v583_v24  ;;  %507 = vst.msk [vmem:[%s954_s3 + $0x58] sm:$0xff] %vm839_vm3, %v591_v25  ;;  %v341_v30 = vadd.f32 %v340_v26, %v833_v46  ;;  %v381_v31 = vadd.f32 %v380_v27, %v833_v46 }
 0x106   :  { %v342_v32 = vpop.f32.mrf.mxu0  ;;  %v382_v33 = vpop.f32.mrf.mxu1 }
 0x107   :  { %v584_v34 = vpack.c.bf16 %v341_v30, %v339_v28  ;;  %v592_v35 = vpack.c.bf16 %v381_v31, %v379_v29  ;;  %v343_v38 = vadd.f32 %v342_v32, %v831_v45  ;;  %v383_v39 = vadd.f32 %v382_v33, %v831_v45 }
 0x108   :  { %v344_v36 = vpop.f32.mrf.mxu0  ;;  %v384_v37 = vpop.f32.mrf.mxu1 }
 0x109   :  { %500 = vst.msk [vmem:[%s954_s3 + $0x20] sm:$0xff] %vm839_vm3, %v584_v34  ;;  %508 = vst.msk [vmem:[%s954_s3 + $0x60] sm:$0xff] %vm839_vm3, %v592_v35  ;;  %v345_v40 = vadd.f32 %v344_v36, %v833_v46  ;;  %v385_v41 = vadd.f32 %v384_v37, %v833_v46 }
 0x10a   :  { %v348_v42 = vpop.f32.mrf.mxu0  ;;  %v388_v43 = vpop.f32.mrf.mxu1 }
 0x10b   :  { %v585_v44 = vpack.c.bf16 %v345_v40, %v343_v38  ;;  %v593_v47 = vpack.c.bf16 %v385_v41, %v383_v39  ;;  %v349_v50 = vadd.f32 %v348_v42, %v831_v45  ;;  %v389_v51 = vadd.f32 %v388_v43, %v831_v45 }
 0x10c   :  { %v350_v48 = vpop.f32.mrf.mxu0  ;;  %v390_v49 = vpop.f32.mrf.mxu1 }
 0x10d   :  { %501 = vst.msk [vmem:[%s954_s3 + $0x28] sm:$0xff] %vm839_vm3, %v585_v44  ;;  %509 = vst.msk [vmem:[%s954_s3 + $0x68] sm:$0xff] %vm839_vm3, %v593_v47  ;;  %v351_v52 = vadd.f32 %v350_v48, %v833_v46  ;;  %v391_v53 = vadd.f32 %v390_v49, %v833_v46 }
 0x10e   :  { %v352_v54 = vpop.f32.mrf.mxu0  ;;  %v392_v56 = vpop.f32.mrf.mxu1 }
 0x10f   :  { %v586_v57 = vpack.c.bf16 %v351_v52, %v349_v50  ;;  %v594_v58 = vpack.c.bf16 %v391_v53, %v389_v51  ;;  %v353_v61 = vadd.f32 %v352_v54, %v831_v45  ;;  %v393_v62 = vadd.f32 %v392_v56, %v831_v45 }
 0x110   :  { %v354_v59 = vpop.f32.mrf.mxu0  ;;  %v394_v60 = vpop.f32.mrf.mxu1 }
 0x111   :  { %502 = vst.msk [vmem:[%s954_s3 + $0x30] sm:$0xff] %vm839_vm3, %v586_v57  ;;  %510 = vst.msk [vmem:[%s954_s3 + $0x70] sm:$0xff] %vm839_vm3, %v594_v58  ;;  %v355_v63 = vadd.f32 %v354_v59, %v833_v46  ;;  %v395_v0 = vadd.f32 %v394_v60, %v833_v46 }
 0x113   :  { %v587_v1 = vpack.c.bf16 %v355_v63, %v353_v61  ;;  %v595_v2 = vpack.c.bf16 %v395_v0, %v393_v62 }
 0x115   :  { %503 = vst.msk [vmem:[%s954_s3 + $0x38] sm:$0xff] %vm839_vm3, %v587_v1  ;;  %511 = vst.msk [vmem:[%s954_s3 + $0x78] sm:$0xff] %vm839_vm3, %v595_v2 }

// kernel: fg_forward.4
= control target key start
LH: loop header
LB: loop body
LE: loop exit
PB: predicated region body
PF: predicated region fallthrough
CT: control target
= control target key end

     0   :  { %8 = vsyncpa [#allocation4], 0  ;;  %s2060_s12 = smov 0   ;;  %s3045_s0 = inlined_call_operand.vmem [shape: f32[2,64,64], index: 0, kind: input, shape index: {}]   ;;  %s3046_s1 = inlined_call_operand.hbm [shape: bf16[64,192], index: 1, kind: input, shape index: {}]   ;;  %s3047_s2 = inlined_call_operand.vmem [shape: f32[3,3,1,192], index: 2, kind: input, shape index: {}]   ;;  %s3048_s3 = inlined_call_operand.vmem [shape: bf16[2,64,192], index: 3, kind: output, shape index: {}]  }
   0x1 LB: > { %s2066_s13 = sadd.s32 4294967295, %s2033_s12   ;;  %p1904_p0 = scmp.ge.s32.totalorder %s2033_s12, 1  ;;  %s2033_s12 = sphi %s2060_s12, %s14_s12  }
   0x2   : > { %p113_p1 = scmp.lt.s32.totalorder %s2033_s12, 3  ;;  %s2035_s14 = smov [#allocation3]  }
   0x3   : > { %s125_s15 = sshll.u32 %s2035_s14, 4  ;;  %p1969_p3 = scmp.eq.s32.totalorder %s2066_s13, 0  ;;  %s126_s15 = int_to_ptr.vmem [resolvable:$true] %s125_s15 }
   0x4   : > { %p2070_p2 = pnand %p1904_p0, %p113_p1  ;;  %s2008_s17 = scalar_lea.vmem %s126_s15, 1024 }
   0x5   : > { %p2009_p7 = scmp.ne.s32.totalorder %s126_s15, %s2008_s17  ;;  %p2016_p10 = scmp.lt.s32.totalorder %s126_s15, %s126_s15 }
   0x6   : > { %p1965_p4 = pneg %p2070_p2  ;;  %p2017_p11 = scmp.lt.s32.totalorder %s2008_s17, %s2008_s17 }
   0x8   : > { %p1966_p5 = pnand %p1969_p3, %p1965_p4  ;;  %p2018_p12 = por %p2017_p11, %p2016_p10 }
   0xa   : > { %p1999_p6 = pneg %p1966_p5 }
   0xc   : > { %p2011_p8 = pnand %p2009_p7, %p1999_p6 }
   0xe   : > { %p2012_p9 = pneg %p2011_p8 }
  0x10   : > { %p2019_p13 = pnand %p2018_p12, %p2012_p9 }
  0x12   : > { %2022 = shalt.err (!%p2019_p13)
}
  0x13   : > { %s2036_s18 = smov 128   ;;  %s2037_s19 = smov 8  }
  0x14   : > { %1968 = dma.hbm_to_vmem [thread:$0]  (!%p1966_p5), %s3046_s1, 1024, %s126_s15, [#allocation4], %s2036_s18, %s2036_s18, %s2037_s19  }
  0x15   : > { %152 = sbr.rel (%p2070_p2) target bundleno = 421 (0x1a5), region = 32 }
  0x1a   : > { %2028 = dma.done.wait (%p1969_p3), [#allocation4], 1024  }
  0x1b   : > { %2030 = vsyncadd (%p1969_p3), [#allocation4], 4294966272  ;;  %v2038_v0 = vmov 0   ;;  %p176_p0 = scmp.lt.s32.totalorder %s2066_s13, 1  ;;  %v1984_v1 = vld [vmem:[#allocation3 + $0x34] ss:$8 sps:$4 sm:$0xff]   ;;  %v475_v22 = vlaneseq }
  0x1c   : > { %292 = vmatprep.mubr.bf16.mxu0 %v2038_v0  ;;  %312 = vmatprep.mubr.bf16.mxu1 %v2038_v0  ;;  %v1986_v2 = vld [vmem:[#allocation3 + $0x30] ss:$8 sps:$4 sm:$0xff]   ;;  %v1987_v3 = vld [vmem:[#allocation3 + $0x24] ss:$8 sps:$4 sm:$0xff]   ;;  %v1989_v4 = vld [vmem:[#allocation3 + $0x20] ss:$8 sps:$4 sm:$0xff]  }
  0x1d   : > { %s3199_s13 = smov (!%p176_p0, %s2066_s13), 1  ;;  %268 = vmatprep.subr.bf16.mxu0 %v1984_v1  ;;  %1953 = vmatprep.subr.bf16.mxu1 %v1984_v1  ;;  %v1990_v5 = vld [vmem:[#allocation3 + $0x14] ss:$8 sps:$4 sm:$0xff]   ;;  %v1992_v6 = vld [vmem:[#allocation3 + $0x10] ss:$8 sps:$4 sm:$0xff]   ;;  %vm247_vm0 = vcmask 523264  }
  0x1e   : > { %269 = vmatpush1.bf16.msra.mxu0 %v1986_v2  ;;  %1957 = vmatpush1.bf16.msra.mxu1 %v1986_v2  ;;  %s1943_s22 = sshll.u32 %s3199_s13, 6  ;;  %v1993_v7 = vld [vmem:[#allocation3 + $0x4] ss:$8 sps:$4 sm:$0xff]   ;;  %v1995_v8 = vld [vmem:[#allocation3] ss:$8 sps:$4 sm:$0xff]   ;;  %v2039_v21 = vmov 0.0  }
  0x1f   : > { %270 = vmatprep.subr.bf16.mxu0 %v1987_v3  ;;  %1954 = vmatprep.subr.bf16.mxu1 %v1987_v3  ;;  %s180_s25 = scalar_lea.vmem %s3045_s0, %s1943_s22  ;;  %333 = vst [vmem:[#allocation2] sm:$0xff] %v2039_v21  ;;  %335 = vst [vmem:[#allocation2 + $0x10] sm:$0x3] %v2039_v21  ;;  %vm336_vm1 = vcmask 517120   ;;  %v476_v23 = vshrl.u32 %v475_v22, 7  ;;  %vm626_vm2 = vcmask 1046528   ;;  %s2506_s21 = scalar_lea.vmem %s3048_s3, %s1943_s22 }
  0x20   : > { %v187_v9 = vld [vmem:[%s180_s25] sm:$0xff]  ;;  %v188_v10 = vld [vmem:[%s180_s25 + $0x8] sm:$0xff]  ;;  %v189_v15 = vld [vmem:[%s180_s25 + $0x10] sm:$0xff]  ;;  %338 = vst [vmem:[#allocation2 + $0x20] sm:$0xff] %v2039_v21  ;;  %vm424_vm3 = vcmask 523265   ;;  %vm427_vm4 = vcmask 516096  }
  0x21   : > { %v191_v11 = vld [vmem:[%s180_s25 + $0x20] sm:$0xff]  ;;  %v192_v12 = vld [vmem:[%s180_s25 + $0x28] sm:$0xff]  ;;  %v195_v13 = vpack.c.bf16 %v188_v10, %v187_v9  ;;  %v190_v16 = vld [vmem:[%s180_s25 + $0x18] sm:$0xff]  ;;  %340 = vst [vmem:[#allocation2 + $0x30] sm:$0x3] %v2039_v21  ;;  %v2112_v24 = vsub.s32 0, %v476_v23 }
  0x22   : > { %271 = vmatpush1.bf16.msra.mxu0 %v1989_v4  ;;  %1958 = vmatpush1.bf16.msra.mxu1 %v1989_v4  ;;  %v197_v14 = vpack.c.bf16 %v192_v12, %v191_v11  ;;  %v193_v17 = vld [vmem:[%s180_s25 + $0x30] sm:$0xff]  ;;  %v194_v18 = vld [vmem:[%s180_s25 + $0x38] sm:$0xff]  ;;  %v196_v19 = vpack.c.bf16 %v190_v16, %v189_v15  ;;  %334 = vst.msk [vmem:[#allocation2 + $0x8] sm:$0xff] %vm247_vm0, %v2039_v21  ;;  %339 = vst.msk [vmem:[#allocation2 + $0x28] sm:$0xff] %vm247_vm0, %v2039_v21  ;;  %v2131_v34 = vsub.s32 1, %v476_v23  ;;  %vm816_vm5 = vcmask 1045504  }
  0x23   : > { %272 = vmatprep.subr.bf16.mxu0 %v1990_v5  ;;  %1955 = vmatprep.subr.bf16.mxu1 %v1990_v5  ;;  %v198_v20 = vpack.c.bf16 %v194_v18, %v193_v17  ;;  %342 = vst [vmem:[#allocation2 + $0x40] sm:$0xff] %v2039_v21  ;;  %343 = vst.msk [vmem:[#allocation2 + $0x48] sm:$0xff] %vm247_vm0, %v2039_v21  ;;  %v1925_v25 = vld [vmem:[%s3047_s2 + $0x2] sm:$0x3]  ;;  %v1926_v29 = vld [vmem:[%s3047_s2 + $0x4] sm:$0x3] }
  0x24   : > { %344 = vst [vmem:[#allocation2 + $0x50] sm:$0x3] %v2039_v21  ;;  %346 = vst [vmem:[#allocation2 + $0x60] sm:$0xff] %v2039_v21  ;;  %v2118_v26 = vrot.slane %v1925_v25, %v2112_v24  ;;  %v473_v30 = vld [vmem:[%s3047_s2] sm:$0x3]  ;;  %v2129_v33 = vrot.slane %v1926_v29, %v2112_v24  ;;  %v2139_v45 = vrot.slane %v1925_v25, %v2131_v34  ;;  %vm1824_vm6 = vcmask 1043456  }
  0x25   : > { %347 = vst.msk [vmem:[#allocation2 + $0x68] sm:$0xff] %vm247_vm0, %v2039_v21  ;;  %348 = vst [vmem:[#allocation2 + $0x70] sm:$0x3] %v2039_v21  ;;  %v2134_v37 = vrot.slane %v473_v30, %v2112_v24  ;;  %v1928_v59 = vld [vmem:[%s3047_s2 + $0x8] sm:$0x3]  ;;  %vm1825_vm7 = vcmask 523268  }
  0x26   : > { %273 = vmatpush1.bf16.msra.mxu0 %v1992_v6  ;;  %1959 = vmatpush1.bf16.msra.mxu1 %v1992_v6  ;;  %350 = vst [vmem:[#allocation2 + $0x80] sm:$0xff] %v2039_v21  ;;  %351 = vst.msk [vmem:[#allocation2 + $0x88] sm:$0xff] %vm247_vm0, %v2039_v21  ;;  %v517_v27 = vld [vmem:[#allocation2] sm:$0xfe]  ;;  %v519_v28 = vld [vmem:[#allocation2 + $0x10] sm:$0x1]  ;;  %v2163_v11 = vrot.slane %v1928_v59, %v2112_v24 }
  0x27   : > { %274 = vmatprep.subr.bf16.mxu0 %v1993_v7  ;;  %1956 = vmatprep.subr.bf16.mxu1 %v1993_v7  ;;  %352 = vst [vmem:[#allocation2 + $0x90] sm:$0x3] %v2039_v21  ;;  %354 = vst [vmem:[#allocation2 + $0xa0] sm:$0xff] %v2039_v21  ;;  %v562_v31 = vmul.f32 %v2118_v26, %v517_v27  ;;  %v564_v32 = vmul.f32 %v2118_v26, %v519_v28  ;;  %v707_v35 = vld [vmem:[#allocation2] sm:$0xfc]  ;;  %v485_v51 = vmul.f32 0.0, %v2134_v37 }
  0x28   : > { %355 = vst.msk [vmem:[#allocation2 + $0xa8] sm:$0xff] %vm247_vm0, %v2039_v21  ;;  %356 = vst [vmem:[#allocation2 + $0xb0] sm:$0x3] %v2039_v21  ;;  %v709_v36 = vld [vmem:[#allocation2 + $0x10] sm:$0x3]  ;;  %v752_v41 = vmul.f32 %v2129_v33, %v707_v35  ;;  %v2156_v7 = vrot.slane %v473_v30, %v2131_v34 }
  0x29   : > { %358 = vst [vmem:[#allocation2 + $0xc0] sm:$0xff] %v2039_v21  ;;  %359 = vst.msk [vmem:[#allocation2 + $0xc8] sm:$0xff] %vm247_vm0, %v2039_v21  ;;  %v627_v39 = vrot.slane %v562_v31, 1  ;;  %v628_v40 = vrot.slane %v564_v32, 1  ;;  %v754_v42 = vmul.f32 %v2129_v33, %v709_v36  ;;  %v518_v48 = vld [vmem:[#allocation2 + $0x8] sm:$0xfe] }
  0x2a   : > { %275 = vmatpush1.bf16.msra.mxu0 %v1995_v8  ;;  %1960 = vmatpush1.bf16.msra.mxu1 %v1995_v8  ;;  %360 = vst [vmem:[#allocation2 + $0xd0] sm:$0x3] %v2039_v21  ;;  %362 = vst [vmem:[#allocation2 + $0xe0] sm:$0xff] %v2039_v21  ;;  %v817_v55 = vrot.slane %v752_v41, 2  ;;  %v563_v60 = vmul.f32 %v2139_v45, %v518_v48  ;;  %v708_v3 = vld [vmem:[#allocation2 + $0x8] sm:$0xfc] }
  0x2b   : > { %363 = vst.msk [vmem:[#allocation2 + $0xe8] sm:$0xff] %vm247_vm0, %v2039_v21  ;;  %364 = vst [vmem:[#allocation2 + $0xf0] sm:$0x3] %v2039_v21  ;;  %v629_v54 = vsel %vm626_vm2, %v627_v39, %v628_v40  ;;  %v818_v56 = vrot.slane %v754_v42, 2  ;;  %v1927_v10 = vld [vmem:[%s3047_s2 + $0x6] sm:$0x3] }
  0x2c   : > { %366 = vst [vmem:[#allocation2 + $0x100] sm:$0xff] %v2039_v21  ;;  %367 = vst.msk [vmem:[#allocation2 + $0x108] sm:$0xff] %vm247_vm0, %v2039_v21  ;;  %v691_v8 = vadd.f32 %v629_v54, %v485_v51  ;;  %v630_v15 = vrot.slane %v563_v60, 1  ;;  %v2177_v30 = vrot.slane %v1927_v10, %v2112_v24  ;;  %v2180_v35 = vrot.slane %v1927_v10, %v2131_v34  ;;  %v1930_v40 = vld [vmem:[%s3047_s2 + $0xc] sm:$0x3] }
  0x2d   : > { %1921 = vmatmul.mubr.msk.bf16.vlgmr.msra.gmra.mxu0 %vm247_vm0, %v195_v13  ;;  %1923 = vmatmul.mubr.msk.bf16.vlgmr.msra.gmra.mxu1 %vm247_vm0, %v197_v14  ;;  %368 = vst [vmem:[#allocation2 + $0x110] sm:$0x3] %v2039_v21  ;;  %370 = vst [vmem:[#allocation2 + $0x120] sm:$0xff] %v2039_v21  ;;  %v819_v9 = vsel %vm816_vm5, %v817_v55, %v818_v56  ;;  %v1929_v14 = vld [vmem:[%s3047_s2 + $0xa] sm:$0x3] }
  0x2e   : > { %302 = vmatprep.mubr.bf16.mxu0 %v2038_v0  ;;  %322 = vmatprep.mubr.bf16.mxu1 %v2038_v0  ;;  %371 = vst.msk [vmem:[#allocation2 + $0x128] sm:$0xff] %vm247_vm0, %v2039_v21  ;;  %372 = vst [vmem:[#allocation2 + $0x130] sm:$0x3] %v2039_v21  ;;  %v2153_v0 = vrot.slane %v1926_v29, %v2131_v34  ;;  %v881_v32 = vadd.f32 %v819_v9, %v691_v8  ;;  %v1931_v51 = vld [vmem:[%s3047_s2 + $0xe] sm:$0x3] }
  0x2f   : > { %337 = vst.msk [vmem:[#allocation2 + $0x18] sm:$0x3] %vm336_vm1, %v2039_v21  ;;  %341 = vst.msk [vmem:[#allocation2 + $0x38] sm:$0x3] %vm336_vm1, %v2039_v21  ;;  %v2186_v39 = vrot.slane %v1929_v14, %v2112_v24  ;;  %v2205_v56 = vrot.slane %v1929_v14, %v2131_v34  ;;  %v2229_v10 = vrot.slane %v1931_v51, %v2131_v34 }
  0x30   : > { %373 = vst.msk [vmem:[#allocation2 + $0x138] sm:$0x3] %vm336_vm1, %v2039_v21  ;;  %345 = vst.msk [vmem:[#allocation2 + $0x58] sm:$0x3] %vm336_vm1, %v2039_v21  ;;  %v753_v22 = vmul.f32 %v2153_v0, %v708_v3 }
  0x31   : > { %349 = vst.msk [vmem:[#allocation2 + $0x78] sm:$0x3] %vm336_vm1, %v2039_v21  ;;  %353 = vst.msk [vmem:[#allocation2 + $0x98] sm:$0x3] %vm336_vm1, %v2039_v21 }
  0x32   : > { %357 = vst.msk [vmem:[#allocation2 + $0xb8] sm:$0x3] %vm336_vm1, %v2039_v21  ;;  %361 = vst.msk [vmem:[#allocation2 + $0xd8] sm:$0x3] %vm336_vm1, %v2039_v21 }
  0x33   : > { %365 = vst.msk [vmem:[#allocation2 + $0xf8] sm:$0x3] %vm336_vm1, %v2039_v21  ;;  %369 = vst.msk [vmem:[#allocation2 + $0x118] sm:$0x3] %vm336_vm1, %v2039_v21  ;;  %v458_v21 = vld [vmem:[#allocation2 + $0x8] sm:$0xff] }
  0x34   : > { %3077 = vst [vmem:[#allocation6_spill] sm:$0xff] %v2118_v26  ;;  %3078 = vst [vmem:[#allocation7_spill] sm:$0xff] %v2129_v33 }
  0x35   : > { %1922 = vmatmul.mubr.msk.bf16.gmra.mxu0 %vm247_vm0, %v196_v19  ;;  %1924 = vmatmul.mubr.msk.bf16.gmra.mxu1 %vm247_vm0, %v198_v20  ;;  %3079 = vst [vmem:[#allocation8_spill] sm:$0xff] %v2134_v37  ;;  %3080 = vst [vmem:[#allocation9_spill] sm:$0xff] %v2153_v0 }
  0x36   : > { %v520_v49 = vld [vmem:[#allocation2 + $0x18] sm:$0x1]  ;;  %3081 = vst [vmem:[#allocation10_spill] sm:$0xff] %v2156_v7  ;;  %3082 = vst [vmem:[#allocation11_spill] sm:$0xff] %v2163_v11 }
  0x37   : > { %v565_v61 = vmul.f32 %v2139_v45, %v520_v49  ;;  %v710_v4 = vld [vmem:[#allocation2 + $0x18] sm:$0x3]  ;;  %3083 = vst [vmem:[#allocation12_spill] sm:$0xff] %v2177_v30  ;;  %3084 = vst [vmem:[#allocation13_spill] sm:$0xff] %v2180_v35 }
  0x38   : > { %v755_v23 = vmul.f32 %v2153_v0, %v710_v4  ;;  %3085 = vst [vmem:[#allocation14_spill] sm:$0xff] %v2205_v56  ;;  %v2224_v4 = vrot.slane %v1931_v51, %v2112_v24  ;;  %3086 = vst [vmem:[#allocation15_spill] sm:$0xff] %v2229_v10 }
  0x39   : > { %v631_v16 = vrot.slane %v565_v61, 1  ;;  %vm2514_vm8 = vmor %vm1825_vm7, %vm1824_vm6 }
  0x3b   : > { %v632_v48 = vsel %vm626_vm2, %v630_v15, %v631_v16 }
  0xed   : > { %v294_v38 = vpop.f32.mrf.mxu0  ;;  %v314_v43 = vpop.f32.mrf.mxu1 }
  0xee   : > { %v390_v44 = vrot.slane %v294_v38, 7  ;;  %v398_v46 = vrot.slane %v314_v43, 7  ;;  %v2183_v38 = vrot.slane %v1928_v59, %v2131_v34 }
  0xef   : > { %v296_v47 = vpop.f32.mrf.mxu0  ;;  %v316_v50 = vpop.f32.mrf.mxu1 }
  0xf0   : > { %423 = vst [vmem:[#allocation2 + $0x20] sm:$0xfe] %v390_v44  ;;  %426 = vst [vmem:[#allocation2 + $0x30] sm:$0x1] %v390_v44  ;;  %v391_v52 = vrot.slane %v296_v47, 7  ;;  %v399_v53 = vrot.slane %v316_v50, 7  ;;  %v486_v47 = vmul.f32 %v2156_v7, %v458_v21 }
  0xf1   : > { %441 = vst [vmem:[#allocation2 + $0xa0] sm:$0xfe] %v398_v46  ;;  %443 = vst [vmem:[#allocation2 + $0xb0] sm:$0x1] %v398_v46  ;;  %v298_v57 = vpop.f32.mrf.mxu0  ;;  %v318_v58 = vpop.f32.mrf.mxu1 }
  0xf2   : > { %425 = vst.msk [vmem:[#allocation2 + $0x28] sm:$0xfe] %vm424_vm3, %v391_v52  ;;  %442 = vst.msk [vmem:[#allocation2 + $0xa8] sm:$0xfe] %vm424_vm3, %v399_v53  ;;  %v392_v62 = vrot.slane %v298_v57, 7  ;;  %v400_v63 = vrot.slane %v318_v58, 7  ;;  %v2208_v57 = vrot.slane %v1930_v40, %v2112_v24 }
  0xf3   : > { %428 = vst.msk [vmem:[#allocation2 + $0x38] sm:$0x1] %vm427_vm4, %v391_v52  ;;  %444 = vst.msk [vmem:[#allocation2 + $0xb8] sm:$0x1] %vm427_vm4, %v399_v53  ;;  %v300_v1 = vpop.f32.mrf.mxu0  ;;  %v320_v2 = vpop.f32.mrf.mxu1  ;;  %v820_v52 = vrot.slane %v753_v22, 2  ;;  %v821_v53 = vrot.slane %v755_v23, 2 }
  0xf4   : > { %429 = vst [vmem:[#allocation2 + $0x40] sm:$0xfe] %v392_v62  ;;  %431 = vst [vmem:[#allocation2 + $0x50] sm:$0x1] %v392_v62  ;;  %v393_v5 = vrot.slane %v300_v1, 7  ;;  %v401_v6 = vrot.slane %v320_v2, 7 }
  0xf5   : > { %445 = vst [vmem:[#allocation2 + $0xc0] sm:$0xfe] %v400_v63  ;;  %447 = vst [vmem:[#allocation2 + $0xd0] sm:$0x1] %v400_v63  ;;  %v304_v12 = vpop.f32.mrf.mxu0  ;;  %v324_v13 = vpop.f32.mrf.mxu1  ;;  %v2218_v63 = vrot.slane %v1930_v40, %v2131_v34  ;;  %v1932_v1 = vld [vmem:[%s3047_s2 + $0x10] sm:$0x3] }
  0xf6   : > { %430 = vst.msk [vmem:[#allocation2 + $0x48] sm:$0xfe] %vm424_vm3, %v393_v5  ;;  %446 = vst.msk [vmem:[#allocation2 + $0xc8] sm:$0xfe] %vm424_vm3, %v401_v6  ;;  %v394_v17 = vrot.slane %v304_v12, 7  ;;  %v402_v18 = vrot.slane %v324_v13, 7  ;;  %v822_v12 = vsel %vm816_vm5, %v820_v52, %v821_v53 }
  0xf7   : > { %432 = vst.msk [vmem:[#allocation2 + $0x58] sm:$0x1] %vm427_vm4, %v393_v5  ;;  %448 = vst.msk [vmem:[#allocation2 + $0xd8] sm:$0x1] %vm427_vm4, %v401_v6  ;;  %v521_v19 = vld [vmem:[#allocation2 + $0x20] sm:$0xfe]  ;;  %v692_v5 = vadd.f32 %v632_v48, %v486_v47 }
  0xf8   : > { %v523_v20 = vld [vmem:[#allocation2 + $0x30] sm:$0x1]  ;;  %v566_v25 = vmul.f32 %v2118_v26, %v521_v19  ;;  %v711_v28 = vld [vmem:[#allocation2 + $0x20] sm:$0xfc]  ;;  %433 = vst [vmem:[#allocation2 + $0x60] sm:$0xfe] %v394_v17  ;;  %v2236_v19 = vrot.slane %v1932_v1, %v2112_v24 }
  0xf9   : > { %v568_v27 = vmul.f32 %v2118_v26, %v523_v20  ;;  %v713_v29 = vld [vmem:[#allocation2 + $0x30] sm:$0x3]  ;;  %v958_v31 = vld [vmem:[#allocation2 + $0x20] sm:$0xfe]  ;;  %435 = vst [vmem:[#allocation2 + $0x70] sm:$0x1] %v394_v17  ;;  %v2196_v49 = vmul.f32 %v2129_v33, %v711_v28  ;;  %v2246_v24 = vadd.f32 %v822_v12, %v692_v5 }
  0xfa   : > { %449 = vst [vmem:[#allocation2 + $0xe0] sm:$0xfe] %v402_v18  ;;  %451 = vst [vmem:[#allocation2 + $0xf0] sm:$0x1] %v402_v18  ;;  %v960_v36 = vld [vmem:[#allocation2 + $0x30] sm:$0x1]  ;;  %v1003_v42 = vmul.f32 %v2163_v11, %v958_v31  ;;  %v2199_v50 = vmul.f32 %v2129_v33, %v713_v29 }
  0xfb   : > { %v459_v41 = vld [vmem:[#allocation2 + $0x20] sm:$0xff]  ;;  %v1005_v43 = vmul.f32 %v2163_v11, %v960_v36  ;;  %v1149_v46 = vld [vmem:[#allocation2 + $0x30] sm:$0x3]  ;;  %v633_v54 = vrot.slane %v566_v25, 1  ;;  %v634_v55 = vrot.slane %v568_v27, 1 }
  0xfc   : > { %v1147_v44 = vld [vmem:[#allocation2 + $0x20] sm:$0xfc]  ;;  %v926_v58 = vmul.f32 %v2177_v30, %v459_v41  ;;  %v2215_v60 = vmul.f32 %v2186_v39, %v1149_v46  ;;  %v539_v62 = vld [vmem:[#allocation2 + $0xb0] sm:$0x1]  ;;  %v1067_v2 = vrot.slane %v1003_v42, 1  ;;  %v487_v20 = vmul.f32 %v2134_v37, %v459_v41 }
  0xfd   : > { %v2212_v59 = vmul.f32 %v2186_v39, %v1147_v44  ;;  %v537_v61 = vld [vmem:[#allocation2 + $0xa0] sm:$0xfe]  ;;  %v1068_v3 = vrot.slane %v1005_v43, 1  ;;  %v635_v13 = vsel %vm626_vm2, %v633_v54, %v634_v55  ;;  %v584_v15 = vmul.f32 %v2118_v26, %v539_v62  ;;  %v729_v17 = vld [vmem:[#allocation2 + $0xb0] sm:$0x3] }
  0xfe   : > { %v467_v9 = vld [vmem:[#allocation2 + $0xa0] sm:$0xff]  ;;  %v582_v14 = vmul.f32 %v2118_v26, %v537_v61  ;;  %v942_v21 = vadd.f32 %v926_v58, %v881_v32  ;;  %v976_v25 = vld [vmem:[#allocation2 + $0xb0] sm:$0x1]  ;;  %v2244_v42 = vrot.slane %v1932_v1, %v2131_v34  ;;  %v2248_v41 = vadd.f32 %v635_v13, %v487_v20  ;;  %v522_v48 = vld [vmem:[#allocation2 + $0x28] sm:$0xfe] }
  0xff   : > { %v727_v16 = vld [vmem:[#allocation2 + $0xa0] sm:$0xfc]  ;;  %v1069_v28 = vsel %vm626_vm2, %v1067_v2, %v1068_v3  ;;  %v495_v29 = vmul.f32 %v2134_v37, %v467_v9  ;;  %v1165_v31 = vld [vmem:[#allocation2 + $0xb0] sm:$0x3]  ;;  %v2254_v43 = vmul.f32 %v2129_v33, %v729_v17  ;;  %v658_v52 = vrot.slane %v584_v15, 1  ;;  %v460_v17 = vld [vmem:[#allocation2 + $0x28] sm:$0xff] }
 0x100   : > { %v974_v18 = vld [vmem:[#allocation2 + $0xa0] sm:$0xfe]  ;;  %v1412_v40 = vld [vmem:[#allocation2 + $0xb0] sm:$0x1]  ;;  %3087 = vst [vmem:[#allocation16_spill] sm:$0xff] %v2244_v42  ;;  %v2251_v32 = vmul.f32 %v2129_v33, %v727_v16  ;;  %v657_v51 = vrot.slane %v582_v14, 1  ;;  %v1021_v34 = vmul.f32 %v2163_v11, %v976_v25  ;;  %v2259_v55 = vadd.f32 %v1069_v28, %v942_v21 }
 0x101   : > { %v1163_v27 = vld [vmem:[#allocation2 + $0xa0] sm:$0xfc]  ;;  %v1019_v44 = vmul.f32 %v2163_v11, %v974_v18  ;;  %v1601_v47 = vld [vmem:[#allocation2 + $0xb0] sm:$0x3]  ;;  %v524_v54 = vld [vmem:[#allocation2 + $0x38] sm:$0x1]  ;;  %v2262_v58 = vmul.f32 %v2177_v30, %v467_v9  ;;  %v1210_v61 = vmul.f32 %v2186_v39, %v1165_v31  ;;  %v1457_v1 = vmul.f32 %v2224_v4, %v1412_v40 }
 0x102   : > { %v1410_v36 = vld [vmem:[#allocation2 + $0xa0] sm:$0xfe]  ;;  %v1208_v53 = vmul.f32 %v2186_v39, %v1163_v27  ;;  %v1646_v3 = vmul.f32 %v2236_v19, %v1601_v47  ;;  %v567_v5 = vmul.f32 %v2139_v45, %v522_v48  ;;  %v712_v12 = vld [vmem:[#allocation2 + $0x28] sm:$0xfc]  ;;  %v714_v13 = vld [vmem:[#allocation2 + $0x38] sm:$0x3]  ;;  %v569_v18 = vmul.f32 %v2139_v45, %v524_v54 }
 0x103   : > { %v1599_v46 = vld [vmem:[#allocation2 + $0xa0] sm:$0xfc]  ;;  %3088 = vst [vmem:[#allocation17_spill] sm:$0xff] %v2262_v58  ;;  %v1455_v62 = vmul.f32 %v2224_v4, %v1410_v36  ;;  %v1091_v16 = vrot.slane %v1019_v44, 1  ;;  %v659_v20 = vsel %vm626_vm2, %v657_v51, %v658_v52  ;;  %v1092_v21 = vrot.slane %v1021_v34, 1 }
 0x104   : > { %v1644_v2 = vmul.f32 %v2236_v19, %v1599_v46  ;;  %v1280_v25 = vrot.slane %v1208_v53, 2  ;;  %v2275_v27 = vmul.f32 %v2208_v57, %v467_v9  ;;  %v959_v28 = vld [vmem:[#allocation2 + $0x28] sm:$0xfe]  ;;  %v961_v31 = vld [vmem:[#allocation2 + $0x38] sm:$0x1]  ;;  %v1281_v36 = vrot.slane %v1210_v61, 2 }
 0x105   : > { %v1525_v40 = vrot.slane %v1455_v62, 1  ;;  %v2278_v46 = vmul.f32 %v2153_v0, %v712_v12  ;;  %v2281_v47 = vmul.f32 %v2153_v0, %v714_v13  ;;  %v538_v44 = vld [vmem:[#allocation2 + $0xa8] sm:$0xfe]  ;;  %v540_v48 = vld [vmem:[#allocation2 + $0xb8] sm:$0x1]  ;;  %v1526_v54 = vrot.slane %v1457_v1, 1 }
 0x106   : > { %3089 = vst [vmem:[#allocation18_spill] sm:$0xff] %v2275_v27  ;;  %v1714_v14 = vrot.slane %v1644_v2, 2  ;;  %v1715_v51 = vrot.slane %v1646_v3, 2  ;;  %v636_v52 = vrot.slane %v567_v5, 1  ;;  %v637_v34 = vrot.slane %v569_v18, 1 }
 0x107   : > { %v927_v9 = vmul.f32 %v2180_v35, %v460_v17  ;;  %v1004_v53 = vmul.f32 %v2183_v38, %v959_v28  ;;  %v1006_v61 = vmul.f32 %v2183_v38, %v961_v31  ;;  %v1148_v62 = vld [vmem:[#allocation2 + $0x28] sm:$0xfc]  ;;  %v1150_v15 = vld [vmem:[#allocation2 + $0x38] sm:$0x3]  ;;  %v2286_v12 = vadd.f32 %v659_v20, %v495_v29 }
 0x108   : > { %v2289_v13 = vsel %vm626_vm2, %v1091_v16, %v1092_v21  ;;  %v583_v22 = vmul.f32 %v2139_v45, %v538_v44  ;;  %v585_v1 = vmul.f32 %v2139_v45, %v540_v48  ;;  %v975_v2 = vld [vmem:[#allocation2 + $0xa8] sm:$0xfe]  ;;  %v2294_v3 = vsel %vm816_vm5, %v1280_v25, %v1281_v36  ;;  %v977_v31 = vld [vmem:[#allocation2 + $0xb8] sm:$0x1] }
 0x109   : > { %3090 = vst [vmem:[#allocation19_spill] sm:$0xff] %v2289_v13  ;;  %3091 = vst [vmem:[#allocation20_spill] sm:$0xff] %v2294_v3  ;;  %v488_v5 = vmul.f32 %v2156_v7, %v460_v17  ;;  %v1164_v29 = vld [vmem:[#allocation2 + $0xa8] sm:$0xfc]  ;;  %v2300_v20 = vsel %vm626_vm2, %v1525_v40, %v1526_v54  ;;  %v2303_v16 = vsel %vm816_vm5, %v1714_v14, %v1715_v51  ;;  %v1166_v36 = vld [vmem:[#allocation2 + $0xb8] sm:$0x3] }
 0x10a   : > { %3092 = vst [vmem:[#allocation21_spill] sm:$0xff] %v2300_v20  ;;  %3093 = vst [vmem:[#allocation22_spill] sm:$0xff] %v2303_v16  ;;  %v2306_v21 = vmul.f32 %v2205_v56, %v1148_v62  ;;  %v2309_v25 = vmul.f32 %v2205_v56, %v1150_v15  ;;  %v1411_v17 = vld [vmem:[#allocation2 + $0xa8] sm:$0xfe]  ;;  %v1413_v44 = vld [vmem:[#allocation2 + $0xb8] sm:$0x1]  ;;  %v638_v48 = vsel %vm626_vm2, %v636_v52, %v637_v34 }
 0x10b   : > { %v943_v18 = vadd.f32 %v927_v9, %v2246_v24  ;;  %v1070_v28 = vrot.slane %v1004_v53, 1  ;;  %v1071_v23 = vrot.slane %v1006_v61, 1  ;;  %v468_v40 = vld [vmem:[#allocation2 + $0xa8] sm:$0xff]  ;;  %v660_v6 = vrot.slane %v583_v22, 1  ;;  %v1602_v15 = vld [vmem:[#allocation2 + $0xb8] sm:$0x3] }
 0x10c   : > { %v728_v54 = vld [vmem:[#allocation2 + $0xa8] sm:$0xfc]  ;;  %v661_v14 = vrot.slane %v585_v1, 1  ;;  %v1020_v51 = vmul.f32 %v2183_v38, %v975_v2  ;;  %v1022_v62 = vmul.f32 %v2183_v38, %v977_v31  ;;  %v730_v16 = vld [vmem:[#allocation2 + $0xb8] sm:$0x3]  ;;  %v1209_v20 = vmul.f32 %v2205_v56, %v1164_v29 }
 0x10d   : > { %v1600_v8 = vld [vmem:[#allocation2 + $0xa8] sm:$0xfc]  ;;  %v1211_v27 = vmul.f32 %v2205_v56, %v1166_v36  ;;  %v1456_v52 = vmul.f32 %v2229_v10, %v1411_v17  ;;  %v1458_v24 = vmul.f32 %v2229_v10, %v1413_v44  ;;  %v2319_v34 = vadd.f32 %v638_v48, %v488_v5  ;;  %v525_v29 = vld [vmem:[#allocation2 + $0x40] sm:$0xfe]  ;;  %v527_v36 = vld [vmem:[#allocation2 + $0x50] sm:$0x1] }
 0x10e   : > { %v496_v53 = vmul.f32 %v2156_v7, %v468_v40  ;;  %v1072_v61 = vsel %vm626_vm2, %v1070_v28, %v1071_v23  ;;  %v2326_v1 = vmul.f32 %v2153_v0, %v728_v54  ;;  %v1645_v2 = vmul.f32 %v2244_v42, %v1600_v8  ;;  %v715_v22 = vld [vmem:[#allocation2 + $0x40] sm:$0xfc] }
 0x10f   : > { %v1647_v31 = vmul.f32 %v2244_v42, %v1602_v15  ;;  %v662_v5 = vsel %vm626_vm2, %v660_v6, %v661_v14  ;;  %v2332_v17 = vmul.f32 %v2153_v0, %v730_v16  ;;  %v1094_v44 = vrot.slane %v1020_v51, 1  ;;  %v461_v15 = vld [vmem:[#allocation2 + $0x40] sm:$0xff]  ;;  %v717_v14 = vld [vmem:[#allocation2 + $0x50] sm:$0x3] }
 0x110   : > { %v1095_v48 = vrot.slane %v1022_v62, 1  ;;  %v1283_v9 = vrot.slane %v1209_v20, 2  ;;  %v1284_v3 = vrot.slane %v1211_v27, 2  ;;  %v1528_v23 = vrot.slane %v1456_v52, 1 }
 0x111   : > { %v1529_v28 = vrot.slane %v1458_v24, 1  ;;  %v2334_v54 = vadd.f32 %v1072_v61, %v943_v18  ;;  %v2337_v8 = vmul.f32 %v2180_v35, %v468_v40  ;;  %v570_v13 = vmul.f32 %v2118_v26, %v525_v29  ;;  %v962_v61 = vld [vmem:[#allocation2 + $0x40] sm:$0xfe]  ;;  %v964_v29 = vld [vmem:[#allocation2 + $0x50] sm:$0x1] }
 0x112   : > { %v572_v6 = vmul.f32 %v2118_v26, %v527_v36  ;;  %v1717_v51 = vrot.slane %v1645_v2, 2  ;;  %v1718_v62 = vrot.slane %v1647_v31, 2  ;;  %v2343_v20 = vmul.f32 %v2129_v33, %v715_v22  ;;  %v1398_v31 = vld [vmem:[#allocation2 + $0x40] sm:$0xfe] }
 0x113   : > { %3094 = vst [vmem:[#allocation23_spill] sm:$0xff] %v2337_v8  ;;  %v2345_v27 = vadd.f32 %v662_v5, %v496_v53  ;;  %v2349_v52 = vsel %vm626_vm2, %v1094_v44, %v1095_v48  ;;  %v2352_v24 = vmul.f32 %v2218_v63, %v468_v40  ;;  %v2355_v36 = vsel %vm816_vm5, %v1283_v9, %v1284_v3  ;;  %v1400_v5 = vld [vmem:[#allocation2 + $0x50] sm:$0x1]  ;;  %v1151_v9 = vld [vmem:[#allocation2 + $0x40] sm:$0xfc] }
 0x114   : > { %3095 = vst [vmem:[#allocation24_spill] sm:$0xff] %v2349_v52  ;;  %3097 = vst [vmem:[#allocation26_spill] sm:$0xff] %v2355_v36  ;;  %v2358_v2 = vsel %vm626_vm2, %v1528_v23, %v1529_v28  ;;  %v489_v22 = vmul.f32 %v2134_v37, %v461_v15  ;;  %v2362_v53 = vmul.f32 %v2129_v33, %v717_v14  ;;  %v639_v44 = vrot.slane %v570_v13, 1  ;;  %v1153_v23 = vld [vmem:[#allocation2 + $0x50] sm:$0x3] }
 0x115   : > { %3096 = vst [vmem:[#allocation25_spill] sm:$0xff] %v2352_v24  ;;  %3098 = vst [vmem:[#allocation27_spill] sm:$0xff] %v2358_v2  ;;  %v640_v48 = vrot.slane %v572_v6, 1  ;;  %v3099_v40 = vrot.slane %v2199_v50, 2  ;;  %v3100_v16 = vrot.slane %v2196_v49, 2  ;;  %v928_v3 = vmul.f32 %v2177_v30, %v461_v15 }
 0x116   : > { %v2371_v28 = vsel %vm816_vm5, %v1717_v51, %v1718_v62  ;;  %v1007_v2 = vmul.f32 %v2163_v11, %v962_v61  ;;  %v1009_v13 = vmul.f32 %v2163_v11, %v964_v29  ;;  %v541_v6 = vld [vmem:[#allocation2 + $0xc0] sm:$0xfe]  ;;  %v543_v24 = vld [vmem:[#allocation2 + $0xd0] sm:$0x1]  ;;  %v3102_v49 = vrot.slane %v2215_v60, 2 }
 0x117   : > { %v825_v18 = vsel %vm816_vm5, %v3100_v16, %v3099_v40  ;;  %3101 = vst [vmem:[#allocation28_spill] sm:$0xff] %v2371_v28  ;;  %v3103_v16 = vrot.slane %v2212_v59, 2  ;;  %v1443_v36 = vmul.f32 %v2224_v4, %v1398_v31  ;;  %v1445_v51 = vmul.f32 %v2224_v4, %v1400_v5  ;;  %v1587_v62 = vld [vmem:[#allocation2 + $0x40] sm:$0xfc]  ;;  %v1589_v14 = vld [vmem:[#allocation2 + $0x50] sm:$0x3] }
 0x118   : > { %v883_v50 = vadd.f32 %v825_v18, %v2248_v41  ;;  %v2386_v29 = vmul.f32 %v2186_v39, %v1151_v9  ;;  %v2389_v28 = vmul.f32 %v2186_v39, %v1153_v23  ;;  %v641_v59 = vsel %vm626_vm2, %v639_v44, %v640_v48  ;;  %v978_v61 = vld [vmem:[#allocation2 + $0xc0] sm:$0xfe]  ;;  %v980_v52 = vld [vmem:[#allocation2 + $0xd0] sm:$0x1] }
 0x119   : > { %v1258_v40 = vsel %vm816_vm5, %v3103_v16, %v3102_v49  ;;  %v1366_v41 = vmul.f32 %v2208_v57, %v461_v15  ;;  %v586_v18 = vmul.f32 %v2118_v26, %v541_v6  ;;  %v588_v31 = vmul.f32 %v2118_v26, %v543_v24  ;;  %v731_v6 = vld [vmem:[#allocation2 + $0xc0] sm:$0xfc]  ;;  %v528_v24 = vld [vmem:[#allocation2 + $0x58] sm:$0x1] }
 0x11a   : > { %v1320_v60 = vadd.f32 %v1258_v40, %v2259_v55  ;;  %v1073_v5 = vrot.slane %v1007_v2, 1  ;;  %v1074_v49 = vrot.slane %v1009_v13, 1  ;;  %v1632_v16 = vmul.f32 %v2236_v19, %v1587_v62  ;;  %v469_v40 = vld [vmem:[#allocation2 + $0xc0] sm:$0xff]  ;;  %v1588_v2 = vld [vmem:[#allocation2 + $0x48] sm:$0xfc] }
 0x11b   : > { %v1634_v9 = vmul.f32 %v2236_v19, %v1589_v14  ;;  %v944_v23 = vadd.f32 %v928_v3, %v883_v50  ;;  %v1507_v8 = vrot.slane %v1443_v36, 1  ;;  %v1508_v58 = vrot.slane %v1445_v51, 1  ;;  %v733_v14 = vld [vmem:[#allocation2 + $0xd0] sm:$0x3]  ;;  %v1167_v50 = vld [vmem:[#allocation2 + $0xc0] sm:$0xfc] }
 0x11c   : > { %v3104_v55 = vrot.slane %v2254_v43, 2  ;;  %v3105_v44 = vrot.slane %v2251_v32, 2  ;;  %v2403_v48 = vadd.f32 %v641_v59, %v489_v22  ;;  %v1382_v13 = vadd.f32 %v1366_v41, %v1320_v60 }
 0x11d   : > { %v663_v62 = vrot.slane %v586_v18, 1  ;;  %v664_v3 = vrot.slane %v588_v31, 1  ;;  %v1023_v36 = vmul.f32 %v2163_v11, %v978_v61  ;;  %v1025_v43 = vmul.f32 %v2163_v11, %v980_v52  ;;  %v1414_v61 = vld [vmem:[#allocation2 + $0xc0] sm:$0xfe]  ;;  %v1416_v52 = vld [vmem:[#allocation2 + $0xd0] sm:$0x1] }
 0x11e   : > { %v849_v15 = vsel %vm816_vm5, %v3105_v44, %v3104_v55  ;;  %v1075_v32 = vsel %vm626_vm2, %v1073_v5, %v1074_v49  ;;  %v1696_v51 = vrot.slane %v1632_v16, 2  ;;  %v1697_v22 = vrot.slane %v1634_v9, 2  ;;  %v1169_v55 = vld [vmem:[#allocation2 + $0xd0] sm:$0x3]  ;;  %v1603_v16 = vld [vmem:[#allocation2 + $0xc0] sm:$0xfc] }
 0x11f   : > { %v891_v59 = vadd.f32 %v849_v15, %v2286_v12  ;;  %v2411_v44 = vadd.f32 %v1075_v32, %v944_v23  ;;  %v1509_v60 = vsel %vm626_vm2, %v1507_v8, %v1508_v58  ;;  %v2415_v41 = vmul.f32 %v2129_v33, %v731_v6  ;;  %v1605_v9 = vld [vmem:[#allocation2 + $0xd0] sm:$0x3]  ;;  %v526_v6 = vld [vmem:[#allocation2 + $0x48] sm:$0xfe] }
 0x120   : > { %v2418_v18 = vmul.f32 %v2129_v33, %v733_v14  ;;  %v1571_v31 = vadd.f32 %v1509_v60, %v1382_v13  ;;  %v497_v5 = vmul.f32 %v2134_v37, %v469_v40  ;;  %v936_v49 = vmul.f32 %v2177_v30, %v469_v40 }
 0x121   : > { %3106 = vst [vmem:[#allocation29_spill] sm:$0xff] %v2415_v41  ;;  %v2423_v12 = vmul.f32 %v2186_v39, %v1167_v50  ;;  %v665_v58 = vsel %vm626_vm2, %v663_v62, %v664_v3  ;;  %v1097_v8 = vrot.slane %v1023_v36, 1  ;;  %v1098_v23 = vrot.slane %v1025_v43, 1  ;;  %v462_v36 = vld [vmem:[#allocation2 + $0x48] sm:$0xff] }
 0x122   : > { %v2427_v15 = vmul.f32 %v2186_v39, %v1169_v55  ;;  %v1698_v14 = vsel %vm816_vm5, %v1696_v51, %v1697_v22  ;;  %v952_v13 = vadd.f32 %v936_v49, %v891_v59  ;;  %v1459_v32 = vmul.f32 %v2224_v4, %v1414_v61  ;;  %v716_v55 = vld [vmem:[#allocation2 + $0x48] sm:$0xfc] }
 0x123   : > { %3107 = vst [vmem:[#allocation30_spill] sm:$0xff] %v2423_v12  ;;  %v1461_v60 = vmul.f32 %v2224_v4, %v1416_v52  ;;  %v2435_v62 = vmul.f32 %v2236_v19, %v1603_v16  ;;  %v2438_v3 = vmul.f32 %v2236_v19, %v1605_v9  ;;  %v2440_v43 = vadd.f32 %v1698_v14, %v1571_v31  ;;  %v963_v9 = vld [vmem:[#allocation2 + $0x48] sm:$0xfe]  ;;  %v1401_v14 = vld [vmem:[#allocation2 + $0x58] sm:$0x1] }
 0x124   : > { %3108 = vst [vmem:[#allocation31_spill] sm:$0xff] %v2427_v15  ;;  %v2442_v51 = vadd.f32 %v665_v58, %v497_v5  ;;  %v2445_v22 = vmul.f32 %v2208_v57, %v469_v40  ;;  %v571_v59 = vmul.f32 %v2139_v45, %v526_v6  ;;  %v1099_v61 = vsel %vm626_vm2, %v1097_v8, %v1098_v23  ;;  %v1399_v50 = vld [vmem:[#allocation2 + $0x48] sm:$0xfe] }
 0x125   : > { %v573_v16 = vmul.f32 %v2139_v45, %v528_v24  ;;  %v2452_v31 = vadd.f32 %v1099_v61, %v952_v13  ;;  %v1531_v5 = vrot.slane %v1459_v32, 1  ;;  %v1532_v58 = vrot.slane %v1461_v60, 1  ;;  %v965_v24 = vld [vmem:[#allocation2 + $0x58] sm:$0x1]  ;;  %v1152_v15 = vld [vmem:[#allocation2 + $0x48] sm:$0xfc] }
 0x126   : > { %3109 = vst [vmem:[#allocation32_spill] sm:$0xff] %v2442_v51  ;;  %3110 = vst [vmem:[#allocation33_spill] sm:$0xff] %v2445_v22  ;;  %v490_v40 = vmul.f32 %v2156_v7, %v462_v36  ;;  %v1720_v8 = vrot.slane %v2435_v62, 2  ;;  %v1721_v23 = vrot.slane %v2438_v3, 2  ;;  %v2458_v6 = vmul.f32 %v2153_v0, %v716_v55  ;;  %v1590_v60 = vld [vmem:[#allocation2 + $0x58] sm:$0x3] }
 0x127   : > { %3111 = vst [vmem:[#allocation34_spill] sm:$0xff] %v2452_v31  ;;  %v3112_v52 = vrot.slane %v2309_v25, 2  ;;  %v3113_v13 = vrot.slane %v2306_v21, 2  ;;  %v642_v61 = vrot.slane %v571_v59, 1  ;;  %v3114_v49 = vrot.slane %v2281_v47, 2 }
 0x128   : > { %v3115_v22 = vrot.slane %v2278_v46, 2  ;;  %v1367_v55 = vmul.f32 %v2218_v63, %v462_v36  ;;  %v643_v31 = vrot.slane %v573_v16, 1  ;;  %v1444_v12 = vmul.f32 %v2229_v10, %v1399_v50  ;;  %v718_v59 = vld [vmem:[#allocation2 + $0x58] sm:$0x3] }
 0x129   : > { %v1261_v32 = vsel %vm816_vm5, %v3113_v13, %v3112_v52  ;;  %v1446_v25 = vmul.f32 %v2229_v10, %v1401_v14  ;;  %v1633_v21 = vmul.f32 %v2244_v42, %v1588_v2  ;;  %v542_v52 = vld [vmem:[#allocation2 + $0xc8] sm:$0xfe]  ;;  %v544_v13 = vld [vmem:[#allocation2 + $0xd8] sm:$0x1]  ;;  %v1008_v47 = vmul.f32 %v2183_v38, %v963_v9 }
 0x12a   : > { %v828_v62 = vsel %vm816_vm5, %v3115_v22, %v3114_v49  ;;  %v1321_v3 = vadd.f32 %v1261_v32, %v2334_v54  ;;  %v1010_v46 = vmul.f32 %v2183_v38, %v965_v24  ;;  %v1635_v54 = vmul.f32 %v2244_v42, %v1590_v60  ;;  %v1154_v2 = vld [vmem:[#allocation2 + $0x58] sm:$0x3] }
 0x12b   : > { %v884_v49 = vadd.f32 %v828_v62, %v2319_v34  ;;  %v1510_v16 = vrot.slane %v1444_v12, 1  ;;  %v1511_v32 = vrot.slane %v1446_v25, 1  ;;  %v1699_v50 = vrot.slane %v1633_v21, 2 }
 0x12c   : > { %v1383_v22 = vadd.f32 %v1367_v55, %v1321_v3  ;;  %v2480_v14 = vsel %vm626_vm2, %v1531_v5, %v1532_v58  ;;  %v1700_v51 = vrot.slane %v1635_v54, 2  ;;  %v587_v41 = vmul.f32 %v2139_v45, %v542_v52  ;;  %v732_v55 = vld [vmem:[#allocation2 + $0xc8] sm:$0xfc] }
 0x12d   : > { %3116 = vst [vmem:[#allocation35_spill] sm:$0xff] %v2480_v14  ;;  %v589_v9 = vmul.f32 %v2139_v45, %v544_v13  ;;  %v2485_v24 = vmul.f32 %v2153_v0, %v718_v59  ;;  %v929_v3 = vmul.f32 %v2180_v35, %v462_v36  ;;  %v2489_v60 = vmul.f32 %v2205_v56, %v1152_v15  ;;  %v734_v15 = vld [vmem:[#allocation2 + $0xd8] sm:$0x3]  ;;  %v979_v13 = vld [vmem:[#allocation2 + $0xc8] sm:$0xfe] }
 0x12e   : > { %v1512_v34 = vsel %vm626_vm2, %v1510_v16, %v1511_v32  ;;  %v644_v12 = vsel %vm626_vm2, %v642_v61, %v643_v31  ;;  %v1076_v5 = vrot.slane %v1008_v47, 1  ;;  %v1077_v58 = vrot.slane %v1010_v46, 1  ;;  %v981_v59 = vld [vmem:[#allocation2 + $0xd8] sm:$0x1]  ;;  %v1168_v46 = vld [vmem:[#allocation2 + $0xc8] sm:$0xfc] }
 0x12f   : > { %v1572_v62 = vadd.f32 %v1512_v34, %v1383_v22  ;;  %v2494_v25 = vsel %vm816_vm5, %v1720_v8, %v1721_v23  ;;  %v945_v21 = vadd.f32 %v929_v3, %v884_v49  ;;  %v2497_v52 = vmul.f32 %v2205_v56, %v1154_v2  ;;  %v1170_v32 = vld [vmem:[#allocation2 + $0xd8] sm:$0x3]  ;;  %v463_v23 = vld [vmem:[#allocation2 + $0x60] sm:$0xff] }
 0x130   : > { %3117 = vst [vmem:[#allocation36_spill] sm:$0xff] %v2494_v25  ;;  %v1701_v36 = vsel %vm816_vm5, %v1699_v50, %v1700_v51  ;;  %v666_v61 = vrot.slane %v587_v41, 1  ;;  %v667_v47 = vrot.slane %v589_v9, 1  ;;  %v2508_v8 = vadd.f32 %v644_v12, %v490_v40  ;;  %v1415_v40 = vld [vmem:[#allocation2 + $0xc8] sm:$0xfe] }
 0x131   : > { %v1761_v31 = vadd.f32 %v1701_v36, %v1572_v62  ;;  %v3118_v22 = vmov 0  ;;  %v3121_v41 = vrot.slane %v2332_v17, 2  ;;  %v3122_v49 = vrot.slane %v2326_v1, 2  ;;  %v1417_v34 = vld [vmem:[#allocation2 + $0xd8] sm:$0x1]  ;;  %v470_v17 = vld [vmem:[#allocation2 + $0xc8] sm:$0xff] }
 0x132   : > { %v3119_v22 = vsel %vm2514_vm8, 4294967295, %v3118_v22  ;;  %v1078_v50 = vsel %vm626_vm2, %v1076_v5, %v1077_v58  ;;  %v1024_v9 = vmul.f32 %v2183_v38, %v979_v13  ;;  %v1026_v3 = vmul.f32 %v2183_v38, %v981_v59  ;;  %v529_v12 = vld [vmem:[#allocation2 + $0x60] sm:$0xfe]  ;;  %v531_v62 = vld [vmem:[#allocation2 + $0x70] sm:$0x1] }
 0x133   : > { %3120 = vst [vmem:[#allocation37_spill] sm:$0xff] %v3119_v22  ;;  %v852_v16 = vsel %vm816_vm5, %v3122_v49, %v3121_v41  ;;  %v1945_v2 = vpack.c.bf16 %v1761_v31, %v2440_v43  ;;  %v2527_v36 = vadd.f32 %v1078_v50, %v945_v21  ;;  %v2531_v41 = vmul.f32 %v2153_v0, %v732_v55  ;;  %v1604_v13 = vld [vmem:[#allocation2 + $0xc8] sm:$0xfc]  ;;  %v1606_v59 = vld [vmem:[#allocation2 + $0xd8] sm:$0x3] }
 0x134   : > { %v2534_v49 = vmul.f32 %v2153_v0, %v734_v15  ;;  %v668_v43 = vsel %vm626_vm2, %v666_v61, %v667_v47  ;;  %v892_v5 = vadd.f32 %v852_v16, %v2345_v27  ;;  %v2542_v58 = vmul.f32 %v2205_v56, %v1168_v46  ;;  %v966_v51 = vld [vmem:[#allocation2 + $0x60] sm:$0xfe] }
 0x135   : > { %1827 = vst.msk [vmem:[%s2506_s21] sm:$0xff] %vm2514_vm8, %v1945_v2  ;;  %v2545_v21 = vmul.f32 %v2205_v56, %v1170_v32  ;;  %v1460_v55 = vmul.f32 %v2229_v10, %v1415_v40  ;;  %v1462_v15 = vmul.f32 %v2229_v10, %v1417_v34  ;;  %v574_v31 = vmul.f32 %v2118_v26, %v529_v12  ;;  %v968_v34 = vld [vmem:[#allocation2 + $0x70] sm:$0x1] }
 0x136   : > { %v576_v50 = vmul.f32 %v2118_v26, %v531_v62  ;;  %v498_v61 = vmul.f32 %v2156_v7, %v470_v17  ;;  %v937_v27 = vmul.f32 %v2180_v35, %v470_v17  ;;  %v1100_v47 = vrot.slane %v1024_v9, 1  ;;  %v719_v9 = vld [vmem:[#allocation2 + $0x60] sm:$0xfc]  ;;  %v721_v32 = vld [vmem:[#allocation2 + $0x70] sm:$0x3] }
 0x137   : > { %v1101_v46 = vrot.slane %v1026_v3, 1  ;;  %v1649_v2 = vmul.f32 %v2244_v42, %v1604_v13  ;;  %v1651_v40 = vmul.f32 %v2244_v42, %v1606_v59  ;;  %v1534_v3 = vrot.slane %v1460_v55, 1  ;;  %v1173_v7 = vld [vmem:[#allocation2 + $0xf0] sm:$0x3] }
 0x138   : > { %v2557_v1 = vadd.f32 %v668_v43, %v498_v61  ;;  %v953_v12 = vadd.f32 %v937_v27, %v892_v5  ;;  %v1535_v25 = vrot.slane %v1462_v15, 1  ;;  %v645_v16 = vrot.slane %v574_v31, 1  ;;  %v1155_v27 = vld [vmem:[#allocation2 + $0x60] sm:$0xfc]  ;;  %v1157_v31 = vld [vmem:[#allocation2 + $0x70] sm:$0x3] }
 0x139   : > { %v646_v14 = vrot.slane %v576_v50, 1  ;;  %v1102_v13 = vsel %vm626_vm2, %v1100_v47, %v1101_v46  ;;  %v3123_v59 = vrot.slane %v2362_v53, 2  ;;  %v3124_v22 = vrot.slane %v2343_v20, 2 }
 0x13a   : > { %v1011_v5 = vmul.f32 %v2163_v11, %v966_v51  ;;  %v1013_v61 = vmul.f32 %v2163_v11, %v968_v34  ;;  %v1723_v62 = vrot.slane %v1649_v2, 2  ;;  %v1724_v54 = vrot.slane %v1651_v40, 2  ;;  %v1402_v2 = vld [vmem:[#allocation2 + $0x60] sm:$0xfe]  ;;  %v1404_v40 = vld [vmem:[#allocation2 + $0x70] sm:$0x1] }
 0x13b   : > { %v831_v43 = vsel %vm816_vm5, %v3124_v22, %v3123_v59  ;;  %v2570_v55 = vmul.f32 %v2129_v33, %v719_v9  ;;  %v2573_v50 = vadd.f32 %v1102_v13, %v953_v12  ;;  %v2576_v53 = vmul.f32 %v2218_v63, %v470_v17  ;;  %v1591_v34 = vld [vmem:[#allocation2 + $0x60] sm:$0xfc] }
 0x13c   : > { %v885_v15 = vadd.f32 %v831_v43, %v2403_v48  ;;  %v491_v20 = vmul.f32 %v2134_v37, %v463_v23  ;;  %v2580_v51 = vmul.f32 %v2129_v33, %v721_v32  ;;  %v2583_v22 = vsel %vm626_vm2, %v1534_v3, %v1535_v25  ;;  %v735_v13 = vld [vmem:[#allocation2 + $0xe0] sm:$0xfc] }
 0x13d   : > { %3125 = vst [vmem:[#allocation38_spill] sm:$0xff] %v2576_v53  ;;  %3126 = vst [vmem:[#allocation39_spill] sm:$0xff] %v2583_v22  ;;  %v647_v47 = vsel %vm626_vm2, %v645_v16, %v646_v14  ;;  %v930_v46 = vmul.f32 %v2177_v30, %v463_v23  ;;  %v2588_v48 = vmul.f32 %v2186_v39, %v1155_v27  ;;  %v1079_v17 = vrot.slane %v1011_v5, 1  ;;  %v1593_v14 = vld [vmem:[#allocation2 + $0x70] sm:$0x3] }
 0x13e   : > { %v1080_v12 = vrot.slane %v1013_v61, 1  ;;  %v2591_v9 = vmul.f32 %v2186_v39, %v1157_v31  ;;  %v3127_v32 = vrot.slane %v2389_v28, 2  ;;  %v3128_v25 = vrot.slane %v2386_v29, 2  ;;  %v545_v5 = vld [vmem:[#allocation2 + $0xe0] sm:$0xfe]  ;;  %v3133_v53 = vld [vmem:[#allocation32_spill] sm:$0xff] }
 0x13f   : > { %v2599_v16 = vsel %vm816_vm5, %v1723_v62, %v1724_v54  ;;  %v946_v59 = vadd.f32 %v930_v46, %v885_v15  ;;  %v547_v61 = vld [vmem:[#allocation2 + $0xf0] sm:$0x1]  ;;  %v1447_v31 = vmul.f32 %v2224_v4, %v1402_v2  ;;  %v1449_v28 = vmul.f32 %v2224_v4, %v1404_v40 }
 0x140   : > { %v1264_v3 = vsel %vm816_vm5, %v3128_v25, %v3127_v32  ;;  %3129 = vst [vmem:[#allocation40_spill] sm:$0xff] %v2599_v16  ;;  %v2607_v29 = vmul.f32 %v2236_v19, %v1591_v34  ;;  %v471_v32 = vld [vmem:[#allocation2 + $0xe0] sm:$0xff]  ;;  %v2609_v54 = vadd.f32 %v647_v47, %v491_v20  ;;  %v1368_v15 = vmul.f32 %v2208_v57, %v463_v23  ;;  %v984_v46 = vld [vmem:[#allocation2 + $0xf0] sm:$0x1] }
 0x141   : > { %v1322_v43 = vadd.f32 %v1264_v3, %v2411_v44  ;;  %v982_v25 = vld [vmem:[#allocation2 + $0xe0] sm:$0xfe]  ;;  %v2614_v44 = vmul.f32 %v2236_v19, %v1593_v14  ;;  %v1081_v3 = vsel %vm626_vm2, %v1079_v17, %v1080_v12  ;;  %v590_v40 = vmul.f32 %v2118_v26, %v545_v5  ;;  %v737_v27 = vld [vmem:[#allocation2 + $0xf0] sm:$0x3] }
 0x142   : > { %v592_v34 = vmul.f32 %v2118_v26, %v547_v61  ;;  %v2620_v20 = vadd.f32 %v1081_v3, %v946_v59  ;;  %v2623_v62 = vmul.f32 %v2134_v37, %v471_v32  ;;  %v1027_v23 = vmul.f32 %v2163_v11, %v982_v25  ;;  %v1418_v14 = vld [vmem:[#allocation2 + $0xe0] sm:$0xfe]  ;;  %v1420_v5 = vld [vmem:[#allocation2 + $0xf0] sm:$0x1] }
 0x143   : > { %v1384_v47 = vadd.f32 %v1368_v15, %v1322_v43  ;;  %v1513_v16 = vrot.slane %v1447_v31, 1  ;;  %v1514_v22 = vrot.slane %v1449_v28, 1  ;;  %v1702_v17 = vrot.slane %v2607_v29, 2  ;;  %v3131_v15 = vld [vmem:[#allocation29_spill] sm:$0xff]  ;;  %v306_v28 = vpop.f32.mrf.mxu0  ;;  %v1609_v26 = vld [vmem:[#allocation2 + $0xf0] sm:$0x3] }
 0x144   : > { %v1029_v12 = vmul.f32 %v2163_v11, %v984_v46  ;;  %v1703_v61 = vrot.slane %v2614_v44, 2  ;;  %v2630_v2 = vmul.f32 %v2129_v33, %v735_v13  ;;  %v2633_v59 = vmul.f32 %v2129_v33, %v737_v27  ;;  %v1607_v44 = vld [vmem:[#allocation2 + $0xe0] sm:$0xfc]  ;;  %v326_v13 = vpop.f32.mrf.mxu1 }
 0x145   : > { %v3130_v43 = vrot.slane %v2418_v18, 2  ;;  %v3132_v25 = vrot.slane %v3131_v15, 2  ;;  %v669_v3 = vrot.slane %v590_v40, 1  ;;  %v670_v29 = vrot.slane %v592_v34, 1  ;;  %v1171_v33 = vld [vmem:[#allocation2 + $0xe0] sm:$0xfc]  ;;  %v308_v10 = vpop.f32.mrf.mxu0 }
 0x146   : > { %v1463_v11 = vmul.f32 %v2224_v4, %v1418_v14  ;;  %v938_v37 = vmul.f32 %v2177_v30, %v471_v32  ;;  %v1103_v27 = vrot.slane %v1027_v23, 1  ;;  %v3134_v18 = vld [vmem:[#allocation31_spill] sm:$0xff]  ;;  %v3136_v15 = vld [vmem:[#allocation30_spill] sm:$0xff]  ;;  %v1465_v40 = vmul.f32 %v2224_v4, %v1420_v5 }
 0x147   : > { %v855_v31 = vsel %vm816_vm5, %v3132_v25, %v3130_v43  ;;  %v3135_v35 = vrot.slane %v3134_v18, 2  ;;  %v3137_v56 = vrot.slane %v3136_v15, 2  ;;  %v1104_v34 = vrot.slane %v1029_v12, 1 }
 0x148   : > { %v893_v46 = vadd.f32 %v855_v31, %v3133_v53  ;;  %v3138_v53 = vld [vmem:[#allocation34_spill] sm:$0xff]  ;;  %v1376_v14 = vmul.f32 %v2208_v57, %v471_v32  ;;  %v395_v31 = vrot.slane %v306_v28, 7  ;;  %v1537_v0 = vrot.slane %v1463_v11, 1  ;;  %v328_v32 = vpop.f32.mrf.mxu1 }
 0x149   : > { %v1288_v43 = vsel %vm816_vm5, %v3137_v56, %v3135_v35  ;;  %v1538_v42 = vrot.slane %v1465_v40, 1  ;;  %v1652_v23 = vmul.f32 %v2236_v19, %v1607_v44  ;;  %v1654_v30 = vmul.f32 %v2236_v19, %v1609_v26 }
 0x14a   : > { %v1330_v25 = vadd.f32 %v1288_v43, %v3138_v53  ;;  %v1515_v18 = vsel %vm626_vm2, %v1513_v16, %v1514_v22  ;;  %v1216_v15 = vmul.f32 %v2186_v39, %v1171_v33  ;;  %v1218_v35 = vmul.f32 %v2186_v39, %v1173_v7  ;;  %434 = vst.msk [vmem:[#allocation2 + $0x68] sm:$0xfe] %vm424_vm3, %v395_v31  ;;  %v310_v43 = vpop.f32.mrf.mxu0 }
 0x14b   : > { %436 = vst.msk [vmem:[#allocation2 + $0x78] sm:$0x1] %vm427_vm4, %v395_v31  ;;  %v403_v56 = vrot.slane %v326_v13, 7  ;;  %v1573_v12 = vadd.f32 %v1515_v18, %v1384_v47  ;;  %v859_v11 = vrot.slane %v2630_v2, 2  ;;  %v860_v5 = vrot.slane %v2633_v59, 2 }
 0x14c   : > { %v954_v28 = vadd.f32 %v938_v37, %v893_v46  ;;  %v671_v26 = vsel %vm626_vm2, %v669_v3, %v670_v29  ;;  %v1105_v22 = vsel %vm626_vm2, %v1103_v27, %v1104_v34  ;;  %v1392_v16 = vadd.f32 %v1376_v14, %v1330_v25  ;;  %v1426_v27 = vld [vmem:[#allocation2 + $0x120] sm:$0xfe] }
 0x14d   : > { %450 = vst.msk [vmem:[#allocation2 + $0xe8] sm:$0xfe] %vm424_vm3, %v403_v56  ;;  %v396_v33 = vrot.slane %v308_v10, 7  ;;  %v1539_v7 = vsel %vm626_vm2, %v1537_v0, %v1538_v42  ;;  %v1726_v44 = vrot.slane %v1652_v23, 2  ;;  %v1727_v13 = vrot.slane %v1654_v30, 2 }
 0x14e   : > { %452 = vst.msk [vmem:[#allocation2 + $0xf8] sm:$0x1] %vm427_vm4, %v403_v56  ;;  %v404_v47 = vrot.slane %v328_v32, 7  ;;  %v1704_v2 = vsel %vm816_vm5, %v1702_v17, %v1703_v61  ;;  %v1292_v59 = vrot.slane %v1216_v15, 2  ;;  %v1293_v37 = vrot.slane %v1218_v35, 2 }
 0x14f   : > { %v3139_v3 = vrot.slane %v2485_v24, 2  ;;  %v3140_v29 = vrot.slane %v2458_v6, 2  ;;  %437 = vst [vmem:[#allocation2 + $0x80] sm:$0xfe] %v396_v33  ;;  %439 = vst [vmem:[#allocation2 + $0x90] sm:$0x1] %v396_v33  ;;  %v2671_v10 = vadd.f32 %v1704_v2, %v1573_v12  ;;  %v705_v0 = vadd.f32 %v671_v26, %v2623_v62 }
 0x150   : > { %v1143_v30 = vadd.f32 %v1105_v22, %v954_v28  ;;  %453 = vst [vmem:[#allocation2 + $0x100] sm:$0xfe] %v404_v47  ;;  %455 = vst [vmem:[#allocation2 + $0x110] sm:$0x1] %v404_v47  ;;  %v1581_v17 = vadd.f32 %v1539_v7, %v1392_v16  ;;  %v3141_v24 = vrot.slane %v2497_v52, 2  ;;  %v3142_v6 = vrot.slane %v2489_v60, 2 }
 0x151   : > { %v834_v46 = vsel %vm816_vm5, %v3140_v29, %v3139_v3  ;;  %v3143_v40 = vrot.slane %v2534_v49, 2  ;;  %v3144_v34 = vrot.slane %v2531_v41, 2  ;;  %v397_v62 = vrot.slane %v310_v43, 7  ;;  %v1428_v32 = vld [vmem:[#allocation2 + $0x130] sm:$0x1] }
 0x152   : > { %v2675_v42 = vadd.f32 %v834_v46, %v2508_v8  ;;  %v1267_v61 = vsel %vm816_vm5, %v3142_v6, %v3141_v24  ;;  %v1728_v25 = vsel %vm816_vm5, %v1726_v44, %v1727_v13  ;;  %v530_v8 = vld [vmem:[#allocation2 + $0x68] sm:$0xfe]  ;;  %v532_v14 = vld [vmem:[#allocation2 + $0x78] sm:$0x1]  ;;  %v861_v23 = vsel %vm816_vm5, %v859_v11, %v860_v5  ;;  %v1615_v12 = vld [vmem:[#allocation2 + $0x120] sm:$0xfc] }
 0x153   : > { %v858_v53 = vsel %vm816_vm5, %v3144_v34, %v3143_v40  ;;  %v1323_v31 = vadd.f32 %v1267_v61, %v2527_v36  ;;  %v2691_v52 = vmul.f32 %v2224_v4, %v1426_v27  ;;  %v3145_v49 = vrot.slane %v2545_v21, 2  ;;  %438 = vst.msk [vmem:[#allocation2 + $0x88] sm:$0xfe] %vm424_vm3, %v397_v62  ;;  %v1617_v26 = vld [vmem:[#allocation2 + $0x130] sm:$0x3]  ;;  %v1352_v61 = vld [vmem:[#allocation2 + $0x128] sm:$0xff] }
 0x154   : > { %v2694_v60 = vadd.f32 %v858_v53, %v2557_v1  ;;  %v3146_v41 = vrot.slane %v2542_v58, 2  ;;  %v3147_v15 = vrot.slane %v2580_v51, 2  ;;  %v3148_v35 = vrot.slane %v2570_v55, 2  ;;  %440 = vst.msk [vmem:[#allocation2 + $0x98] sm:$0x1] %vm427_vm4, %v397_v62  ;;  %v464_v1 = vld [vmem:[#allocation2 + $0x68] sm:$0xff] }
 0x155   : > { %v1294_v56 = vsel %vm816_vm5, %v1292_v59, %v1293_v37  ;;  %v575_v21 = vmul.f32 %v2139_v45, %v530_v8  ;;  %v967_v58 = vld [vmem:[#allocation2 + $0x68] sm:$0xfe]  ;;  %v3149_v55 = vrot.slane %v2591_v9, 2  ;;  %v3150_v5 = vrot.slane %v2588_v48, 2  ;;  %v969_v33 = vld [vmem:[#allocation2 + $0x78] sm:$0x1] }
 0x156   : > { %v1291_v18 = vsel %vm816_vm5, %v3146_v41, %v3145_v49  ;;  %v837_v36 = vsel %vm816_vm5, %v3148_v35, %v3147_v15  ;;  %v2721_v22 = vadd.f32 %v1728_v25, %v1581_v17  ;;  %v577_v16 = vmul.f32 %v2139_v45, %v532_v14  ;;  %v1403_v7 = vld [vmem:[#allocation2 + $0x68] sm:$0xfe]  ;;  %v1405_v44 = vld [vmem:[#allocation2 + $0x78] sm:$0x1]  ;;  %v1996_v9 = vld [vmem:[#allocation2] sm:$0xff] }
 0x157   : > { %v2711_v11 = vadd.f32 %v1291_v18, %v2573_v50  ;;  %v2714_v51 = vadd.f32 %v837_v36, %v2609_v54  ;;  %v1270_v28 = vsel %vm816_vm5, %v3150_v5, %v3149_v55  ;;  %v2727_v13 = vadd.f32 %v861_v23, %v705_v0  ;;  %v1592_v54 = vld [vmem:[#allocation2 + $0x68] sm:$0xfc]  ;;  %v722_v37 = vld [vmem:[#allocation2 + $0x78] sm:$0x3]  ;;  %v3155_v25 = vld [vmem:[#allocation16_spill] sm:$0xff] }
 0x158   : > { %v2725_v50 = vadd.f32 %v1270_v28, %v2620_v20  ;;  %v2729_v47 = vadd.f32 %v1294_v56, %v1143_v30  ;;  %v2732_v48 = vmul.f32 %v1996_v9, %v2208_v57  ;;  %v2735_v43 = vmul.f32 %v2224_v4, %v1428_v32  ;;  %v720_v59 = vld [vmem:[#allocation2 + $0x68] sm:$0xfc]  ;;  %v1594_v29 = vld [vmem:[#allocation2 + $0x78] sm:$0x3]  ;;  %v3161_v9 = vld [vmem:[#allocation10_spill] sm:$0xff] }
 0x159   : > { %v1012_v3 = vmul.f32 %v2183_v38, %v967_v58  ;;  %v1369_v20 = vmul.f32 %v2218_v63, %v464_v1  ;;  %v2741_v46 = vmul.f32 %v2236_v19, %v1615_v12  ;;  %v2744_v27 = vmul.f32 %v2236_v19, %v1617_v26  ;;  %v3154_v17 = vld [vmem:[#allocation15_spill] sm:$0xff]  ;;  %v1158_v53 = vld [vmem:[#allocation2 + $0x78] sm:$0x3] }
 0x15a   : > { %3151 = vst [vmem:[#allocation29_spill] sm:$0xff] %v2732_v48  ;;  %v648_v0 = vrot.slane %v575_v21, 1  ;;  %v1014_v30 = vmul.f32 %v2183_v38, %v969_v33  ;;  %v1448_v24 = vmul.f32 %v3154_v17, %v1403_v7  ;;  %v1450_v6 = vmul.f32 %v3154_v17, %v1405_v44  ;;  %v1156_v34 = vld [vmem:[#allocation2 + $0x68] sm:$0xfc]  ;;  %v3156_v23 = vld [vmem:[#allocation9_spill] sm:$0xff]  ;;  %v3158_v21 = vld [vmem:[#allocation14_spill] sm:$0xff] }
 0x15b   : > { %3152 = vst [vmem:[#allocation32_spill] sm:$0xff] %v2741_v46  ;;  %3153 = vst [vmem:[#allocation31_spill] sm:$0xff] %v2744_v27  ;;  %v649_v40 = vrot.slane %v577_v16, 1  ;;  %v1385_v62 = vadd.f32 %v1369_v20, %v1323_v31  ;;  %v1637_v8 = vmul.f32 %v3155_v25, %v1592_v54  ;;  %v1639_v14 = vmul.f32 %v3155_v25, %v1594_v29  ;;  %v1427_v35 = vld [vmem:[#allocation2 + $0x128] sm:$0xfe]  ;;  %v3159_v33 = vld [vmem:[#allocation13_spill] sm:$0xff] }
 0x15c   : > { %v2752_v49 = vmul.f32 %v3156_v23, %v720_v59  ;;  %v2755_v41 = vmul.f32 %v3156_v23, %v722_v37  ;;  %v1516_v18 = vrot.slane %v1448_v24, 1  ;;  %v1517_v15 = vrot.slane %v1450_v6, 1  ;;  %v546_v28 = vld [vmem:[#allocation2 + $0xe8] sm:$0xfe]  ;;  %v1429_v26 = vld [vmem:[#allocation2 + $0x138] sm:$0x1] }
 0x15d   : > { %v1082_v36 = vrot.slane %v1012_v3, 1  ;;  %v1705_v56 = vrot.slane %v1637_v8, 2  ;;  %v1706_v32 = vrot.slane %v1639_v14, 2  ;;  %v2758_v12 = vmul.f32 %v2218_v63, %v1352_v61  ;;  %v472_v29 = vld [vmem:[#allocation2 + $0xe8] sm:$0xff]  ;;  %v548_v6 = vld [vmem:[#allocation2 + $0xf8] sm:$0x1] }
 0x15e   : > { %v1083_v31 = vrot.slane %v1014_v30, 1  ;;  %v2761_v58 = vmul.f32 %v3158_v21, %v1156_v34  ;;  %v2764_v55 = vmul.f32 %v3158_v21, %v1158_v53  ;;  %v1518_v5 = vsel %vm626_vm2, %v1516_v18, %v1517_v15  ;;  %v1419_v30 = vld [vmem:[#allocation2 + $0xe8] sm:$0xfe]  ;;  %v1610_v14 = vld [vmem:[#allocation2 + $0xf8] sm:$0x3] }
 0x15f   : > { %3157 = vst [vmem:[#allocation30_spill] sm:$0xff] %v2758_v12  ;;  %v650_v16 = vsel %vm626_vm2, %v648_v0, %v649_v40  ;;  %v931_v7 = vmul.f32 %v3159_v33, %v464_v1  ;;  %v1574_v44 = vadd.f32 %v1518_v5, %v1385_v62  ;;  %v2770_v54 = vmul.f32 %v3154_v17, %v1427_v35  ;;  %v1421_v40 = vld [vmem:[#allocation2 + $0xf8] sm:$0x1]  ;;  %v1608_v34 = vld [vmem:[#allocation2 + $0xe8] sm:$0xfc] }
 0x160   : > { %v492_v59 = vmul.f32 %v3161_v9, %v464_v1  ;;  %v1707_v20 = vsel %vm816_vm5, %v1705_v56, %v1706_v32  ;;  %v2780_v61 = vmul.f32 %v2139_v45, %v546_v28  ;;  %v2783_v1 = vmul.f32 %v3154_v17, %v1429_v26  ;;  %v2798_v32 = vld [vmem:[#allocation2 + $0x80] sm:$0xff]  ;;  %v535_v26 = vld [vmem:[#allocation2 + $0x90] sm:$0x1]  ;;  %v3166_v12 = vld [vmem:[#allocation7_spill] sm:$0xff] }
 0x161   : > { %3160 = vst [vmem:[#allocation34_spill] sm:$0xff] %v2770_v54  ;;  %v2777_v24 = vadd.f32 %v931_v7, %v2675_v42  ;;  %v1763_v0 = vadd.f32 %v1707_v20, %v1574_v44  ;;  %v2788_v62 = vsel %vm626_vm2, %v1082_v36, %v1083_v31  ;;  %v2794_v15 = vmul.f32 %v3161_v9, %v472_v29  ;;  %v533_v5 = vld [vmem:[#allocation2 + $0x80] sm:$0xfe]  ;;  %v725_v7 = vld [vmem:[#allocation2 + $0x90] sm:$0x3] }
 0x162   : > { %3162 = vst [vmem:[#allocation15_spill] sm:$0xff] %v2783_v1  ;;  %v2785_v53 = vadd.f32 %v650_v16, %v492_v59  ;;  %v1377_v35 = vmul.f32 %v2218_v63, %v472_v29  ;;  %v1464_v56 = vmul.f32 %v3154_v17, %v1419_v30  ;;  %v2801_v36 = vmul.f32 %v2139_v45, %v548_v6  ;;  %v723_v16 = vld [vmem:[#allocation2 + $0x80] sm:$0xfc]  ;;  %v972_v1 = vld [vmem:[#allocation2 + $0x90] sm:$0x1] }
 0x163   : > { %v1946_v18 = vpack.c.bf16 %v1763_v0, %v2671_v10  ;;  %v2804_v31 = vmul.f32 %v3159_v33, %v472_v29  ;;  %v1466_v28 = vmul.f32 %v3154_v17, %v1421_v40  ;;  %v1653_v10 = vmul.f32 %v3155_v25, %v1608_v34  ;;  %v970_v6 = vld [vmem:[#allocation2 + $0x80] sm:$0xfe]  ;;  %v3164_v40 = vld [vmem:[#allocation8_spill] sm:$0xff] }
 0x164   : > { %v672_v59 = vrot.slane %v2780_v61, 1  ;;  %v1393_v20 = vadd.f32 %v1377_v35, %v2711_v11  ;;  %v1540_v30 = vrot.slane %v1464_v56, 1  ;;  %v1655_v0 = vmul.f32 %v3155_v25, %v1610_v14  ;;  %v3165_v34 = vld [vmem:[#allocation6_spill] sm:$0xff]  ;;  %v3167_v14 = vld [vmem:[#allocation12_spill] sm:$0xff] }
 0x165   : > { %1828 = vst.msk [vmem:[%s2506_s21 + $0x8] sm:$0xff] %vm2514_vm8, %v1946_v18  ;;  %v1541_v29 = vrot.slane %v1466_v28, 1  ;;  %v1729_v2 = vrot.slane %v1653_v10, 2  ;;  %v493_v8 = vmul.f32 %v3164_v40, %v2798_v32  ;;  %v578_v42 = vmul.f32 %v3165_v34, %v533_v5  ;;  %v3168_v28 = vld [vmem:[#allocation11_spill] sm:$0xff]  ;;  %v1159_v54 = vld [vmem:[#allocation2 + $0x80] sm:$0xfc] }
 0x166   : > { %v1730_v37 = vrot.slane %v1655_v0, 2  ;;  %v580_v3 = vmul.f32 %v3165_v34, %v535_v26  ;;  %v768_v18 = vmul.f32 %v3166_v12, %v723_v16  ;;  %v770_v61 = vmul.f32 %v3166_v12, %v725_v7  ;;  %v1161_v40 = vld [vmem:[#allocation2 + $0x90] sm:$0x3] }
 0x167   : > { %v1542_v11 = vsel %vm626_vm2, %v1540_v30, %v1541_v29  ;;  %v651_v35 = vrot.slane %v578_v42, 1  ;;  %v932_v56 = vmul.f32 %v3167_v14, %v2798_v32  ;;  %v1015_v10 = vmul.f32 %v3168_v28, %v970_v6  ;;  %v1406_v30 = vld [vmem:[#allocation2 + $0x80] sm:$0xfe]  ;;  %v736_v42 = vld [vmem:[#allocation2 + $0xe8] sm:$0xfc] }
 0x168   : > { %v1582_v27 = vadd.f32 %v1542_v11, %v1393_v20  ;;  %v1731_v5 = vsel %vm816_vm5, %v1729_v2, %v1730_v37  ;;  %v652_v0 = vrot.slane %v580_v3, 1  ;;  %v841_v26 = vrot.slane %v768_v18, 2  ;;  %v738_v29 = vld [vmem:[#allocation2 + $0xf8] sm:$0x3]  ;;  %v1408_v11 = vld [vmem:[#allocation2 + $0x90] sm:$0x1] }
 0x169   : > { %v842_v34 = vrot.slane %v770_v61, 2  ;;  %v948_v16 = vadd.f32 %v932_v56, %v2714_v51  ;;  %v1017_v12 = vmul.f32 %v3168_v28, %v972_v1  ;;  %v1085_v7 = vrot.slane %v1015_v10, 1  ;;  %v983_v37 = vld [vmem:[#allocation2 + $0xe8] sm:$0xfe]  ;;  %v985_v3 = vld [vmem:[#allocation2 + $0xf8] sm:$0x1] }
 0x16a   : > { %v1771_v48 = vadd.f32 %v1731_v5, %v1582_v27  ;;  %v653_v46 = vsel %vm626_vm2, %v651_v35, %v652_v0  ;;  %v1204_v6 = vmul.f32 %v2186_v39, %v1159_v54  ;;  %v1206_v20 = vmul.f32 %v2186_v39, %v1161_v40  ;;  %v986_v5 = vld [vmem:[#allocation2 + $0x100] sm:$0xfe] }
 0x16b   : > { %v673_v2 = vrot.slane %v2801_v36, 1  ;;  %v699_v18 = vadd.f32 %v653_v46, %v493_v8  ;;  %v843_v51 = vsel %vm816_vm5, %v841_v26, %v842_v34  ;;  %v1086_v1 = vrot.slane %v1017_v12, 1  ;;  %v988_v46 = vld [vmem:[#allocation2 + $0x110] sm:$0x1]  ;;  %v1595_v26 = vld [vmem:[#allocation2 + $0x80] sm:$0xfc] }
 0x16c   : > { %v1950_v61 = vpack.c.bf16 %v1771_v48, %v2721_v22  ;;  %v1274_v56 = vrot.slane %v1204_v6, 2  ;;  %v1275_v27 = vrot.slane %v1206_v20, 2  ;;  %v1451_v35 = vmul.f32 %v2224_v4, %v1406_v30  ;;  %v1597_v34 = vld [vmem:[#allocation2 + $0x90] sm:$0x3]  ;;  %v3169_v30 = vld [vmem:[#allocation17_spill] sm:$0xff] }
 0x16d   : > { %v2835_v54 = vmul.f32 %v3156_v23, %v736_v42  ;;  %v889_v10 = vadd.f32 %v843_v51, %v699_v18  ;;  %v1087_v40 = vsel %vm626_vm2, %v1085_v7, %v1086_v1  ;;  %v1453_v36 = vmul.f32 %v2224_v4, %v1408_v11  ;;  %v1172_v6 = vld [vmem:[#allocation2 + $0xe8] sm:$0xfc]  ;;  %v1174_v20 = vld [vmem:[#allocation2 + $0xf8] sm:$0x3]  ;;  %v1175_v1 = vld [vmem:[#allocation2 + $0x100] sm:$0xfc] }
 0x16e   : > { %v2840_v8 = vmul.f32 %v3156_v23, %v738_v29  ;;  %v1028_v0 = vmul.f32 %v2183_v38, %v983_v37  ;;  %v1030_v22 = vmul.f32 %v2183_v38, %v985_v3  ;;  %1832 = vst.msk [vmem:[%s2506_s21 + $0x28] sm:$0xff] %vm2514_vm8, %v1950_v61  ;;  %v1137_v48 = vadd.f32 %v1087_v40, %v948_v16  ;;  %v911_v3 = vld [vmem:[#allocation2 + $0x100] sm:$0xff]  ;;  %v3170_v51 = vld [vmem:[#allocation19_spill] sm:$0xff]  ;;  %v1177_v61 = vld [vmem:[#allocation2 + $0x110] sm:$0x3] }
 0x16f   : > { %v674_v12 = vsel %vm626_vm2, %v672_v59, %v673_v2  ;;  %v955_v7 = vadd.f32 %v2804_v31, %v2694_v60  ;;  %v950_v42 = vadd.f32 %v3169_v30, %v889_v10  ;;  %v1370_v29 = vmul.f32 %v2208_v57, %v2798_v32 }
 0x170   : > { %v1276_v11 = vsel %vm816_vm5, %v1274_v56, %v1275_v27  ;;  %v1519_v37 = vrot.slane %v1451_v35, 1  ;;  %v1031_v16 = vmul.f32 %v3168_v28, %v986_v5  ;;  %v1033_v18 = vmul.f32 %v3168_v28, %v988_v46  ;;  %v3171_v28 = vld [vmem:[#allocation20_spill] sm:$0xff] }
 0x171   : > { %v1139_v59 = vadd.f32 %v3170_v51, %v950_v42  ;;  %v1520_v2 = vrot.slane %v1453_v36, 1  ;;  %v1640_v60 = vmul.f32 %v2236_v19, %v1595_v26  ;;  %v1642_v31 = vmul.f32 %v2236_v19, %v1597_v34  ;;  %v1422_v51 = vld [vmem:[#allocation2 + $0x100] sm:$0xfe] }
 0x172   : > { %v1106_v32 = vrot.slane %v1028_v0, 1  ;;  %v1107_v10 = vrot.slane %v1030_v22, 1  ;;  %v1326_v40 = vadd.f32 %v1276_v11, %v1137_v48  ;;  %v1386_v56 = vadd.f32 %v1370_v29, %v2725_v50 }
 0x173   : > { %v2861_v27 = vmul.f32 %v3158_v21, %v1172_v6  ;;  %v2864_v35 = vmul.f32 %v3158_v21, %v1174_v20  ;;  %v1328_v5 = vadd.f32 %v3171_v28, %v1139_v59  ;;  %v940_v36 = vmul.f32 %v3167_v14, %v911_v3  ;;  %v3172_v6 = vld [vmem:[#allocation18_spill] sm:$0xff]  ;;  %v1424_v59 = vld [vmem:[#allocation2 + $0x110] sm:$0x1]  ;;  %v3174_v28 = vld [vmem:[#allocation21_spill] sm:$0xff] }
 0x174   : > { %v1109_v46 = vrot.slane %v1031_v16, 1  ;;  %v1110_v26 = vrot.slane %v1033_v18, 1  ;;  %v1220_v34 = vmul.f32 %v2186_v39, %v1175_v1  ;;  %v1222_v0 = vmul.f32 %v2186_v39, %v1177_v61  ;;  %v534_v1 = vld [vmem:[#allocation2 + $0x88] sm:$0xfe]  ;;  %v536_v61 = vld [vmem:[#allocation2 + $0x98] sm:$0x1] }
 0x175   : > { %v1521_v22 = vsel %vm626_vm2, %v1519_v37, %v1520_v2  ;;  %v1708_v48 = vrot.slane %v1640_v60, 2  ;;  %v1709_v50 = vrot.slane %v1642_v31, 2  ;;  %v956_v30 = vadd.f32 %v940_v36, %v2727_v13  ;;  %v3173_v37 = vld [vmem:[#allocation33_spill] sm:$0xff] }
 0x176   : > { %v862_v42 = vrot.slane %v2835_v54, 2  ;;  %v1108_v29 = vsel %vm626_vm2, %v1106_v32, %v1107_v10  ;;  %v1388_v20 = vadd.f32 %v3172_v6, %v1326_v40  ;;  %v1575_v11 = vadd.f32 %v1521_v22, %v1386_v56  ;;  %v1611_v40 = vld [vmem:[#allocation2 + $0x100] sm:$0xfc]  ;;  %v724_v56 = vld [vmem:[#allocation2 + $0x88] sm:$0xfc] }
 0x177   : > { %v2877_v14 = vadd.f32 %v2788_v62, %v2777_v24  ;;  %v863_v16 = vrot.slane %v2840_v8, 2  ;;  %v1295_v39 = vrot.slane %v2861_v27, 2  ;;  %v1390_v18 = vadd.f32 %v3173_v37, %v1328_v5  ;;  %v973_v6 = vld [vmem:[#allocation2 + $0x98] sm:$0x1]  ;;  %v3193_v8 = vld [vmem:[#allocation28_spill] sm:$0xff] }
 0x178   : > { %v2883_v13 = vadd.f32 %v674_v12, %v2794_v15  ;;  %v1111_v2 = vsel %vm626_vm2, %v1109_v46, %v1110_v26  ;;  %v1298_v60 = vrot.slane %v1220_v34, 2  ;;  %v1299_v31 = vrot.slane %v1222_v0, 2  ;;  %v3175_v46 = vld [vmem:[#allocation35_spill] sm:$0xff] }
 0x179   : > { %v2886_v32 = vadd.f32 %v1108_v29, %v955_v7  ;;  %v1296_v24 = vrot.slane %v2864_v35, 2  ;;  %v1710_v62 = vsel %vm816_vm5, %v1708_v48, %v1709_v50  ;;  %v1145_v10 = vadd.f32 %v1111_v2, %v956_v30  ;;  %v726_v7 = vld [vmem:[#allocation2 + $0x98] sm:$0x3]  ;;  %v466_v0 = vld [vmem:[#allocation2 + $0x88] sm:$0xff] }
 0x17a   : > { %v2891_v5 = vadd.f32 %v3174_v28, %v1388_v20  ;;  %v2893_v15 = vadd.f32 %v1710_v62, %v1575_v11  ;;  %v2896_v12 = vmul.f32 %v2208_v57, %v911_v3  ;;  %v2899_v36 = vmul.f32 %v2224_v4, %v1422_v51  ;;  %v971_v29 = vld [vmem:[#allocation2 + $0x88] sm:$0xfe]  ;;  %v1162_v51 = vld [vmem:[#allocation2 + $0x98] sm:$0x3] }
 0x17b   : > { %v2902_v26 = vadd.f32 %v3175_v46, %v1390_v18  ;;  %v2905_v34 = vmul.f32 %v2224_v4, %v1424_v59  ;;  %v579_v22 = vmul.f32 %v2139_v45, %v534_v1  ;;  %v581_v48 = vmul.f32 %v2139_v45, %v536_v61  ;;  %v1160_v18 = vld [vmem:[#allocation2 + $0x88] sm:$0xfc]  ;;  %v1409_v28 = vld [vmem:[#allocation2 + $0x98] sm:$0x1] }
 0x17c   : > { %v1300_v50 = vsel %vm816_vm5, %v1298_v60, %v1299_v31  ;;  %v1550_v57 = vrot.slane %v2735_v43, 1  ;;  %v2912_v3 = vmul.f32 %v2236_v19, %v1611_v40  ;;  %v769_v30 = vmul.f32 %v3156_v23, %v724_v56  ;;  %v3190_v43 = vld [vmem:[#allocation29_spill] sm:$0xff] }
 0x17d   : > { %v2915_v20 = vadd.f32 %v1300_v50, %v1145_v10  ;;  %v654_v4 = vrot.slane %v579_v22, 1  ;;  %v655_v11 = vrot.slane %v581_v48, 1  ;;  %v771_v37 = vmul.f32 %v3156_v23, %v726_v7 }
 0x17e   : > { %v494_v45 = vmul.f32 %v3161_v9, %v466_v0  ;;  %v3176_v59 = vrot.slane %v2755_v41, 2  ;;  %v3177_v2 = vrot.slane %v2752_v49, 2  ;;  %v844_v31 = vrot.slane %v769_v30, 2  ;;  %v1407_v49 = vld [vmem:[#allocation2 + $0x88] sm:$0xfe] }
 0x17f   : > { %v933_v1 = vmul.f32 %v3159_v33, %v466_v0  ;;  %v656_v61 = vsel %vm626_vm2, %v654_v4, %v655_v11  ;;  %v845_v62 = vrot.slane %v771_v37, 2  ;;  %v1016_v23 = vmul.f32 %v2183_v38, %v971_v29  ;;  %v1596_v30 = vld [vmem:[#allocation2 + $0x88] sm:$0xfc] }
 0x180   : > { %v840_v60 = vsel %vm816_vm5, %v3177_v2, %v3176_v59  ;;  %v700_v40 = vadd.f32 %v656_v61, %v494_v45  ;;  %v1018_v56 = vmul.f32 %v2183_v38, %v973_v6  ;;  %v1205_v9 = vmul.f32 %v3158_v21, %v1160_v18  ;;  %v1598_v59 = vld [vmem:[#allocation2 + $0x98] sm:$0x3]  ;;  %v330_v2 = vpop.f32.mrf.mxu1  ;;  %v1613_v61 = vld [vmem:[#allocation2 + $0x110] sm:$0x3] }
 0x181   : > { %v888_v10 = vadd.f32 %v840_v60, %v2785_v53  ;;  %v1207_v41 = vmul.f32 %v3158_v21, %v1162_v51  ;;  %v846_v7 = vsel %vm816_vm5, %v844_v31, %v845_v62  ;;  %v1088_v22 = vrot.slane %v1016_v23, 1 }
 0x182   : > { %v3178_v48 = vrot.slane %v2764_v55, 2  ;;  %v3179_v50 = vrot.slane %v2761_v58, 2  ;;  %v890_v29 = vadd.f32 %v846_v7, %v700_v40  ;;  %v1089_v4 = vrot.slane %v1018_v56, 1  ;;  %v3180_v55 = vld [vmem:[#allocation23_spill] sm:$0xff] }
 0x183   : > { %v949_v46 = vadd.f32 %v933_v1, %v888_v10  ;;  %v1277_v6 = vrot.slane %v1205_v9, 2  ;;  %v1278_v11 = vrot.slane %v1207_v41, 2  ;;  %v1371_v18 = vmul.f32 %v2218_v63, %v466_v0  ;;  %v3181_v0 = vld [vmem:[#allocation24_spill] sm:$0xff] }
 0x184   : > { %v1273_v53 = vsel %vm816_vm5, %v3179_v50, %v3178_v48  ;;  %v1452_v51 = vmul.f32 %v3154_v17, %v1407_v49  ;;  %v1454_v45 = vmul.f32 %v3154_v17, %v1409_v28  ;;  %v951_v60 = vadd.f32 %v3180_v55, %v890_v29  ;;  %v3183_v29 = vld [vmem:[#allocation22_spill] sm:$0xff]  ;;  %v3189_v55 = vld [vmem:[#allocation27_spill] sm:$0xff] }
 0x185   : > { %v1325_v37 = vadd.f32 %v1273_v53, %v2877_v14  ;;  %v1090_v58 = vsel %vm626_vm2, %v1088_v22, %v1089_v4  ;;  %v1279_v31 = vsel %vm816_vm5, %v1277_v6, %v1278_v11  ;;  %v1641_v1 = vmul.f32 %v3155_v25, %v1596_v30  ;;  %v3185_v11 = vld [vmem:[#allocation25_spill] sm:$0xff] }
 0x186   : > { %v1138_v62 = vadd.f32 %v1090_v58, %v949_v46  ;;  %v1522_v14 = vrot.slane %v1452_v51, 1  ;;  %v1523_v23 = vrot.slane %v1454_v45, 1  ;;  %v1140_v40 = vadd.f32 %v3181_v0, %v951_v60  ;;  %v3182_v46 = vld [vmem:[#allocation26_spill] sm:$0xff] }
 0x187   : > { %v1387_v10 = vadd.f32 %v1371_v18, %v1325_v37  ;;  %v1643_v56 = vmul.f32 %v3155_v25, %v1598_v59  ;;  %v1711_v9 = vrot.slane %v1641_v1, 2  ;;  %v405_v41 = vrot.slane %v330_v2, 7  ;;  %v3187_v45 = vld [vmem:[#allocation38_spill] sm:$0xff]  ;;  %v3188_v2 = vld [vmem:[#allocation32_spill] sm:$0xff] }
 0x188   : > { %v1543_v49 = vrot.slane %v2899_v36, 1  ;;  %v1544_v28 = vrot.slane %v2905_v34, 1  ;;  %v1327_v7 = vadd.f32 %v1279_v31, %v1138_v62  ;;  %v1524_v22 = vsel %vm626_vm2, %v1522_v14, %v1523_v23  ;;  %v3184_v36 = vld [vmem:[#allocation36_spill] sm:$0xff]  ;;  %v3191_v31 = vld [vmem:[#allocation39_spill] sm:$0xff]  ;;  %v1618_v62 = vld [vmem:[#allocation2 + $0x138] sm:$0x3] }
 0x189   : > { %v2951_v48 = vmul.f32 %v2236_v19, %v1613_v61  ;;  %v1329_v50 = vadd.f32 %v3182_v46, %v1140_v40  ;;  %v1576_v53 = vadd.f32 %v1524_v22, %v1387_v10  ;;  %v1712_v30 = vrot.slane %v1643_v56, 2  ;;  %454 = vst.msk [vmem:[#allocation2 + $0x108] sm:$0xfe] %vm424_vm3, %v405_v41  ;;  %v1616_v61 = vld [vmem:[#allocation2 + $0x128] sm:$0xfc]  ;;  %v3195_v56 = vld [vmem:[#allocation34_spill] sm:$0xff] }
 0x18a   : > { %456 = vst.msk [vmem:[#allocation2 + $0x118] sm:$0x1] %vm427_vm4, %v405_v41  ;;  %v1766_v4 = vadd.f32 %v3183_v29, %v2891_v5  ;;  %v1768_v34 = vadd.f32 %v3184_v36, %v2902_v26  ;;  %v1394_v6 = vadd.f32 %v2896_v12, %v2729_v47  ;;  %v1389_v19 = vadd.f32 %v3185_v11, %v1327_v7  ;;  %v3192_v10 = vld [vmem:[#allocation31_spill] sm:$0xff] }
 0x18b   : > { %v3186_v37 = vrot.slane %v2691_v52, 1  ;;  %v1732_v51 = vrot.slane %v2912_v3, 2  ;;  %v1391_v59 = vadd.f32 %v3187_v45, %v1329_v50  ;;  %v1713_v5 = vsel %vm816_vm5, %v1711_v9, %v1712_v30 }
 0x18c   : > { %v1738_v26 = vrot.slane %v3188_v2, 2  ;;  %v1578_v60 = vadd.f32 %v3189_v55, %v1389_v19  ;;  %v1765_v47 = vadd.f32 %v1713_v5, %v1576_v53  ;;  %v864_v52 = vsel %vm816_vm5, %v862_v42, %v863_v16  ;;  %v3194_v16 = vld [vmem:[#allocation40_spill] sm:$0xff] }
 0x18d   : > { %v2968_v18 = vsel %vm626_vm2, %v3186_v37, %v1550_v57  ;;  %v2982_v12 = vadd.f32 %v3190_v43, %v2915_v20  ;;  %v1545_v57 = vsel %vm626_vm2, %v1543_v49, %v1544_v28  ;;  %v1733_v58 = vrot.slane %v2951_v48, 2  ;;  %v3196_v28 = vld [vmem:[#allocation15_spill] sm:$0xff] }
 0x18e   : > { %v1580_v1 = vadd.f32 %v3191_v31, %v1391_v59  ;;  %v1739_v14 = vrot.slane %v3192_v10, 2  ;;  %v1767_v23 = vadd.f32 %v3193_v8, %v1578_v60  ;;  %v1947_v54 = vpack.c.bf16 %v1765_v47, %v2893_v15 }
 0x18f   : > { %v1297_v42 = vsel %vm816_vm5, %v1295_v39, %v1296_v24  ;;  %v896_v0 = vadd.f32 %v864_v52, %v2883_v13  ;;  %v1552_v9 = vrot.slane %v3195_v56, 1  ;;  %v1553_v27 = vrot.slane %v3196_v28, 1 }
 0x190   : > { %v1769_v20 = vadd.f32 %v3194_v16, %v1580_v1  ;;  %v1333_v40 = vadd.f32 %v1297_v42, %v2886_v32  ;;  %v1948_v41 = vpack.c.bf16 %v1767_v23, %v1766_v4  ;;  %1829 = vst.msk [vmem:[%s2506_s21 + $0x10] sm:$0xff] %vm2514_vm8, %v1947_v54  ;;  %v912_v15 = vld [vmem:[#allocation2 + $0x108] sm:$0xff]  ;;  %v1661_v39 = vmul.f32 %v3155_v25, %v1616_v61  ;;  %v3197_v16 = vld [vmem:[#allocation30_spill] sm:$0xff] }
 0x191   : > { %v987_v49 = vld [vmem:[#allocation2 + $0x108] sm:$0xfe]  ;;  %v989_v35 = vld [vmem:[#allocation2 + $0x118] sm:$0x1]  ;;  %v1663_v24 = vmul.f32 %v3155_v25, %v1618_v62  ;;  %v941_v32 = vmul.f32 %v3159_v33, %v912_v15  ;;  %v1379_v29 = vmul.f32 %v2218_v63, %v912_v15  ;;  %v1583_v52 = vadd.f32 %v1545_v57, %v1394_v6 }
 0x192   : > { %v1949_v13 = vpack.c.bf16 %v1769_v20, %v1768_v34  ;;  %v1032_v7 = vmul.f32 %v2183_v38, %v987_v49  ;;  %v1034_v22 = vmul.f32 %v2183_v38, %v989_v35  ;;  %v1176_v48 = vld [vmem:[#allocation2 + $0x108] sm:$0xfc]  ;;  %v1178_v46 = vld [vmem:[#allocation2 + $0x118] sm:$0x3]  ;;  %1830 = vst.msk [vmem:[%s2506_s21 + $0x18] sm:$0xff] %vm2514_vm8, %v1948_v41  ;;  %v1741_v31 = vrot.slane %v1661_v39, 2 }
 0x193   : > { %v1423_v50 = vld [vmem:[#allocation2 + $0x108] sm:$0xfe]  ;;  %v1221_v53 = vmul.f32 %v3158_v21, %v1176_v48  ;;  %v1223_v30 = vmul.f32 %v3158_v21, %v1178_v46  ;;  %v1425_v4 = vld [vmem:[#allocation2 + $0x118] sm:$0x1]  ;;  %v957_v38 = vadd.f32 %v941_v32, %v896_v0  ;;  %v1395_v5 = vadd.f32 %v1379_v29, %v1333_v40 }
 0x194   : > { %v1468_v36 = vmul.f32 %v3154_v17, %v1423_v50  ;;  %v1612_v33 = vld [vmem:[#allocation2 + $0x108] sm:$0xfc]  ;;  %v1614_v34 = vld [vmem:[#allocation2 + $0x118] sm:$0x3]  ;;  %1831 = vst.msk [vmem:[%s2506_s21 + $0x20] sm:$0xff] %vm2514_vm8, %v1949_v13  ;;  %v1112_v11 = vrot.slane %v1032_v7, 1  ;;  %v1470_v37 = vmul.f32 %v3154_v17, %v1425_v4  ;;  %v1734_v54 = vsel %vm816_vm5, %v1732_v51, %v1733_v58 }
 0x195   : > { %v1113_v19 = vrot.slane %v1034_v22, 1  ;;  %v1301_v45 = vrot.slane %v1221_v53, 2  ;;  %v1302_v59 = vrot.slane %v1223_v30, 2  ;;  %v1657_v60 = vmul.f32 %v3155_v25, %v1612_v33 }
 0x196   : > { %v1546_v55 = vrot.slane %v1468_v36, 1  ;;  %v1547_v63 = vrot.slane %v1470_v37, 1  ;;  %v1659_v47 = vmul.f32 %v3155_v25, %v1614_v34  ;;  %v1742_v1 = vrot.slane %v1663_v24, 2 }
 0x197   : > { %v1114_v21 = vsel %vm626_vm2, %v1112_v11, %v1113_v19  ;;  %v1303_v61 = vsel %vm816_vm5, %v1301_v45, %v1302_v59  ;;  %v1735_v17 = vrot.slane %v1657_v60, 2  ;;  %v1554_v25 = vsel %vm626_vm2, %v1552_v9, %v1553_v27 }
 0x198   : > { %v1146_v43 = vadd.f32 %v1114_v21, %v957_v38  ;;  %v1548_v62 = vsel %vm626_vm2, %v1546_v55, %v1547_v63  ;;  %v1736_v10 = vrot.slane %v1659_v47, 2  ;;  %v1585_v57 = vadd.f32 %v2968_v18, %v2982_v12 }
 0x199   : > { %v1584_v23 = vadd.f32 %v1548_v62, %v1395_v5  ;;  %v1772_v42 = vadd.f32 %v1734_v54, %v1583_v52  ;;  %v1740_v40 = vsel %vm816_vm5, %v1738_v26, %v1739_v14  ;;  %v1743_v3 = vsel %vm816_vm5, %v1741_v31, %v1742_v1 }
 0x19a   : > { %v1335_v8 = vadd.f32 %v1303_v61, %v1146_v43  ;;  %v1737_v6 = vsel %vm816_vm5, %v1735_v17, %v1736_v10  ;;  %v1774_v51 = vadd.f32 %v1740_v40, %v1585_v57 }
 0x19b   : > { %v1773_v0 = vadd.f32 %v1737_v6, %v1584_v23 }
 0x19c   : > { %v1397_v20 = vadd.f32 %v3197_v16, %v1335_v8 }
 0x19d   : > { %v1951_v41 = vpack.c.bf16 %v1773_v0, %v1772_v42 }
 0x19e   : > { %v1586_v56 = vadd.f32 %v1554_v25, %v1397_v20 }
 0x19f   : > { %1833 = vst.msk [vmem:[%s2506_s21 + $0x30] sm:$0xff] %vm2514_vm8, %v1951_v41 }
 0x1a0   : > { %v1775_v58 = vadd.f32 %v1743_v3, %v1586_v56 }
 0x1a2   : > { %v1952_v9 = vpack.c.bf16 %v1775_v58, %v1774_v51 }
 0x1a4   : > { %1834 = vst.msk [vmem:[%s2506_s21 + $0x38] sm:$0xff] %vm2514_vm8, %v1952_v9 }
 0x1a5 PF: > { %s14_s12 = sadd.s32 1, %s2033_s12  }
 0x1a6   : > { %p11_p1 = scmp.ge.s32.totalorder %s14_s12, 4  }
 0x1a8   :  { %13 = sbr.rel (!%p11_p1) target bundleno = 1 (0x1), region = 77 }
 0x1ad   :  { %1856 = vsyncpa [#allocation4], 1 }
 0x1ae   :  { %1858 = vsyncpa [#allocation4 + $0x1], 1 }

// kernel: fg_forward.7
= control target key start
LH: loop header
LB: loop body
LE: loop exit
PB: predicated region body
PF: predicated region fallthrough
CT: control target
= control target key end

     0   :  { %13 = vsyncpa [#allocation5], 0  ;;  %s6405_s0 = inlined_call_operand.vmem [shape: bf16[2,64,144], index: 0, kind: input, shape index: {}]   ;;  %s6406_s1 = inlined_call_operand.vmem [shape: bf16[2,64,64], index: 1, kind: input, shape index: {}]   ;;  %s6407_s2 = inlined_call_operand.vmem [shape: f32[2,64,64], index: 2, kind: input, shape index: {}]   ;;  %s6408_s3 = inlined_call_operand.vmem [shape: bf16[3,3,144,64], index: 3, kind: input, shape index: {}]   ;;  %s6409_s4 = inlined_call_operand.vmem [shape: f32[1,64], index: 4, kind: input, shape index: {}]   ;;  %s6410_s5 = inlined_call_operand.vmem [shape: bf16[64,64], index: 5, kind: input, shape index: {}]   ;;  %s6411_s6 = inlined_call_operand.vmem [shape: bf16[3,3,64,64], index: 6, kind: input, shape index: {}]   ;;  %s6412_s7 = inlined_call_operand.vmem [shape: f32[1,64], index: 7, kind: input, shape index: {}]   ;;  %s6413_s8 = inlined_call_operand.hbm [shape: f32[2,64,64], index: 8, kind: output, shape index: {}]  }
   0x1   :  { %15 = vsyncpa [#allocation5 + $0x1], 0  ;;  %s5226_s27 = smov 0   ;;  %s5228_s28 = smov 0  }
   0x2   :  { %s5230_s29 = smov 0   ;;  %s5232_s30 = smov 0  }
   0x3 LB: > { %s5247_s9 = sadd.s32 4294967295, %s5174_s30   ;;  %s4274_s10 = sadd.s32 4294967294, %s5174_s30   ;;  %s5174_s30 = sphi %s5232_s30, %s6427_s30   ;;  %s5170_s29 = sphi %s5230_s29, %s6426_s29   ;;  %s5166_s28 = sphi %s5228_s28, %s6425_s28   ;;  %s5162_s27 = sphi %s5226_s27, %s6424_s27  }
   0x4   : > { %s5251_s11 = sadd.s32 1, %s5174_s30   ;;  %s211_s12 = sadd.s32 1, %s5170_s29 }
   0x5   : > { %s208_s13 = ssub.s32 %s5174_s30, %s5251_s11  ;;  %p221_p0 = scmp.ne.s32.totalorder %s5170_s29, %s5166_s28 }
   0x6   : > { %p209_p1 = scmp.eq.s32.totalorder %s208_s13, 0  ;;  %p222_p2 = scmp.eq.s32.totalorder %s5247_s9, 1 }
   0x7   : > { %p227_p3 = scmp.ne.s32.totalorder %s5166_s28, %s5162_s27  ;;  %p228_p4 = scmp.eq.s32.totalorder %s4274_s10, 1 }
   0x8   : > { %s5262_s14 = scalar_select %p209_p1, %s5170_s29, %s211_s12  }
   0x9   : > { %p5264_p5 = por %p222_p2, %p221_p0  ;;  %p5268_p6 = por %p228_p4, %p227_p3 }
   0xa   : > { %p4277_p7 = scmp.ge.s32.totalorder %s5174_s30, 1  ;;  %p285_p8 = scmp.lt.s32.totalorder %s5174_s30, 3 }
   0xc   : > { %p286_p9 = pnand %p4277_p7, %p285_p8 }
   0xe   : > { %289 = sbr.rel (%p286_p9) target bundleno = 720 (0x2d0), region = 52 }
  0x13   : > { %v4988_v0 = vld [vmem:[%s6408_s3 + $0x80] sm:$0xff]   ;;  %v5176_v1 = vmov 0   ;;  %v4989_v2 = vld [vmem:[%s6408_s3 + $0x38] sm:$0xff]   ;;  %v4991_v4 = vld [vmem:[%s6408_s3 + $0x30] sm:$0xff]   ;;  %v5177_v5 = vmov 0.0   ;;  %p329_p10 = scmp.lt.s32.totalorder %s5247_s9, 1 }
  0x14   : > { %758 = vmatprep.subr.bf16.mxu0 %v5176_v1  ;;  %889 = vmatprep.subr.bf16.mxu1 %v5176_v1  ;;  %v4990_v3 = vld [vmem:[%s6408_s3 + $0x78] sm:$0xff]   ;;  %345 = vst [vmem:[#allocation2] sm:$0xff] %v5177_v5  ;;  %348 = vst [vmem:[#allocation2 + $0x10] sm:$0x3] %v5177_v5  ;;  %vm346_vm0 = vcmask 130048   ;;  %v4992_v6 = vld [vmem:[%s6408_s3 + $0x70] sm:$0xff]  }
  0x15   : > { %759 = vmatpush1.bf16.msra.mxu0 %v4988_v0  ;;  %890 = vmatpush1.bf16.msra.mxu1 %v4989_v2  ;;  %351 = vst [vmem:[#allocation2 + $0x20] sm:$0xff] %v5177_v5  ;;  %353 = vst [vmem:[#allocation2 + $0x30] sm:$0x3] %v5177_v5  ;;  %vm349_vm1 = vcmask 123904   ;;  %v4993_v7 = vld [vmem:[%s6408_s3 + $0x28] sm:$0xff]   ;;  %s5352_s13 = scalar_select %p329_p10, %s5247_s9, 1 }
  0x16   : > { %760 = vmatprep.subr.bf16.mxu0 %v5176_v1  ;;  %355 = vst [vmem:[#allocation2 + $0x40] sm:$0xff] %v5177_v5  ;;  %357 = vst [vmem:[#allocation2 + $0x50] sm:$0x3] %v5177_v5  ;;  %891 = vmatprep.subr.bf16.mxu1 %v5176_v1  ;;  %v4994_v8 = vld [vmem:[%s6408_s3 + $0x68] sm:$0xff]   ;;  %v4995_v9 = vld [vmem:[%s6408_s3 + $0x20] sm:$0xff]   ;;  %vm461_vm2 = vcmask 130049  }
  0x17   : > { %359 = vst [vmem:[#allocation2 + $0x60] sm:$0xff] %v5177_v5  ;;  %361 = vst [vmem:[#allocation2 + $0x70] sm:$0x3] %v5177_v5  ;;  %s4701_s21 = sshll.u32 %s5352_s13, 6  ;;  %v4996_v10 = vld [vmem:[%s6408_s3 + $0x60] sm:$0xff]   ;;  %v4997_v11 = vld [vmem:[%s6408_s3 + $0x18] sm:$0xff]  }
  0x18   : > { %363 = vst [vmem:[#allocation2 + $0x80] sm:$0xff] %v5177_v5  ;;  %365 = vst [vmem:[#allocation2 + $0x90] sm:$0x3] %v5177_v5  ;;  %s5375_s12 = scalar_lea.vmem %s6405_s0, %s4701_s21  ;;  %v4998_v12 = vld [vmem:[%s6408_s3 + $0x58] sm:$0xff]   ;;  %v4999_v14 = vld [vmem:[%s6408_s3 + $0x10] sm:$0xff]   ;;  %vm464_vm3 = vcmask 122880  }
  0x19   : > { %367 = vst [vmem:[#allocation2 + $0xa0] sm:$0xff] %v5177_v5  ;;  %369 = vst [vmem:[#allocation2 + $0xb0] sm:$0x3] %v5177_v5  ;;  %761 = vmatpush1.bf16.msra.mxu0 %v4990_v3  ;;  %892 = vmatpush1.bf16.msra.mxu1 %v4991_v4  ;;  %v387_v13 = vld [vmem:[%s5375_s12] sm:$0xff]  ;;  %v5000_v17 = vld [vmem:[%s6408_s3 + $0x50] sm:$0xff]   ;;  %vm600_vm4 = vcmask 1046528  }
  0x1a   : > { %371 = vst [vmem:[#allocation2 + $0xc0] sm:$0xff] %v5177_v5  ;;  %373 = vst [vmem:[#allocation2 + $0xd0] sm:$0x3] %v5177_v5  ;;  %762 = vmatprep.subr.bf16.mxu0 %v5176_v1  ;;  %893 = vmatprep.subr.bf16.mxu1 %v5176_v1  ;;  %v396_v15 = vunpack.c.h.bf16 %v387_v13  ;;  %v395_v16 = vunpack.c.l.bf16 %v387_v13  ;;  %v5001_v19 = vld [vmem:[%s6408_s3 + $0x8] sm:$0xff]   ;;  %v389_v25 = vld [vmem:[%s5375_s12 + $0x10] sm:$0xff]  ;;  %vm1018_vm5 = vcmask 1045504  }
  0x1b   : > { %375 = vst [vmem:[#allocation2 + $0xe0] sm:$0xff] %v5177_v5  ;;  %377 = vst [vmem:[#allocation2 + $0xf0] sm:$0x3] %v5177_v5  ;;  %v536_v23 = vld [vmem:[#allocation2] sm:$0xfe]  ;;  %v388_v24 = vld [vmem:[%s5375_s12 + $0x8] sm:$0xff]  ;;  %v400_v29 = vunpack.c.h.bf16 %v389_v25  ;;  %v399_v31 = vunpack.c.l.bf16 %v389_v25 }
  0x1c   : > { %379 = vst [vmem:[#allocation2 + $0x100] sm:$0xff] %v5177_v5  ;;  %381 = vst [vmem:[#allocation2 + $0x110] sm:$0x3] %v5177_v5  ;;  %v428_v20 = vrot.slane %v396_v15, 7  ;;  %v427_v22 = vrot.slane %v395_v16, 7  ;;  %v5002_v26 = vld [vmem:[%s6408_s3 + $0x48] sm:$0xff]   ;;  %v398_v28 = vunpack.c.h.bf16 %v388_v24  ;;  %v397_v30 = vunpack.c.l.bf16 %v388_v24 }
  0x1d   : > { %383 = vst [vmem:[#allocation2 + $0x120] sm:$0xff] %v5177_v5  ;;  %385 = vst [vmem:[#allocation2 + $0x130] sm:$0x3] %v5177_v5  ;;  %763 = vmatpush1.bf16.msra.mxu0 %v4992_v6  ;;  %894 = vmatpush1.bf16.msra.mxu1 %v4993_v7  ;;  %v538_v27 = vld [vmem:[#allocation2 + $0x10] sm:$0x1]  ;;  %v5003_v32 = vld [vmem:[%s6408_s3] sm:$0xff]  }
  0x1e   : > { %347 = vst.msk [vmem:[#allocation2 + $0x8] sm:$0xff] %vm346_vm0, %v5177_v5  ;;  %352 = vst.msk [vmem:[#allocation2 + $0x28] sm:$0xff] %vm346_vm0, %v5177_v5  ;;  %764 = vmatprep.subr.bf16.mxu0 %v5176_v1  ;;  %895 = vmatprep.subr.bf16.mxu1 %v5176_v1  ;;  %v430_v35 = vrot.slane %v398_v28, 7  ;;  %v432_v36 = vrot.slane %v400_v29, 7  ;;  %v429_v37 = vrot.slane %v397_v30, 7  ;;  %v431_v38 = vrot.slane %v399_v31, 7 }
  0x1f   : > { %356 = vst.msk [vmem:[#allocation2 + $0x48] sm:$0xff] %vm346_vm0, %v5177_v5  ;;  %360 = vst.msk [vmem:[#allocation2 + $0x68] sm:$0xff] %vm346_vm0, %v5177_v5  ;;  %v601_v39 = vrot.slane %v536_v23, 1  ;;  %v602_v40 = vrot.slane %v538_v27, 1  ;;  %v5004_v41 = vld [vmem:[%s6408_s3 + $0x88] sm:$0xff]   ;;  %v390_v43 = vld [vmem:[%s5375_s12 + $0x18] sm:$0xff] }
  0x20   : > { %364 = vst.msk [vmem:[#allocation2 + $0x88] sm:$0xff] %vm346_vm0, %v5177_v5  ;;  %368 = vst.msk [vmem:[#allocation2 + $0xa8] sm:$0xff] %vm346_vm0, %v5177_v5  ;;  %v5005_v44 = vld [vmem:[%s6408_s3 + $0x40] sm:$0xff]   ;;  %v402_v46 = vunpack.c.h.bf16 %v390_v43  ;;  %v401_v47 = vunpack.c.l.bf16 %v390_v43  ;;  %v5006_v63 = vld [vmem:[%s6408_s3 + $0xc8] sm:$0xff]   ;;  %vm2865_vm6 = vcmask 523264   ;;  %s4702_s10 = sshll.u32 %s5352_s13, 5 }
  0x21   : > { %372 = vst.msk [vmem:[#allocation2 + $0xc8] sm:$0xff] %vm346_vm0, %v5177_v5  ;;  %376 = vst.msk [vmem:[#allocation2 + $0xe8] sm:$0xff] %vm346_vm0, %v5177_v5  ;;  %765 = vmatpush1.bf16.msra.mxu0 %v4994_v8  ;;  %896 = vmatpush1.bf16.msra.mxu1 %v4995_v9  ;;  %v391_v45 = vld [vmem:[%s5375_s12 + $0x20] sm:$0xff]  ;;  %v603_v59 = vsel %vm600_vm4, %v601_v39, %v602_v40  ;;  %v5010_v39 = vld [vmem:[%s6408_s3 + $0xb8] sm:$0xff]   ;;  %s5912_s23 = scalar_lea.vmem %s6406_s1, %s4702_s10  ;;  %vm2944_vm7 = vcmask 517120   ;;  %s326_s24 = sand.u32 1, %s5166_s28  }
  0x22   : > { %380 = vst.msk [vmem:[#allocation2 + $0x108] sm:$0xff] %vm346_vm0, %v5177_v5  ;;  %384 = vst.msk [vmem:[#allocation2 + $0x128] sm:$0xff] %vm346_vm0, %v5177_v5  ;;  %766 = vmatprep.subr.bf16.mxu0 %v5176_v1  ;;  %897 = vmatprep.subr.bf16.mxu1 %v5176_v1  ;;  %v404_v52 = vunpack.c.h.bf16 %v391_v45  ;;  %v403_v53 = vunpack.c.l.bf16 %v391_v45  ;;  %v434_v0 = vrot.slane %v402_v46, 7  ;;  %v433_v4 = vrot.slane %v401_v47, 7  ;;  %v5008_v15 = vld [vmem:[%s6408_s3 + $0xc0] sm:$0xff]   ;;  %s4278_s13 = sshll.u32 %s326_s24, 6 }
  0x23   : > { %350 = vst.msk [vmem:[#allocation2 + $0x18] sm:$0x3] %vm349_vm1, %v5177_v5  ;;  %354 = vst.msk [vmem:[#allocation2 + $0x38] sm:$0x3] %vm349_vm1, %v5177_v5  ;;  %s4704_s10 = sshll.u32 %s5247_s9, 10  ;;  %s6365_s9 = scalar_lea.sflag [#allocation5], %s326_s24 }
  0x24   : > { %358 = vst.msk [vmem:[#allocation2 + $0x58] sm:$0x3] %vm349_vm1, %v5177_v5  ;;  %362 = vst.msk [vmem:[#allocation2 + $0x78] sm:$0x3] %vm349_vm1, %v5177_v5  ;;  %v436_v2 = vrot.slane %v404_v52, 7  ;;  %v435_v6 = vrot.slane %v403_v53, 7  ;;  %s6355_s20 = scalar_lea.hbm %s6413_s8, %s4704_s10 }
  0x25   : > { %366 = vst.msk [vmem:[#allocation2 + $0x98] sm:$0x3] %vm349_vm1, %v5177_v5  ;;  %370 = vst.msk [vmem:[#allocation2 + $0xb8] sm:$0x3] %vm349_vm1, %v5177_v5  ;;  %767 = vmatpush1.bf16.msra.mxu0 %v4996_v10  ;;  %898 = vmatpush1.bf16.msra.mxu1 %v4997_v11  ;;  %v537_v18 = vld [vmem:[#allocation2 + $0x8] sm:$0xfe] }
  0x26   : > { %374 = vst.msk [vmem:[#allocation2 + $0xd8] sm:$0x3] %vm349_vm1, %v5177_v5  ;;  %378 = vst.msk [vmem:[#allocation2 + $0xf8] sm:$0x3] %vm349_vm1, %v5177_v5  ;;  %768 = vmatprep.subr.bf16.mxu0 %v5176_v1  ;;  %899 = vmatprep.subr.bf16.mxu1 %v5176_v1  ;;  %v604_v33 = vrot.slane %v537_v18, 1  ;;  %v495_v42 = vld [vmem:[#allocation2 + $0x8] sm:$0xff] }
  0x27   : > { %382 = vst.msk [vmem:[#allocation2 + $0x118] sm:$0x3] %vm349_vm1, %v5177_v5  ;;  %386 = vst.msk [vmem:[#allocation2 + $0x138] sm:$0x3] %vm349_vm1, %v5177_v5  ;;  %v5007_v10 = vld [vmem:[%s6408_s3 + $0x110] sm:$0xff]   ;;  %s5178_s22 = smov [#allocation4]  }
  0x28   : > { %462 = vst.msk [vmem:[#allocation2 + $0x28] sm:$0xfe] %vm461_vm2, %v428_v20  ;;  %460 = vst [vmem:[#allocation2 + $0x20] sm:$0xfe] %v427_v22 }
  0x29   : > { %769 = vmatpush1.bf16.msra.mxu0 %v4998_v12  ;;  %900 = vmatpush1.bf16.msra.mxu1 %v4999_v14  ;;  %465 = vst.msk [vmem:[#allocation2 + $0x38] sm:$0x1] %vm464_vm3, %v428_v20  ;;  %463 = vst [vmem:[#allocation2 + $0x30] sm:$0x1] %v427_v22 }
  0x2a   : > { %v539_v21 = vld [vmem:[#allocation2 + $0x18] sm:$0x1]  ;;  %770 = vmatprep.subr.bf16.mxu0 %v5176_v1  ;;  %901 = vmatprep.subr.bf16.mxu1 %v5176_v1  ;;  %467 = vst.msk [vmem:[#allocation2 + $0x48] sm:$0xfe] %vm461_vm2, %v430_v35  ;;  %471 = vst.msk [vmem:[#allocation2 + $0x68] sm:$0xfe] %vm461_vm2, %v432_v36 }
  0x2b   : > { %v605_v34 = vrot.slane %v539_v21, 1  ;;  %469 = vst.msk [vmem:[#allocation2 + $0x58] sm:$0x1] %vm464_vm3, %v430_v35  ;;  %473 = vst.msk [vmem:[#allocation2 + $0x78] sm:$0x1] %vm464_vm3, %v432_v36 }
  0x2c   : > { %466 = vst [vmem:[#allocation2 + $0x40] sm:$0xfe] %v429_v37  ;;  %468 = vst [vmem:[#allocation2 + $0x50] sm:$0x1] %v429_v37 }
  0x2d   : > { %771 = vmatpush1.bf16.msra.mxu0 %v5000_v17  ;;  %902 = vmatpush1.bf16.msra.mxu1 %v5001_v19  ;;  %470 = vst [vmem:[#allocation2 + $0x60] sm:$0xfe] %v431_v38  ;;  %472 = vst [vmem:[#allocation2 + $0x70] sm:$0x1] %v431_v38  ;;  %v606_v50 = vsel %vm600_vm4, %v604_v33, %v605_v34 }
  0x2e   : > { %772 = vmatprep.subr.bf16.mxu0 %v5176_v1  ;;  %903 = vmatprep.subr.bf16.mxu1 %v5176_v1  ;;  %475 = vst.msk [vmem:[#allocation2 + $0x88] sm:$0xfe] %vm461_vm2, %v434_v0  ;;  %479 = vst.msk [vmem:[#allocation2 + $0xa8] sm:$0xfe] %vm461_vm2, %v436_v2 }
  0x2f   : > { %v541_v48 = vld [vmem:[#allocation2 + $0x28] sm:$0xfe]  ;;  %v540_v57 = vld [vmem:[#allocation2 + $0x20] sm:$0xfe]  ;;  %477 = vst.msk [vmem:[#allocation2 + $0x98] sm:$0x1] %vm464_vm3, %v434_v0 }
  0x30   : > { %v543_v49 = vld [vmem:[#allocation2 + $0x38] sm:$0x1]  ;;  %v5420_v51 = vld [vmem:[#allocation2 + $0x28] sm:$0xff]  ;;  %v610_v54 = vrot.slane %v541_v48, 1  ;;  %v542_v58 = vld [vmem:[#allocation2 + $0x30] sm:$0x1] }
  0x31   : > { %773 = vmatpush1.bf16.msra.mxu0 %v5002_v26  ;;  %904 = vmatpush1.bf16.msra.mxu1 %v5003_v32  ;;  %v611_v55 = vrot.slane %v543_v49, 1  ;;  %v511_v56 = vpack.c.bf16 %v5420_v51, %v495_v42  ;;  %v607_v60 = vrot.slane %v540_v57, 1  ;;  %v608_v61 = vrot.slane %v542_v58, 1  ;;  %v5426_v62 = vld [vmem:[#allocation2 + $0x20] sm:$0xff]  ;;  %481 = vst.msk [vmem:[#allocation2 + $0xb8] sm:$0x1] %vm464_vm3, %v436_v2 }
  0x32   : > { %788 = vmatprep.subr.bf16.mxu0 %v5176_v1  ;;  %919 = vmatprep.subr.bf16.mxu1 %v5176_v1  ;;  %v510_v9 = vpack.c.bf16 %v5426_v62, %v5177_v5  ;;  %v545_v12 = vld [vmem:[#allocation2 + $0x48] sm:$0xfe]  ;;  %v547_v13 = vld [vmem:[#allocation2 + $0x58] sm:$0x1]  ;;  %474 = vst [vmem:[#allocation2 + $0x80] sm:$0xfe] %v433_v4 }
  0x33   : > { %v612_v3 = vsel %vm600_vm4, %v610_v54, %v611_v55  ;;  %4325 = vmatprep.mubr.msk.bf16.mxu1 %vm346_vm0, %v511_v56  ;;  %v609_v8 = vsel %vm600_vm4, %v607_v60, %v608_v61  ;;  %v549_v14 = vld [vmem:[#allocation2 + $0x68] sm:$0xfe]  ;;  %476 = vst [vmem:[#allocation2 + $0x90] sm:$0x1] %v433_v4  ;;  %478 = vst [vmem:[#allocation2 + $0xa0] sm:$0xfe] %v435_v6 }
  0x34   : > { %v666_v7 = vpack.c.bf16 %v612_v3, %v606_v50  ;;  %v665_v11 = vpack.c.bf16 %v609_v8, %v603_v59  ;;  %480 = vst [vmem:[#allocation2 + $0xb0] sm:$0x1] %v435_v6  ;;  %v551_v16 = vld [vmem:[#allocation2 + $0x78] sm:$0x1]  ;;  %v616_v17 = vrot.slane %v545_v12, 1  ;;  %v617_v18 = vrot.slane %v547_v13, 1 }
  0x35   : > { %789 = vmatpush2.bf16.msra.mxu0 %v5004_v41  ;;  %920 = vmatpush2.bf16.msra.mxu1 %v5005_v44  ;;  %v622_v19 = vrot.slane %v549_v14, 1  ;;  %v5449_v20 = vld [vmem:[#allocation2 + $0x48] sm:$0xff]  ;;  %v623_v21 = vrot.slane %v551_v16, 1  ;;  %v544_v22 = vld [vmem:[#allocation2 + $0x40] sm:$0xfe]  ;;  %v5012_v57 = vld [vmem:[%s6408_s3 + $0xb0] sm:$0xff]  }
  0x36   : > { %1176 = vmatprep.subr.bf16.mxu0 %v5176_v1  ;;  %4312 = vmatprep.mubr.msk.bf16.mxu0 %vm346_vm0, %v666_v7  ;;  %v546_v23 = vld [vmem:[#allocation2 + $0x50] sm:$0x1]  ;;  %v5451_v24 = vld [vmem:[#allocation2 + $0x68] sm:$0xff]  ;;  %v618_v25 = vsel %vm600_vm4, %v616_v17, %v617_v18  ;;  %v548_v26 = vld [vmem:[#allocation2 + $0x60] sm:$0xfe]  ;;  %v613_v28 = vrot.slane %v544_v22, 1 }
  0x37   : > { %1358 = vmatprep.subr.bf16.mxu1 %v5176_v1  ;;  %v550_v27 = vld [vmem:[#allocation2 + $0x70] sm:$0x1]  ;;  %v614_v29 = vrot.slane %v546_v23, 1  ;;  %v513_v30 = vpack.c.bf16 %v5451_v24, %v5449_v20  ;;  %v624_v31 = vsel %vm600_vm4, %v622_v19, %v623_v21  ;;  %v5009_v32 = vld [vmem:[%s6408_s3 + $0x108] sm:$0xff]   ;;  %v619_v33 = vrot.slane %v548_v26, 1  ;;  %v5461_v35 = vld [vmem:[#allocation2 + $0x40] sm:$0xff] }
  0x38   : > { %791 = vmatmul.mubr.bf16.vlgmr.msra.gmra.mxu0 %v665_v11  ;;  %922 = vmatmul.mubr.bf16.vlgmr.msra.gmra.mxu1 %v510_v9  ;;  %v620_v34 = vrot.slane %v550_v27, 1  ;;  %v5463_v36 = vld [vmem:[#allocation2 + $0x60] sm:$0xff]  ;;  %v668_v37 = vpack.c.bf16 %v624_v31, %v618_v25  ;;  %v553_v43 = vld [vmem:[#allocation2 + $0x88] sm:$0xfe]  ;;  %v555_v44 = vld [vmem:[#allocation2 + $0x98] sm:$0x1] }
  0x39   : > { %1177 = vmatpush1.bf16.msra.mxu0 %v5006_v63  ;;  %1359 = vmatpush1.bf16.msra.mxu1 %v5007_v10  ;;  %v615_v38 = vsel %vm600_vm4, %v613_v28, %v614_v29  ;;  %v512_v41 = vpack.c.bf16 %v5463_v36, %v5461_v35  ;;  %v5011_v42 = vld [vmem:[%s6408_s3 + $0x100] sm:$0xff]   ;;  %v557_v45 = vld [vmem:[#allocation2 + $0xa8] sm:$0xfe]  ;;  %v559_v47 = vld [vmem:[#allocation2 + $0xb8] sm:$0x1]  ;;  %v628_v48 = vrot.slane %v553_v43, 1 }
  0x3a   : > { %1178 = vmatprep.subr.bf16.mxu0 %v5176_v1  ;;  %1360 = vmatprep.subr.bf16.mxu1 %v5176_v1  ;;  %v621_v40 = vsel %vm600_vm4, %v619_v33, %v620_v34  ;;  %v629_v49 = vrot.slane %v555_v44, 1  ;;  %v634_v50 = vrot.slane %v557_v45, 1  ;;  %v5478_v52 = vld [vmem:[#allocation2 + $0x88] sm:$0xff]  ;;  %v635_v53 = vrot.slane %v559_v47, 1  ;;  %v552_v54 = vld [vmem:[#allocation2 + $0x80] sm:$0xfe] }
  0x3b   : > { %4326 = vmatprep.mubr.msk.bf16.mxu1 %vm346_vm0, %v513_v30  ;;  %4313 = vmatprep.mubr.msk.bf16.mxu0 %vm346_vm0, %v668_v37  ;;  %v667_v46 = vpack.c.bf16 %v621_v40, %v615_v38  ;;  %v554_v55 = vld [vmem:[#allocation2 + $0x90] sm:$0x1]  ;;  %v5481_v56 = vld [vmem:[#allocation2 + $0xa8] sm:$0xff]  ;;  %v556_v59 = vld [vmem:[#allocation2 + $0xa0] sm:$0xfe]  ;;  %v625_v61 = vrot.slane %v552_v54, 1 }
  0x3c   : > { %v630_v58 = vsel %vm600_vm4, %v628_v48, %v629_v49  ;;  %v558_v60 = vld [vmem:[#allocation2 + $0xb0] sm:$0x1]  ;;  %v626_v63 = vrot.slane %v554_v55, 1  ;;  %v636_v0 = vsel %vm600_vm4, %v634_v50, %v635_v53  ;;  %v5013_v2 = vld [vmem:[%s6408_s3 + $0xf8] sm:$0xff]   ;;  %v631_v3 = vrot.slane %v556_v59, 1  ;;  %v5494_v7 = vld [vmem:[#allocation2 + $0x80] sm:$0xff] }
  0x3d   : > { %1179 = vmatpush1.bf16.msra.mxu0 %v5008_v15  ;;  %1361 = vmatpush1.bf16.msra.mxu1 %v5009_v32  ;;  %v632_v4 = vrot.slane %v558_v60, 1  ;;  %v515_v6 = vpack.c.bf16 %v5481_v56, %v5478_v52  ;;  %v392_v8 = vld [vmem:[%s5375_s12 + $0x28] sm:$0xff]  ;;  %v670_v9 = vpack.c.bf16 %v636_v0, %v630_v58  ;;  %v393_v11 = vld [vmem:[%s5375_s12 + $0x30] sm:$0xff]  ;;  %v5501_v14 = vld [vmem:[#allocation2 + $0xa0] sm:$0xff]  ;;  %2943 = vst.msk [vmem:[#allocation3] sm:$0xff] %vm2865_vm6, %v5177_v5 }
  0x3e   : > { %1180 = vmatprep.subr.bf16.mxu0 %v5176_v1  ;;  %1362 = vmatprep.subr.bf16.mxu1 %v5176_v1  ;;  %v627_v10 = vsel %vm600_vm4, %v625_v61, %v626_v63  ;;  %v406_v12 = vunpack.c.h.bf16 %v392_v8  ;;  %v408_v15 = vunpack.c.h.bf16 %v393_v11  ;;  %v405_v16 = vunpack.c.l.bf16 %v392_v8  ;;  %v5014_v26 = vld [vmem:[%s6408_s3 + $0xa8] sm:$0xff]   ;;  %v5015_v27 = vld [vmem:[%s6408_s3 + $0xf0] sm:$0xff]   ;;  %v957_v29 = vld [vmem:[#allocation2 + $0x18] sm:$0x3]  ;;  %2946 = vst.msk [vmem:[#allocation3 + $0x10] sm:$0xff] %vm2865_vm6, %v5177_v5 }
  0x3f   : > { %v633_v13 = vsel %vm600_vm4, %v631_v3, %v632_v4  ;;  %v407_v17 = vunpack.c.l.bf16 %v393_v11  ;;  %v514_v25 = vpack.c.bf16 %v5501_v14, %v5494_v7  ;;  %v955_v28 = vld [vmem:[#allocation2 + $0x8] sm:$0xfc]  ;;  %v961_v31 = vld [vmem:[#allocation2 + $0x38] sm:$0x3]  ;;  %v5016_v32 = vld [vmem:[%s6408_s3 + $0xa0] sm:$0xff]   ;;  %v1023_v37 = vrot.slane %v957_v29, 2 }
  0x40   : > { %799 = vmatmul.mubr.bf16.gmra.mxu0 %v667_v46  ;;  %930 = vmatmul.mubr.bf16.gmra.mxu1 %v512_v41  ;;  %v438_v18 = vrot.slane %v406_v12, 7  ;;  %v669_v19 = vpack.c.bf16 %v633_v13, %v627_v10  ;;  %v440_v21 = vrot.slane %v408_v15, 7  ;;  %v437_v22 = vrot.slane %v405_v16, 7  ;;  %v959_v30 = vld [vmem:[#allocation2 + $0x28] sm:$0xfc]  ;;  %v5019_v46 = vld [vmem:[%s6408_s3 + $0xe0] sm:$0xff]  }
  0x41   : > { %1181 = vmatpush1.bf16.msra.mxu0 %v5010_v39  ;;  %1363 = vmatpush1.bf16.msra.mxu1 %v5011_v42  ;;  %v439_v23 = vrot.slane %v407_v17, 7  ;;  %v5017_v33 = vld [vmem:[%s6408_s3 + $0xe8] sm:$0xff]   ;;  %v1022_v34 = vrot.slane %v955_v28, 2  ;;  %v5527_v38 = vld [vmem:[#allocation2] sm:$0xfc]  ;;  %v5018_v39 = vld [vmem:[%s6408_s3 + $0x98] sm:$0xff]   ;;  %v1266_v63 = vpack.c.bf16 %v5449_v20, %v5420_v51 }
  0x42   : > { %1182 = vmatprep.subr.bf16.mxu0 %v5176_v1  ;;  %1364 = vmatprep.subr.bf16.mxu1 %v5176_v1  ;;  %483 = vst.msk [vmem:[#allocation2 + $0xc8] sm:$0xfe] %vm461_vm2, %v438_v18  ;;  %487 = vst.msk [vmem:[#allocation2 + $0xe8] sm:$0xfe] %vm461_vm2, %v440_v21  ;;  %v1028_v40 = vrot.slane %v959_v30, 2  ;;  %v1029_v41 = vrot.slane %v961_v31, 2 }
  0x43   : > { %4314 = vmatprep.mubr.msk.bf16.mxu0 %vm346_vm0, %v670_v9  ;;  %4327 = vmatprep.mubr.msk.bf16.mxu1 %vm346_vm0, %v515_v6  ;;  %485 = vst.msk [vmem:[#allocation2 + $0xd8] sm:$0x1] %vm464_vm3, %v438_v18  ;;  %489 = vst.msk [vmem:[#allocation2 + $0xf8] sm:$0x1] %vm464_vm3, %v440_v21  ;;  %v5533_v42 = vld [vmem:[#allocation2 + $0x10] sm:$0x3]  ;;  %v5543_v61 = vsel %vm1018_vm5, %v1022_v34, %v1023_v37 }
  0x44   : > { %482 = vst [vmem:[#allocation2 + $0xc0] sm:$0xfe] %v437_v22  ;;  %484 = vst [vmem:[#allocation2 + $0xd0] sm:$0x1] %v437_v22  ;;  %v1019_v47 = vrot.slane %v5527_v38, 2  ;;  %v1030_v8 = vsel %vm1018_vm5, %v1028_v40, %v1029_v41  ;;  %v5020_v51 = vld [vmem:[%s6408_s3 + $0x90] sm:$0xff]  }
  0x45   : > { %1183 = vmatpush1.bf16.msra.mxu0 %v5012_v57  ;;  %1365 = vmatpush1.bf16.msra.mxu1 %v5013_v2  ;;  %486 = vst [vmem:[#allocation2 + $0xe0] sm:$0xfe] %v439_v23  ;;  %488 = vst [vmem:[#allocation2 + $0xf0] sm:$0x1] %v439_v23  ;;  %v958_v54 = vld [vmem:[#allocation2 + $0x20] sm:$0xfc]  ;;  %v1084_v28 = vpack.c.bf16 %v1030_v8, %v5543_v61 }
  0x46   : > { %1184 = vmatprep.subr.bf16.mxu0 %v5176_v1  ;;  %1366 = vmatprep.subr.bf16.mxu1 %v5176_v1  ;;  %v960_v55 = vld [vmem:[#allocation2 + $0x30] sm:$0x3]  ;;  %v1020_v20 = vrot.slane %v5533_v42, 2  ;;  %v5021_v21 = vld [vmem:[%s6408_s3 + $0xd8] sm:$0xff]   ;;  %v1025_v23 = vrot.slane %v958_v54, 2  ;;  %2948 = vst.msk [vmem:[#allocation3 + $0x20] sm:$0xff] %vm2865_vm6, %v5177_v5 }
  0x47   : > { %v5023_v29 = vld [vmem:[%s6408_s3 + $0x118] sm:$0xff]   ;;  %v963_v30 = vld [vmem:[#allocation2 + $0x48] sm:$0xfc]  ;;  %2950 = vst.msk [vmem:[#allocation3 + $0x30] sm:$0xff] %vm2865_vm6, %v5177_v5  ;;  %2952 = vst.msk [vmem:[#allocation3 + $0x40] sm:$0xff] %vm2865_vm6, %v5177_v5 }
  0x48   : > { %807 = vmatmul.mubr.bf16.gmra.mxu0 %v669_v19  ;;  %938 = vmatmul.mubr.bf16.gmra.mxu1 %v514_v25  ;;  %v1026_v25 = vrot.slane %v960_v55, 2  ;;  %v965_v31 = vld [vmem:[#allocation2 + $0x58] sm:$0x3]  ;;  %2954 = vst.msk [vmem:[#allocation3 + $0x50] sm:$0xff] %vm2865_vm6, %v5177_v5  ;;  %2956 = vst.msk [vmem:[#allocation3 + $0x60] sm:$0xff] %vm2865_vm6, %v5177_v5 }
  0x49   : > { %1185 = vmatpush1.bf16.msra.mxu0 %v5014_v26  ;;  %1367 = vmatpush1.bf16.msra.mxu1 %v5015_v27  ;;  %v561_v43 = vld [vmem:[#allocation2 + $0xc8] sm:$0xfe]  ;;  %v5022_v27 = vld [vmem:[%s6408_s3 + $0xd0] sm:$0xff]   ;;  %2958 = vst.msk [vmem:[#allocation3 + $0x70] sm:$0xff] %vm2865_vm6, %v5177_v5  ;;  %2960 = vst.msk [vmem:[#allocation3 + $0x80] sm:$0xff] %vm2865_vm6, %v5177_v5  ;;  %v1035_v40 = vrot.slane %v965_v31, 2 }
  0x4a   : > { %1186 = vmatprep.subr.bf16.mxu0 %v5176_v1  ;;  %1368 = vmatprep.subr.bf16.mxu1 %v5176_v1  ;;  %v563_v44 = vld [vmem:[#allocation2 + $0xd8] sm:$0x1]  ;;  %v5535_v45 = vld [vmem:[#allocation2 + $0xc8] sm:$0xff]  ;;  %v640_v50 = vrot.slane %v561_v43, 1  ;;  %2962 = vst.msk [vmem:[#allocation3 + $0x90] sm:$0xff] %vm2865_vm6, %v5177_v5 }
  0x4b   : > { %v565_v48 = vld [vmem:[#allocation2 + $0xe8] sm:$0xfe]  ;;  %v567_v49 = vld [vmem:[#allocation2 + $0xf8] sm:$0x1]  ;;  %v641_v53 = vrot.slane %v563_v44, 1  ;;  %v5553_v13 = vld [vmem:[#allocation2 + $0xc0] sm:$0xff] }
  0x4c   : > { %v646_v57 = vrot.slane %v565_v48, 1  ;;  %v647_v58 = vrot.slane %v567_v49, 1  ;;  %v560_v59 = vld [vmem:[#allocation2 + $0xc0] sm:$0xfe]  ;;  %v562_v60 = vld [vmem:[#allocation2 + $0xd0] sm:$0x1] }
  0x4d   : > { %1187 = vmatpush1.bf16.msra.mxu0 %v5016_v32  ;;  %1369 = vmatpush1.bf16.msra.mxu1 %v5017_v33  ;;  %v642_v0 = vsel %vm600_vm4, %v640_v50, %v641_v53  ;;  %v564_v2 = vld [vmem:[#allocation2 + $0xe0] sm:$0xfe]  ;;  %v566_v3 = vld [vmem:[#allocation2 + $0xf0] sm:$0x1]  ;;  %v637_v4 = vrot.slane %v560_v59, 1  ;;  %v638_v6 = vrot.slane %v562_v60, 1  ;;  %v1021_v32 = vsel %vm1018_vm5, %v1019_v47, %v1020_v20 }
  0x4e   : > { %1188 = vmatprep.subr.bf16.mxu0 %v5176_v1  ;;  %1370 = vmatprep.subr.bf16.mxu1 %v5176_v1  ;;  %v648_v9 = vsel %vm600_vm4, %v646_v57, %v647_v58  ;;  %v643_v10 = vrot.slane %v564_v2, 1  ;;  %v644_v11 = vrot.slane %v566_v3, 1  ;;  %v5551_v12 = vld [vmem:[#allocation2 + $0xe8] sm:$0xff]  ;;  %v5555_v15 = vld [vmem:[#allocation2 + $0xe0] sm:$0xff]  ;;  %v1027_v33 = vsel %vm1018_vm5, %v1025_v23, %v1026_v25  ;;  %v969_v37 = vld [vmem:[#allocation2 + $0x78] sm:$0x3] }
  0x4f   : > { %v672_v16 = vpack.c.bf16 %v648_v9, %v642_v0  ;;  %v639_v17 = vsel %vm600_vm4, %v637_v4, %v638_v6  ;;  %v517_v18 = vpack.c.bf16 %v5551_v12, %v5535_v45  ;;  %v516_v19 = vpack.c.bf16 %v5555_v15, %v5553_v13  ;;  %v967_v34 = vld [vmem:[#allocation2 + $0x68] sm:$0xfc]  ;;  %v962_v5 = vld [vmem:[#allocation2 + $0x40] sm:$0xfc]  ;;  %v964_v38 = vld [vmem:[#allocation2 + $0x50] sm:$0x3] }
  0x50   : > { %v645_v22 = vsel %vm600_vm4, %v643_v10, %v644_v11  ;;  %v1040_v41 = vrot.slane %v967_v34, 2  ;;  %v1041_v42 = vrot.slane %v969_v37, 2  ;;  %v1083_v43 = vpack.c.bf16 %v1027_v33, %v1021_v32  ;;  %v5024_v44 = vld [vmem:[%s6408_s3 + $0x158] sm:$0xff]   ;;  %v966_v47 = vld [vmem:[#allocation2 + $0x60] sm:$0xfc] }
  0x51   : > { %1189 = vmatpush1.bf16.msra.mxu0 %v5018_v39  ;;  %1371 = vmatpush1.bf16.msra.mxu1 %v5019_v46  ;;  %v671_v26 = vpack.c.bf16 %v645_v22, %v639_v17  ;;  %v1034_v39 = vrot.slane %v963_v30, 2  ;;  %v1265_v46 = vpack.c.bf16 %v5461_v35, %v5426_v62  ;;  %v968_v48 = vld [vmem:[#allocation2 + $0x70] sm:$0x3]  ;;  %v1031_v49 = vrot.slane %v962_v5, 2  ;;  %v5025_v58 = vld [vmem:[%s6408_s3 + $0x1a0] sm:$0xff]   ;;  %v5027_v59 = vld [vmem:[%s6408_s3 + $0x198] sm:$0xff]  }
  0x52   : > { %1190 = vmatprep.subr.bf16.mxu0 %v5176_v1  ;;  %4315 = vmatprep.mubr.msk.bf16.mxu0 %vm346_vm0, %v672_v16  ;;  %v1032_v50 = vrot.slane %v964_v38, 2  ;;  %v1042_v54 = vsel %vm1018_vm5, %v1040_v41, %v1041_v42  ;;  %v1037_v55 = vrot.slane %v966_v47, 2  ;;  %v1038_v57 = vrot.slane %v968_v48, 2  ;;  %v5026_v62 = vld [vmem:[%s6408_s3 + $0x150] sm:$0xff]   ;;  %v971_v61 = vld [vmem:[#allocation2 + $0x88] sm:$0xfc] }
  0x53   : > { %4328 = vmatprep.mubr.msk.bf16.mxu1 %vm346_vm0, %v517_v18  ;;  %1372 = vmatprep.subr.bf16.mxu1 %v5176_v1  ;;  %v1036_v53 = vsel %vm1018_vm5, %v1034_v39, %v1035_v40  ;;  %v1268_v60 = vpack.c.bf16 %v5478_v52, %v5451_v24  ;;  %v975_v3 = vld [vmem:[#allocation2 + $0xa8] sm:$0xfc]  ;;  %v977_v4 = vld [vmem:[#allocation2 + $0xb8] sm:$0x3]  ;;  %v1046_v6 = vrot.slane %v971_v61, 2  ;;  %v1267_v20 = vpack.c.bf16 %v5494_v7, %v5463_v36  ;;  %v5030_v36 = vld [vmem:[%s6408_s3 + $0x140] sm:$0xff]  }
  0x54   : > { %946 = vmatmul.mubr.bf16.gmra.mxu1 %v516_v19  ;;  %815 = vmatmul.mubr.bf16.gmra.mxu0 %v671_v26  ;;  %v1086_v35 = vpack.c.bf16 %v1042_v54, %v1036_v53  ;;  %v1033_v0 = vsel %vm1018_vm5, %v1031_v49, %v1032_v50  ;;  %v1039_v2 = vsel %vm1018_vm5, %v1037_v55, %v1038_v57  ;;  %v1052_v9 = vrot.slane %v975_v3, 2  ;;  %v970_v24 = vld [vmem:[#allocation2 + $0x80] sm:$0xfc]  ;;  %v972_v52 = vld [vmem:[#allocation2 + $0x90] sm:$0x3]  ;;  %v5032_v5 = vld [vmem:[%s6408_s3 + $0x138] sm:$0xff]  }
  0x55   : > { %4387 = vmatprep.mubr.msk.bf16.mxu1 %vm346_vm0, %v1266_v63  ;;  %1191 = vmatpush1.bf16.msra.mxu0 %v5020_v51  ;;  %v973_v63 = vld [vmem:[#allocation2 + $0x98] sm:$0x3]  ;;  %v1053_v10 = vrot.slane %v977_v4, 2  ;;  %v1085_v11 = vpack.c.bf16 %v1039_v2, %v1033_v0  ;;  %v5028_v51 = vld [vmem:[%s6408_s3 + $0x148] sm:$0xff]   ;;  %v974_v16 = vld [vmem:[#allocation2 + $0xa0] sm:$0xfc]  ;;  %v1269_v38 = vpack.c.bf16 %v5553_v13, %v5501_v14 }
  0x56   : > { %1373 = vmatpush1.bf16.msra.mxu1 %v5021_v21  ;;  %1206 = vmatprep.subr.bf16.mxu0 %v5176_v1  ;;  %v1047_v8 = vrot.slane %v973_v63, 2  ;;  %v976_v17 = vld [vmem:[#allocation2 + $0xb0] sm:$0x3]  ;;  %v1043_v18 = vrot.slane %v970_v24, 2  ;;  %v1044_v19 = vrot.slane %v972_v52, 2  ;;  %v1049_v23 = vrot.slane %v974_v16, 2 }
  0x57   : > { %1388 = vmatprep.subr.bf16.mxu1 %v5176_v1  ;;  %4356 = vmatprep.mubr.msk.bf16.mxu0 %vm346_vm0, %v1084_v28  ;;  %v1054_v22 = vsel %vm1018_vm5, %v1052_v9, %v1053_v10  ;;  %v1050_v25 = vrot.slane %v976_v17, 2  ;;  %v5029_v26 = vld [vmem:[%s6408_s3 + $0x190] sm:$0xff]   ;;  %v1270_v28 = vpack.c.bf16 %v5535_v45, %v5481_v56  ;;  %v981_v30 = vld [vmem:[#allocation2 + $0xd8] sm:$0x3]  ;;  %v983_v33 = vld [vmem:[#allocation2 + $0xe8] sm:$0xfc] }
  0x58   : > { %v1048_v21 = vsel %vm1018_vm5, %v1046_v6, %v1047_v8  ;;  %v1045_v31 = vsel %vm1018_vm5, %v1043_v18, %v1044_v19  ;;  %v985_v34 = vld [vmem:[#allocation2 + $0xf8] sm:$0x3]  ;;  %v1059_v39 = vrot.slane %v981_v30, 2  ;;  %v1064_v40 = vrot.slane %v983_v33, 2  ;;  %v978_v56 = vld [vmem:[#allocation2 + $0xc0] sm:$0xfc] }
  0x59   : > { %1207 = vmatpush2.bf16.msra.mxu0 %v5022_v27  ;;  %v1088_v7 = vpack.c.bf16 %v1054_v22, %v1048_v21  ;;  %v5031_v27 = vld [vmem:[%s6408_s3 + $0x188] sm:$0xff]   ;;  %v1051_v32 = vsel %vm1018_vm5, %v1049_v23, %v1050_v25  ;;  %v1065_v41 = vrot.slane %v985_v34, 2  ;;  %v980_v45 = vld [vmem:[#allocation2 + $0xd0] sm:$0x3]  ;;  %v1055_v48 = vrot.slane %v978_v56, 2  ;;  %v394_v55 = vld [vmem:[%s5375_s12 + $0x38] sm:$0xff] }
  0x5a   : > { %1389 = vmatpush2.bf16.msra.mxu1 %v5023_v29  ;;  %1652 = vmatprep.subr.bf16.mxu0 %v5176_v1  ;;  %v979_v29 = vld [vmem:[#allocation2 + $0xc8] sm:$0xfc]  ;;  %v1087_v42 = vpack.c.bf16 %v1051_v32, %v1045_v31  ;;  %v984_v47 = vld [vmem:[#allocation2 + $0xf0] sm:$0x3]  ;;  %v1056_v50 = vrot.slane %v980_v45, 2  ;;  %v410_v57 = vunpack.c.h.bf16 %v394_v55  ;;  %v5038_v25 = vld [vmem:[%s6408_s3 + $0x120] sm:$0xff]  }
  0x5b   : > { %1946 = vmatprep.subr.bf16.mxu1 %v5176_v1  ;;  %v1058_v37 = vrot.slane %v979_v29, 2  ;;  %v1066_v49 = vsel %vm1018_vm5, %v1064_v40, %v1065_v41  ;;  %v1062_v54 = vrot.slane %v984_v47, 2  ;;  %v5034_v14 = vld [vmem:[%s6408_s3 + $0x130] sm:$0xff]   ;;  %v1432_v63 = vld [vmem:[#allocation2 + $0x28] sm:$0xfe] }
  0x5c   : > { %1209 = vmatmul.mubr.bf16.vlgmr.msra.gmra.mxu0 %v1083_v43  ;;  %v5033_v43 = vld [vmem:[%s6408_s3 + $0x180] sm:$0xff]   ;;  %v1434_v0 = vld [vmem:[#allocation2 + $0x38] sm:$0x1]  ;;  %v1436_v2 = vld [vmem:[#allocation2 + $0x48] sm:$0xfe]  ;;  %v1498_v4 = vrot.slane %v1432_v63, 1 }
  0x5d   : > { %1391 = vmatmul.mubr.bf16.vlgmr.msra.gmra.mxu1 %v1265_v46  ;;  %1653 = vmatpush1.bf16.msra.mxu0 %v5024_v44  ;;  %v1060_v44 = vsel %vm1018_vm5, %v1058_v37, %v1059_v39  ;;  %v982_v46 = vld [vmem:[#allocation2 + $0xe0] sm:$0xfc]  ;;  %v1438_v3 = vld [vmem:[#allocation2 + $0x58] sm:$0x1]  ;;  %v1499_v6 = vrot.slane %v1434_v0, 1  ;;  %v1504_v8 = vrot.slane %v1436_v2, 1 }
  0x5e   : > { %1947 = vmatpush1.bf16.msra.mxu1 %v5025_v58  ;;  %1654 = vmatprep.subr.bf16.mxu0 %v5176_v1  ;;  %v1061_v53 = vrot.slane %v982_v46, 2  ;;  %v409_v58 = vunpack.c.l.bf16 %v394_v55  ;;  %v1090_v13 = vpack.c.bf16 %v1066_v49, %v1060_v44  ;;  %v1505_v9 = vrot.slane %v1438_v3, 1  ;;  %v5036_v24 = vld [vmem:[%s6408_s3 + $0x128] sm:$0xff]   ;;  %v1435_v17 = vld [vmem:[#allocation2 + $0x40] sm:$0xfe]  ;;  %v5043_v0 = vld [vmem:[%s6408_s3 + $0x230] sm:$0xff]  }
  0x5f   : > { %1948 = vmatprep.subr.bf16.mxu1 %v5176_v1  ;;  %4357 = vmatprep.mubr.msk.bf16.mxu0 %vm346_vm0, %v1086_v35  ;;  %v1500_v52 = vsel %vm600_vm4, %v1498_v4, %v1499_v6  ;;  %v1437_v18 = vld [vmem:[#allocation2 + $0x50] sm:$0x1]  ;;  %v1726_v22 = vld [vmem:[#allocation2 + $0x28] sm:$0xfc]  ;;  %v1728_v23 = vld [vmem:[#allocation2 + $0x38] sm:$0x3] }
  0x60   : > { %4388 = vmatprep.mubr.msk.bf16.mxu1 %vm346_vm0, %v1268_v60  ;;  %v441_v35 = vrot.slane %v409_v58, 7  ;;  %v1057_v60 = vsel %vm1018_vm5, %v1055_v48, %v1056_v50  ;;  %v1063_v61 = vsel %vm1018_vm5, %v1061_v53, %v1062_v54  ;;  %v1506_v16 = vsel %vm600_vm4, %v1504_v8, %v1505_v9  ;;  %v1725_v41 = vld [vmem:[#allocation2 + $0x20] sm:$0xfc]  ;;  %v5041_v47 = vld [vmem:[%s6408_s3 + $0x1a8] sm:$0xff]   ;;  %v1442_v55 = vld [vmem:[#allocation2 + $0x78] sm:$0x1] }
  0x61   : > { %1655 = vmatpush1.bf16.msra.mxu0 %v5026_v62  ;;  %v442_v62 = vrot.slane %v410_v57, 7  ;;  %v1089_v10 = vpack.c.bf16 %v1063_v61, %v1057_v60  ;;  %v1793_v29 = vrot.slane %v1728_v23, 2  ;;  %v1501_v39 = vrot.slane %v1435_v17, 1  ;;  %v1440_v54 = vld [vmem:[#allocation2 + $0x68] sm:$0xfe] }
  0x62   : > { %1949 = vmatpush1.bf16.msra.mxu1 %v5027_v59  ;;  %1656 = vmatprep.subr.bf16.mxu0 %v5176_v1  ;;  %v5035_v59 = vld [vmem:[%s6408_s3 + $0x178] sm:$0xff]   ;;  %490 = vst [vmem:[#allocation2 + $0x100] sm:$0xfe] %v441_v35  ;;  %492 = vst [vmem:[#allocation2 + $0x110] sm:$0x1] %v441_v35  ;;  %v1502_v40 = vrot.slane %v1437_v18, 1 }
  0x63   : > { %1950 = vmatprep.subr.bf16.mxu1 %v5176_v1  ;;  %491 = vst.msk [vmem:[#allocation2 + $0x108] sm:$0xfe] %vm461_vm2, %v442_v62  ;;  %v1444_v58 = vld [vmem:[#allocation2 + $0x88] sm:$0xfe]  ;;  %v1439_v3 = vld [vmem:[#allocation2 + $0x60] sm:$0xfe] }
  0x64   : > { %1217 = vmatmul.mubr.bf16.gmra.mxu0 %v1085_v11  ;;  %493 = vst.msk [vmem:[#allocation2 + $0x118] sm:$0x1] %vm464_vm3, %v442_v62  ;;  %v1431_v11 = vld [vmem:[#allocation2 + $0x20] sm:$0xfe]  ;;  %v1503_v50 = vsel %vm600_vm4, %v1501_v39, %v1502_v40  ;;  %v1511_v62 = vrot.slane %v1442_v55, 1  ;;  %v5042_v35 = vld [vmem:[%s6408_s3 + $0x1e8] sm:$0xff]  }
  0x65   : > { %1399 = vmatmul.mubr.bf16.gmra.mxu1 %v1267_v20  ;;  %1657 = vmatpush1.bf16.msra.mxu0 %v5028_v51  ;;  %v1433_v51 = vld [vmem:[#allocation2 + $0x30] sm:$0x1]  ;;  %v1495_v19 = vrot.slane %v1431_v11, 1  ;;  %v1443_v8 = vld [vmem:[#allocation2 + $0x80] sm:$0xfe] }
  0x66   : > { %1951 = vmatpush1.bf16.msra.mxu1 %v5029_v26  ;;  %1658 = vmatprep.subr.bf16.mxu0 %v5176_v1  ;;  %v5037_v20 = vld [vmem:[%s6408_s3 + $0x170] sm:$0xff]   ;;  %v1496_v21 = vrot.slane %v1433_v51, 1  ;;  %v5039_v26 = vld [vmem:[%s6408_s3 + $0x168] sm:$0xff]  }
  0x67   : > { %1952 = vmatprep.subr.bf16.mxu1 %v5176_v1  ;;  %4358 = vmatprep.mubr.msk.bf16.mxu0 %vm346_vm0, %v1088_v7  ;;  %v1730_v7 = vld [vmem:[#allocation2 + $0x48] sm:$0xfc]  ;;  %v1441_v4 = vld [vmem:[#allocation2 + $0x70] sm:$0x1] }
  0x68   : > { %4389 = vmatprep.mubr.msk.bf16.mxu1 %vm346_vm0, %v1270_v28  ;;  %v1792_v28 = vrot.slane %v1726_v22, 2  ;;  %v1798_v32 = vrot.slane %v1730_v7, 2  ;;  %v1497_v49 = vsel %vm600_vm4, %v1495_v19, %v1496_v21  ;;  %v1445_v9 = vld [vmem:[#allocation2 + $0x90] sm:$0x1]  ;;  %v1734_v51 = vld [vmem:[#allocation2 + $0x68] sm:$0xfc] }
  0x69   : > { %1659 = vmatpush1.bf16.msra.mxu0 %v5030_v36  ;;  %v1560_v36 = vpack.c.bf16 %v1506_v16, %v1500_v52  ;;  %v5705_v31 = vld [vmem:[#allocation2 + $0x100] sm:$0xff]  ;;  %v1559_v61 = vpack.c.bf16 %v1503_v50, %v1497_v49  ;;  %v1513_v52 = vrot.slane %v1443_v8, 1  ;;  %v1514_v11 = vrot.slane %v1445_v9, 1  ;;  %v1738_v18 = vld [vmem:[#allocation2 + $0x88] sm:$0xfc]  ;;  %v5048_v50 = vld [vmem:[%s6408_s3 + $0x1d0] sm:$0xff]  }
  0x6a   : > { %1953 = vmatpush1.bf16.msra.mxu1 %v5031_v27  ;;  %1660 = vmatprep.subr.bf16.mxu0 %v5176_v1  ;;  %v1732_v27 = vld [vmem:[#allocation2 + $0x58] sm:$0x3]  ;;  %v5703_v30 = vld [vmem:[#allocation2 + $0x108] sm:$0xff]  ;;  %v1271_v37 = vpack.c.bf16 %v5705_v31, %v5555_v15  ;;  %v1794_v56 = vsel %vm1018_vm5, %v1792_v28, %v1793_v29  ;;  %v5044_v16 = vld [vmem:[%s6408_s3 + $0x1e0] sm:$0xff]   ;;  %v1804_v21 = vrot.slane %v1734_v51, 2  ;;  %v1810_v23 = vrot.slane %v1738_v18, 2 }
  0x6b   : > { %1954 = vmatprep.subr.bf16.mxu1 %v5176_v1  ;;  %v1799_v33 = vrot.slane %v1732_v27, 2  ;;  %v1272_v34 = vpack.c.bf16 %v5703_v30, %v5551_v12  ;;  %v5040_v12 = vld [vmem:[%s6408_s3 + $0x160] sm:$0xff]   ;;  %v1740_v19 = vld [vmem:[#allocation2 + $0x98] sm:$0x3]  ;;  %v1515_v7 = vsel %vm600_vm4, %v1513_v52, %v1514_v11  ;;  %v1735_v29 = vld [vmem:[#allocation2 + $0x70] sm:$0x3] }
  0x6c   : > { %1225 = vmatmul.mubr.bf16.gmra.mxu0 %v1087_v42  ;;  %v1727_v42 = vld [vmem:[#allocation2 + $0x30] sm:$0x3]  ;;  %v1733_v28 = vld [vmem:[#allocation2 + $0x60] sm:$0xfc]  ;;  %v1802_v39 = vrot.slane %v1735_v29, 2 }
  0x6d   : > { %1407 = vmatmul.mubr.bf16.gmra.mxu1 %v1269_v38  ;;  %1661 = vmatpush1.bf16.msra.mxu0 %v5032_v5  ;;  %v1800_v45 = vsel %vm1018_vm5, %v1798_v32, %v1799_v33  ;;  %v1729_v5 = vld [vmem:[#allocation2 + $0x40] sm:$0xfc]  ;;  %v1731_v38 = vld [vmem:[#allocation2 + $0x50] sm:$0x3]  ;;  %v1790_v44 = vrot.slane %v1727_v42, 2  ;;  %v5046_v42 = vld [vmem:[%s6408_s3 + $0x1d8] sm:$0xff]  }
  0x6e   : > { %1955 = vmatpush1.bf16.msra.mxu1 %v5033_v43  ;;  %1662 = vmatprep.subr.bf16.mxu0 %v5176_v1  ;;  %v1854_v15 = vpack.c.bf16 %v1800_v45, %v1794_v56  ;;  %v1789_v43 = vrot.slane %v1725_v41, 2  ;;  %v1795_v46 = vrot.slane %v1729_v5, 2  ;;  %v1796_v48 = vrot.slane %v1731_v38, 2  ;;  %v1737_v33 = vld [vmem:[#allocation2 + $0x80] sm:$0xfc] }
  0x6f   : > { %1956 = vmatprep.subr.bf16.mxu1 %v5176_v1  ;;  %4359 = vmatprep.mubr.msk.bf16.mxu0 %vm346_vm0, %v1090_v13  ;;  %v1510_v13 = vrot.slane %v1440_v54, 1  ;;  %v1807_v41 = vrot.slane %v1737_v33, 2  ;;  %v1748_v8 = vld [vmem:[#allocation2 + $0xd8] sm:$0x3]  ;;  %v1743_v18 = vld [vmem:[#allocation2 + $0xb0] sm:$0x3] }
  0x70   : > { %4390 = vmatprep.mubr.msk.bf16.mxu1 %vm346_vm0, %v1272_v34  ;;  %v1791_v53 = vsel %vm1018_vm5, %v1789_v43, %v1790_v44  ;;  %v1797_v57 = vsel %vm1018_vm5, %v1795_v46, %v1796_v48  ;;  %v1739_v34 = vld [vmem:[#allocation2 + $0x90] sm:$0x3]  ;;  %v1450_v43 = vld [vmem:[#allocation2 + $0xb8] sm:$0x1]  ;;  %v1452_v46 = vld [vmem:[#allocation2 + $0xc8] sm:$0xfe] }
  0x71   : > { %1663 = vmatpush1.bf16.msra.mxu0 %v5034_v14  ;;  %v1446_v14 = vld [vmem:[#allocation2 + $0x98] sm:$0x1]  ;;  %v1853_v63 = vpack.c.bf16 %v1797_v57, %v1791_v53  ;;  %v1512_v2 = vsel %vm600_vm4, %v1510_v13, %v1511_v62  ;;  %v1808_v56 = vrot.slane %v1739_v34, 2  ;;  %v1523_v49 = vrot.slane %v1450_v43, 1  ;;  %v1451_v62 = vld [vmem:[#allocation2 + $0xc0] sm:$0xfe] }
  0x72   : > { %1957 = vmatpush1.bf16.msra.mxu1 %v5035_v59  ;;  %1664 = vmatprep.subr.bf16.mxu0 %v5176_v1  ;;  %v1516_v59 = vrot.slane %v1444_v58, 1  ;;  %v1517_v60 = vrot.slane %v1446_v14, 1  ;;  %v1528_v53 = vrot.slane %v1452_v46, 1  ;;  %v5049_v57 = vld [vmem:[%s6408_s3 + $0x218] sm:$0xff]   ;;  %v1447_v58 = vld [vmem:[#allocation2 + $0xa0] sm:$0xfe] }
  0x73   : > { %1958 = vmatprep.subr.bf16.mxu1 %v5176_v1  ;;  %v1809_v38 = vsel %vm1018_vm5, %v1807_v41, %v1808_v56  ;;  %v1449_v14 = vld [vmem:[#allocation2 + $0xb0] sm:$0x1]  ;;  %v1823_v11 = vrot.slane %v1748_v8, 2  ;;  %v1456_v33 = vld [vmem:[#allocation2 + $0xe8] sm:$0xfe] }
  0x74   : > { %1233 = vmatmul.mubr.bf16.gmra.mxu0 %v1089_v10  ;;  %v1518_v6 = vsel %vm600_vm4, %v1516_v59, %v1517_v60  ;;  %v1507_v10 = vrot.slane %v1439_v3, 1  ;;  %v1519_v59 = vrot.slane %v1447_v58, 1  ;;  %v1520_v60 = vrot.slane %v1449_v14, 1  ;;  %v1744_v3 = vld [vmem:[#allocation2 + $0xb8] sm:$0x3] }
  0x75   : > { %1665 = vmatpush1.bf16.msra.mxu0 %v5036_v24  ;;  %4418 = vmatprep.mubr.msk.bf16.mxu0 %vm346_vm0, %v1560_v36  ;;  %v1508_v24 = vrot.slane %v1441_v4, 1  ;;  %v1562_v17 = vpack.c.bf16 %v1518_v6, %v1512_v2  ;;  %v1742_v2 = vld [vmem:[#allocation2 + $0xa8] sm:$0xfc]  ;;  %v1458_v34 = vld [vmem:[#allocation2 + $0xf8] sm:$0x1]  ;;  %v1534_v41 = vrot.slane %v1456_v33, 1 }
  0x76   : > { %1959 = vmatpush1.bf16.msra.mxu1 %v5037_v20  ;;  %1666 = vmatprep.subr.bf16.mxu0 %v5176_v1  ;;  %v1736_v20 = vld [vmem:[#allocation2 + $0x78] sm:$0x3]  ;;  %v1521_v4 = vsel %vm600_vm4, %v1519_v59, %v1520_v60  ;;  %v1746_v6 = vld [vmem:[#allocation2 + $0xc8] sm:$0xfc]  ;;  %v1816_v9 = vrot.slane %v1742_v2, 2  ;;  %v1535_v56 = vrot.slane %v1458_v34, 1 }
  0x77   : > { %1960 = vmatprep.subr.bf16.mxu1 %v5176_v1  ;;  %1415 = vmatmul.mubr.bf16.gmra.mxu1 %v1271_v37  ;;  %v1805_v22 = vrot.slane %v1736_v20, 2  ;;  %v1509_v36 = vsel %vm600_vm4, %v1507_v10, %v1508_v24  ;;  %v1801_v37 = vrot.slane %v1733_v28, 2  ;;  %v1817_v10 = vrot.slane %v1744_v3, 2  ;;  %v5051_v28 = vld [vmem:[%s6408_s3 + $0x210] sm:$0xff]   ;;  %v1754_v58 = vld [vmem:[#allocation2 + $0x108] sm:$0xfc] }
  0x78   : > { %4449 = vmatprep.mubr.msk.bf16.mxu1 %vm346_vm0, %v1854_v15  ;;  %v1561_v45 = vpack.c.bf16 %v1515_v7, %v1509_v36  ;;  %v1448_v15 = vld [vmem:[#allocation2 + $0xa8] sm:$0xfe]  ;;  %v1822_v52 = vrot.slane %v1746_v6, 2  ;;  %v1461_v46 = vld [vmem:[#allocation2 + $0x110] sm:$0x1]  ;;  %v1834_v59 = vrot.slane %v1754_v58, 2 }
  0x79   : > { %1667 = vmatpush1.bf16.msra.mxu0 %v5038_v25  ;;  %v1811_v25 = vrot.slane %v1740_v19, 2  ;;  %v1806_v27 = vsel %vm1018_vm5, %v1804_v21, %v1805_v22  ;;  %v1803_v5 = vsel %vm1018_vm5, %v1801_v37, %v1802_v39  ;;  %v1522_v48 = vrot.slane %v1448_v15, 1  ;;  %v1745_v21 = vld [vmem:[#allocation2 + $0xc0] sm:$0xfc]  ;;  %v1747_v22 = vld [vmem:[#allocation2 + $0xd0] sm:$0x3] }
  0x7a   : > { %1961 = vmatpush1.bf16.msra.mxu1 %v5039_v26  ;;  %1682 = vmatprep.subr.bf16.mxu0 %v5176_v1  ;;  %v5045_v26 = vld [vmem:[%s6408_s3 + $0x228] sm:$0xff]   ;;  %v1855_v44 = vpack.c.bf16 %v1809_v38, %v1803_v5  ;;  %v1818_v20 = vsel %vm1018_vm5, %v1816_v9, %v1817_v10  ;;  %v1824_v19 = vsel %vm1018_vm5, %v1822_v52, %v1823_v11  ;;  %v1819_v36 = vrot.slane %v1745_v21, 2  ;;  %v1457_v15 = vld [vmem:[#allocation2 + $0xf0] sm:$0x1]  ;;  %v1756_v14 = vld [vmem:[#allocation2 + $0x118] sm:$0x3] }
  0x7b   : > { %1976 = vmatprep.subr.bf16.mxu1 %v5176_v1  ;;  %v1812_v32 = vsel %vm1018_vm5, %v1810_v23, %v1811_v25  ;;  %v1524_v55 = vsel %vm600_vm4, %v1522_v48, %v1523_v49  ;;  %v1814_v25 = vrot.slane %v1743_v18, 2  ;;  %v1820_v7 = vrot.slane %v1747_v22, 2  ;;  %v1460_v39 = vld [vmem:[#allocation2 + $0x108] sm:$0xfe]  ;;  %v1749_v2 = vld [vmem:[#allocation2 + $0xe0] sm:$0xfc] }
  0x7c   : > { %v1856_v40 = vpack.c.bf16 %v1812_v32, %v1806_v27  ;;  %v5052_v32 = vld [vmem:[%s6408_s3 + $0x1c0] sm:$0xff]   ;;  %v1536_v5 = vsel %vm600_vm4, %v1534_v41, %v1535_v56  ;;  %v5053_v38 = vld [vmem:[%s6408_s3 + $0x208] sm:$0xff]   ;;  %v1532_v48 = vrot.slane %v1457_v15, 1  ;;  %v1835_v60 = vrot.slane %v1756_v14, 2  ;;  %v1751_v3 = vld [vmem:[#allocation2 + $0xf0] sm:$0x3] }
  0x7d   : > { %1683 = vmatpush2.bf16.msra.mxu0 %v5040_v12  ;;  %v5047_v12 = vld [vmem:[%s6408_s3 + $0x220] sm:$0xff]   ;;  %v1821_v29 = vsel %vm1018_vm5, %v1819_v36, %v1820_v7  ;;  %v1755_v8 = vld [vmem:[#allocation2 + $0x110] sm:$0x3]  ;;  %v1825_v9 = vrot.slane %v1749_v2, 2  ;;  %v1826_v10 = vrot.slane %v1751_v3, 2  ;;  %v2021_v22 = vld [vmem:[#allocation2 + $0x48] sm:$0xff] }
  0x7e   : > { %1977 = vmatpush2.bf16.msra.mxu1 %v5041_v47  ;;  %2129 = vmatprep.subr.bf16.mxu0 %v5176_v1  ;;  %v1454_v47 = vld [vmem:[#allocation2 + $0xd8] sm:$0x1]  ;;  %v1753_v6 = vld [vmem:[#allocation2 + $0x100] sm:$0xfc]  ;;  %v1832_v11 = vrot.slane %v1755_v8, 2  ;;  %v5058_v21 = vld [vmem:[%s6408_s3 + $0x1f0] sm:$0xff]  }
  0x7f   : > { %2423 = vmatprep.subr.bf16.mxu1 %v5176_v1  ;;  %v1529_v54 = vrot.slane %v1454_v47, 1  ;;  %v1831_v52 = vrot.slane %v1753_v6, 2  ;;  %v2020_v36 = vld [vmem:[#allocation2 + $0x40] sm:$0xff]  ;;  %v2209_v33 = vld [vmem:[#allocation2 + $0x78] sm:$0x1]  ;;  %v5062_v3 = vld [vmem:[%s6408_s3 + $0x268] sm:$0xff]  }
  0x80   : > { %1685 = vmatmul.mubr.bf16.vlgmr.msra.gmra.mxu0 %v1559_v61  ;;  %v2022_v7 = vld [vmem:[#allocation2 + $0x60] sm:$0xff]  ;;  %v5060_v41 = vld [vmem:[%s6408_s3 + $0x278] sm:$0xff]   ;;  %v2211_v58 = vld [vmem:[#allocation2 + $0x88] sm:$0xfe] }
  0x81   : > { %1979 = vmatmul.mubr.bf16.vlgmr.msra.gmra.mxu1 %v1853_v63  ;;  %2130 = vmatpush1.bf16.msra.mxu0 %v5042_v35  ;;  %v1530_v13 = vsel %vm600_vm4, %v1528_v53, %v1529_v54  ;;  %v1453_v35 = vld [vmem:[#allocation2 + $0xd0] sm:$0x1]  ;;  %v1525_v63 = vrot.slane %v1451_v62, 1  ;;  %v1538_v53 = vrot.slane %v1461_v46, 1  ;;  %v1750_v54 = vld [vmem:[#allocation2 + $0xe8] sm:$0xfc] }
  0x82   : > { %2424 = vmatpush1.bf16.msra.mxu1 %v5043_v0  ;;  %2131 = vmatprep.subr.bf16.mxu0 %v5176_v1  ;;  %v1564_v61 = vpack.c.bf16 %v1530_v13, %v1524_v55  ;;  %v1526_v0 = vrot.slane %v1453_v35, 1  ;;  %v1752_v55 = vld [vmem:[#allocation2 + $0xf8] sm:$0x3]  ;;  %v1828_v13 = vrot.slane %v1750_v54, 2  ;;  %v2202_v56 = vld [vmem:[#allocation2 + $0x40] sm:$0xfe] }
  0x83   : > { %2425 = vmatprep.subr.bf16.mxu1 %v5176_v1  ;;  %4419 = vmatprep.mubr.msk.bf16.mxu0 %vm346_vm0, %v1562_v17  ;;  %v1741_v17 = vld [vmem:[#allocation2 + $0xa0] sm:$0xfc]  ;;  %v1829_v62 = vrot.slane %v1752_v55, 2  ;;  %v2212_v8 = vld [vmem:[#allocation2 + $0x90] sm:$0x1] }
  0x84   : > { %4450 = vmatprep.mubr.msk.bf16.mxu1 %vm346_vm0, %v1856_v40  ;;  %v1527_v24 = vsel %vm600_vm4, %v1525_v63, %v1526_v0  ;;  %v1813_v23 = vrot.slane %v1741_v17, 2  ;;  %v1462_v40 = vld [vmem:[#allocation2 + $0x118] sm:$0x1]  ;;  %v5056_v17 = vld [vmem:[%s6408_s3 + $0x1b0] sm:$0xff]   ;;  %v2024_v55 = vld [vmem:[#allocation2 + $0x80] sm:$0xff] }
  0x85   : > { %2132 = vmatpush1.bf16.msra.mxu0 %v5044_v16  ;;  %v1563_v51 = vpack.c.bf16 %v1527_v24, %v1521_v4  ;;  %v5050_v16 = vld [vmem:[%s6408_s3 + $0x1c8] sm:$0xff]   ;;  %v1830_v63 = vsel %vm1018_vm5, %v1828_v13, %v1829_v62  ;;  %v5054_v0 = vld [vmem:[%s6408_s3 + $0x1b8] sm:$0xff]   ;;  %v1836_v4 = vsel %vm1018_vm5, %v1834_v59, %v1835_v60  ;;  %v2281_v60 = vrot.slane %v2211_v58, 1 }
  0x86   : > { %2426 = vmatpush1.bf16.msra.mxu1 %v5045_v26  ;;  %2133 = vmatprep.subr.bf16.mxu0 %v5176_v1  ;;  %v1858_v26 = vpack.c.bf16 %v1824_v19, %v1818_v20  ;;  %v1815_v27 = vsel %vm1018_vm5, %v1813_v23, %v1814_v25  ;;  %v1860_v24 = vpack.c.bf16 %v1836_v4, %v1830_v63  ;;  %v5055_v20 = vld [vmem:[%s6408_s3 + $0x200] sm:$0xff]   ;;  %v5057_v19 = vld [vmem:[%s6408_s3 + $0x1f8] sm:$0xff]   ;;  %v2023_v23 = vld [vmem:[#allocation2 + $0x68] sm:$0xff] }
  0x87   : > { %2427 = vmatprep.subr.bf16.mxu1 %v5176_v1  ;;  %v1857_v37 = vpack.c.bf16 %v1821_v29, %v1815_v27  ;;  %v2037_v25 = vpack.c.bf16 %v2023_v23, %v2021_v22  ;;  %v2203_v27 = vld [vmem:[#allocation2 + $0x48] sm:$0xfe]  ;;  %v2205_v29 = vld [vmem:[#allocation2 + $0x58] sm:$0x1]  ;;  %v2210_v4 = vld [vmem:[#allocation2 + $0x80] sm:$0xfe] }
  0x88   : > { %1693 = vmatmul.mubr.bf16.gmra.mxu0 %v1561_v45  ;;  %v1540_v45 = vrot.slane %v1460_v39, 1  ;;  %v2269_v34 = vrot.slane %v2203_v27, 1  ;;  %v2213_v13 = vld [vmem:[#allocation2 + $0x98] sm:$0x1]  ;;  %v2215_v62 = vld [vmem:[#allocation2 + $0xa8] sm:$0xfe] }
  0x89   : > { %1987 = vmatmul.mubr.bf16.gmra.mxu1 %v1855_v44  ;;  %2134 = vmatpush1.bf16.msra.mxu0 %v5046_v42  ;;  %v1541_v42 = vrot.slane %v1462_v40, 1  ;;  %v1459_v44 = vld [vmem:[#allocation2 + $0x100] sm:$0xfe]  ;;  %v2276_v40 = vrot.slane %v2209_v33, 1  ;;  %v2287_v63 = vrot.slane %v2215_v62, 1 }
  0x8a   : > { %2428 = vmatpush1.bf16.msra.mxu1 %v5047_v12  ;;  %2135 = vmatprep.subr.bf16.mxu0 %v5176_v1  ;;  %v1455_v12 = vld [vmem:[#allocation2 + $0xe0] sm:$0xfe]  ;;  %v2223_v27 = vld [vmem:[#allocation2 + $0xe8] sm:$0xfe]  ;;  %v2233_v58 = vld [vmem:[#allocation2 + $0x138] sm:$0x1] }
  0x8b   : > { %2429 = vmatprep.subr.bf16.mxu1 %v5176_v1  ;;  %4420 = vmatprep.mubr.msk.bf16.mxu0 %vm346_vm0, %v1564_v61  ;;  %v1542_v43 = vsel %vm600_vm4, %v1540_v45, %v1541_v42  ;;  %v1531_v47 = vrot.slane %v1455_v12, 1  ;;  %v2208_v12 = vld [vmem:[#allocation2 + $0x70] sm:$0x1] }
  0x8c   : > { %4451 = vmatprep.mubr.msk.bf16.mxu1 %vm346_vm0, %v1858_v26  ;;  %v1566_v49 = vpack.c.bf16 %v1542_v43, %v1536_v5  ;;  %v5059_v26 = vld [vmem:[%s6408_s3 + $0x238] sm:$0xff]   ;;  %v2204_v5 = vld [vmem:[#allocation2 + $0x50] sm:$0x1]  ;;  %v2266_v43 = vrot.slane %v2202_v56, 1 }
  0x8d   : > { %2136 = vmatpush1.bf16.msra.mxu0 %v5048_v50  ;;  %v1537_v50 = vrot.slane %v1459_v44, 1  ;;  %v2267_v44 = vrot.slane %v2204_v5, 1  ;;  %v2220_v5 = vld [vmem:[#allocation2 + $0xd0] sm:$0x1] }
  0x8e   : > { %2430 = vmatpush1.bf16.msra.mxu1 %v5049_v57  ;;  %2137 = vmatprep.subr.bf16.mxu0 %v5176_v1  ;;  %v1533_v57 = vsel %vm600_vm4, %v1531_v47, %v1532_v48  ;;  %v5061_v47 = vld [vmem:[%s6408_s3 + $0x270] sm:$0xff]   ;;  %v2273_v48 = vrot.slane %v2208_v12, 1  ;;  %v2222_v12 = vld [vmem:[#allocation2 + $0xe0] sm:$0xfe] }
  0x8f   : > { %2431 = vmatprep.subr.bf16.mxu1 %v5176_v1  ;;  %v1539_v35 = vsel %vm600_vm4, %v1537_v50, %v1538_v53  ;;  %v2027_v50 = vld [vmem:[#allocation2 + $0xa8] sm:$0xff]  ;;  %v2268_v53 = vsel %vm600_vm4, %v2266_v43, %v2267_v44  ;;  %v2291_v44 = vrot.slane %v2220_v5, 1 }
  0x90   : > { %1701 = vmatmul.mubr.bf16.gmra.mxu0 %v1563_v51  ;;  %v1565_v61 = vpack.c.bf16 %v1539_v35, %v1533_v57  ;;  %v1827_v51 = vsel %vm1018_vm5, %v1825_v9, %v1826_v10  ;;  %v2026_v57 = vld [vmem:[#allocation2 + $0xa0] sm:$0xff]  ;;  %v2217_v35 = vld [vmem:[#allocation2 + $0xb8] sm:$0x1]  ;;  %v2216_v10 = vld [vmem:[#allocation2 + $0xb0] sm:$0x1] }
  0x91   : > { %2138 = vmatpush1.bf16.msra.mxu0 %v5050_v16  ;;  %1995 = vmatmul.mubr.bf16.gmra.mxu1 %v1857_v37  ;;  %v1833_v16 = vsel %vm1018_vm5, %v1831_v52, %v1832_v11  ;;  %v2270_v37 = vrot.slane %v2205_v29, 1  ;;  %v2288_v2 = vrot.slane %v2217_v35, 1  ;;  %v2214_v9 = vld [vmem:[#allocation2 + $0xa0] sm:$0xfe]  ;;  %v2278_v52 = vrot.slane %v2210_v4, 1 }
  0x92   : > { %2432 = vmatpush1.bf16.msra.mxu1 %v5051_v28  ;;  %2139 = vmatprep.subr.bf16.mxu0 %v5176_v1  ;;  %v1859_v18 = vpack.c.bf16 %v1833_v16, %v1827_v51  ;;  %v2036_v28 = vpack.c.bf16 %v2022_v7, %v2020_v36  ;;  %v2279_v11 = vrot.slane %v2212_v8, 1  ;;  %v2284_v51 = vrot.slane %v2214_v9, 1  ;;  %v2221_v36 = vld [vmem:[#allocation2 + $0xd8] sm:$0x1]  ;;  %v2230_v8 = vld [vmem:[#allocation2 + $0x120] sm:$0xfe] }
  0x93   : > { %2433 = vmatprep.subr.bf16.mxu1 %v5176_v1  ;;  %4421 = vmatprep.mubr.msk.bf16.mxu0 %vm346_vm0, %v1566_v49  ;;  %v2271_v45 = vsel %vm600_vm4, %v2269_v34, %v2270_v37  ;;  %v2025_v49 = vld [vmem:[#allocation2 + $0x88] sm:$0xff]  ;;  %v2299_v34 = vrot.slane %v2223_v27, 1  ;;  %v2232_v9 = vld [vmem:[#allocation2 + $0x130] sm:$0x1] }
  0x94   : > { %4452 = vmatprep.mubr.msk.bf16.mxu1 %vm346_vm0, %v1860_v24  ;;  %v2039_v54 = vpack.c.bf16 %v2027_v50, %v2025_v49  ;;  %v2289_v24 = vsel %vm600_vm4, %v2287_v63, %v2288_v2  ;;  %v2280_v22 = vsel %vm600_vm4, %v2278_v52, %v2279_v11  ;;  %v2035_v49 = vld [vmem:[#allocation2 + $0x128] sm:$0xff]  ;;  %v2228_v2 = vld [vmem:[#allocation2 + $0x110] sm:$0x1]  ;;  %v2308_v11 = vrot.slane %v2230_v8, 1 }
  0x95   : > { %2140 = vmatpush1.bf16.msra.mxu0 %v5052_v32  ;;  %v2207_v32 = vld [vmem:[#allocation2 + $0x68] sm:$0xfe] }
  0x96   : > { %2434 = vmatpush1.bf16.msra.mxu1 %v5053_v38  ;;  %2141 = vmatprep.subr.bf16.mxu0 %v5176_v1  ;;  %v2275_v39 = vrot.slane %v2207_v32, 1  ;;  %v2206_v38 = vld [vmem:[#allocation2 + $0x60] sm:$0xfe]  ;;  %v2294_v32 = vrot.slane %v2221_v36, 1  ;;  %v2227_v50 = vld [vmem:[#allocation2 + $0x108] sm:$0xfe] }
  0x97   : > { %2435 = vmatprep.subr.bf16.mxu1 %v5176_v1  ;;  %v2272_v46 = vrot.slane %v2206_v38, 1  ;;  %v2305_v62 = vrot.slane %v2227_v50, 1  ;;  %v5067_v63 = vld [vmem:[%s6408_s3 + $0x248] sm:$0xff]  }
  0x98   : > { %1709 = vmatmul.mubr.bf16.gmra.mxu0 %v1565_v61  ;;  %v2277_v42 = vsel %vm600_vm4, %v2275_v39, %v2276_v40  ;;  %v2282_v61 = vrot.slane %v2213_v13, 1  ;;  %v5064_v40 = vld [vmem:[%s6408_s3 + $0x258] sm:$0xff]   ;;  %v5066_v13 = vld [vmem:[%s6408_s3 + $0x250] sm:$0xff]  }
  0x99   : > { %2142 = vmatpush1.bf16.msra.mxu0 %v5054_v0  ;;  %2003 = vmatmul.mubr.bf16.gmra.mxu1 %v1859_v18  ;;  %v2331_v15 = vpack.c.bf16 %v2277_v42, %v2271_v45  ;;  %v2274_v14 = vsel %vm600_vm4, %v2272_v46, %v2273_v48  ;;  %v2038_v0 = vpack.c.bf16 %v2026_v57, %v2024_v55  ;;  %v5063_v18 = vld [vmem:[%s6408_s3 + $0x260] sm:$0xff]   ;;  %v5065_v45 = vld [vmem:[%s6410_s5 + $0x18] sm:$0xff]   ;;  %v2296_v46 = vrot.slane %v2222_v12, 1  ;;  %v2231_v57 = vld [vmem:[#allocation2 + $0x128] sm:$0xfe] }
  0x9a   : > { %2143 = vmatprep.subr.bf16.mxu0 %v5176_v1  ;;  %2436 = vmatpush1.bf16.msra.mxu1 %v5055_v20  ;;  %v2330_v59 = vpack.c.bf16 %v2274_v14, %v2268_v53  ;;  %v2283_v6 = vsel %vm600_vm4, %v2281_v60, %v2282_v61  ;;  %v2029_v20 = vld [vmem:[#allocation2 + $0xc8] sm:$0xff]  ;;  %v2218_v42 = vld [vmem:[#allocation2 + $0xc0] sm:$0xfe]  ;;  %v2229_v55 = vld [vmem:[#allocation2 + $0x118] sm:$0x1]  ;;  %v2312_v60 = vrot.slane %v2233_v58, 1 }
  0x9b   : > { %2437 = vmatprep.subr.bf16.mxu1 %v5176_v1  ;;  %4480 = vmatprep.mubr.msk.bf16.mxu0 %vm346_vm0, %v2037_v25  ;;  %v2333_v16 = vpack.c.bf16 %v2289_v24, %v2283_v6  ;;  %v2030_v25 = vld [vmem:[#allocation2 + $0xe0] sm:$0xff]  ;;  %v2290_v43 = vrot.slane %v2218_v42, 1  ;;  %v2306_v35 = vrot.slane %v2229_v55, 1  ;;  %v2303_v24 = vrot.slane %v2228_v2, 1  ;;  %v2506_v55 = vld [vmem:[#allocation2 + $0x90] sm:$0x3] }
  0x9c   : > { %4511 = vmatprep.mubr.msk.bf16.mxu1 %vm346_vm0, %v2331_v15  ;;  %v2224_v15 = vld [vmem:[#allocation2 + $0xf0] sm:$0x1]  ;;  %v2508_v58 = vld [vmem:[#allocation2 + $0xa0] sm:$0xfc]  ;;  %v2519_v2 = vld [vmem:[#allocation2 + $0xf8] sm:$0x3] }
  0x9d   : > { %2144 = vmatpush1.bf16.msra.mxu0 %v5056_v17  ;;  %v2285_v17 = vrot.slane %v2216_v10, 1  ;;  %v2292_v48 = vsel %vm600_vm4, %v2290_v43, %v2291_v44  ;;  %v2307_v61 = vsel %vm600_vm4, %v2305_v62, %v2306_v35  ;;  %v2505_v43 = vld [vmem:[#allocation2 + $0x88] sm:$0xfc]  ;;  %v2507_v44 = vld [vmem:[#allocation2 + $0x98] sm:$0x3]  ;;  %v2573_v62 = vrot.slane %v2506_v55, 2 }
  0x9e   : > { %2159 = vmatprep.subr.bf16.mxu0 %v5176_v1  ;;  %2438 = vmatpush1.bf16.msra.mxu1 %v5057_v19  ;;  %v2031_v19 = vld [vmem:[#allocation2 + $0xe8] sm:$0xff]  ;;  %v2576_v50 = vrot.slane %v2507_v44, 2 }
  0x9f   : > { %2453 = vmatprep.subr.bf16.mxu1 %v5176_v1  ;;  %v2041_v23 = vpack.c.bf16 %v2031_v19, %v2029_v20  ;;  %v2286_v7 = vsel %vm600_vm4, %v2284_v51, %v2285_v17  ;;  %v2309_v51 = vrot.slane %v2232_v9, 1  ;;  %v5069_v17 = vld [vmem:[%s6408_s3 + $0x240] sm:$0xff]  }
  0xa0   : > { %v2332_v33 = vpack.c.bf16 %v2286_v7, %v2280_v22  ;;  %v5072_v19 = vld [vmem:[%s6410_s5] sm:$0xff]   ;;  %v2499_v22 = vld [vmem:[#allocation2 + $0x58] sm:$0x3] }
  0xa1   : > { %2160 = vmatpush2.bf16.msra.mxu0 %v5058_v21  ;;  %v2028_v21 = vld [vmem:[#allocation2 + $0xc0] sm:$0xff]  ;;  %v2564_v36 = vrot.slane %v2499_v22, 2 }
  0xa2   : > { %2717 = vmatprep.subr.bf16.mxu0 %v5176_v1  ;;  %2454 = vmatpush2.bf16.msra.mxu1 %v5059_v26  ;;  %v2219_v26 = vld [vmem:[#allocation2 + $0xc8] sm:$0xfe]  ;;  %v5071_v7 = vld [vmem:[%s6408_s3 + $0x280] sm:$0xff]  }
  0xa3   : > { %v2293_v29 = vrot.slane %v2219_v26, 1  ;;  %4785 = vmatprep.subr.bf16.mxu1 %v5065_v45 }
  0xa4   : > { %2162 = vmatmul.mubr.bf16.vlgmr.msra.gmra.mxu0 %v2036_v28  ;;  %v2225_v28 = vld [vmem:[#allocation2 + $0xf8] sm:$0x1] }
  0xa5   : > { %2718 = vmatpush1.bf16.msra.mxu0 %v5060_v41  ;;  %4481 = vmatprep.mubr.msk.bf16.mxu0 %vm346_vm0, %v2039_v54  ;;  %v2300_v37 = vrot.slane %v2225_v28, 1  ;;  %v2295_v39 = vsel %vm600_vm4, %v2293_v29, %v2294_v32  ;;  %v2040_v41 = vpack.c.bf16 %v2030_v25, %v2028_v21  ;;  %v2043_v54 = vpack.c.bf16 %v2035_v49, %v5703_v30  ;;  %v5068_v30 = vld [vmem:[%s6410_s5 + $0x10] sm:$0xff]   ;;  %v2497_v21 = vld [vmem:[#allocation2 + $0x48] sm:$0xfc]  ;;  %v2503_v25 = vld [vmem:[#allocation2 + $0x78] sm:$0x3] }
  0xa6   : > { %2719 = vmatprep.subr.bf16.mxu0 %v5176_v1  ;;  %2456 = vmatmul.mubr.bf16.vlgmr.msra.gmra.mxu1 %v2330_v59  ;;  %v2311_v59 = vrot.slane %v2231_v57, 1  ;;  %v2563_v26 = vrot.slane %v2497_v21, 2  ;;  %v2570_v28 = vrot.slane %v2503_v25, 2  ;;  %v2496_v29 = vld [vmem:[#allocation2 + $0x40] sm:$0xfc]  ;;  %v2575_v49 = vrot.slane %v2505_v43, 2 }
  0xa7   : > { %4512 = vmatprep.mubr.msk.bf16.mxu1 %vm346_vm0, %v2333_v16  ;;  %v2301_v56 = vsel %vm600_vm4, %v2299_v34, %v2300_v37  ;;  %4786 = vmatpush3.bf16.msra.mxu1 %v5065_v45  ;;  %v5070_v16 = vld [vmem:[%s6410_s5 + $0x8] sm:$0xff]   ;;  %v2498_v32 = vld [vmem:[#allocation2 + $0x50] sm:$0x3]  ;;  %v2500_v34 = vld [vmem:[#allocation2 + $0x60] sm:$0xfc] }
  0xa8   : > { %v2335_v38 = vpack.c.bf16 %v2301_v56, %v2295_v39  ;;  %v2313_v6 = vsel %vm600_vm4, %v2311_v59, %v2312_v60  ;;  %4787 = vmatprep.subr.bf16.mxu1 %v5068_v30  ;;  %v2502_v37 = vld [vmem:[#allocation2 + $0x70] sm:$0x3]  ;;  %v2560_v39 = vrot.slane %v2496_v29, 2  ;;  %v2566_v56 = vrot.slane %v2500_v34, 2 }
  0xa9   : > { %2720 = vmatpush1.bf16.msra.mxu0 %v5061_v47  ;;  %v2297_v47 = vrot.slane %v2224_v15, 1  ;;  %v2337_v52 = vpack.c.bf16 %v2313_v6, %v2307_v61  ;;  %v2567_v45 = vrot.slane %v2502_v37, 2  ;;  %v5074_v15 = vld [vmem:[%s5912_s23 + $0x8] sm:$0xff]   ;;  %v2577_v57 = vsel %vm1018_vm5, %v2575_v49, %v2576_v50  ;;  %v2515_v61 = vld [vmem:[#allocation2 + $0xd8] sm:$0x3] }
  0xaa   : > { %2721 = vmatprep.subr.bf16.mxu0 %v5176_v1  ;;  %v2578_v59 = vrot.slane %v2508_v58, 2  ;;  %v2588_v6 = vrot.slane %v2515_v61, 2  ;;  %v2520_v37 = vld [vmem:[#allocation2 + $0x100] sm:$0xfc] }
  0xab   : > { %v2298_v53 = vsel %vm600_vm4, %v2296_v46, %v2297_v47  ;;  %4788 = vmatpush3.bf16.msra.mxu1 %v5068_v30  ;;  %v2568_v12 = vsel %vm1018_vm5, %v2566_v56, %v2567_v45  ;;  %v2509_v47 = vld [vmem:[#allocation2 + $0xa8] sm:$0xfc]  ;;  %v2596_v56 = vrot.slane %v2520_v37, 2 }
  0xac   : > { %2170 = vmatmul.mubr.bf16.gmra.mxu0 %v2038_v0  ;;  %v2334_v14 = vpack.c.bf16 %v2298_v53, %v2292_v48  ;;  %v2226_v0 = vld [vmem:[#allocation2 + $0x100] sm:$0xfe]  ;;  %4789 = vmatprep.subr.bf16.mxu1 %v5070_v16  ;;  %v2511_v48 = vld [vmem:[#allocation2 + $0xb8] sm:$0x3]  ;;  %v2513_v30 = vld [vmem:[#allocation2 + $0xc8] sm:$0xfc] }
  0xad   : > { %2722 = vmatpush1.bf16.msra.mxu0 %v5062_v3  ;;  %4482 = vmatprep.mubr.msk.bf16.mxu0 %vm346_vm0, %v2041_v23  ;;  %v5886_v3 = vld [vmem:[#allocation2] sm:$0xff]  ;;  %v2302_v10 = vrot.slane %v2226_v0, 1  ;;  %v2501_v23 = vld [vmem:[#allocation2 + $0x68] sm:$0xfc]  ;;  %v2582_v53 = vrot.slane %v2511_v48, 2 }
  0xae   : > { %2723 = vmatprep.subr.bf16.mxu0 %v5176_v1  ;;  %2464 = vmatmul.mubr.bf16.gmra.mxu1 %v2332_v33  ;;  %v2042_v4 = vpack.c.bf16 %v5886_v3, %v5705_v31  ;;  %v2310_v31 = vsel %vm600_vm4, %v2308_v11, %v2309_v51  ;;  %v2569_v27 = vrot.slane %v2501_v23, 2  ;;  %v2565_v33 = vsel %vm1018_vm5, %v2563_v26, %v2564_v36  ;;  %v2517_v0 = vld [vmem:[#allocation2 + $0xe8] sm:$0xfc]  ;;  %v5075_v11 = vld [vmem:[%s5912_s23 + $0x10] sm:$0xff]   ;;  %v2512_v51 = vld [vmem:[#allocation2 + $0xc0] sm:$0xfc] }
  0xaf   : > { %4513 = vmatprep.mubr.msk.bf16.mxu1 %vm346_vm0, %v2335_v38  ;;  %v2304_v20 = vsel %vm600_vm4, %v2302_v10, %v2303_v24  ;;  %4790 = vmatpush3.bf16.msra.mxu1 %v5070_v16  ;;  %v5073_v38 = vld [vmem:[%s5912_s23] sm:$0xff]   ;;  %v2593_v10 = vrot.slane %v2517_v0, 2  ;;  %v2594_v24 = vrot.slane %v2519_v2, 2  ;;  %v5076_v26 = vld [vmem:[%s5912_s23 + $0x18] sm:$0xff]   ;;  %v2521_v36 = vld [vmem:[#allocation2 + $0x108] sm:$0xfc]  ;;  %s6300_s23 = scalar_lea.vmem %s6407_s2, %s4701_s21 }
  0xb0   : > { %4791 = vmatprep.subr.bf16.mxu1 %v5072_v19  ;;  %v2516_v16 = vld [vmem:[#allocation2 + $0xe0] sm:$0xfc]  ;;  %v2599_v29 = vrot.slane %v2521_v36, 2  ;;  %2947 = vst.msk [vmem:[#allocation3 + $0x18] sm:$0x3] %vm2944_vm7, %v5886_v3  ;;  %v5081_v37 = vld [vmem:[%s6411_s6 + $0x28] sm:$0xff]  }
  0xb1   : > { %2724 = vmatpush1.bf16.msra.mxu0 %v5063_v18  ;;  %v2336_v18 = vpack.c.bf16 %v2310_v31, %v2304_v20  ;;  %v2514_v20 = vld [vmem:[#allocation2 + $0xd0] sm:$0x3]  ;;  %v2595_v31 = vsel %vm1018_vm5, %v2593_v10, %v2594_v24  ;;  %v2590_v22 = vrot.slane %v2516_v16, 2  ;;  %2945 = vst.msk [vmem:[#allocation3 + $0x8] sm:$0x3] %vm2944_vm7, %v5886_v3  ;;  %s6326_s21 = scalar_lea.vmem [#allocation4], %s4278_s13 }
  0xb2   : > { %2725 = vmatprep.subr.bf16.mxu0 %v5176_v1  ;;  %v2585_v21 = vrot.slane %v2514_v20, 2  ;;  %2949 = vst.msk [vmem:[#allocation3 + $0x28] sm:$0x3] %vm2944_vm7, %v5886_v3  ;;  %2951 = vst.msk [vmem:[#allocation3 + $0x38] sm:$0x3] %vm2944_vm7, %v5886_v3  ;;  %s4188_s17 = sshll.u32 %s6326_s21, 4  ;;  %s6357_s17 = int_to_ptr.vmem [resolvable:$true] %s4188_s17 }
  0xb3   : > { %4792 = vmatpush3.bf16.msra.mxu1 %v5072_v19  ;;  %2953 = vst.msk [vmem:[#allocation3 + $0x48] sm:$0x3] %vm2944_vm7, %v5886_v3  ;;  %2955 = vst.msk [vmem:[#allocation3 + $0x58] sm:$0x3] %vm2944_vm7, %v5886_v3  ;;  %s5114_s12 = scalar_lea.vmem %s6357_s17, 1024 }
  0xb4   : > { %2178 = vmatmul.mubr.bf16.gmra.mxu0 %v2040_v41  ;;  %v2571_v41 = vsel %vm1018_vm5, %v2569_v27, %v2570_v28  ;;  %v2525_v27 = vld [vmem:[#allocation2 + $0x128] sm:$0xfc]  ;;  %v2527_v28 = vld [vmem:[#allocation2 + $0x138] sm:$0x3]  ;;  %2957 = vst.msk [vmem:[#allocation3 + $0x68] sm:$0x3] %vm2944_vm7, %v5886_v3  ;;  %p5115_p11 = scmp.ne.s32.totalorder %s6357_s17, %s5114_s12 }
  0xb5   : > { %2726 = vmatpush1.bf16.msra.mxu0 %v5064_v40  ;;  %4483 = vmatprep.mubr.msk.bf16.mxu0 %vm346_vm0, %v2043_v54  ;;  %v2561_v40 = vrot.slane %v2498_v32, 2  ;;  %v2625_v42 = vpack.c.bf16 %v2571_v41, %v2565_v33  ;;  %v2504_v54 = vld [vmem:[#allocation2 + $0x80] sm:$0xfc]  ;;  %v2605_v33 = vrot.slane %v2525_v27, 2  ;;  %v2606_v34 = vrot.slane %v2527_v28, 2  ;;  %v5079_v27 = vld [vmem:[%s6411_s6 + $0x30] sm:$0xff]  }
  0xb6   : > { %2727 = vmatprep.subr.bf16.mxu0 %v5176_v1  ;;  %2472 = vmatmul.mubr.bf16.gmra.mxu1 %v2334_v14  ;;  %v2510_v14 = vld [vmem:[#allocation2 + $0xb0] sm:$0x3]  ;;  %2959 = vst.msk [vmem:[#allocation3 + $0x78] sm:$0x3] %vm2944_vm7, %v5886_v3  ;;  %2961 = vst.msk [vmem:[#allocation3 + $0x88] sm:$0x3] %vm2944_vm7, %v5886_v3  ;;  %p5116_p12 = pnand %p5115_p11, %p5264_p5 }
  0xb7   : > { %4514 = vmatprep.mubr.msk.bf16.mxu1 %vm346_vm0, %v2337_v52  ;;  %v2562_v5 = vsel %vm1018_vm5, %v2560_v39, %v2561_v40  ;;  %v2579_v60 = vrot.slane %v2510_v14, 2  ;;  %v2522_v39 = vld [vmem:[#allocation2 + $0x110] sm:$0x3]  ;;  %v2524_v40 = vld [vmem:[#allocation2 + $0x120] sm:$0xfc]  ;;  %v2607_v43 = vsel %vm1018_vm5, %v2605_v33, %v2606_v34 }
  0xb8   : > { %v2624_v46 = vpack.c.bf16 %v2568_v12, %v2562_v5  ;;  %v2526_v41 = vld [vmem:[#allocation2 + $0x130] sm:$0x3]  ;;  %v2597_v45 = vrot.slane %v2522_v39, 2  ;;  %2963 = vst.msk [vmem:[#allocation3 + $0x98] sm:$0x3] %vm2944_vm7, %v5886_v3  ;;  %v5082_v39 = vld [vmem:[%s6411_s6 + $0x48] sm:$0xff]   ;;  %p5117_p13 = pneg %p5116_p12 }
  0xb9   : > { %2728 = vmatpush1.bf16.msra.mxu0 %v5066_v13  ;;  %v2572_v13 = vrot.slane %v2504_v54, 2  ;;  %v2580_v9 = vsel %vm1018_vm5, %v2578_v59, %v2579_v60  ;;  %v2603_v12 = vrot.slane %v2526_v41, 2  ;;  %v5080_v28 = vld [vmem:[%s6411_s6 + $0x50] sm:$0xff]  }
  0xba   : > { %2729 = vmatprep.subr.bf16.mxu0 %v5176_v1 }
  0xbb   : > { %v2574_v8 = vsel %vm1018_vm5, %v2572_v13, %v2573_v62 }
  0xbc   : > { %2186 = vmatmul.mubr.bf16.gmra.mxu0 %v2042_v4  ;;  %v2587_v4 = vrot.slane %v2513_v30, 2  ;;  %v2626_v19 = vpack.c.bf16 %v2580_v9, %v2574_v8 }
  0xbd   : > { %2730 = vmatpush1.bf16.msra.mxu0 %v5067_v63  ;;  %4542 = vmatprep.mubr.msk.bf16.mxu0 %vm346_vm0, %v2625_v42 }
  0xbe   : > { %2731 = vmatprep.subr.bf16.mxu0 %v5176_v1  ;;  %2480 = vmatmul.mubr.bf16.gmra.mxu1 %v2336_v18  ;;  %v2589_v52 = vsel %vm1018_vm5, %v2587_v4, %v2588_v6  ;;  %v2584_v18 = vrot.slane %v2512_v51, 2 }
  0xbf   : > { %4793 = vmatprep.mubr.msk.bf16.mxu1 %vm2865_vm6, %v5073_v38  ;;  %v2629_v23 = vpack.c.bf16 %v2595_v31, %v2589_v52  ;;  %v2602_v38 = vrot.slane %v2524_v40, 2 }
  0xc0   : > { %v2586_v42 = vsel %vm1018_vm5, %v2584_v18, %v2585_v21 }
  0xc1   : > { %2732 = vmatpush1.bf16.msra.mxu0 %v5069_v17  ;;  %v2518_v17 = vld [vmem:[#allocation2 + $0xf0] sm:$0x3]  ;;  %v2604_v48 = vsel %vm1018_vm5, %v2602_v38, %v2603_v12  ;;  %v5083_v38 = vld [vmem:[%s6411_s6 + $0x20] sm:$0xff]  }
  0xc2   : > { %2747 = vmatprep.subr.bf16.mxu0 %v5176_v1  ;;  %v2581_v1 = vrot.slane %v2509_v47, 2  ;;  %v2591_v25 = vrot.slane %v2518_v17, 2  ;;  %v2598_v47 = vsel %vm1018_vm5, %v2596_v56, %v2597_v45  ;;  %v5084_v12 = vld [vmem:[%s6411_s6 + $0x40] sm:$0xff]  }
  0xc3   : > { %v2630_v49 = vpack.c.bf16 %v2604_v48, %v2598_v47 }
  0xc4   : > { %v2583_v35 = vsel %vm1018_vm5, %v2581_v1, %v2582_v53  ;;  %v2592_v5 = vsel %vm1018_vm5, %v2590_v22, %v2591_v25  ;;  %v5077_v22 = vld [vmem:[%s6411_s6 + $0x38] sm:$0xff]  }
  0xc5   : > { %2748 = vmatpush2.bf16.msra.mxu0 %v5071_v7  ;;  %v2627_v63 = vpack.c.bf16 %v2583_v35, %v2577_v57  ;;  %v2523_v7 = vld [vmem:[#allocation2 + $0x118] sm:$0x3]  ;;  %v2628_v44 = vpack.c.bf16 %v2592_v5, %v2586_v42  ;;  %4801 = vmatprep.subr.bf16.mxu1 %v5077_v22 }
  0xc6   : > { %4794 = vmatmul.mubr.msk.bf16.vlgmr.msra.gmra.mxu1 %vm2865_vm6, %v5074_v15  ;;  %v2600_v32 = vrot.slane %v2523_v7, 2 }
  0xc7   : > { %4797 = vmatprep.mubr.msk.bf16.mxu1 %vm2865_vm6, %v5075_v11  ;;  %4802 = vmatpush3.bf16.msra.mxu1 %v5077_v22 }
  0xc8   : > { %2750 = vmatmul.mubr.bf16.vlgmr.msra.gmra.mxu0 %v2624_v46  ;;  %v2601_v15 = vsel %vm1018_vm5, %v2599_v29, %v2600_v32  ;;  %4803 = vmatprep.subr.bf16.mxu1 %v5079_v27 }
  0xc9   : > { %4543 = vmatprep.mubr.msk.bf16.mxu0 %vm346_vm0, %v2627_v63  ;;  %v2631_v46 = vpack.c.bf16 %v2607_v43, %v2601_v15 }
  0xcb   : > { %4804 = vmatpush3.bf16.msra.mxu1 %v5079_v27 }
  0xcc   : > { %4805 = vmatprep.subr.bf16.mxu1 %v5081_v37 }
  0xce   : > { %4798 = vmatmul.mubr.msk.bf16.gmra.mxu1 %vm2865_vm6, %v5076_v26 }
  0xcf   : > { %4806 = vmatpush3.bf16.msra.mxu1 %v5081_v37 }
  0xd0   : > { %2758 = vmatmul.mubr.bf16.gmra.mxu0 %v2626_v19  ;;  %4807 = vmatprep.subr.bf16.mxu1 %v5083_v38 }
  0xd1   : > { %4544 = vmatprep.mubr.msk.bf16.mxu0 %vm346_vm0, %v2629_v23  ;;  %v5078_v23 = vld [vmem:[%s6411_s6 + $0x58] sm:$0xff]  }
  0xd2   : > { %4833 = vmatprep.subr.bf16.mxu0 %v5078_v23 }
  0xd3   : > { %4834 = vmatpush3.bf16.msra.mxu0 %v5078_v23  ;;  %4808 = vmatpush3.bf16.msra.mxu1 %v5083_v38 }
  0xd4   : > { %4835 = vmatprep.subr.bf16.mxu0 %v5080_v28 }
  0xd7   : > { %4836 = vmatpush3.bf16.msra.mxu0 %v5080_v28 }
  0xd8   : > { %2766 = vmatmul.mubr.bf16.gmra.mxu0 %v2628_v44  ;;  %4837 = vmatprep.subr.bf16.mxu0 %v5082_v39 }
  0xd9   : > { %4545 = vmatprep.mubr.msk.bf16.mxu0 %vm346_vm0, %v2631_v46 }
  0xdb   : > { %4838 = vmatpush3.bf16.msra.mxu0 %v5082_v39 }
  0xdc   : > { %4839 = vmatprep.subr.bf16.mxu0 %v5084_v12 }
  0xdf   : > { %4840 = vmatpush3.bf16.msra.mxu0 %v5084_v12 }
  0xe0   : > { %2774 = vmatmul.mubr.bf16.gmra.mxu0 %v2630_v49 }
  0xf8   : > { %v792_v50 = vpop.f32.mrf.mxu0  ;;  %v923_v1 = vpop.f32.mrf.mxu1 }
  0xf9   : > { %v5943_v53 = vadd.f32 %v923_v1, %v792_v50 }
  0xfa   : > { %v794_v54 = vpop.f32.mrf.mxu0  ;;  %v925_v55 = vpop.f32.mrf.mxu1 }
  0xfc   : > { %v795_v57 = vpop.f32.mrf.mxu0  ;;  %v926_v58 = vpop.f32.mrf.mxu1 }
  0xfd   : > { %v5945_v14 = vadd.f32 %v926_v58, %v795_v57 }
  0xfe   : > { %v797_v13 = vpop.f32.mrf.mxu0  ;;  %v928_v62 = vpop.f32.mrf.mxu1 }
 0x100   : > { %v800_v35 = vpop.f32.mrf.mxu0  ;;  %v931_v59 = vpop.f32.mrf.mxu1 }
 0x101   : > { %v5947_v60 = vadd.f32 %v931_v59, %v800_v35  ;;  %v6001_v59 = vld [vmem:[%s6411_s6 + $0x18] sm:$0xff]  }
 0x102   : > { %v802_v30 = vpop.f32.mrf.mxu0  ;;  %v933_v61 = vpop.f32.mrf.mxu1  ;;  %4817 = vmatprep.subr.bf16.mxu1 %v6001_v59 }
 0x104   : > { %v803_v63 = vpop.f32.mrf.mxu0  ;;  %v934_v0 = vpop.f32.mrf.mxu1 }
 0x105   : > { %v5949_v2 = vadd.f32 %v934_v0, %v803_v63 }
 0x106   : > { %v805_v4 = vpop.f32.mrf.mxu0  ;;  %v936_v6 = vpop.f32.mrf.mxu1 }
 0x108   : > { %v808_v8 = vpop.f32.mrf.mxu0  ;;  %v939_v9 = vpop.f32.mrf.mxu1 }
 0x109   : > { %v5951_v10 = vadd.f32 %v939_v9, %v808_v8 }
 0x10a   : > { %v810_v24 = vpop.f32.mrf.mxu0  ;;  %v941_v52 = vpop.f32.mrf.mxu1 }
 0x10c   : > { %v811_v11 = vpop.f32.mrf.mxu0  ;;  %v942_v51 = vpop.f32.mrf.mxu1 }
 0x10d   : > { %v5953_v20 = vadd.f32 %v942_v51, %v811_v11 }
 0x10e   : > { %v813_v31 = vpop.f32.mrf.mxu0  ;;  %v944_v16 = vpop.f32.mrf.mxu1 }
 0x114   : > { %v947_v17 = vpop.f32.mrf.mxu1  ;;  %v816_v18 = vpop.f32.mrf.mxu0 }
 0x115   : > { %v5965_v19 = vadd.f32 %v947_v17, %v816_v18 }
 0x116   : > { %v949_v21 = vpop.f32.mrf.mxu1  ;;  %v818_v25 = vpop.f32.mrf.mxu0 }
 0x118   : > { %v950_v26 = vpop.f32.mrf.mxu1  ;;  %v819_v36 = vpop.f32.mrf.mxu0 }
 0x119   : > { %v5973_v3 = vadd.f32 %v950_v26, %v819_v36 }
 0x11a   : > { %v952_v7 = vpop.f32.mrf.mxu1  ;;  %v821_v29 = vpop.f32.mrf.mxu0 }
 0x11c   : > { %v1210_v32 = vpop.f32.mrf.mxu0 }
 0x11d   : > { %v1392_v33 = vpop.f32.mrf.mxu1  ;;  %v1241_v34 = vadd.f32 %v1210_v32, %v5943_v53 }
 0x11e   : > { %v1212_v40 = vpop.f32.mrf.mxu0 }
 0x11f   : > { %v1394_v41 = vpop.f32.mrf.mxu1  ;;  %v1423_v56 = vadd.f32 %v1392_v33, %v1241_v34 }
 0x120   : > { %v1213_v45 = vpop.f32.mrf.mxu0 }
 0x121   : > { %v1395_v42 = vpop.f32.mrf.mxu1  ;;  %v1242_v5 = vadd.f32 %v1213_v45, %v5945_v14 }
 0x122   : > { %v1215_v15 = vpop.f32.mrf.mxu0 }
 0x123   : > { %v1397_v43 = vpop.f32.mrf.mxu1  ;;  %v1424_v44 = vadd.f32 %v1395_v42, %v1242_v5 }
 0x124   : > { %v1218_v46 = vpop.f32.mrf.mxu0 }
 0x125   : > { %v1400_v47 = vpop.f32.mrf.mxu1  ;;  %v1243_v48 = vadd.f32 %v1218_v46, %v5947_v60  ;;  %v6006_v60 = vld [vmem:[%s6411_s6 + $0x98] sm:$0xff]  }
 0x126   : > { %v1220_v49 = vpop.f32.mrf.mxu0  ;;  %4865 = vmatprep.subr.bf16.mxu0 %v6006_v60 }
 0x127   : > { %v1402_v50 = vpop.f32.mrf.mxu1  ;;  %v1425_v1 = vadd.f32 %v1400_v47, %v1243_v48 }
 0x128   : > { %v1221_v53 = vpop.f32.mrf.mxu0 }
 0x129   : > { %v1403_v54 = vpop.f32.mrf.mxu1  ;;  %v1244_v55 = vadd.f32 %v1221_v53, %v5949_v2 }
 0x12a   : > { %v1223_v57 = vpop.f32.mrf.mxu0 }
 0x12b   : > { %v1405_v58 = vpop.f32.mrf.mxu1  ;;  %v1426_v14 = vadd.f32 %v1403_v54, %v1244_v55 }
 0x12c   : > { %v1226_v13 = vpop.f32.mrf.mxu0 }
 0x12d   : > { %v1408_v62 = vpop.f32.mrf.mxu1  ;;  %v1245_v35 = vadd.f32 %v1226_v13, %v5951_v10 }
 0x12e   : > { %v1228_v30 = vpop.f32.mrf.mxu0 }
 0x12f   : > { %v1410_v61 = vpop.f32.mrf.mxu1  ;;  %v1427_v63 = vadd.f32 %v1408_v62, %v1245_v35 }
 0x130   : > { %v1229_v0 = vpop.f32.mrf.mxu0 }
 0x131   : > { %v1411_v2 = vpop.f32.mrf.mxu1  ;;  %v1246_v4 = vadd.f32 %v1229_v0, %v5953_v20 }
 0x132   : > { %v1231_v6 = vpop.f32.mrf.mxu0 }
 0x133   : > { %v1413_v8 = vpop.f32.mrf.mxu1  ;;  %v1428_v9 = vadd.f32 %v1411_v2, %v1246_v4 }
 0x134   : > { %v1234_v10 = vpop.f32.mrf.mxu0 }
 0x135   : > { %v1247_v24 = vadd.f32 %v1234_v10, %v5965_v19 }
 0x136   : > { %v1236_v52 = vpop.f32.mrf.mxu0 }
 0x137   : > { %v1416_v11 = vpop.f32.mrf.mxu1 }
 0x138   : > { %v1237_v51 = vpop.f32.mrf.mxu0  ;;  %v1429_v31 = vadd.f32 %v1416_v11, %v1247_v24 }
 0x139   : > { %v1248_v16 = vadd.f32 %v1237_v51, %v5973_v3  ;;  %v1418_v17 = vpop.f32.mrf.mxu1 }
 0x13a   : > { %v1239_v18 = vpop.f32.mrf.mxu0 }
 0x13b   : > { %v1419_v21 = vpop.f32.mrf.mxu1 }
 0x13c   : > { %v1430_v22 = vadd.f32 %v1419_v21, %v1248_v16 }
 0x13d   : > { %v1421_v23 = vpop.f32.mrf.mxu1 }
 0x140   : > { %v1686_v25 = vpop.f32.mrf.mxu0 }
 0x141   : > { %v1980_v26 = vpop.f32.mrf.mxu1  ;;  %v1717_v20 = vadd.f32 %v1686_v25, %v1423_v56 }
 0x142   : > { %v1688_v36 = vpop.f32.mrf.mxu0 }
 0x143   : > { %v1982_v7 = vpop.f32.mrf.mxu1  ;;  %v6013_v27 = vadd.f32 %v1980_v26, %v1717_v20 }
 0x144   : > { %v1689_v28 = vpop.f32.mrf.mxu0 }
 0x145   : > { %v1983_v19 = vpop.f32.mrf.mxu1  ;;  %v1718_v29 = vadd.f32 %v1689_v28, %v1424_v44 }
 0x146   : > { %v1691_v32 = vpop.f32.mrf.mxu0 }
 0x147   : > { %v1985_v33 = vpop.f32.mrf.mxu1  ;;  %v6015_v34 = vadd.f32 %v1983_v19, %v1718_v29 }
 0x148   : > { %v1694_v3 = vpop.f32.mrf.mxu0 }
 0x149   : > { %v1988_v37 = vpop.f32.mrf.mxu1  ;;  %v1719_v39 = vadd.f32 %v1694_v3, %v1425_v1 }
 0x14a   : > { %v1696_v40 = vpop.f32.mrf.mxu0 }
 0x14b   : > { %v1990_v41 = vpop.f32.mrf.mxu1  ;;  %v6017_v45 = vadd.f32 %v1988_v37, %v1719_v39 }
 0x14c   : > { %v1697_v42 = vpop.f32.mrf.mxu0 }
 0x14d   : > { %v1991_v56 = vpop.f32.mrf.mxu1  ;;  %v1720_v5 = vadd.f32 %v1697_v42, %v1426_v14 }
 0x14e   : > { %v1699_v38 = vpop.f32.mrf.mxu0 }
 0x14f   : > { %v1993_v12 = vpop.f32.mrf.mxu1  ;;  %v6019_v15 = vadd.f32 %v1991_v56, %v1720_v5 }
 0x150   : > { %v1702_v43 = vpop.f32.mrf.mxu0 }
 0x151   : > { %v1721_v44 = vadd.f32 %v1702_v43, %v1427_v63  ;;  %v1996_v47 = vpop.f32.mrf.mxu1  ;;  %v6046_v43 = vld [vmem:[%s6409_s4] ss:$0 sm:$0xff] }
 0x152   : > { %v1704_v46 = vpop.f32.mrf.mxu0 }
 0x153   : > { %v6021_v49 = vadd.f32 %v1996_v47, %v1721_v44  ;;  %v1998_v1 = vpop.f32.mrf.mxu1 }
 0x154   : > { %v1705_v48 = vpop.f32.mrf.mxu0 }
 0x155   : > { %v1722_v50 = vadd.f32 %v1705_v48, %v1428_v9  ;;  %v1999_v54 = vpop.f32.mrf.mxu1 }
 0x156   : > { %v1707_v53 = vpop.f32.mrf.mxu0 }
 0x157   : > { %v6023_v55 = vadd.f32 %v1999_v54, %v1722_v50  ;;  %v2001_v57 = vpop.f32.mrf.mxu1 }
 0x158   : > { %v1710_v58 = vpop.f32.mrf.mxu0 }
 0x159   : > { %v6025_v14 = vadd.f32 %v1710_v58, %v1429_v31  ;;  %v6027_v35 = vpop.f32.mrf.mxu1 }
 0x15a   : > { %v1712_v13 = vpop.f32.mrf.mxu0 }
 0x15b   : > { %v2006_v63 = vpop.f32.mrf.mxu1 }
 0x15c   : > { %v1713_v62 = vpop.f32.mrf.mxu0 }
 0x15d   : > { %v6029_v30 = vadd.f32 %v1713_v62, %v1430_v22  ;;  %v6031_v0 = vpop.f32.mrf.mxu1 }
 0x15e   : > { %v1715_v61 = vpop.f32.mrf.mxu0 }
 0x15f   : > { %v2009_v2 = vpop.f32.mrf.mxu1 }
 0x164   : > { %v2163_v4 = vpop.f32.mrf.mxu0 }
 0x165   : > { %v2194_v40 = vadd.f32 %v2163_v4, %v6013_v27 }
 0x166   : > { %v2165_v6 = vpop.f32.mrf.mxu0  ;;  %v2457_v9 = vpop.f32.mrf.mxu1 }
 0x167   : > { %v2488_v56 = vadd.f32 %v2457_v9, %v2194_v40  ;;  %v2018_v40 = vadd.f32 %v6031_v0, %v6029_v30 }
 0x168   : > { %v2166_v8 = vpop.f32.mrf.mxu0  ;;  %v2459_v24 = vpop.f32.mrf.mxu1 }
 0x169   : > { %v2195_v5 = vadd.f32 %v2166_v8, %v6015_v34 }
 0x16a   : > { %v2168_v10 = vpop.f32.mrf.mxu0  ;;  %v2460_v11 = vpop.f32.mrf.mxu1 }
 0x16b   : > { %v2489_v48 = vadd.f32 %v2460_v11, %v2195_v5  ;;  %v2993_v11 = vld [vmem:[#allocation3 + $0x1] sm:$0xff] }
 0x16c   : > { %v2171_v52 = vpop.f32.mrf.mxu0  ;;  %v2462_v31 = vpop.f32.mrf.mxu1 }
 0x16d   : > { %v2196_v50 = vadd.f32 %v2171_v52, %v6017_v45 }
 0x16e   : > { %v2173_v51 = vpop.f32.mrf.mxu0  ;;  %v2465_v17 = vpop.f32.mrf.mxu1 }
 0x16f   : > { %v2490_v13 = vadd.f32 %v2465_v17, %v2196_v50 }
 0x170   : > { %v2174_v16 = vpop.f32.mrf.mxu0  ;;  %v2467_v21 = vpop.f32.mrf.mxu1 }
 0x171   : > { %v2197_v62 = vadd.f32 %v2174_v16, %v6019_v15  ;;  %v3216_v15 = vld [vmem:[#allocation3 + $0x2] sm:$0xff] }
 0x172   : > { %v2176_v18 = vpop.f32.mrf.mxu0  ;;  %v2468_v23 = vpop.f32.mrf.mxu1 }
 0x173   : > { %v2491_v8 = vadd.f32 %v2468_v23, %v2197_v62 }
 0x174   : > { %v2179_v22 = vpop.f32.mrf.mxu0  ;;  %v2470_v26 = vpop.f32.mrf.mxu1 }
 0x175   : > { %v2198_v9 = vadd.f32 %v2179_v22, %v6021_v49 }
 0x176   : > { %v2181_v25 = vpop.f32.mrf.mxu0  ;;  %v2473_v36 = vpop.f32.mrf.mxu1 }
 0x177   : > { %v2492_v23 = vadd.f32 %v2473_v36, %v2198_v9  ;;  %v5092_v9 = vld [vmem:[%s6411_s6 + $0x80] sm:$0xff]  }
 0x178   : > { %v2182_v20 = vpop.f32.mrf.mxu0  ;;  %v2475_v28 = vpop.f32.mrf.mxu1 }
 0x179   : > { %v2199_v16 = vadd.f32 %v2182_v20, %v6023_v55  ;;  %v2017_v28 = vadd.f32 %v6027_v35, %v6025_v14 }
 0x17a   : > { %v2184_v7 = vpop.f32.mrf.mxu0  ;;  %v2476_v29 = vpop.f32.mrf.mxu1 }
 0x17c   : > { %v6033_v19 = vpop.f32.mrf.mxu0  ;;  %v2478_v33 = vpop.f32.mrf.mxu1 }
 0x17d   : > { %v2200_v33 = vadd.f32 %v6033_v19, %v2017_v28 }
 0x17e   : > { %v2189_v32 = vpop.f32.mrf.mxu0  ;;  %v6037_v37 = vpop.f32.mrf.mxu1 }
 0x17f   : > { %v2493_v32 = vadd.f32 %v2476_v29, %v2199_v16 }
 0x180   : > { %v6035_v3 = vpop.f32.mrf.mxu0  ;;  %v2483_v41 = vpop.f32.mrf.mxu1 }
 0x182   : > { %v2192_v39 = vpop.f32.mrf.mxu0  ;;  %v6040_v42 = vpop.f32.mrf.mxu1 }
 0x184   : > { %v2486_v38 = vpop.f32.mrf.mxu1 }
 0x185   : > { %v2201_v38 = vadd.f32 %v6035_v3, %v2018_v40 }
 0x186   : > { %v4795_v46 = vpop.f32.mrf.mxu1 }
 0x188   : > { %v2751_v12 = vpop.f32.mrf.mxu0  ;;  %v2912_v1 = vpop.f32.mrf.mxu1 }
 0x189   : > { %v2782_v44 = vadd.f32 %v2751_v12, %v2488_v56 }
 0x18a   : > { %v2753_v47 = vpop.f32.mrf.mxu0  ;;  %v4796_v34 = vpop.f32.mrf.mxu1 }
 0x18b   : > { %v2797_v27 = vadd.f32 %v6046_v43, %v2782_v44  ;;  %v5087_v47 = vld [vmem:[%s6411_s6 + $0x10] sm:$0xff]  }
 0x18c   : > { %v2754_v53 = vpop.f32.mrf.mxu0  ;;  %v2915_v63 = vpop.f32.mrf.mxu1 }
 0x18d   : > { %v2783_v54 = vadd.f32 %v2754_v53, %v2489_v48  ;;  %v2913_v57 = vadd.f32 %v2912_v1, %v2797_v27 }
 0x18e   : > { %v2756_v58 = vpop.f32.mrf.mxu0  ;;  %v4799_v52 = vpop.f32.mrf.mxu1 }
 0x18f   : > { %2965 = vst.msk [vmem:[#allocation3 + $0x11] sm:$0xff] %vm2865_vm6, %v2913_v57  ;;  %v2798_v61 = vadd.f32 %v6046_v43, %v2783_v54  ;;  %v2495_v54 = vadd.f32 %v6040_v42, %v2201_v38  ;;  %v5090_v58 = vld [vmem:[%s6411_s6 + $0x88] sm:$0xff]  }
 0x190   : > { %v2759_v2 = vpop.f32.mrf.mxu0  ;;  %v2928_v7 = vpop.f32.mrf.mxu1 }
 0x191   : > { %v2784_v4 = vadd.f32 %v2759_v2, %v2490_v13  ;;  %v2916_v6 = vadd.f32 %v2915_v63, %v2798_v61 }
 0x192   : > { %v2761_v45 = vpop.f32.mrf.mxu0  ;;  %v4800_v56 = vpop.f32.mrf.mxu1 }
 0x193   : > { %v2799_v10 = vadd.f32 %v6046_v43, %v2784_v4  ;;  %2966 = vst.msk [vmem:[#allocation3 + $0x21] sm:$0xff] %vm2865_vm6, %v2916_v6 }
 0x194   : > { %v2762_v24 = vpop.f32.mrf.mxu0  ;;  %v2931_v48 = vpop.f32.mrf.mxu1 }
 0x195   : > { %v2921_v51 = vadd.f32 %v4795_v46, %v2799_v10  ;;  %v2785_v31 = vadd.f32 %v2762_v24, %v2491_v8  ;;  %v2494_v46 = vadd.f32 %v6037_v37, %v2200_v33  ;;  %v5088_v37 = vld [vmem:[%s6411_s6 + $0x90] sm:$0xff]   ;;  %v5091_v8 = vld [vmem:[%s6411_s6] sm:$0xff]   ;;  %v5094_v24 = vld [vmem:[%s6411_s6 + $0xd8] sm:$0xff]  }
 0x196   : > { %v2764_v17 = vpop.f32.mrf.mxu0  ;;  %v6057_v18 = vld [vmem:[#allocation3 + $0x11] sm:$0xff] }
 0x197   : > { %v6059_v21 = vld [vmem:[#allocation3 + $0x12] sm:$0xff]  ;;  %2967 = vst.msk [vmem:[#allocation3 + $0x31] sm:$0xff] %vm2865_vm6, %v2921_v51  ;;  %v2800_v49 = vadd.f32 %v6046_v43, %v2785_v31  ;;  %v3001_v22 = vpack.c.bf16 %v6057_v18, %v2993_v11  ;;  %v2973_v11 = vld [vmem:[#allocation3] sm:$0xff] }
 0x198   : > { %v3224_v25 = vpack.c.bf16 %v6059_v21, %v3216_v15  ;;  %v2767_v26 = vpop.f32.mrf.mxu0  ;;  %v2974_v15 = vld [vmem:[#allocation3 + $0x10] sm:$0xff] }
 0x199   : > { %v2924_v55 = vadd.f32 %v4796_v34, %v2800_v49  ;;  %v2786_v20 = vadd.f32 %v2767_v26, %v2492_v23  ;;  %4809 = vmatprep.mubr.msk.bf16.mxu1 %vm2865_vm6, %v3001_v22  ;;  %v5089_v34 = vld [vmem:[%s6411_s6 + $0x8] sm:$0xff]   ;;  %v2981_v49 = vpack.c.bf16 %v2974_v15, %v2973_v11 }
 0x19a   : > { %4841 = vmatprep.mubr.msk.bf16.mxu0 %vm2865_vm6, %v3224_v25  ;;  %v2769_v36 = vpop.f32.mrf.mxu0  ;;  %v6074_v5 = vld [vmem:[#allocation3 + $0x21] sm:$0xff] }
 0x19b   : > { %2968 = vst.msk [vmem:[#allocation3 + $0x41] sm:$0xff] %vm2865_vm6, %v2924_v55  ;;  %v2801_v39 = vadd.f32 %v6046_v43, %v2786_v20  ;;  %v6079_v29 = vld [vmem:[#allocation3 + $0x22] sm:$0xff]  ;;  %v3484_v22 = vpack.c.bf16 %v6074_v5, %v6057_v18  ;;  %v5095_v18 = vld [vmem:[%s6411_s6 + $0x70] sm:$0xff]  }
 0x19c   : > { %v2770_v41 = vpop.f32.mrf.mxu0 }
 0x19d   : > { %v2929_v14 = vadd.f32 %v2928_v7, %v2801_v39  ;;  %v2787_v35 = vadd.f32 %v2770_v41, %v2493_v32  ;;  %v2975_v7 = vld [vmem:[#allocation3 + $0x20] sm:$0xff]  ;;  %v5096_v32 = vld [vmem:[%s6411_s6 + $0xd0] sm:$0xff]   ;;  %v5097_v39 = vld [vmem:[%s6411_s6 + $0x68] sm:$0xff]  }
 0x19e   : > { %v2772_v12 = vpop.f32.mrf.mxu0  ;;  %v6077_v44 = vld [vmem:[#allocation3 + $0x31] sm:$0xff]  ;;  %v3354_v38 = vpack.c.bf16 %v2975_v7, %v2974_v15 }
 0x19f   : > { %v6081_v19 = vld [vmem:[#allocation3 + $0x32] sm:$0xff]  ;;  %2969 = vst.msk [vmem:[#allocation3 + $0x51] sm:$0xff] %vm2865_vm6, %v2929_v14  ;;  %v2802_v30 = vadd.f32 %v6046_v43, %v2787_v35  ;;  %v6088_v0 = vpack.c.bf16 %v6077_v44, %v6074_v5  ;;  %v5099_v12 = vld [vmem:[%s6411_s6 + $0x60] sm:$0xff]  }
 0x1a0   : > { %v6092_v3 = vpack.c.bf16 %v6081_v19, %v6079_v29  ;;  %v2775_v50 = vpop.f32.mrf.mxu0  ;;  %v2976_v25 = vld [vmem:[#allocation3 + $0x30] sm:$0xff] }
 0x1a1   : > { %v2932_v27 = vadd.f32 %v2931_v48, %v2802_v30  ;;  %v2788_v1 = vadd.f32 %v2775_v50, %v2494_v46  ;;  %4810 = vmatmul.mubr.msk.bf16.vlgmr.msra.gmra.mxu1 %vm2865_vm6, %v6088_v0  ;;  %v2982_v28 = vpack.c.bf16 %v2976_v25, %v2975_v7  ;;  %v5101_v46 = vld [vmem:[%s6411_s6 + $0xb8] sm:$0xff]   ;;  %v5104_v50 = vld [vmem:[%s6411_s6 + $0x110] sm:$0xff]  }
 0x1a2   : > { %4842 = vmatmul.mubr.msk.bf16.vlgmr.msra.gmra.mxu0 %vm2865_vm6, %v6092_v3  ;;  %v2777_v53 = vpop.f32.mrf.mxu0  ;;  %4818 = vmatpush3.bf16.msra.mxu1 %v6001_v59  ;;  %v6115_v63 = vld [vmem:[#allocation3 + $0x42] sm:$0xff]  ;;  %v5102_v30 = vld [vmem:[%s6411_s6 + $0x118] sm:$0xff]  }
 0x1a3   : > { %4866 = vmatpush3.bf16.msra.mxu0 %v6006_v60  ;;  %2970 = vst.msk [vmem:[#allocation3 + $0x61] sm:$0xff] %vm2865_vm6, %v2932_v27  ;;  %v2803_v57 = vadd.f32 %v6046_v43, %v2788_v1  ;;  %4819 = vmatprep.subr.bf16.mxu1 %v5087_v47  ;;  %v2997_v60 = vld [vmem:[#allocation3 + $0x41] sm:$0xff]  ;;  %v3744_v53 = vld [vmem:[#allocation3 + $0x90] sm:$0xff] }
 0x1a4   : > { %4867 = vmatprep.subr.bf16.mxu0 %v5088_v37  ;;  %v2778_v13 = vpop.f32.mrf.mxu0  ;;  %v3485_v55 = vpack.c.bf16 %v2997_v60, %v6077_v44  ;;  %v2977_v20 = vld [vmem:[#allocation3 + $0x40] sm:$0xff]  ;;  %v5105_v27 = vld [vmem:[%s6411_s6 + $0xa8] sm:$0xff]  }
 0x1a5   : > { %v2937_v59 = vadd.f32 %v4799_v52, %v2803_v57  ;;  %v2789_v62 = vadd.f32 %v2778_v13, %v2495_v54  ;;  %v5100_v44 = vld [vmem:[%s6411_s6 + $0xc0] sm:$0xff]   ;;  %v5106_v54 = vld [vmem:[%s6411_s6 + $0x108] sm:$0xff]   ;;  %v3614_v13 = vpack.c.bf16 %v6079_v29, %v6059_v21  ;;  %v3615_v21 = vpack.c.bf16 %v6115_v63, %v6081_v19  ;;  %v5110_v29 = vld [vmem:[%s6411_s6 + $0xf0] sm:$0xff]  }
 0x1a6   : > { %v2780_v61 = vpop.f32.mrf.mxu0  ;;  %v2998_v42 = vld [vmem:[#allocation3 + $0x51] sm:$0xff]  ;;  %4820 = vmatpush3.bf16.msra.mxu1 %v5087_v47  ;;  %v3355_v47 = vpack.c.bf16 %v2977_v20, %v2976_v25  ;;  %v5111_v19 = vld [vmem:[%s6411_s6 + $0xe8] sm:$0xff]  }
 0x1a7   : > { %v6117_v2 = vld [vmem:[#allocation3 + $0x52] sm:$0xff]  ;;  %4868 = vmatpush3.bf16.msra.mxu0 %v5088_v37  ;;  %2971 = vst.msk [vmem:[#allocation3 + $0x71] sm:$0xff] %vm2865_vm6, %v2937_v59  ;;  %v2804_v4 = vadd.f32 %v6046_v43, %v2789_v62  ;;  %v6121_v6 = vpack.c.bf16 %v2998_v42, %v2997_v60  ;;  %4821 = vmatprep.subr.bf16.mxu1 %v5089_v34  ;;  %v5108_v59 = vld [vmem:[%s6411_s6 + $0x100] sm:$0xff]  }
 0x1a8   : > { %v6125_v45 = vpack.c.bf16 %v6117_v2, %v6115_v63  ;;  %4869 = vmatprep.subr.bf16.mxu0 %v5090_v58  ;;  %v5093_v43 = vld [vmem:[%s6411_s6 + $0x78] sm:$0xff]   ;;  %v2978_v26 = vld [vmem:[#allocation3 + $0x50] sm:$0xff]  ;;  %v5112_v63 = vld [vmem:[%s6411_s6 + $0xe0] sm:$0xff]  }
 0x1a9   : > { %v2940_v10 = vadd.f32 %v4800_v56, %v2804_v4  ;;  %4813 = vmatprep.mubr.msk.bf16.mxu1 %vm2865_vm6, %v6121_v6  ;;  %v2983_v36 = vpack.c.bf16 %v2978_v26, %v2977_v20  ;;  %v5098_v56 = vld [vmem:[%s6411_s6 + $0xc8] sm:$0xff]   ;;  %v5103_v37 = vld [vmem:[%s6411_s6 + $0xb0] sm:$0xff]   ;;  %v5109_v62 = vld [vmem:[%s6411_s6 + $0xf8] sm:$0xff]  }
 0x1aa   : > { %4845 = vmatprep.mubr.msk.bf16.mxu0 %vm2865_vm6, %v6125_v45  ;;  %4822 = vmatpush3.bf16.msra.mxu1 %v5089_v34  ;;  %v2999_v52 = vld [vmem:[#allocation3 + $0x61] sm:$0xff]  ;;  %v4004_v61 = vld [vmem:[#allocation3 + $0x92] sm:$0xff] }
 0x1ab   : > { %4870 = vmatpush3.bf16.msra.mxu0 %v5090_v58  ;;  %2972 = vst.msk [vmem:[#allocation3 + $0x81] sm:$0xff] %vm2865_vm6, %v2940_v10  ;;  %4823 = vmatprep.subr.bf16.mxu1 %v5091_v8  ;;  %v6144_v31 = vld [vmem:[#allocation3 + $0x62] sm:$0xff]  ;;  %v3486_v33 = vpack.c.bf16 %v2999_v52, %v2998_v42  ;;  %v3874_v4 = vld [vmem:[#allocation3 + $0x91] sm:$0xff] }
 0x1ac   : > { %4871 = vmatprep.subr.bf16.mxu0 %v5092_v9  ;;  %v2979_v14 = vld [vmem:[#allocation3 + $0x60] sm:$0xff] }
 0x1ad   : > { %v3356_v48 = vpack.c.bf16 %v2979_v14, %v2978_v26  ;;  %v5107_v58 = vld [vmem:[%s6411_s6 + $0xa0] sm:$0xff]  }
 0x1ae   : > { %v3000_v51 = vld [vmem:[#allocation3 + $0x71] sm:$0xff]  ;;  %4824 = vmatpush3.bf16.msra.mxu1 %v5091_v8 }
 0x1af   : > { %v6146_v16 = vld [vmem:[#allocation3 + $0x72] sm:$0xff]  ;;  %4872 = vmatpush3.bf16.msra.mxu0 %v5092_v9  ;;  %v6148_v17 = vpack.c.bf16 %v3000_v51, %v2999_v52  ;;  %4849 = vmatprep.subr.bf16.mxu1 %v5093_v43 }
 0x1b0   : > { %v6152_v23 = vpack.c.bf16 %v6146_v16, %v6144_v31  ;;  %4897 = vmatprep.subr.bf16.mxu0 %v5094_v24  ;;  %v2980_v40 = vld [vmem:[#allocation3 + $0x70] sm:$0xff] }
 0x1b1   : > { %4814 = vmatmul.mubr.msk.bf16.gmra.mxu1 %vm2865_vm6, %v6148_v17  ;;  %v2984_v35 = vpack.c.bf16 %v2980_v40, %v2979_v14 }
 0x1b2   : > { %4846 = vmatmul.mubr.msk.bf16.gmra.mxu0 %vm2865_vm6, %v6152_v23  ;;  %4825 = vmatprep.mubr.msk.bf16.mxu1 %vm2865_vm6, %v2981_v49  ;;  %v6176_v41 = vld [vmem:[#allocation3 + $0x81] sm:$0xff] }
 0x1b3   : > { %4873 = vmatprep.mubr.msk.bf16.mxu0 %vm2865_vm6, %v3484_v22  ;;  %v3487_v5 = vpack.c.bf16 %v6176_v41, %v3000_v51  ;;  %v3353_v1 = vld [vmem:[#allocation3 + $0x80] sm:$0xff] }
 0x1b4   : > { %v3357_v57 = vpack.c.bf16 %v3353_v1, %v2980_v40  ;;  %v3748_v34 = vpack.c.bf16 %v3744_v53, %v3353_v1  ;;  %v3613_v60 = vld [vmem:[#allocation3 + $0x82] sm:$0xff] }
 0x1b5   : > { %v3617_v42 = vpack.c.bf16 %v3613_v60, %v6146_v16 }
 0x1b9   : > { %4826 = vmatmul.mubr.msk.bf16.vlgmr.msra.gmra.mxu1 %vm2865_vm6, %v2982_v28 }
 0x1ba   : > { %4874 = vmatmul.mubr.msk.bf16.vlgmr.msra.gmra.mxu0 %vm2865_vm6, %v3485_v55  ;;  %4850 = vmatpush3.bf16.msra.mxu1 %v5093_v43 }
 0x1bb   : > { %4829 = vmatprep.mubr.msk.bf16.mxu1 %vm2865_vm6, %v2983_v36  ;;  %4877 = vmatprep.mubr.msk.bf16.mxu0 %vm2865_vm6, %v3486_v33 }
 0x1bc   : > { %4898 = vmatpush3.bf16.msra.mxu0 %v5094_v24  ;;  %4851 = vmatprep.subr.bf16.mxu1 %v5095_v18 }
 0x1bd   : > { %4899 = vmatprep.subr.bf16.mxu0 %v5096_v32 }
 0x1be   : > { %4852 = vmatpush3.bf16.msra.mxu1 %v5095_v18 }
 0x1bf   : > { %4853 = vmatprep.subr.bf16.mxu1 %v5097_v39 }
 0x1c0   : > { %4900 = vmatpush3.bf16.msra.mxu0 %v5096_v32 }
 0x1c1   : > { %4901 = vmatprep.subr.bf16.mxu0 %v5098_v56  ;;  %4830 = vmatmul.mubr.msk.bf16.gmra.mxu1 %vm2865_vm6, %v2984_v35 }
 0x1c2   : > { %4878 = vmatmul.mubr.msk.bf16.gmra.mxu0 %vm2865_vm6, %v3487_v5  ;;  %4854 = vmatpush3.bf16.msra.mxu1 %v5097_v39 }
 0x1c3   : > { %4857 = vmatprep.mubr.msk.bf16.mxu1 %vm2865_vm6, %v3354_v38  ;;  %4905 = vmatprep.mubr.msk.bf16.mxu0 %vm2865_vm6, %v2982_v28 }
 0x1c4   : > { %4902 = vmatpush3.bf16.msra.mxu0 %v5098_v56  ;;  %4855 = vmatprep.subr.bf16.mxu1 %v5099_v12 }
 0x1c5   : > { %4903 = vmatprep.subr.bf16.mxu0 %v5100_v44 }
 0x1c6   : > { %4856 = vmatpush3.bf16.msra.mxu1 %v5099_v12 }
 0x1c7   : > { %4881 = vmatprep.subr.bf16.mxu1 %v5101_v46 }
 0x1c8   : > { %4904 = vmatpush3.bf16.msra.mxu0 %v5100_v44 }
 0x1c9   : > { %4929 = vmatprep.subr.bf16.mxu0 %v5102_v30  ;;  %4858 = vmatmul.mubr.msk.bf16.vlgmr.msra.gmra.mxu1 %vm2865_vm6, %v3355_v47 }
 0x1ca   : > { %4882 = vmatpush3.bf16.msra.mxu1 %v5101_v46  ;;  %4861 = vmatprep.mubr.msk.bf16.mxu1 %vm2865_vm6, %v3356_v48 }
 0x1cb   : > { %4906 = vmatmul.mubr.msk.bf16.vlgmr.msra.gmra.mxu0 %vm2865_vm6, %v2983_v36  ;;  %4883 = vmatprep.subr.bf16.mxu1 %v5103_v37 }
 0x1cc   : > { %4909 = vmatprep.mubr.msk.bf16.mxu0 %vm2865_vm6, %v2984_v35  ;;  %4930 = vmatpush3.bf16.msra.mxu0 %v5102_v30 }
 0x1cd   : > { %4931 = vmatprep.subr.bf16.mxu0 %v5104_v50 }
 0x1ce   : > { %4884 = vmatpush3.bf16.msra.mxu1 %v5103_v37 }
 0x1cf   : > { %4885 = vmatprep.subr.bf16.mxu1 %v5105_v27 }
 0x1d0   : > { %4932 = vmatpush3.bf16.msra.mxu0 %v5104_v50 }
 0x1d1   : > { %4862 = vmatmul.mubr.msk.bf16.gmra.mxu1 %vm2865_vm6, %v3357_v57  ;;  %4933 = vmatprep.subr.bf16.mxu0 %v5106_v54 }
 0x1d2   : > { %4886 = vmatpush3.bf16.msra.mxu1 %v5105_v27  ;;  %4889 = vmatprep.mubr.msk.bf16.mxu1 %vm2865_vm6, %v3614_v13 }
 0x1d3   : > { %4910 = vmatmul.mubr.msk.bf16.gmra.mxu0 %vm2865_vm6, %v3748_v34  ;;  %4887 = vmatprep.subr.bf16.mxu1 %v5107_v58 }
 0x1d4   : > { %4937 = vmatprep.mubr.msk.bf16.mxu0 %vm2865_vm6, %v6092_v3  ;;  %4934 = vmatpush3.bf16.msra.mxu0 %v5106_v54  ;;  %v3616_v3 = vpack.c.bf16 %v6144_v31, %v6117_v2  ;;  %v4008_v2 = vpack.c.bf16 %v4004_v61, %v3613_v60 }
 0x1d5   : > { %4935 = vmatprep.subr.bf16.mxu0 %v5108_v59 }
 0x1d6   : > { %4888 = vmatpush3.bf16.msra.mxu1 %v5107_v58 }
 0x1d7   : > { %4913 = vmatprep.subr.bf16.mxu1 %v5109_v62 }
 0x1d8   : > { %4936 = vmatpush3.bf16.msra.mxu0 %v5108_v59 }
 0x1d9   : > { %4890 = vmatmul.mubr.msk.bf16.vlgmr.msra.gmra.mxu1 %vm2865_vm6, %v3615_v21 }
 0x1da   : > { %4914 = vmatpush3.bf16.msra.mxu1 %v5109_v62  ;;  %4893 = vmatprep.mubr.msk.bf16.mxu1 %vm2865_vm6, %v3616_v3 }
 0x1db   : > { %4938 = vmatmul.mubr.msk.bf16.vlgmr.msra.gmra.mxu0 %vm2865_vm6, %v6125_v45  ;;  %4915 = vmatprep.subr.bf16.mxu1 %v5110_v29  ;;  %v3878_v45 = vpack.c.bf16 %v3874_v4, %v6176_v41 }
 0x1dc   : > { %4941 = vmatprep.mubr.msk.bf16.mxu0 %vm2865_vm6, %v6152_v23 }
 0x1de   : > { %4916 = vmatpush3.bf16.msra.mxu1 %v5110_v29 }
 0x1df   : > { %4917 = vmatprep.subr.bf16.mxu1 %v5111_v19 }
 0x1e1   : > { %4894 = vmatmul.mubr.msk.bf16.gmra.mxu1 %vm2865_vm6, %v3617_v42 }
 0x1e2   : > { %4918 = vmatpush3.bf16.msra.mxu1 %v5111_v19  ;;  %4921 = vmatprep.mubr.msk.bf16.mxu1 %vm2865_vm6, %v6088_v0 }
 0x1e3   : > { %4942 = vmatmul.mubr.msk.bf16.gmra.mxu0 %vm2865_vm6, %v4008_v2  ;;  %4919 = vmatprep.subr.bf16.mxu1 %v5112_v63 }
 0x1e6   : > { %4920 = vmatpush3.bf16.msra.mxu1 %v5112_v63 }
 0x1e9   : > { %4922 = vmatmul.mubr.msk.bf16.vlgmr.msra.gmra.mxu1 %vm2865_vm6, %v6121_v6 }
 0x1ea   : > { %4925 = vmatprep.mubr.msk.bf16.mxu1 %vm2865_vm6, %v6148_v17 }
 0x1f1   : > { %4926 = vmatmul.mubr.msk.bf16.gmra.mxu1 %vm2865_vm6, %v3878_v45 }
 0x261   : > { %v4811_v8 = vpop.f32.mrf.mxu1 }
 0x262   : > { %v4843_v9 = vpop.f32.mrf.mxu0 }
 0x263   : > { %v3084_v10 = vpop.f32.mrf.mxu1 }
 0x264   : > { %v3307_v43 = vpop.f32.mrf.mxu0 }
 0x265   : > { %v4812_v0 = vpop.f32.mrf.mxu1 }
 0x266   : > { %v4844_v24 = vpop.f32.mrf.mxu0 }
 0x267   : > { %v3087_v52 = vpop.f32.mrf.mxu1 }
 0x268   : > { %v3310_v11 = vpop.f32.mrf.mxu0 }
 0x271   : > { %v4815_v15 = vpop.f32.mrf.mxu1 }
 0x272   : > { %v6260_v51 = vpop.f32.mrf.mxu0 }
 0x273   : > { %v3100_v6 = vpop.f32.mrf.mxu1 }
 0x274   : > { %v6262_v31 = vpop.f32.mrf.mxu0 }
 0x275   : > { %v4816_v16 = vpop.f32.mrf.mxu1 }
 0x276   : > { %v6264_v17 = vpop.f32.mrf.mxu0 }
 0x277   : > { %v3103_v23 = vpop.f32.mrf.mxu1 }
 0x278   : > { %v6266_v49 = vpop.f32.mrf.mxu0 }
 0x279   : > { %v4827_v22 = vpop.f32.mrf.mxu1 }
 0x27a   : > { %v4875_v25 = vpop.f32.mrf.mxu0  ;;  %v3194_v57 = vadd.f32 %v4827_v22, %v4811_v8 }
 0x27b   : > { %v3185_v26 = vpop.f32.mrf.mxu1 }
 0x27c   : > { %v3567_v7 = vpop.f32.mrf.mxu0  ;;  %v3186_v13 = vadd.f32 %v3185_v26, %v3084_v10  ;;  %v3340_v21 = vadd.f32 %v4843_v9, %v3194_v57 }
 0x27d   : > { %v4828_v28 = vpop.f32.mrf.mxu1 }
 0x27e   : > { %v4876_v55 = vpop.f32.mrf.mxu0  ;;  %v3197_v62 = vadd.f32 %v4828_v28, %v4812_v0  ;;  %v3338_v61 = vadd.f32 %v3307_v43, %v3186_v13 }
 0x27f   : > { %v3188_v20 = vpop.f32.mrf.mxu1 }
 0x280   : > { %v6268_v36 = vpop.f32.mrf.mxu0  ;;  %v3189_v19 = vadd.f32 %v3188_v20, %v3087_v52  ;;  %v3341_v2 = vadd.f32 %v4844_v24, %v3197_v62 }
 0x281   : > { %v4831_v18 = vpop.f32.mrf.mxu1 }
 0x282   : > { %v6270_v32 = vpop.f32.mrf.mxu0  ;;  %v3210_v4 = vadd.f32 %v4831_v18, %v4815_v15  ;;  %v3339_v22 = vadd.f32 %v3310_v11, %v3189_v19 }
 0x283   : > { %v3201_v33 = vpop.f32.mrf.mxu1 }
 0x284   : > { %v6272_v39 = vpop.f32.mrf.mxu0  ;;  %v3202_v45 = vadd.f32 %v3201_v33, %v3100_v6  ;;  %v3344_v52 = vadd.f32 %v6260_v51, %v3210_v4 }
 0x285   : > { %v4832_v40 = vpop.f32.mrf.mxu1 }
 0x286   : > { %v6274_v41 = vpop.f32.mrf.mxu0  ;;  %v3342_v43 = vadd.f32 %v6262_v31, %v3202_v45 }
 0x287   : > { %v3204_v56 = vpop.f32.mrf.mxu1 }
 0x288   : > { %v6276_v14 = vpop.f32.mrf.mxu0  ;;  %v3205_v28 = vadd.f32 %v3204_v56, %v3103_v23 }
 0x289   : > { %v4859_v35 = vpop.f32.mrf.mxu1 }
 0x28a   : > { %v3470_v60 = vadd.f32 %v4859_v35, %v3340_v21  ;;  %v3343_v51 = vadd.f32 %v6266_v49, %v3205_v28  ;;  %v6308_v49 = vld [vmem:[%s6412_s7] ss:$0 sm:$0xff] }
 0x28b   : > { %v4907_v5 = vpop.f32.mrf.mxu0  ;;  %v3437_v38 = vpop.f32.mrf.mxu1 }
 0x28c   : > { %v3468_v63 = vadd.f32 %v3437_v38, %v3338_v61  ;;  %v4145_v61 = vld [vmem:[%s6300_s23 + $0x18] sm:$0xff] }
 0x28d   : > { %v3828_v12 = vpop.f32.mrf.mxu0  ;;  %v4860_v44 = vpop.f32.mrf.mxu1 }
 0x28e   : > { %v3471_v8 = vadd.f32 %v4860_v44, %v3341_v2  ;;  %v3598_v9 = vadd.f32 %v3567_v7, %v3468_v63 }
 0x28f   : > { %v6278_v46 = vpop.f32.mrf.mxu0  ;;  %v3440_v30 = vpop.f32.mrf.mxu1 }
 0x290   : > { %v3469_v26 = vadd.f32 %v3440_v30, %v3339_v22  ;;  %v3601_v6 = vadd.f32 %v4876_v55, %v3471_v8  ;;  %v4143_v22 = vld [vmem:[%s6300_s23 + $0x8] sm:$0xff] }
 0x291   : > { %v6280_v47 = vpop.f32.mrf.mxu0  ;;  %v4863_v37 = vpop.f32.mrf.mxu1 }
 0x292   : > { %v3474_v18 = vadd.f32 %v4863_v37, %v3344_v52 }
 0x293   : > { %v6282_v48 = vpop.f32.mrf.mxu0  ;;  %v3453_v50 = vpop.f32.mrf.mxu1 }
 0x294   : > { %6416 = vst [vmem:[#allocation7_spill] sm:$0xff] %v6282_v48  ;;  %v3213_v48 = vadd.f32 %v4832_v40, %v4816_v16  ;;  %v3472_v33 = vadd.f32 %v3453_v50, %v3342_v43  ;;  %v3599_v40 = vadd.f32 %v6268_v36, %v3469_v26  ;;  %v3604_v36 = vadd.f32 %v6270_v32, %v3474_v18  ;;  %v4144_v32 = vld [vmem:[%s6300_s23 + $0x10] sm:$0xff] }
 0x295   : > { %v6284_v27 = vpop.f32.mrf.mxu0  ;;  %v4864_v1 = vpop.f32.mrf.mxu1 }
 0x296   : > { %6417 = vst [vmem:[#allocation8_spill] sm:$0xff] %v6284_v27  ;;  %v3345_v11 = vadd.f32 %v6264_v17, %v3213_v48 }
 0x297   : > { %v6286_v53 = vpop.f32.mrf.mxu0  ;;  %v3456_v54 = vpop.f32.mrf.mxu1 }
 0x298   : > { %6418 = vst [vmem:[#allocation9_spill] sm:$0xff] %v6286_v53  ;;  %v3475_v23 = vadd.f32 %v4864_v1, %v3345_v11  ;;  %v3473_v38 = vadd.f32 %v3456_v54, %v3343_v51  ;;  %v4146_v51 = vld [vmem:[%s6300_s23 + $0x20] sm:$0xff] }
 0x299   : > { %v6288_v34 = vpop.f32.mrf.mxu0  ;;  %v4891_v58 = vpop.f32.mrf.mxu1 }
 0x29a   : > { %6419 = vst [vmem:[#allocation10_spill] sm:$0xff] %v6288_v34  ;;  %v3600_v34 = vadd.f32 %v4875_v25, %v3470_v60  ;;  %v3605_v54 = vadd.f32 %v6274_v41, %v3475_v23  ;;  %v3603_v62 = vadd.f32 %v6276_v14, %v3473_v38 }
 0x29b   : > { %v3697_v59 = vpop.f32.mrf.mxu1  ;;  %v4939_v29 = vpop.f32.mrf.mxu0 }
 0x29c   : > { %v3730_v0 = vadd.f32 %v4891_v58, %v3600_v34  ;;  %v3728_v15 = vadd.f32 %v3697_v59, %v3598_v9 }
 0x29d   : > { %v4892_v3 = vpop.f32.mrf.mxu1  ;;  %v4088_v53 = vpop.f32.mrf.mxu0  ;;  %v6421_v2 = vld [vmem:[#allocation8_spill] sm:$0xff] }
 0x29e   : > { %v3731_v25 = vadd.f32 %v4892_v3, %v3601_v6  ;;  %v3861_v7 = vadd.f32 %v4907_v5, %v3730_v0  ;;  %v3859_v55 = vadd.f32 %v3828_v12, %v3728_v15  ;;  %v3602_v5 = vadd.f32 %v6272_v39, %v3472_v33 }
 0x29f   : > { %v3700_v42 = vpop.f32.mrf.mxu1  ;;  %v4940_v20 = vpop.f32.mrf.mxu0  ;;  %v6422_v0 = vld [vmem:[#allocation9_spill] sm:$0xff] }
 0x2a0   : > { %v3729_v35 = vadd.f32 %v3700_v42, %v3599_v40  ;;  %v3862_v48 = vadd.f32 %v6278_v46, %v3731_v25  ;;  %v4142_v46 = vld [vmem:[%s6300_s23] sm:$0xff]  ;;  %v4148_v25 = vld [vmem:[%s6300_s23 + $0x30] sm:$0xff] }
 0x2a1   : > { %v4895_v27 = vpop.f32.mrf.mxu1  ;;  %v4091_v56 = vpop.f32.mrf.mxu0  ;;  %v6420_v42 = vld [vmem:[#allocation7_spill] sm:$0xff]  ;;  %v6423_v18 = vld [vmem:[#allocation10_spill] sm:$0xff] }
 0x2a2   : > { %v3734_v50 = vadd.f32 %v4895_v27, %v3604_v36  ;;  %v3860_v13 = vadd.f32 %v6280_v47, %v3729_v35 }
 0x2a3   : > { %v3713_v10 = vpop.f32.mrf.mxu1  ;;  %v4943_v12 = vpop.f32.mrf.mxu0 }
 0x2a4   : > { %v3732_v1 = vadd.f32 %v3713_v10, %v3602_v5  ;;  %v3865_v63 = vadd.f32 %v6420_v42, %v3734_v50  ;;  %v4149_v5 = vld [vmem:[%s6300_s23 + $0x38] sm:$0xff]  ;;  %v4147_v50 = vld [vmem:[%s6300_s23 + $0x28] sm:$0xff]  ;;  %s5118_s23 = sshll.u32 %s5178_s22, 4  ;;  %s5119_s23 = int_to_ptr.vmem [resolvable:$false] %s5118_s23 }
 0x2a5   : > { %v4896_v24 = vpop.f32.mrf.mxu1  ;;  %v4104_v19 = vpop.f32.mrf.mxu0  ;;  %s5120_s25 = scalar_lea.vmem %s5119_s23, 2048  ;;  %p5121_p0 = scmp.lt.s32.totalorder %s6357_s17, %s5119_s23 }
 0x2a6   : > { %v3735_v59 = vadd.f32 %v4896_v24, %v3605_v54  ;;  %v3863_v4 = vadd.f32 %v6421_v2, %v3732_v1  ;;  %p5122_p1 = scmp.lt.s32.totalorder %s5120_s25, %s5114_s12 }
 0x2a7   : > { %v3716_v16 = vpop.f32.mrf.mxu1  ;;  %v4944_v24 = vpop.f32.mrf.mxu0 }
 0x2a8   : > { %v3733_v60 = vadd.f32 %v3716_v16, %v3603_v62  ;;  %v3866_v9 = vadd.f32 %v6422_v0, %v3735_v59  ;;  %p5123_p2 = por %p5122_p1, %p5121_p0 }
 0x2a9   : > { %v4923_v31 = vpop.f32.mrf.mxu1  ;;  %v4107_v38 = vpop.f32.mrf.mxu0 }
 0x2aa   : > { %v3991_v17 = vadd.f32 %v4923_v31, %v3861_v7  ;;  %v3864_v33 = vadd.f32 %v6423_v18, %v3733_v60  ;;  %p5124_p3 = pnand %p5123_p2, %p5117_p13 }
 0x2ab   : > { %v3958_v44 = vpop.f32.mrf.mxu1 }
 0x2ac   : > { %v4121_v30 = vadd.f32 %v4939_v29, %v3991_v17  ;;  %v3989_v37 = vadd.f32 %v3958_v44, %v3859_v55 }
 0x2ad   : > { %v4924_v57 = vpop.f32.mrf.mxu1 }
 0x2ae   : > { %v4136_v39 = vadd.f32 %v6308_v49, %v4121_v30  ;;  %v4119_v34 = vadd.f32 %v4088_v53, %v3989_v37  ;;  %v3992_v58 = vadd.f32 %v4924_v57, %v3862_v48 }
 0x2af   : > { %v3961_v27 = vpop.f32.mrf.mxu1 }
 0x2b0   : > { %v4152_v21 = vadd.f32 %v4144_v32, %v4136_v39  ;;  %v4134_v41 = vadd.f32 %v6308_v49, %v4119_v34  ;;  %v4122_v29 = vadd.f32 %v4940_v20, %v3992_v58  ;;  %v3990_v3 = vadd.f32 %v3961_v27, %v3860_v13 }
 0x2b1   : > { %v4927_v53 = vpop.f32.mrf.mxu1 }
 0x2b2   : > { %v4160_v47 = vmax.f32 %v4152_v21, 0.0  ;;  %v4150_v45 = vadd.f32 %v4142_v46, %v4134_v41  ;;  %v4137_v14 = vadd.f32 %v6308_v49, %v4122_v29  ;;  %v4120_v8 = vadd.f32 %v4091_v56, %v3990_v3 }
 0x2b3   : > { %v3995_v10 = vadd.f32 %v4927_v53, %v3865_v63  ;;  %v3974_v26 = vpop.f32.mrf.mxu1 }
 0x2b4   : > { %4168 = vst.msk [vmem:[%s6326_s21 + $0x10] sm:$0xff] %vm2865_vm6, %v4160_v47  ;;  %v4158_v28 = vmax.f32 %v4150_v45, 0.0  ;;  %v4153_v52 = vadd.f32 %v4145_v61, %v4137_v14  ;;  %v4135_v43 = vadd.f32 %v6308_v49, %v4120_v8  ;;  %v3993_v20 = vadd.f32 %v3974_v26, %v3863_v4 }
 0x2b5   : > { %v4125_v15 = vadd.f32 %v4943_v12, %v3995_v10  ;;  %v4928_v6 = vpop.f32.mrf.mxu1 }
 0x2b6   : > { %4166 = vst.msk [vmem:[%s6326_s21] sm:$0xff] %vm2865_vm6, %v4158_v28  ;;  %v4161_v11 = vmax.f32 %v4153_v52, 0.0  ;;  %v4151_v16 = vadd.f32 %v4143_v22, %v4135_v43  ;;  %v4123_v40 = vadd.f32 %v4104_v19, %v3993_v20  ;;  %v3996_v7 = vadd.f32 %v4928_v6, %v3866_v9 }
 0x2b7   : > { %v4140_v23 = vadd.f32 %v6308_v49, %v4125_v15  ;;  %v3977_v56 = vpop.f32.mrf.mxu1 }
 0x2b8   : > { %4169 = vst.msk [vmem:[%s6326_s21 + $0x18] sm:$0xff] %vm2865_vm6, %v4161_v11  ;;  %v4159_v31 = vmax.f32 %v4151_v16, 0.0  ;;  %v4138_v35 = vadd.f32 %v6308_v49, %v4123_v40  ;;  %v4126_v17 = vadd.f32 %v4944_v24, %v3996_v7  ;;  %v3994_v55 = vadd.f32 %v3977_v56, %v3864_v33 }
 0x2b9   : > { %v4156_v36 = vadd.f32 %v4148_v25, %v4140_v23 }
 0x2ba   : > { %4167 = vst.msk [vmem:[%s6326_s21 + $0x8] sm:$0xff] %vm2865_vm6, %v4159_v31  ;;  %v4154_v44 = vadd.f32 %v4146_v51, %v4138_v35  ;;  %v4141_v30 = vadd.f32 %v6308_v49, %v4126_v17  ;;  %v4124_v37 = vadd.f32 %v4107_v38, %v3994_v55 }
 0x2bb   : > { %v4164_v48 = vmax.f32 %v4156_v36, 0.0 }
 0x2bc   : > { %v4162_v12 = vmax.f32 %v4154_v44, 0.0  ;;  %v4157_v1 = vadd.f32 %v4149_v5, %v4141_v30  ;;  %v4139_v54 = vadd.f32 %v6308_v49, %v4124_v37 }
 0x2bd   : > { %4172 = vst.msk [vmem:[%s6326_s21 + $0x30] sm:$0xff] %vm2865_vm6, %v4164_v48 }
 0x2be   : > { %4170 = vst.msk [vmem:[%s6326_s21 + $0x20] sm:$0xff] %vm2865_vm6, %v4162_v12  ;;  %v4165_v32 = vmax.f32 %v4157_v1, 0.0  ;;  %v4155_v57 = vadd.f32 %v4147_v50, %v4139_v54 }
 0x2c0   : > { %4173 = vst.msk [vmem:[%s6326_s21 + $0x38] sm:$0xff] %vm2865_vm6, %v4165_v32  ;;  %v4163_v49 = vmax.f32 %v4155_v57, 0.0 }
 0x2c2   : > { %4171 = vst.msk [vmem:[%s6326_s21 + $0x28] sm:$0xff] %vm2865_vm6, %v4163_v49 }
 0x2c3   : > { %5127 = shalt.err (!%p5124_p3)
}
 0x2c4   : > { %s5128_s24 = scalar_lea.hbm %s6355_s20, 1024  ;;  %s5132_s21 = scalar_lea.hbm %s6413_s8, 2048 }
 0x2c5   : > { %p5129_p4 = scmp.ne.s32.totalorder %s6355_s20, %s5128_s24  ;;  %p5133_p9 = scmp.lt.s32.totalorder %s6355_s20, %s6413_s8 }
 0x2c6   : > { %p5134_p10 = scmp.lt.s32.totalorder %s5132_s21, %s5128_s24 }
 0x2c7   : > { %p5130_p7 = pnand %p5129_p4, %p5264_p5 }
 0x2c8   : > { %p5135_p11 = por %p5134_p10, %p5133_p9 }
 0x2c9   : > { %p5131_p8 = pneg %p5130_p7 }
 0x2cb   : > { %p5136_p12 = pnand %p5135_p11, %p5131_p8 }
 0x2cd   : > { %5139 = shalt.err (!%p5136_p12)
}
 0x2ce   : > { %s5179_s19 = smov 128   ;;  %s5180_s12 = smov 8  }
 0x2cf   : > { %4945 = dma.vmem_to_hbm [thread:$0]  (%p5264_p5), %s6357_s17, 1024, %s6355_s20, %s6365_s9, %s5179_s19, %s5179_s19, %s5180_s12  }
 0x2d0 PF: > { %p4951_p13 = scmp.ge.s32.totalorder %s5174_s30, 2  ;;  %s4203_s22 = sand.u32 1, %s5162_s27  }
 0x2d1   : > { %s4204_s23 = scalar_lea.sflag [#allocation5], %s4203_s22 }
 0x2d2   : > { %p4948_p0 = pnand %p4951_p13, %p5268_p6 }
 0x2d4   : > { %p4949_p1 = pneg %p4948_p0 }
 0x2d6   : > { %5157 = dma.done.wait (%p4949_p1), %s4204_s23, 1024  }
 0x2d7   : > { %5159 = vsyncadd (%p4949_p1), %s4204_s23, 4294966272  ;;  %p18_p2 = scmp.ge.s32.totalorder %s5251_s11, 4   ;;  %s6424_s27 = smov %s5166_s28 }
 0x2d8   : > { %s6425_s28 = smov %s5170_s29  ;;  %s6426_s29 = smov %s5262_s14 }
 0x2d9   : > { %s6427_s30 = smov %s5251_s11  ;;  %20 = sbr.rel (!%p18_p2) target bundleno = 3 (0x3), region = 113 }
 0x2de   :  { %4209 = vsyncpa [#allocation5], 1 }
 0x2df   :  { %4211 = vsyncpa [#allocation5 + $0x1], 1 }

</bundles_post_ra>
